<compile_context>
chip_gen: v6e
topology: v6e:2x2x1
jax: 0.10.0
libtpu: 0.0.40
codegen_flags: <defaults>
</compile_context>

<pallas_src>
import jax
import jax.numpy as jnp
from jax.experimental import pallas as pl
from jax.experimental.pallas import tpu as pltpu

LANE = 128


def _round_up(x, m):
    return ((x + m - 1) // m) * m


# ----------------------------- Pallas kernels -------------------------------

def _upsample_fused_kernel(p_ref, w_ref, b_ref, o_ref):
    """Fused ConvTranspose(4,2,1) (sub-pixel) + bias + InstanceNorm + LeakyReLU(0.2).

    One grid step == one batch sample.
      p_ref: (4, HW, Kp)  bf16  -- per-parity im2col patches (2x2 effective taps)
      w_ref: (4, Kp, Cp)  bf16  -- per-parity weight matrices (lane-padded Cout)
      b_ref: (1, Cp)      f32
      o_ref: (4, HW, Cp)  bf16
    """
    n_parity, hw, _ = p_ref.shape
    n_elems = float(n_parity * hw)           # full 2H x 2W spatial extent of the sample

    # Parity matmuls (MXU, f32 accumulation) + bias; accumulate per-channel sums.
    ys = []
    s = jnp.zeros_like(b_ref[...])
    for p in range(n_parity):
        y = jnp.dot(p_ref[p], w_ref[p], preferred_element_type=jnp.float32) + b_ref[...]
        ys.append(y)
        s = s + jnp.sum(y, axis=0, keepdims=True)
    mean = s / n_elems

    # Biased variance (matches nn.InstanceNorm2d), computed stably around the mean.
    var = jnp.zeros_like(mean)
    for p in range(n_parity):
        d = ys[p] - mean
        var = var + jnp.sum(d * d, axis=0, keepdims=True)
    inv = jax.lax.rsqrt(var / n_elems + 1e-5)

    for p in range(n_parity):
        yn = (ys[p] - mean) * inv
        o_ref[p] = jnp.where(yn > 0, yn, 0.2 * yn).astype(o_ref.dtype)


def _conv_matmul_kernel(x_ref, w_ref, b_ref, o_ref):
    """(M, Kp) @ (Kp, Cp) + bias, lane-dense padded Cout. One grid step per sample."""
    acc = jnp.dot(x_ref[...], w_ref[...], preferred_element_type=jnp.float32)
    o_ref[...] = (acc + b_ref[...]).astype(o_ref.dtype)


# ----------------------------- layer wrappers --------------------------------

def upsample_layer(x_nhwc, wt, bias):
    """ConvTranspose2d(k=4,s=2,p=1) + InstanceNorm2d + LeakyReLU(0.2). NHWC in/out (bf16).

    wt: torch layout (Cin, Cout, 4, 4); bias: (Cout,).
    """
    N, H, W, Cin = x_nhwc.shape
    Cout = wt.shape[1]
    Cp = _round_up(Cout, LANE)
    K = 4 * Cin
    Kp = _round_up(K, LANE)
    HW = H * W

    # Sub-pixel decomposition: output pixel (2r+py, 2c+px) depends only on
    # xp[r+py+dy, c+px+dx] for (dy,dx) in {0,1}^2, where xp = zero-pad(x, 1).
    xp = jnp.pad(x_nhwc, ((0, 0), (1, 1), (1, 1), (0, 0)))
    parities = []
    for py in (0, 1):
        for px in (0, 1):
            taps = [xp[:, py + dy: py + dy + H, px + dx: px + dx + W, :]
                    for dy in (0, 1) for dx in (0, 1)]
            parities.append(jnp.concatenate(taps, axis=-1))          # (N, H, W, 4*Cin)
    patches = jnp.stack(parities, axis=1).reshape(N, 4, HW, K)
    if Kp != K:
        patches = jnp.pad(patches, ((0, 0), (0, 0), (0, 0), (0, Kp - K)))
    patches = patches.astype(jnp.bfloat16)

    # Per-parity weight matrices: tap (dy,dx) uses kernel element
    # (ky, kx) = (3 - py - 2*dy, 3 - px - 2*dx)   (spatial flip + stride phase).
    wmats = []
    for py in (0, 1):
        for px in (0, 1):
            rows = [wt[:, :, 3 - py - 2 * dy, 3 - px - 2 * dx]
                    for dy in (0, 1) for dx in (0, 1)]
            wmats.append(jnp.concatenate(rows, axis=0))               # (4*Cin, Cout)
    wmat = jnp.stack(wmats, axis=0)                                   # (4, K, Cout)
    wmat = jnp.pad(wmat, ((0, 0), (0, Kp - K), (0, Cp - Cout))).astype(jnp.bfloat16)
    bvec = jnp.pad(bias, (0, Cp - Cout)).reshape(1, Cp).astype(jnp.float32)

    out = pl.pallas_call(
        _upsample_fused_kernel,
        out_shape=jax.ShapeDtypeStruct((N, 4, HW, Cp), jnp.bfloat16),
        grid=(N,),
        in_specs=[
            pl.BlockSpec((None, 4, HW, Kp), lambda n: (n, 0, 0, 0)),
            pl.BlockSpec((4, Kp, Cp), lambda n: (0, 0, 0)),
            pl.BlockSpec((1, Cp), lambda n: (0, 0)),
        ],
        out_specs=pl.BlockSpec((None, 4, HW, Cp), lambda n: (n, 0, 0, 0)),
        compiler_params=pltpu.CompilerParams(dimension_semantics=("parallel",)),
    )(patches, wmat, bvec)

    # Pixel-shuffle the 4 parities (p = py*2 + px) back into (N, 2H, 2W, Cout).
    out = out[:, :, :, :Cout].reshape(N, 2, 2, H, W, Cout)
    out = out.transpose(0, 3, 1, 4, 2, 5).reshape(N, 2 * H, 2 * W, Cout)
    return out


def conv2d_valid_nhwc(x_nhwc, w, b, out_dtype):
    """Valid conv, stride 1. x: (N,H,W,Cin); w: torch layout (Cout,Cin,kh,kw); b: (Cout,)."""
    N, H, W, Cin = x_nhwc.shape
    Cout, _, kh, kw = w.shape
    OH, OW = H - kh + 1, W - kw + 1
    M = OH * OW
    K = Cin * kh * kw
    Kp = _round_up(K, LANE)
    Cp = _round_up(Cout, LANE)

    taps = [x_nhwc[:, dy:dy + OH, dx:dx + OW, :]
            for dy in range(kh) for dx in range(kw)]
    patches = jnp.concatenate(taps, axis=-1).reshape(N, M, K)
    if Kp != K:
        patches = jnp.pad(patches, ((0, 0), (0, 0), (0, Kp - K)))
    patches = patches.astype(jnp.bfloat16)

    wmat = w.transpose(2, 3, 1, 0).reshape(K, Cout)                   # rows: (dy, dx, cin)
    wmat = jnp.pad(wmat, ((0, Kp - K), (0, Cp - Cout))).astype(jnp.bfloat16)
    bvec = jnp.pad(b, (0, Cp - Cout)).reshape(1, Cp).astype(jnp.float32)

    out = pl.pallas_call(
        _conv_matmul_kernel,
        out_shape=jax.ShapeDtypeStruct((N, M, Cp), out_dtype),
        grid=(N,),
        in_specs=[
            pl.BlockSpec((None, M, Kp), lambda n: (n, 0, 0)),
            pl.BlockSpec((Kp, Cp), lambda n: (0, 0)),
            pl.BlockSpec((1, Cp), lambda n: (0, 0)),
        ],
        out_specs=pl.BlockSpec((None, M, Cp), lambda n: (n, 0, 0)),
        compiler_params=pltpu.CompilerParams(dimension_semantics=("parallel",)),
    )(patches, wmat, bvec)
    return out[:, :, :Cout].reshape(N, OH, OW, Cout)


# ----------------------------- Decoder ---------------------------------------

def make_decoder_params(key, out_channels=3, dim=4, n_upsample=3):
    """Deterministic synthetic parameters with the exact torch shapes."""
    params = {"convt": []}
    keys = jax.random.split(key, 2 * n_upsample + 4)
    ki = 0
    for i in reversed(range(n_upsample)):
        cin = dim * (i + 2) * 2
        cout = dim * (i + 1) * 2
        wt = 0.05 * jax.random.normal(keys[ki], (cin, cout, 4, 4), jnp.float32)
        bt = 0.01 * jax.random.normal(keys[ki + 1], (cout,), jnp.float32)
        params["convt"].append((wt, bt))
        ki += 2
    cin_last = dim * 1 * 2  # i == 0 after the loop
    params["conv1_w"] = 0.05 * jax.random.normal(
        keys[ki], (out_channels, cin_last, 3, 3), jnp.float32)
    params["conv1_b"] = 0.01 * jax.random.normal(
        keys[ki + 1], (out_channels,), jnp.float32)
    params["conv2_w"] = 0.05 * jax.random.normal(
        keys[ki + 2], (out_channels, out_channels, 7, 7), jnp.float32)
    params["conv2_b"] = 0.01 * jax.random.normal(
        keys[ki + 3], (out_channels,), jnp.float32)
    return params


@jax.jit
def decoder_forward(x, params):
    # NCHW (torch interface) -> NHWC, bf16 between layers (f32 accumulation/stats).
    h = jnp.transpose(x, (0, 2, 3, 1)).astype(jnp.bfloat16)
    for wt, bt in params["convt"]:
        h = upsample_layer(h, wt, bt)          # fused Pallas: convT + IN + LeakyReLU
    # ReflectionPad2d(4) -- layout-only, done in the wrapper.
    h = jnp.pad(h, ((0, 0), (4, 4), (4, 4), (0, 0)), mode="reflect")
    h = conv2d_valid_nhwc(h, params["conv1_w"], params["conv1_b"], jnp.bfloat16)  # 3x3
    h = conv2d_valid_nhwc(h, params["conv2_w"], params["conv2_b"], jnp.float32)   # 7x7
    # NOTE: torch forward() does NOT apply self.activation — so neither do we.
    return jnp.transpose(h, (0, 3, 1, 2))      # back to NCHW


# ----------------------------- main -------------------------------------------

if __name__ == "__main__":
    key = jax.random.PRNGKey(0)
    k_x, k_p = jax.random.split(key)

    out_channels, dim, n_upsample = 3, 4, 3
    batch, spatial = 2, 4
    cin = dim * (n_upsample - 1 + 2) * 2   # dim*(i+2)*2 with i = n_upsample-1 -> 32

    x = jax.random.normal(k_x, (batch, cin, spatial, spatial), jnp.float32)
    params = make_decoder_params(k_p, out_channels=out_channels, dim=dim,
                                 n_upsample=n_upsample)

    out = decoder_forward(x, params)
    out = jax.block_until_ready(out)

    expected_shape = (batch, out_channels,
                      spatial * (2 ** n_upsample), spatial * (2 ** n_upsample))
    assert out.shape == expected_shape, (out.shape, expected_shape)
    assert jnp.isfinite(out).all()
    print("KERNEL_OK")
</pallas_src>

<mosaic_0001>
module attributes {stable_mosaic.version = 11 : i64} {
  func.func @_upsample_fused_kernel(%arg0: i32, %arg1: memref<1x4x16x128xbf16, #tpu.memory_space<vmem>>, %arg2: memref<4x128x128xbf16, #tpu.memory_space<vmem>>, %arg3: memref<1x128xf32, #tpu.memory_space<vmem>>, %arg4: memref<1x4x16x128xbf16, #tpu.memory_space<vmem>>) attributes {dimension_semantics = [#tpu.dimension_semantics<parallel>], iteration_bounds = array<i64: 2>, scalar_prefetch = 0 : i64, scratch_operands = 0 : i64, tpu.core_type = #tpu.core_type<tc>, window_params = [{transform_indices = @transform_0, window_bounds = array<i64: 1, 4, 16, 128>}, {pipeline_mode = #tpu.pipeline_mode<synchronous>, transform_indices = @transform_1, window_bounds = array<i64: 4, 128, 128>}, {pipeline_mode = #tpu.pipeline_mode<synchronous>, transform_indices = @transform_2, window_bounds = array<i64: 1, 128>}, {transform_indices = @transform_3, window_bounds = array<i64: 1, 4, 16, 128>}]} {
    %cst = arith.constant 0.000000e+00 : f32
    %0 = vector.broadcast %cst : f32 to vector<1x128xf32>
    %c0 = arith.constant 0 : index
    %c0_0 = arith.constant 0 : index
    %c0_1 = arith.constant 0 : index
    %c0_2 = arith.constant 0 : index
    %1 = vector.load %arg1[%c0, %c0_0, %c0_1, %c0_2] : memref<1x4x16x128xbf16, #tpu.memory_space<vmem>>, vector<1x1x16x128xbf16>
    %2 = vector.shape_cast %1 : vector<1x1x16x128xbf16> to vector<16x128xbf16>
    %c0_3 = arith.constant 0 : index
    %c0_4 = arith.constant 0 : index
    %c0_5 = arith.constant 0 : index
    %3 = vector.load %arg2[%c0_3, %c0_4, %c0_5] : memref<4x128x128xbf16, #tpu.memory_space<vmem>>, vector<1x128x128xbf16>
    %4 = vector.shape_cast %3 : vector<1x128x128xbf16> to vector<128x128xbf16>
    %cst_6 = arith.constant dense<0.000000e+00> : vector<16x128xf32>
    %5 = tpu.matmul %2, %4, %cst_6 {dimension_numbers = #tpu.dot_dimension_numbers<[1], [0], [0], [1], [0, 0, 1, 1], [], []>} : vector<16x128xbf16>, vector<128x128xbf16>, vector<16x128xf32> -> vector<16x128xf32>
    %c0_7 = arith.constant 0 : index
    %c0_8 = arith.constant 0 : index
    %6 = vector.load %arg3[%c0_7, %c0_8] : memref<1x128xf32, #tpu.memory_space<vmem>>, vector<1x128xf32>
    %7 = vector.broadcast %6 : vector<1x128xf32> to vector<16x128xf32>
    %8 = arith.addf %5, %7 : vector<16x128xf32>
    %cst_9 = arith.constant dense<0.000000e+00> : vector<128xf32>
    %9 = vector.multi_reduction <add>, %8, %cst_9 [0] : vector<16x128xf32> to vector<128xf32>
    %10 = vector.shape_cast %9 : vector<128xf32> to vector<1x128xf32>
    %11 = arith.addf %0, %10 : vector<1x128xf32>
    %c0_10 = arith.constant 0 : index
    %c1 = arith.constant 1 : index
    %c0_11 = arith.constant 0 : index
    %c0_12 = arith.constant 0 : index
    %12 = vector.load %arg1[%c0_10, %c1, %c0_11, %c0_12] : memref<1x4x16x128xbf16, #tpu.memory_space<vmem>>, vector<1x1x16x128xbf16>
    %13 = vector.shape_cast %12 : vector<1x1x16x128xbf16> to vector<16x128xbf16>
    %c1_13 = arith.constant 1 : index
    %c0_14 = arith.constant 0 : index
    %c0_15 = arith.constant 0 : index
    %14 = vector.load %arg2[%c1_13, %c0_14, %c0_15] : memref<4x128x128xbf16, #tpu.memory_space<vmem>>, vector<1x128x128xbf16>
    %15 = vector.shape_cast %14 : vector<1x128x128xbf16> to vector<128x128xbf16>
    %cst_16 = arith.constant dense<0.000000e+00> : vector<16x128xf32>
    %16 = tpu.matmul %13, %15, %cst_16 {dimension_numbers = #tpu.dot_dimension_numbers<[1], [0], [0], [1], [0, 0, 1, 1], [], []>} : vector<16x128xbf16>, vector<128x128xbf16>, vector<16x128xf32> -> vector<16x128xf32>
    %c0_17 = arith.constant 0 : index
    %c0_18 = arith.constant 0 : index
    %17 = vector.load %arg3[%c0_17, %c0_18] : memref<1x128xf32, #tpu.memory_space<vmem>>, vector<1x128xf32>
    %18 = vector.broadcast %17 : vector<1x128xf32> to vector<16x128xf32>
    %19 = arith.addf %16, %18 : vector<16x128xf32>
    %cst_19 = arith.constant dense<0.000000e+00> : vector<128xf32>
    %20 = vector.multi_reduction <add>, %19, %cst_19 [0] : vector<16x128xf32> to vector<128xf32>
    %21 = vector.shape_cast %20 : vector<128xf32> to vector<1x128xf32>
    %22 = arith.addf %11, %21 : vector<1x128xf32>
    %c0_20 = arith.constant 0 : index
    %c2 = arith.constant 2 : index
    %c0_21 = arith.constant 0 : index
    %c0_22 = arith.constant 0 : index
    %23 = vector.load %arg1[%c0_20, %c2, %c0_21, %c0_22] : memref<1x4x16x128xbf16, #tpu.memory_space<vmem>>, vector<1x1x16x128xbf16>
    %24 = vector.shape_cast %23 : vector<1x1x16x128xbf16> to vector<16x128xbf16>
    %c2_23 = arith.constant 2 : index
    %c0_24 = arith.constant 0 : index
    %c0_25 = arith.constant 0 : index
    %25 = vector.load %arg2[%c2_23, %c0_24, %c0_25] : memref<4x128x128xbf16, #tpu.memory_space<vmem>>, vector<1x128x128xbf16>
    %26 = vector.shape_cast %25 : vector<1x128x128xbf16> to vector<128x128xbf16>
    %cst_26 = arith.constant dense<0.000000e+00> : vector<16x128xf32>
    %27 = tpu.matmul %24, %26, %cst_26 {dimension_numbers = #tpu.dot_dimension_numbers<[1], [0], [0], [1], [0, 0, 1, 1], [], []>} : vector<16x128xbf16>, vector<128x128xbf16>, vector<16x128xf32> -> vector<16x128xf32>
    %c0_27 = arith.constant 0 : index
    %c0_28 = arith.constant 0 : index
    %28 = vector.load %arg3[%c0_27, %c0_28] : memref<1x128xf32, #tpu.memory_space<vmem>>, vector<1x128xf32>
    %29 = vector.broadcast %28 : vector<1x128xf32> to vector<16x128xf32>
    %30 = arith.addf %27, %29 : vector<16x128xf32>
    %cst_29 = arith.constant dense<0.000000e+00> : vector<128xf32>
    %31 = vector.multi_reduction <add>, %30, %cst_29 [0] : vector<16x128xf32> to vector<128xf32>
    %32 = vector.shape_cast %31 : vector<128xf32> to vector<1x128xf32>
    %33 = arith.addf %22, %32 : vector<1x128xf32>
    %c0_30 = arith.constant 0 : index
    %c3 = arith.constant 3 : index
    %c0_31 = arith.constant 0 : index
    %c0_32 = arith.constant 0 : index
    %34 = vector.load %arg1[%c0_30, %c3, %c0_31, %c0_32] : memref<1x4x16x128xbf16, #tpu.memory_space<vmem>>, vector<1x1x16x128xbf16>
    %35 = vector.shape_cast %34 : vector<1x1x16x128xbf16> to vector<16x128xbf16>
    %c3_33 = arith.constant 3 : index
    %c0_34 = arith.constant 0 : index
    %c0_35 = arith.constant 0 : index
    %36 = vector.load %arg2[%c3_33, %c0_34, %c0_35] : memref<4x128x128xbf16, #tpu.memory_space<vmem>>, vector<1x128x128xbf16>
    %37 = vector.shape_cast %36 : vector<1x128x128xbf16> to vector<128x128xbf16>
    %cst_36 = arith.constant dense<0.000000e+00> : vector<16x128xf32>
    %38 = tpu.matmul %35, %37, %cst_36 {dimension_numbers = #tpu.dot_dimension_numbers<[1], [0], [0], [1], [0, 0, 1, 1], [], []>} : vector<16x128xbf16>, vector<128x128xbf16>, vector<16x128xf32> -> vector<16x128xf32>
    %c0_37 = arith.constant 0 : index
    %c0_38 = arith.constant 0 : index
    %39 = vector.load %arg3[%c0_37, %c0_38] : memref<1x128xf32, #tpu.memory_space<vmem>>, vector<1x128xf32>
    %40 = vector.broadcast %39 : vector<1x128xf32> to vector<16x128xf32>
    %41 = arith.addf %38, %40 : vector<16x128xf32>
    %cst_39 = arith.constant dense<0.000000e+00> : vector<128xf32>
    %42 = vector.multi_reduction <add>, %41, %cst_39 [0] : vector<16x128xf32> to vector<128xf32>
    %43 = vector.shape_cast %42 : vector<128xf32> to vector<1x128xf32>
    %44 = arith.addf %33, %43 : vector<1x128xf32>
    %cst_40 = arith.constant 6.400000e+01 : f32
    %45 = vector.broadcast %cst_40 : f32 to vector<1x128xf32>
    %46 = arith.divf %44, %45 : vector<1x128xf32>
    %cst_41 = arith.constant 0.000000e+00 : f32
    %47 = vector.broadcast %cst_41 : f32 to vector<1x128xf32>
    %48 = vector.broadcast %46 : vector<1x128xf32> to vector<16x128xf32>
    %49 = arith.subf %8, %48 : vector<16x128xf32>
    %50 = arith.mulf %49, %49 : vector<16x128xf32>
    %cst_42 = arith.constant dense<0.000000e+00> : vector<128xf32>
    %51 = vector.multi_reduction <add>, %50, %cst_42 [0] : vector<16x128xf32> to vector<128xf32>
    %52 = vector.shape_cast %51 : vector<128xf32> to vector<1x128xf32>
    %53 = arith.addf %47, %52 : vector<1x128xf32>
    %54 = vector.broadcast %46 : vector<1x128xf32> to vector<16x128xf32>
    %55 = arith.subf %19, %54 : vector<16x128xf32>
    %56 = arith.mulf %55, %55 : vector<16x128xf32>
    %cst_43 = arith.constant dense<0.000000e+00> : vector<128xf32>
    %57 = vector.multi_reduction <add>, %56, %cst_43 [0] : vector<16x128xf32> to vector<128xf32>
    %58 = vector.shape_cast %57 : vector<128xf32> to vector<1x128xf32>
    %59 = arith.addf %53, %58 : vector<1x128xf32>
    %60 = vector.broadcast %46 : vector<1x128xf32> to vector<16x128xf32>
    %61 = arith.subf %30, %60 : vector<16x128xf32>
    %62 = arith.mulf %61, %61 : vector<16x128xf32>
    %cst_44 = arith.constant dense<0.000000e+00> : vector<128xf32>
    %63 = vector.multi_reduction <add>, %62, %cst_44 [0] : vector<16x128xf32> to vector<128xf32>
    %64 = vector.shape_cast %63 : vector<128xf32> to vector<1x128xf32>
    %65 = arith.addf %59, %64 : vector<1x128xf32>
    %66 = vector.broadcast %46 : vector<1x128xf32> to vector<16x128xf32>
    %67 = arith.subf %41, %66 : vector<16x128xf32>
    %68 = arith.mulf %67, %67 : vector<16x128xf32>
    %cst_45 = arith.constant dense<0.000000e+00> : vector<128xf32>
    %69 = vector.multi_reduction <add>, %68, %cst_45 [0] : vector<16x128xf32> to vector<128xf32>
    %70 = vector.shape_cast %69 : vector<128xf32> to vector<1x128xf32>
    %71 = arith.addf %65, %70 : vector<1x128xf32>
    %cst_46 = arith.constant 6.400000e+01 : f32
    %72 = vector.broadcast %cst_46 : f32 to vector<1x128xf32>
    %73 = arith.divf %71, %72 : vector<1x128xf32>
    %cst_47 = arith.constant 9.99999974E-6 : f32
    %74 = vector.broadcast %cst_47 : f32 to vector<1x128xf32>
    %75 = arith.addf %73, %74 : vector<1x128xf32>
    %76 = math.rsqrt %75 : vector<1x128xf32>
    %77 = vector.broadcast %46 : vector<1x128xf32> to vector<16x128xf32>
    %78 = arith.subf %8, %77 : vector<16x128xf32>
    %79 = vector.broadcast %76 : vector<1x128xf32> to vector<16x128xf32>
    %80 = arith.mulf %78, %79 : vector<16x128xf32>
    %cst_48 = arith.constant 0.000000e+00 : f32
    %81 = vector.broadcast %cst_48 : f32 to vector<16x128xf32>
    %82 = arith.cmpf ogt, %80, %81 : vector<16x128xf32>
    %cst_49 = arith.constant 2.000000e-01 : f32
    %83 = vector.broadcast %cst_49 : f32 to vector<16x128xf32>
    %84 = arith.mulf %83, %80 : vector<16x128xf32>
    %85 = arith.select %82, %80, %84 : vector<16x128xi1>, vector<16x128xf32>
    %86 = arith.truncf %85 : vector<16x128xf32> to vector<16x128xbf16>
    %c0_50 = arith.constant 0 : index
    %c0_51 = arith.constant 0 : index
    %c0_52 = arith.constant 0 : index
    %c0_53 = arith.constant 0 : index
    %87 = vector.load %arg4[%c0_50, %c0_51, %c0_52, %c0_53] : memref<1x4x16x128xbf16, #tpu.memory_space<vmem>>, vector<1x1x16x128xbf16>
    %88 = vector.shape_cast %87 : vector<1x1x16x128xbf16> to vector<16x128xbf16>
    %89 = vector.shape_cast %86 : vector<16x128xbf16> to vector<1x1x16x128xbf16>
    tpu.vector_store %arg4[%c0_50, %c0_51, %c0_52, %c0_53], %89 {strides = array<i32>} : memref<1x4x16x128xbf16, #tpu.memory_space<vmem>>, vector<1x1x16x128xbf16>,
    %90 = vector.broadcast %46 : vector<1x128xf32> to vector<16x128xf32>
    %91 = arith.subf %19, %90 : vector<16x128xf32>
    %92 = vector.broadcast %76 : vector<1x128xf32> to vector<16x128xf32>
    %93 = arith.mulf %91, %92 : vector<16x128xf32>
    %cst_54 = arith.constant 0.000000e+00 : f32
    %94 = vector.broadcast %cst_54 : f32 to vector<16x128xf32>
    %95 = arith.cmpf ogt, %93, %94 : vector<16x128xf32>
    %cst_55 = arith.constant 2.000000e-01 : f32
    %96 = vector.broadcast %cst_55 : f32 to vector<16x128xf32>
    %97 = arith.mulf %96, %93 : vector<16x128xf32>
    %98 = arith.select %95, %93, %97 : vector<16x128xi1>, vector<16x128xf32>
    %99 = arith.truncf %98 : vector<16x128xf32> to vector<16x128xbf16>
    %c0_56 = arith.constant 0 : index
    %c1_57 = arith.constant 1 : index
    %c0_58 = arith.constant 0 : index
    %c0_59 = arith.constant 0 : index
    %100 = vector.load %arg4[%c0_56, %c1_57, %c0_58, %c0_59] : memref<1x4x16x128xbf16, #tpu.memory_space<vmem>>, vector<1x1x16x128xbf16>
    %101 = vector.shape_cast %100 : vector<1x1x16x128xbf16> to vector<16x128xbf16>
    %102 = vector.shape_cast %99 : vector<16x128xbf16> to vector<1x1x16x128xbf16>
    tpu.vector_store %arg4[%c0_56, %c1_57, %c0_58, %c0_59], %102 {strides = array<i32>} : memref<1x4x16x128xbf16, #tpu.memory_space<vmem>>, vector<1x1x16x128xbf16>,
    %103 = vector.broadcast %46 : vector<1x128xf32> to vector<16x128xf32>
    %104 = arith.subf %30, %103 : vector<16x128xf32>
    %105 = vector.broadcast %76 : vector<1x128xf32> to vector<16x128xf32>
    %106 = arith.mulf %104, %105 : vector<16x128xf32>
    %cst_60 = arith.constant 0.000000e+00 : f32
    %107 = vector.broadcast %cst_60 : f32 to vector<16x128xf32>
    %108 = arith.cmpf ogt, %106, %107 : vector<16x128xf32>
    %cst_61 = arith.constant 2.000000e-01 : f32
    %109 = vector.broadcast %cst_61 : f32 to vector<16x128xf32>
    %110 = arith.mulf %109, %106 : vector<16x128xf32>
    %111 = arith.select %108, %106, %110 : vector<16x128xi1>, vector<16x128xf32>
    %112 = arith.truncf %111 : vector<16x128xf32> to vector<16x128xbf16>
    %c0_62 = arith.constant 0 : index
    %c2_63 = arith.constant 2 : index
    %c0_64 = arith.constant 0 : index
    %c0_65 = arith.constant 0 : index
    %113 = vector.load %arg4[%c0_62, %c2_63, %c0_64, %c0_65] : memref<1x4x16x128xbf16, #tpu.memory_space<vmem>>, vector<1x1x16x128xbf16>
    %114 = vector.shape_cast %113 : vector<1x1x16x128xbf16> to vector<16x128xbf16>
    %115 = vector.shape_cast %112 : vector<16x128xbf16> to vector<1x1x16x128xbf16>
    tpu.vector_store %arg4[%c0_62, %c2_63, %c0_64, %c0_65], %115 {strides = array<i32>} : memref<1x4x16x128xbf16, #tpu.memory_space<vmem>>, vector<1x1x16x128xbf16>,
    %116 = vector.broadcast %46 : vector<1x128xf32> to vector<16x128xf32>
    %117 = arith.subf %41, %116 : vector<16x128xf32>
    %118 = vector.broadcast %76 : vector<1x128xf32> to vector<16x128xf32>
    %119 = arith.mulf %117, %118 : vector<16x128xf32>
    %cst_66 = arith.constant 0.000000e+00 : f32
    %120 = vector.broadcast %cst_66 : f32 to vector<16x128xf32>
    %121 = arith.cmpf ogt, %119, %120 : vector<16x128xf32>
    %cst_67 = arith.constant 2.000000e-01 : f32
    %122 = vector.broadcast %cst_67 : f32 to vector<16x128xf32>
    %123 = arith.mulf %122, %119 : vector<16x128xf32>
    %124 = arith.select %121, %119, %123 : vector<16x128xi1>, vector<16x128xf32>
    %125 = arith.truncf %124 : vector<16x128xf32> to vector<16x128xbf16>
    %c0_68 = arith.constant 0 : index
    %c3_69 = arith.constant 3 : index
    %c0_70 = arith.constant 0 : index
    %c0_71 = arith.constant 0 : index
    %126 = vector.load %arg4[%c0_68, %c3_69, %c0_70, %c0_71] : memref<1x4x16x128xbf16, #tpu.memory_space<vmem>>, vector<1x1x16x128xbf16>
    %127 = vector.shape_cast %126 : vector<1x1x16x128xbf16> to vector<16x128xbf16>
    %128 = vector.shape_cast %125 : vector<16x128xbf16> to vector<1x1x16x128xbf16>
    tpu.vector_store %arg4[%c0_68, %c3_69, %c0_70, %c0_71], %128 {strides = array<i32>} : memref<1x4x16x128xbf16, #tpu.memory_space<vmem>>, vector<1x1x16x128xbf16>,
    return
  }
  func.func @transform_0(%arg0: i32) -> (i32, i32, i32, i32) {
    %c0_i32 = arith.constant 0 : i32
    %c0_i32_0 = arith.constant 0 : i32
    %c0_i32_1 = arith.constant 0 : i32
    %c0_i32_2 = arith.constant 0 : i32
    return %arg0, %c0_i32, %c0_i32_0, %c0_i32_1 : i32, i32, i32, i32
  }
  func.func @transform_1(%arg0: i32) -> (i32, i32, i32) {
    %c0_i32 = arith.constant 0 : i32
    %c0_i32_0 = arith.constant 0 : i32
    %c0_i32_1 = arith.constant 0 : i32
    %c0_i32_2 = arith.constant 0 : i32
    return %c0_i32, %c0_i32_0, %c0_i32_1 : i32, i32, i32
  }
  func.func @transform_2(%arg0: i32) -> (i32, i32) {
    %c0_i32 = arith.constant 0 : i32
    %c0_i32_0 = arith.constant 0 : i32
    %c0_i32_1 = arith.constant 0 : i32
    return %c0_i32, %c0_i32_0 : i32, i32
  }
  func.func @transform_3(%arg0: i32) -> (i32, i32, i32, i32) {
    %c0_i32 = arith.constant 0 : i32
    %c0_i32_0 = arith.constant 0 : i32
    %c0_i32_1 = arith.constant 0 : i32
    %c0_i32_2 = arith.constant 0 : i32
    return %arg0, %c0_i32, %c0_i32_0, %c0_i32_1 : i32, i32, i32, i32
  }
}

module attributes {stable_mosaic.version = 11 : i64} {
  func.func @_upsample_fused_kernel(%arg0: i32, %arg1: memref<1x4x64x128xbf16, #tpu.memory_space<vmem>>, %arg2: memref<4x128x128xbf16, #tpu.memory_space<vmem>>, %arg3: memref<1x128xf32, #tpu.memory_space<vmem>>, %arg4: memref<1x4x64x128xbf16, #tpu.memory_space<vmem>>) attributes {dimension_semantics = [#tpu.dimension_semantics<parallel>], iteration_bounds = array<i64: 2>, scalar_prefetch = 0 : i64, scratch_operands = 0 : i64, tpu.core_type = #tpu.core_type<tc>, window_params = [{transform_indices = @transform_0, window_bounds = array<i64: 1, 4, 64, 128>}, {pipeline_mode = #tpu.pipeline_mode<synchronous>, transform_indices = @transform_1, window_bounds = array<i64: 4, 128, 128>}, {pipeline_mode = #tpu.pipeline_mode<synchronous>, transform_indices = @transform_2, window_bounds = array<i64: 1, 128>}, {transform_indices = @transform_3, window_bounds = array<i64: 1, 4, 64, 128>}]} {
    %cst = arith.constant 0.000000e+00 : f32
    %0 = vector.broadcast %cst : f32 to vector<1x128xf32>
    %c0 = arith.constant 0 : index
    %c0_0 = arith.constant 0 : index
    %c0_1 = arith.constant 0 : index
    %c0_2 = arith.constant 0 : index
    %1 = vector.load %arg1[%c0, %c0_0, %c0_1, %c0_2] : memref<1x4x64x128xbf16, #tpu.memory_space<vmem>>, vector<1x1x64x128xbf16>
    %2 = vector.shape_cast %1 : vector<1x1x64x128xbf16> to vector<64x128xbf16>
    %c0_3 = arith.constant 0 : index
    %c0_4 = arith.constant 0 : index
    %c0_5 = arith.constant 0 : index
    %3 = vector.load %arg2[%c0_3, %c0_4, %c0_5] : memref<4x128x128xbf16, #tpu.memory_space<vmem>>, vector<1x128x128xbf16>
    %4 = vector.shape_cast %3 : vector<1x128x128xbf16> to vector<128x128xbf16>
    %cst_6 = arith.constant dense<0.000000e+00> : vector<64x128xf32>
    %5 = tpu.matmul %2, %4, %cst_6 {dimension_numbers = #tpu.dot_dimension_numbers<[1], [0], [0], [1], [0, 0, 1, 1], [], []>} : vector<64x128xbf16>, vector<128x128xbf16>, vector<64x128xf32> -> vector<64x128xf32>
    %c0_7 = arith.constant 0 : index
    %c0_8 = arith.constant 0 : index
    %6 = vector.load %arg3[%c0_7, %c0_8] : memref<1x128xf32, #tpu.memory_space<vmem>>, vector<1x128xf32>
    %7 = vector.broadcast %6 : vector<1x128xf32> to vector<64x128xf32>
    %8 = arith.addf %5, %7 : vector<64x128xf32>
    %cst_9 = arith.constant dense<0.000000e+00> : vector<128xf32>
    %9 = vector.multi_reduction <add>, %8, %cst_9 [0] : vector<64x128xf32> to vector<128xf32>
    %10 = vector.shape_cast %9 : vector<128xf32> to vector<1x128xf32>
    %11 = arith.addf %0, %10 : vector<1x128xf32>
    %c0_10 = arith.constant 0 : index
    %c1 = arith.constant 1 : index
    %c0_11 = arith.constant 0 : index
    %c0_12 = arith.constant 0 : index
    %12 = vector.load %arg1[%c0_10, %c1, %c0_11, %c0_12] : memref<1x4x64x128xbf16, #tpu.memory_space<vmem>>, vector<1x1x64x128xbf16>
    %13 = vector.shape_cast %12 : vector<1x1x64x128xbf16> to vector<64x128xbf16>
    %c1_13 = arith.constant 1 : index
    %c0_14 = arith.constant 0 : index
    %c0_15 = arith.constant 0 : index
    %14 = vector.load %arg2[%c1_13, %c0_14, %c0_15] : memref<4x128x128xbf16, #tpu.memory_space<vmem>>, vector<1x128x128xbf16>
    %15 = vector.shape_cast %14 : vector<1x128x128xbf16> to vector<128x128xbf16>
    %cst_16 = arith.constant dense<0.000000e+00> : vector<64x128xf32>
    %16 = tpu.matmul %13, %15, %cst_16 {dimension_numbers = #tpu.dot_dimension_numbers<[1], [0], [0], [1], [0, 0, 1, 1], [], []>} : vector<64x128xbf16>, vector<128x128xbf16>, vector<64x128xf32> -> vector<64x128xf32>
    %c0_17 = arith.constant 0 : index
    %c0_18 = arith.constant 0 : index
    %17 = vector.load %arg3[%c0_17, %c0_18] : memref<1x128xf32, #tpu.memory_space<vmem>>, vector<1x128xf32>
    %18 = vector.broadcast %17 : vector<1x128xf32> to vector<64x128xf32>
    %19 = arith.addf %16, %18 : vector<64x128xf32>
    %cst_19 = arith.constant dense<0.000000e+00> : vector<128xf32>
    %20 = vector.multi_reduction <add>, %19, %cst_19 [0] : vector<64x128xf32> to vector<128xf32>
    %21 = vector.shape_cast %20 : vector<128xf32> to vector<1x128xf32>
    %22 = arith.addf %11, %21 : vector<1x128xf32>
    %c0_20 = arith.constant 0 : index
    %c2 = arith.constant 2 : index
    %c0_21 = arith.constant 0 : index
    %c0_22 = arith.constant 0 : index
    %23 = vector.load %arg1[%c0_20, %c2, %c0_21, %c0_22] : memref<1x4x64x128xbf16, #tpu.memory_space<vmem>>, vector<1x1x64x128xbf16>
    %24 = vector.shape_cast %23 : vector<1x1x64x128xbf16> to vector<64x128xbf16>
    %c2_23 = arith.constant 2 : index
    %c0_24 = arith.constant 0 : index
    %c0_25 = arith.constant 0 : index
    %25 = vector.load %arg2[%c2_23, %c0_24, %c0_25] : memref<4x128x128xbf16, #tpu.memory_space<vmem>>, vector<1x128x128xbf16>
    %26 = vector.shape_cast %25 : vector<1x128x128xbf16> to vector<128x128xbf16>
    %cst_26 = arith.constant dense<0.000000e+00> : vector<64x128xf32>
    %27 = tpu.matmul %24, %26, %cst_26 {dimension_numbers = #tpu.dot_dimension_numbers<[1], [0], [0], [1], [0, 0, 1, 1], [], []>} : vector<64x128xbf16>, vector<128x128xbf16>, vector<64x128xf32> -> vector<64x128xf32>
    %c0_27 = arith.constant 0 : index
    %c0_28 = arith.constant 0 : index
    %28 = vector.load %arg3[%c0_27, %c0_28] : memref<1x128xf32, #tpu.memory_space<vmem>>, vector<1x128xf32>
    %29 = vector.broadcast %28 : vector<1x128xf32> to vector<64x128xf32>
    %30 = arith.addf %27, %29 : vector<64x128xf32>
    %cst_29 = arith.constant dense<0.000000e+00> : vector<128xf32>
    %31 = vector.multi_reduction <add>, %30, %cst_29 [0] : vector<64x128xf32> to vector<128xf32>
    %32 = vector.shape_cast %31 : vector<128xf32> to vector<1x128xf32>
    %33 = arith.addf %22, %32 : vector<1x128xf32>
    %c0_30 = arith.constant 0 : index
    %c3 = arith.constant 3 : index
    %c0_31 = arith.constant 0 : index
    %c0_32 = arith.constant 0 : index
    %34 = vector.load %arg1[%c0_30, %c3, %c0_31, %c0_32] : memref<1x4x64x128xbf16, #tpu.memory_space<vmem>>, vector<1x1x64x128xbf16>
    %35 = vector.shape_cast %34 : vector<1x1x64x128xbf16> to vector<64x128xbf16>
    %c3_33 = arith.constant 3 : index
    %c0_34 = arith.constant 0 : index
    %c0_35 = arith.constant 0 : index
    %36 = vector.load %arg2[%c3_33, %c0_34, %c0_35] : memref<4x128x128xbf16, #tpu.memory_space<vmem>>, vector<1x128x128xbf16>
    %37 = vector.shape_cast %36 : vector<1x128x128xbf16> to vector<128x128xbf16>
    %cst_36 = arith.constant dense<0.000000e+00> : vector<64x128xf32>
    %38 = tpu.matmul %35, %37, %cst_36 {dimension_numbers = #tpu.dot_dimension_numbers<[1], [0], [0], [1], [0, 0, 1, 1], [], []>} : vector<64x128xbf16>, vector<128x128xbf16>, vector<64x128xf32> -> vector<64x128xf32>
    %c0_37 = arith.constant 0 : index
    %c0_38 = arith.constant 0 : index
    %39 = vector.load %arg3[%c0_37, %c0_38] : memref<1x128xf32, #tpu.memory_space<vmem>>, vector<1x128xf32>
    %40 = vector.broadcast %39 : vector<1x128xf32> to vector<64x128xf32>
    %41 = arith.addf %38, %40 : vector<64x128xf32>
    %cst_39 = arith.constant dense<0.000000e+00> : vector<128xf32>
    %42 = vector.multi_reduction <add>, %41, %cst_39 [0] : vector<64x128xf32> to vector<128xf32>
    %43 = vector.shape_cast %42 : vector<128xf32> to vector<1x128xf32>
    %44 = arith.addf %33, %43 : vector<1x128xf32>
    %cst_40 = arith.constant 2.560000e+02 : f32
    %45 = vector.broadcast %cst_40 : f32 to vector<1x128xf32>
    %46 = arith.divf %44, %45 : vector<1x128xf32>
    %cst_41 = arith.constant 0.000000e+00 : f32
    %47 = vector.broadcast %cst_41 : f32 to vector<1x128xf32>
    %48 = vector.broadcast %46 : vector<1x128xf32> to vector<64x128xf32>
    %49 = arith.subf %8, %48 : vector<64x128xf32>
    %50 = arith.mulf %49, %49 : vector<64x128xf32>
    %cst_42 = arith.constant dense<0.000000e+00> : vector<128xf32>
    %51 = vector.multi_reduction <add>, %50, %cst_42 [0] : vector<64x128xf32> to vector<128xf32>
    %52 = vector.shape_cast %51 : vector<128xf32> to vector<1x128xf32>
    %53 = arith.addf %47, %52 : vector<1x128xf32>
    %54 = vector.broadcast %46 : vector<1x128xf32> to vector<64x128xf32>
    %55 = arith.subf %19, %54 : vector<64x128xf32>
    %56 = arith.mulf %55, %55 : vector<64x128xf32>
    %cst_43 = arith.constant dense<0.000000e+00> : vector<128xf32>
    %57 = vector.multi_reduction <add>, %56, %cst_43 [0] : vector<64x128xf32> to vector<128xf32>
    %58 = vector.shape_cast %57 : vector<128xf32> to vector<1x128xf32>
    %59 = arith.addf %53, %58 : vector<1x128xf32>
    %60 = vector.broadcast %46 : vector<1x128xf32> to vector<64x128xf32>
    %61 = arith.subf %30, %60 : vector<64x128xf32>
    %62 = arith.mulf %61, %61 : vector<64x128xf32>
    %cst_44 = arith.constant dense<0.000000e+00> : vector<128xf32>
    %63 = vector.multi_reduction <add>, %62, %cst_44 [0] : vector<64x128xf32> to vector<128xf32>
    %64 = vector.shape_cast %63 : vector<128xf32> to vector<1x128xf32>
    %65 = arith.addf %59, %64 : vector<1x128xf32>
    %66 = vector.broadcast %46 : vector<1x128xf32> to vector<64x128xf32>
    %67 = arith.subf %41, %66 : vector<64x128xf32>
    %68 = arith.mulf %67, %67 : vector<64x128xf32>
    %cst_45 = arith.constant dense<0.000000e+00> : vector<128xf32>
    %69 = vector.multi_reduction <add>, %68, %cst_45 [0] : vector<64x128xf32> to vector<128xf32>
    %70 = vector.shape_cast %69 : vector<128xf32> to vector<1x128xf32>
    %71 = arith.addf %65, %70 : vector<1x128xf32>
    %cst_46 = arith.constant 2.560000e+02 : f32
    %72 = vector.broadcast %cst_46 : f32 to vector<1x128xf32>
    %73 = arith.divf %71, %72 : vector<1x128xf32>
    %cst_47 = arith.constant 9.99999974E-6 : f32
    %74 = vector.broadcast %cst_47 : f32 to vector<1x128xf32>
    %75 = arith.addf %73, %74 : vector<1x128xf32>
    %76 = math.rsqrt %75 : vector<1x128xf32>
    %77 = vector.broadcast %46 : vector<1x128xf32> to vector<64x128xf32>
    %78 = arith.subf %8, %77 : vector<64x128xf32>
    %79 = vector.broadcast %76 : vector<1x128xf32> to vector<64x128xf32>
    %80 = arith.mulf %78, %79 : vector<64x128xf32>
    %cst_48 = arith.constant 0.000000e+00 : f32
    %81 = vector.broadcast %cst_48 : f32 to vector<64x128xf32>
    %82 = arith.cmpf ogt, %80, %81 : vector<64x128xf32>
    %cst_49 = arith.constant 2.000000e-01 : f32
    %83 = vector.broadcast %cst_49 : f32 to vector<64x128xf32>
    %84 = arith.mulf %83, %80 : vector<64x128xf32>
    %85 = arith.select %82, %80, %84 : vector<64x128xi1>, vector<64x128xf32>
    %86 = arith.truncf %85 : vector<64x128xf32> to vector<64x128xbf16>
    %c0_50 = arith.constant 0 : index
    %c0_51 = arith.constant 0 : index
    %c0_52 = arith.constant 0 : index
    %c0_53 = arith.constant 0 : index
    %87 = vector.load %arg4[%c0_50, %c0_51, %c0_52, %c0_53] : memref<1x4x64x128xbf16, #tpu.memory_space<vmem>>, vector<1x1x64x128xbf16>
    %88 = vector.shape_cast %87 : vector<1x1x64x128xbf16> to vector<64x128xbf16>
    %89 = vector.shape_cast %86 : vector<64x128xbf16> to vector<1x1x64x128xbf16>
    tpu.vector_store %arg4[%c0_50, %c0_51, %c0_52, %c0_53], %89 {strides = array<i32>} : memref<1x4x64x128xbf16, #tpu.memory_space<vmem>>, vector<1x1x64x128xbf16>,
    %90 = vector.broadcast %46 : vector<1x128xf32> to vector<64x128xf32>
    %91 = arith.subf %19, %90 : vector<64x128xf32>
    %92 = vector.broadcast %76 : vector<1x128xf32> to vector<64x128xf32>
    %93 = arith.mulf %91, %92 : vector<64x128xf32>
    %cst_54 = arith.constant 0.000000e+00 : f32
    %94 = vector.broadcast %cst_54 : f32 to vector<64x128xf32>
    %95 = arith.cmpf ogt, %93, %94 : vector<64x128xf32>
    %cst_55 = arith.constant 2.000000e-01 : f32
    %96 = vector.broadcast %cst_55 : f32 to vector<64x128xf32>
    %97 = arith.mulf %96, %93 : vector<64x128xf32>
    %98 = arith.select %95, %93, %97 : vector<64x128xi1>, vector<64x128xf32>
    %99 = arith.truncf %98 : vector<64x128xf32> to vector<64x128xbf16>
    %c0_56 = arith.constant 0 : index
    %c1_57 = arith.constant 1 : index
    %c0_58 = arith.constant 0 : index
    %c0_59 = arith.constant 0 : index
    %100 = vector.load %arg4[%c0_56, %c1_57, %c0_58, %c0_59] : memref<1x4x64x128xbf16, #tpu.memory_space<vmem>>, vector<1x1x64x128xbf16>
    %101 = vector.shape_cast %100 : vector<1x1x64x128xbf16> to vector<64x128xbf16>
    %102 = vector.shape_cast %99 : vector<64x128xbf16> to vector<1x1x64x128xbf16>
    tpu.vector_store %arg4[%c0_56, %c1_57, %c0_58, %c0_59], %102 {strides = array<i32>} : memref<1x4x64x128xbf16, #tpu.memory_space<vmem>>, vector<1x1x64x128xbf16>,
    %103 = vector.broadcast %46 : vector<1x128xf32> to vector<64x128xf32>
    %104 = arith.subf %30, %103 : vector<64x128xf32>
    %105 = vector.broadcast %76 : vector<1x128xf32> to vector<64x128xf32>
    %106 = arith.mulf %104, %105 : vector<64x128xf32>
    %cst_60 = arith.constant 0.000000e+00 : f32
    %107 = vector.broadcast %cst_60 : f32 to vector<64x128xf32>
    %108 = arith.cmpf ogt, %106, %107 : vector<64x128xf32>
    %cst_61 = arith.constant 2.000000e-01 : f32
    %109 = vector.broadcast %cst_61 : f32 to vector<64x128xf32>
    %110 = arith.mulf %109, %106 : vector<64x128xf32>
    %111 = arith.select %108, %106, %110 : vector<64x128xi1>, vector<64x128xf32>
    %112 = arith.truncf %111 : vector<64x128xf32> to vector<64x128xbf16>
    %c0_62 = arith.constant 0 : index
    %c2_63 = arith.constant 2 : index
    %c0_64 = arith.constant 0 : index
    %c0_65 = arith.constant 0 : index
    %113 = vector.load %arg4[%c0_62, %c2_63, %c0_64, %c0_65] : memref<1x4x64x128xbf16, #tpu.memory_space<vmem>>, vector<1x1x64x128xbf16>
    %114 = vector.shape_cast %113 : vector<1x1x64x128xbf16> to vector<64x128xbf16>
    %115 = vector.shape_cast %112 : vector<64x128xbf16> to vector<1x1x64x128xbf16>
    tpu.vector_store %arg4[%c0_62, %c2_63, %c0_64, %c0_65], %115 {strides = array<i32>} : memref<1x4x64x128xbf16, #tpu.memory_space<vmem>>, vector<1x1x64x128xbf16>,
    %116 = vector.broadcast %46 : vector<1x128xf32> to vector<64x128xf32>
    %117 = arith.subf %41, %116 : vector<64x128xf32>
    %118 = vector.broadcast %76 : vector<1x128xf32> to vector<64x128xf32>
    %119 = arith.mulf %117, %118 : vector<64x128xf32>
    %cst_66 = arith.constant 0.000000e+00 : f32
    %120 = vector.broadcast %cst_66 : f32 to vector<64x128xf32>
    %121 = arith.cmpf ogt, %119, %120 : vector<64x128xf32>
    %cst_67 = arith.constant 2.000000e-01 : f32
    %122 = vector.broadcast %cst_67 : f32 to vector<64x128xf32>
    %123 = arith.mulf %122, %119 : vector<64x128xf32>
    %124 = arith.select %121, %119, %123 : vector<64x128xi1>, vector<64x128xf32>
    %125 = arith.truncf %124 : vector<64x128xf32> to vector<64x128xbf16>
    %c0_68 = arith.constant 0 : index
    %c3_69 = arith.constant 3 : index
    %c0_70 = arith.constant 0 : index
    %c0_71 = arith.constant 0 : index
    %126 = vector.load %arg4[%c0_68, %c3_69, %c0_70, %c0_71] : memref<1x4x64x128xbf16, #tpu.memory_space<vmem>>, vector<1x1x64x128xbf16>
    %127 = vector.shape_cast %126 : vector<1x1x64x128xbf16> to vector<64x128xbf16>
    %128 = vector.shape_cast %125 : vector<64x128xbf16> to vector<1x1x64x128xbf16>
    tpu.vector_store %arg4[%c0_68, %c3_69, %c0_70, %c0_71], %128 {strides = array<i32>} : memref<1x4x64x128xbf16, #tpu.memory_space<vmem>>, vector<1x1x64x128xbf16>,
    return
  }
  func.func @transform_0(%arg0: i32) -> (i32, i32, i32, i32) {
    %c0_i32 = arith.constant 0 : i32
    %c0_i32_0 = arith.constant 0 : i32
    %c0_i32_1 = arith.constant 0 : i32
    %c0_i32_2 = arith.constant 0 : i32
    return %arg0, %c0_i32, %c0_i32_0, %c0_i32_1 : i32, i32, i32, i32
  }
  func.func @transform_1(%arg0: i32) -> (i32, i32, i32) {
    %c0_i32 = arith.constant 0 : i32
    %c0_i32_0 = arith.constant 0 : i32
    %c0_i32_1 = arith.constant 0 : i32
    %c0_i32_2 = arith.constant 0 : i32
    return %c0_i32, %c0_i32_0, %c0_i32_1 : i32, i32, i32
  }
  func.func @transform_2(%arg0: i32) -> (i32, i32) {
    %c0_i32 = arith.constant 0 : i32
    %c0_i32_0 = arith.constant 0 : i32
    %c0_i32_1 = arith.constant 0 : i32
    return %c0_i32, %c0_i32_0 : i32, i32
  }
  func.func @transform_3(%arg0: i32) -> (i32, i32, i32, i32) {
    %c0_i32 = arith.constant 0 : i32
    %c0_i32_0 = arith.constant 0 : i32
    %c0_i32_1 = arith.constant 0 : i32
    %c0_i32_2 = arith.constant 0 : i32
    return %arg0, %c0_i32, %c0_i32_0, %c0_i32_1 : i32, i32, i32, i32
  }
}

module attributes {stable_mosaic.version = 11 : i64} {
  func.func @_upsample_fused_kernel(%arg0: i32, %arg1: memref<1x4x256x128xbf16, #tpu.memory_space<vmem>>, %arg2: memref<4x128x128xbf16, #tpu.memory_space<vmem>>, %arg3: memref<1x128xf32, #tpu.memory_space<vmem>>, %arg4: memref<1x4x256x128xbf16, #tpu.memory_space<vmem>>) attributes {dimension_semantics = [#tpu.dimension_semantics<parallel>], iteration_bounds = array<i64: 2>, scalar_prefetch = 0 : i64, scratch_operands = 0 : i64, tpu.core_type = #tpu.core_type<tc>, window_params = [{transform_indices = @transform_0, window_bounds = array<i64: 1, 4, 256, 128>}, {pipeline_mode = #tpu.pipeline_mode<synchronous>, transform_indices = @transform_1, window_bounds = array<i64: 4, 128, 128>}, {pipeline_mode = #tpu.pipeline_mode<synchronous>, transform_indices = @transform_2, window_bounds = array<i64: 1, 128>}, {transform_indices = @transform_3, window_bounds = array<i64: 1, 4, 256, 128>}]} {
    %cst = arith.constant 0.000000e+00 : f32
    %0 = vector.broadcast %cst : f32 to vector<1x128xf32>
    %c0 = arith.constant 0 : index
    %c0_0 = arith.constant 0 : index
    %c0_1 = arith.constant 0 : index
    %c0_2 = arith.constant 0 : index
    %1 = vector.load %arg1[%c0, %c0_0, %c0_1, %c0_2] : memref<1x4x256x128xbf16, #tpu.memory_space<vmem>>, vector<1x1x256x128xbf16>
    %2 = vector.shape_cast %1 : vector<1x1x256x128xbf16> to vector<256x128xbf16>
    %c0_3 = arith.constant 0 : index
    %c0_4 = arith.constant 0 : index
    %c0_5 = arith.constant 0 : index
    %3 = vector.load %arg2[%c0_3, %c0_4, %c0_5] : memref<4x128x128xbf16, #tpu.memory_space<vmem>>, vector<1x128x128xbf16>
    %4 = vector.shape_cast %3 : vector<1x128x128xbf16> to vector<128x128xbf16>
    %cst_6 = arith.constant dense<0.000000e+00> : vector<256x128xf32>
    %5 = tpu.matmul %2, %4, %cst_6 {dimension_numbers = #tpu.dot_dimension_numbers<[1], [0], [0], [1], [0, 0, 1, 1], [], []>} : vector<256x128xbf16>, vector<128x128xbf16>, vector<256x128xf32> -> vector<256x128xf32>
    %c0_7 = arith.constant 0 : index
    %c0_8 = arith.constant 0 : index
    %6 = vector.load %arg3[%c0_7, %c0_8] : memref<1x128xf32, #tpu.memory_space<vmem>>, vector<1x128xf32>
    %7 = vector.broadcast %6 : vector<1x128xf32> to vector<256x128xf32>
    %8 = arith.addf %5, %7 : vector<256x128xf32>
    %cst_9 = arith.constant dense<0.000000e+00> : vector<128xf32>
    %9 = vector.multi_reduction <add>, %8, %cst_9 [0] : vector<256x128xf32> to vector<128xf32>
    %10 = vector.shape_cast %9 : vector<128xf32> to vector<1x128xf32>
    %11 = arith.addf %0, %10 : vector<1x128xf32>
    %c0_10 = arith.constant 0 : index
    %c1 = arith.constant 1 : index
    %c0_11 = arith.constant 0 : index
    %c0_12 = arith.constant 0 : index
    %12 = vector.load %arg1[%c0_10, %c1, %c0_11, %c0_12] : memref<1x4x256x128xbf16, #tpu.memory_space<vmem>>, vector<1x1x256x128xbf16>
    %13 = vector.shape_cast %12 : vector<1x1x256x128xbf16> to vector<256x128xbf16>
    %c1_13 = arith.constant 1 : index
    %c0_14 = arith.constant 0 : index
    %c0_15 = arith.constant 0 : index
    %14 = vector.load %arg2[%c1_13, %c0_14, %c0_15] : memref<4x128x128xbf16, #tpu.memory_space<vmem>>, vector<1x128x128xbf16>
    %15 = vector.shape_cast %14 : vector<1x128x128xbf16> to vector<128x128xbf16>
    %cst_16 = arith.constant dense<0.000000e+00> : vector<256x128xf32>
    %16 = tpu.matmul %13, %15, %cst_16 {dimension_numbers = #tpu.dot_dimension_numbers<[1], [0], [0], [1], [0, 0, 1, 1], [], []>} : vector<256x128xbf16>, vector<128x128xbf16>, vector<256x128xf32> -> vector<256x128xf32>
    %c0_17 = arith.constant 0 : index
    %c0_18 = arith.constant 0 : index
    %17 = vector.load %arg3[%c0_17, %c0_18] : memref<1x128xf32, #tpu.memory_space<vmem>>, vector<1x128xf32>
    %18 = vector.broadcast %17 : vector<1x128xf32> to vector<256x128xf32>
    %19 = arith.addf %16, %18 : vector<256x128xf32>
    %cst_19 = arith.constant dense<0.000000e+00> : vector<128xf32>
    %20 = vector.multi_reduction <add>, %19, %cst_19 [0] : vector<256x128xf32> to vector<128xf32>
    %21 = vector.shape_cast %20 : vector<128xf32> to vector<1x128xf32>
    %22 = arith.addf %11, %21 : vector<1x128xf32>
    %c0_20 = arith.constant 0 : index
    %c2 = arith.constant 2 : index
    %c0_21 = arith.constant 0 : index
    %c0_22 = arith.constant 0 : index
    %23 = vector.load %arg1[%c0_20, %c2, %c0_21, %c0_22] : memref<1x4x256x128xbf16, #tpu.memory_space<vmem>>, vector<1x1x256x128xbf16>
    %24 = vector.shape_cast %23 : vector<1x1x256x128xbf16> to vector<256x128xbf16>
    %c2_23 = arith.constant 2 : index
    %c0_24 = arith.constant 0 : index
    %c0_25 = arith.constant 0 : index
    %25 = vector.load %arg2[%c2_23, %c0_24, %c0_25] : memref<4x128x128xbf16, #tpu.memory_space<vmem>>, vector<1x128x128xbf16>
    %26 = vector.shape_cast %25 : vector<1x128x128xbf16> to vector<128x128xbf16>
    %cst_26 = arith.constant dense<0.000000e+00> : vector<256x128xf32>
    %27 = tpu.matmul %24, %26, %cst_26 {dimension_numbers = #tpu.dot_dimension_numbers<[1], [0], [0], [1], [0, 0, 1, 1], [], []>} : vector<256x128xbf16>, vector<128x128xbf16>, vector<256x128xf32> -> vector<256x128xf32>
    %c0_27 = arith.constant 0 : index
    %c0_28 = arith.constant 0 : index
    %28 = vector.load %arg3[%c0_27, %c0_28] : memref<1x128xf32, #tpu.memory_space<vmem>>, vector<1x128xf32>
    %29 = vector.broadcast %28 : vector<1x128xf32> to vector<256x128xf32>
    %30 = arith.addf %27, %29 : vector<256x128xf32>
    %cst_29 = arith.constant dense<0.000000e+00> : vector<128xf32>
    %31 = vector.multi_reduction <add>, %30, %cst_29 [0] : vector<256x128xf32> to vector<128xf32>
    %32 = vector.shape_cast %31 : vector<128xf32> to vector<1x128xf32>
    %33 = arith.addf %22, %32 : vector<1x128xf32>
    %c0_30 = arith.constant 0 : index
    %c3 = arith.constant 3 : index
    %c0_31 = arith.constant 0 : index
    %c0_32 = arith.constant 0 : index
    %34 = vector.load %arg1[%c0_30, %c3, %c0_31, %c0_32] : memref<1x4x256x128xbf16, #tpu.memory_space<vmem>>, vector<1x1x256x128xbf16>
    %35 = vector.shape_cast %34 : vector<1x1x256x128xbf16> to vector<256x128xbf16>
    %c3_33 = arith.constant 3 : index
    %c0_34 = arith.constant 0 : index
    %c0_35 = arith.constant 0 : index
    %36 = vector.load %arg2[%c3_33, %c0_34, %c0_35] : memref<4x128x128xbf16, #tpu.memory_space<vmem>>, vector<1x128x128xbf16>
    %37 = vector.shape_cast %36 : vector<1x128x128xbf16> to vector<128x128xbf16>
    %cst_36 = arith.constant dense<0.000000e+00> : vector<256x128xf32>
    %38 = tpu.matmul %35, %37, %cst_36 {dimension_numbers = #tpu.dot_dimension_numbers<[1], [0], [0], [1], [0, 0, 1, 1], [], []>} : vector<256x128xbf16>, vector<128x128xbf16>, vector<256x128xf32> -> vector<256x128xf32>
    %c0_37 = arith.constant 0 : index
    %c0_38 = arith.constant 0 : index
    %39 = vector.load %arg3[%c0_37, %c0_38] : memref<1x128xf32, #tpu.memory_space<vmem>>, vector<1x128xf32>
    %40 = vector.broadcast %39 : vector<1x128xf32> to vector<256x128xf32>
    %41 = arith.addf %38, %40 : vector<256x128xf32>
    %cst_39 = arith.constant dense<0.000000e+00> : vector<128xf32>
    %42 = vector.multi_reduction <add>, %41, %cst_39 [0] : vector<256x128xf32> to vector<128xf32>
    %43 = vector.shape_cast %42 : vector<128xf32> to vector<1x128xf32>
    %44 = arith.addf %33, %43 : vector<1x128xf32>
    %cst_40 = arith.constant 1.024000e+03 : f32
    %45 = vector.broadcast %cst_40 : f32 to vector<1x128xf32>
    %46 = arith.divf %44, %45 : vector<1x128xf32>
    %cst_41 = arith.constant 0.000000e+00 : f32
    %47 = vector.broadcast %cst_41 : f32 to vector<1x128xf32>
    %48 = vector.broadcast %46 : vector<1x128xf32> to vector<256x128xf32>
    %49 = arith.subf %8, %48 : vector<256x128xf32>
    %50 = arith.mulf %49, %49 : vector<256x128xf32>
    %cst_42 = arith.constant dense<0.000000e+00> : vector<128xf32>
    %51 = vector.multi_reduction <add>, %50, %cst_42 [0] : vector<256x128xf32> to vector<128xf32>
    %52 = vector.shape_cast %51 : vector<128xf32> to vector<1x128xf32>
    %53 = arith.addf %47, %52 : vector<1x128xf32>
    %54 = vector.broadcast %46 : vector<1x128xf32> to vector<256x128xf32>
    %55 = arith.subf %19, %54 : vector<256x128xf32>
    %56 = arith.mulf %55, %55 : vector<256x128xf32>
    %cst_43 = arith.constant dense<0.000000e+00> : vector<128xf32>
    %57 = vector.multi_reduction <add>, %56, %cst_43 [0] : vector<256x128xf32> to vector<128xf32>
    %58 = vector.shape_cast %57 : vector<128xf32> to vector<1x128xf32>
    %59 = arith.addf %53, %58 : vector<1x128xf32>
    %60 = vector.broadcast %46 : vector<1x128xf32> to vector<256x128xf32>
    %61 = arith.subf %30, %60 : vector<256x128xf32>
    %62 = arith.mulf %61, %61 : vector<256x128xf32>
    %cst_44 = arith.constant dense<0.000000e+00> : vector<128xf32>
    %63 = vector.multi_reduction <add>, %62, %cst_44 [0] : vector<256x128xf32> to vector<128xf32>
    %64 = vector.shape_cast %63 : vector<128xf32> to vector<1x128xf32>
    %65 = arith.addf %59, %64 : vector<1x128xf32>
    %66 = vector.broadcast %46 : vector<1x128xf32> to vector<256x128xf32>
    %67 = arith.subf %41, %66 : vector<256x128xf32>
    %68 = arith.mulf %67, %67 : vector<256x128xf32>
    %cst_45 = arith.constant dense<0.000000e+00> : vector<128xf32>
    %69 = vector.multi_reduction <add>, %68, %cst_45 [0] : vector<256x128xf32> to vector<128xf32>
    %70 = vector.shape_cast %69 : vector<128xf32> to vector<1x128xf32>
    %71 = arith.addf %65, %70 : vector<1x128xf32>
    %cst_46 = arith.constant 1.024000e+03 : f32
    %72 = vector.broadcast %cst_46 : f32 to vector<1x128xf32>
    %73 = arith.divf %71, %72 : vector<1x128xf32>
    %cst_47 = arith.constant 9.99999974E-6 : f32
    %74 = vector.broadcast %cst_47 : f32 to vector<1x128xf32>
    %75 = arith.addf %73, %74 : vector<1x128xf32>
    %76 = math.rsqrt %75 : vector<1x128xf32>
    %77 = vector.broadcast %46 : vector<1x128xf32> to vector<256x128xf32>
    %78 = arith.subf %8, %77 : vector<256x128xf32>
    %79 = vector.broadcast %76 : vector<1x128xf32> to vector<256x128xf32>
    %80 = arith.mulf %78, %79 : vector<256x128xf32>
    %cst_48 = arith.constant 0.000000e+00 : f32
    %81 = vector.broadcast %cst_48 : f32 to vector<256x128xf32>
    %82 = arith.cmpf ogt, %80, %81 : vector<256x128xf32>
    %cst_49 = arith.constant 2.000000e-01 : f32
    %83 = vector.broadcast %cst_49 : f32 to vector<256x128xf32>
    %84 = arith.mulf %83, %80 : vector<256x128xf32>
    %85 = arith.select %82, %80, %84 : vector<256x128xi1>, vector<256x128xf32>
    %86 = arith.truncf %85 : vector<256x128xf32> to vector<256x128xbf16>
    %c0_50 = arith.constant 0 : index
    %c0_51 = arith.constant 0 : index
    %c0_52 = arith.constant 0 : index
    %c0_53 = arith.constant 0 : index
    %87 = vector.load %arg4[%c0_50, %c0_51, %c0_52, %c0_53] : memref<1x4x256x128xbf16, #tpu.memory_space<vmem>>, vector<1x1x256x128xbf16>
    %88 = vector.shape_cast %87 : vector<1x1x256x128xbf16> to vector<256x128xbf16>
    %89 = vector.shape_cast %86 : vector<256x128xbf16> to vector<1x1x256x128xbf16>
    tpu.vector_store %arg4[%c0_50, %c0_51, %c0_52, %c0_53], %89 {strides = array<i32>} : memref<1x4x256x128xbf16, #tpu.memory_space<vmem>>, vector<1x1x256x128xbf16>,
    %90 = vector.broadcast %46 : vector<1x128xf32> to vector<256x128xf32>
    %91 = arith.subf %19, %90 : vector<256x128xf32>
    %92 = vector.broadcast %76 : vector<1x128xf32> to vector<256x128xf32>
    %93 = arith.mulf %91, %92 : vector<256x128xf32>
    %cst_54 = arith.constant 0.000000e+00 : f32
    %94 = vector.broadcast %cst_54 : f32 to vector<256x128xf32>
    %95 = arith.cmpf ogt, %93, %94 : vector<256x128xf32>
    %cst_55 = arith.constant 2.000000e-01 : f32
    %96 = vector.broadcast %cst_55 : f32 to vector<256x128xf32>
    %97 = arith.mulf %96, %93 : vector<256x128xf32>
    %98 = arith.select %95, %93, %97 : vector<256x128xi1>, vector<256x128xf32>
    %99 = arith.truncf %98 : vector<256x128xf32> to vector<256x128xbf16>
    %c0_56 = arith.constant 0 : index
    %c1_57 = arith.constant 1 : index
    %c0_58 = arith.constant 0 : index
    %c0_59 = arith.constant 0 : index
    %100 = vector.load %arg4[%c0_56, %c1_57, %c0_58, %c0_59] : memref<1x4x256x128xbf16, #tpu.memory_space<vmem>>, vector<1x1x256x128xbf16>
    %101 = vector.shape_cast %100 : vector<1x1x256x128xbf16> to vector<256x128xbf16>
    %102 = vector.shape_cast %99 : vector<256x128xbf16> to vector<1x1x256x128xbf16>
    tpu.vector_store %arg4[%c0_56, %c1_57, %c0_58, %c0_59], %102 {strides = array<i32>} : memref<1x4x256x128xbf16, #tpu.memory_space<vmem>>, vector<1x1x256x128xbf16>,
    %103 = vector.broadcast %46 : vector<1x128xf32> to vector<256x128xf32>
    %104 = arith.subf %30, %103 : vector<256x128xf32>
    %105 = vector.broadcast %76 : vector<1x128xf32> to vector<256x128xf32>
    %106 = arith.mulf %104, %105 : vector<256x128xf32>
    %cst_60 = arith.constant 0.000000e+00 : f32
    %107 = vector.broadcast %cst_60 : f32 to vector<256x128xf32>
    %108 = arith.cmpf ogt, %106, %107 : vector<256x128xf32>
    %cst_61 = arith.constant 2.000000e-01 : f32
    %109 = vector.broadcast %cst_61 : f32 to vector<256x128xf32>
    %110 = arith.mulf %109, %106 : vector<256x128xf32>
    %111 = arith.select %108, %106, %110 : vector<256x128xi1>, vector<256x128xf32>
    %112 = arith.truncf %111 : vector<256x128xf32> to vector<256x128xbf16>
    %c0_62 = arith.constant 0 : index
    %c2_63 = arith.constant 2 : index
    %c0_64 = arith.constant 0 : index
    %c0_65 = arith.constant 0 : index
    %113 = vector.load %arg4[%c0_62, %c2_63, %c0_64, %c0_65] : memref<1x4x256x128xbf16, #tpu.memory_space<vmem>>, vector<1x1x256x128xbf16>
    %114 = vector.shape_cast %113 : vector<1x1x256x128xbf16> to vector<256x128xbf16>
    %115 = vector.shape_cast %112 : vector<256x128xbf16> to vector<1x1x256x128xbf16>
    tpu.vector_store %arg4[%c0_62, %c2_63, %c0_64, %c0_65], %115 {strides = array<i32>} : memref<1x4x256x128xbf16, #tpu.memory_space<vmem>>, vector<1x1x256x128xbf16>,
    %116 = vector.broadcast %46 : vector<1x128xf32> to vector<256x128xf32>
    %117 = arith.subf %41, %116 : vector<256x128xf32>
    %118 = vector.broadcast %76 : vector<1x128xf32> to vector<256x128xf32>
    %119 = arith.mulf %117, %118 : vector<256x128xf32>
    %cst_66 = arith.constant 0.000000e+00 : f32
    %120 = vector.broadcast %cst_66 : f32 to vector<256x128xf32>
    %121 = arith.cmpf ogt, %119, %120 : vector<256x128xf32>
    %cst_67 = arith.constant 2.000000e-01 : f32
    %122 = vector.broadcast %cst_67 : f32 to vector<256x128xf32>
    %123 = arith.mulf %122, %119 : vector<256x128xf32>
    %124 = arith.select %121, %119, %123 : vector<256x128xi1>, vector<256x128xf32>
    %125 = arith.truncf %124 : vector<256x128xf32> to vector<256x128xbf16>
    %c0_68 = arith.constant 0 : index
    %c3_69 = arith.constant 3 : index
    %c0_70 = arith.constant 0 : index
    %c0_71 = arith.constant 0 : index
    %126 = vector.load %arg4[%c0_68, %c3_69, %c0_70, %c0_71] : memref<1x4x256x128xbf16, #tpu.memory_space<vmem>>, vector<1x1x256x128xbf16>
    %127 = vector.shape_cast %126 : vector<1x1x256x128xbf16> to vector<256x128xbf16>
    %128 = vector.shape_cast %125 : vector<256x128xbf16> to vector<1x1x256x128xbf16>
    tpu.vector_store %arg4[%c0_68, %c3_69, %c0_70, %c0_71], %128 {strides = array<i32>} : memref<1x4x256x128xbf16, #tpu.memory_space<vmem>>, vector<1x1x256x128xbf16>,
    return
  }
  func.func @transform_0(%arg0: i32) -> (i32, i32, i32, i32) {
    %c0_i32 = arith.constant 0 : i32
    %c0_i32_0 = arith.constant 0 : i32
    %c0_i32_1 = arith.constant 0 : i32
    %c0_i32_2 = arith.constant 0 : i32
    return %arg0, %c0_i32, %c0_i32_0, %c0_i32_1 : i32, i32, i32, i32
  }
  func.func @transform_1(%arg0: i32) -> (i32, i32, i32) {
    %c0_i32 = arith.constant 0 : i32
    %c0_i32_0 = arith.constant 0 : i32
    %c0_i32_1 = arith.constant 0 : i32
    %c0_i32_2 = arith.constant 0 : i32
    return %c0_i32, %c0_i32_0, %c0_i32_1 : i32, i32, i32
  }
  func.func @transform_2(%arg0: i32) -> (i32, i32) {
    %c0_i32 = arith.constant 0 : i32
    %c0_i32_0 = arith.constant 0 : i32
    %c0_i32_1 = arith.constant 0 : i32
    return %c0_i32, %c0_i32_0 : i32, i32
  }
  func.func @transform_3(%arg0: i32) -> (i32, i32, i32, i32) {
    %c0_i32 = arith.constant 0 : i32
    %c0_i32_0 = arith.constant 0 : i32
    %c0_i32_1 = arith.constant 0 : i32
    %c0_i32_2 = arith.constant 0 : i32
    return %arg0, %c0_i32, %c0_i32_0, %c0_i32_1 : i32, i32, i32, i32
  }
}

module attributes {stable_mosaic.version = 11 : i64} {
  func.func @_conv_matmul_kernel(%arg0: i32, %arg1: memref<1x1444x128xbf16, #tpu.memory_space<vmem>>, %arg2: memref<128x128xbf16, #tpu.memory_space<vmem>>, %arg3: memref<1x128xf32, #tpu.memory_space<vmem>>, %arg4: memref<1x1444x128xbf16, #tpu.memory_space<vmem>>) attributes {dimension_semantics = [#tpu.dimension_semantics<parallel>], iteration_bounds = array<i64: 2>, scalar_prefetch = 0 : i64, scratch_operands = 0 : i64, tpu.core_type = #tpu.core_type<tc>, window_params = [{transform_indices = @transform_0, window_bounds = array<i64: 1, 1444, 128>}, {pipeline_mode = #tpu.pipeline_mode<synchronous>, transform_indices = @transform_1, window_bounds = array<i64: 128, 128>}, {pipeline_mode = #tpu.pipeline_mode<synchronous>, transform_indices = @transform_2, window_bounds = array<i64: 1, 128>}, {transform_indices = @transform_3, window_bounds = array<i64: 1, 1444, 128>}]} {
    %c0 = arith.constant 0 : index
    %c0_0 = arith.constant 0 : index
    %c0_1 = arith.constant 0 : index
    %0 = vector.load %arg1[%c0, %c0_0, %c0_1] : memref<1x1444x128xbf16, #tpu.memory_space<vmem>>, vector<1x1444x128xbf16>
    %1 = vector.shape_cast %0 : vector<1x1444x128xbf16> to vector<1444x128xbf16>
    %c0_2 = arith.constant 0 : index
    %c0_3 = arith.constant 0 : index
    %2 = vector.load %arg2[%c0_2, %c0_3] : memref<128x128xbf16, #tpu.memory_space<vmem>>, vector<128x128xbf16>
    %cst = arith.constant dense<0.000000e+00> : vector<1444x128xf32>
    %3 = tpu.matmul %1, %2, %cst {dimension_numbers = #tpu.dot_dimension_numbers<[1], [0], [0], [1], [0, 0, 1, 1], [], []>} : vector<1444x128xbf16>, vector<128x128xbf16>, vector<1444x128xf32> -> vector<1444x128xf32>
    %c0_4 = arith.constant 0 : index
    %c0_5 = arith.constant 0 : index
    %4 = vector.load %arg3[%c0_4, %c0_5] : memref<1x128xf32, #tpu.memory_space<vmem>>, vector<1x128xf32>
    %5 = vector.broadcast %4 : vector<1x128xf32> to vector<1444x128xf32>
    %6 = arith.addf %3, %5 : vector<1444x128xf32>
    %7 = arith.truncf %6 : vector<1444x128xf32> to vector<1444x128xbf16>
    %c0_6 = arith.constant 0 : index
    %c0_7 = arith.constant 0 : index
    %c0_8 = arith.constant 0 : index
    %8 = vector.load %arg4[%c0_6, %c0_7, %c0_8] : memref<1x1444x128xbf16, #tpu.memory_space<vmem>>, vector<1x1444x128xbf16>
    %9 = vector.shape_cast %8 : vector<1x1444x128xbf16> to vector<1444x128xbf16>
    %10 = vector.shape_cast %7 : vector<1444x128xbf16> to vector<1x1444x128xbf16>
    tpu.vector_store %arg4[%c0_6, %c0_7, %c0_8], %10 {strides = array<i32>} : memref<1x1444x128xbf16, #tpu.memory_space<vmem>>, vector<1x1444x128xbf16>,
    return
  }
  func.func @transform_0(%arg0: i32) -> (i32, i32, i32) {
    %c0_i32 = arith.constant 0 : i32
    %c0_i32_0 = arith.constant 0 : i32
    %c0_i32_1 = arith.constant 0 : i32
    return %arg0, %c0_i32, %c0_i32_0 : i32, i32, i32
  }
  func.func @transform_1(%arg0: i32) -> (i32, i32) {
    %c0_i32 = arith.constant 0 : i32
    %c0_i32_0 = arith.constant 0 : i32
    %c0_i32_1 = arith.constant 0 : i32
    return %c0_i32, %c0_i32_0 : i32, i32
  }
  func.func @transform_2(%arg0: i32) -> (i32, i32) {
    %c0_i32 = arith.constant 0 : i32
    %c0_i32_0 = arith.constant 0 : i32
    %c0_i32_1 = arith.constant 0 : i32
    return %c0_i32, %c0_i32_0 : i32, i32
  }
  func.func @transform_3(%arg0: i32) -> (i32, i32, i32) {
    %c0_i32 = arith.constant 0 : i32
    %c0_i32_0 = arith.constant 0 : i32
    %c0_i32_1 = arith.constant 0 : i32
    return %arg0, %c0_i32, %c0_i32_0 : i32, i32, i32
  }
}

module attributes {stable_mosaic.version = 11 : i64} {
  func.func @_conv_matmul_kernel(%arg0: i32, %arg1: memref<1x1024x256xbf16, #tpu.memory_space<vmem>>, %arg2: memref<256x128xbf16, #tpu.memory_space<vmem>>, %arg3: memref<1x128xf32, #tpu.memory_space<vmem>>, %arg4: memref<1x1024x128xf32, #tpu.memory_space<vmem>>) attributes {dimension_semantics = [#tpu.dimension_semantics<parallel>], iteration_bounds = array<i64: 2>, scalar_prefetch = 0 : i64, scratch_operands = 0 : i64, tpu.core_type = #tpu.core_type<tc>, window_params = [{transform_indices = @transform_0, window_bounds = array<i64: 1, 1024, 256>}, {pipeline_mode = #tpu.pipeline_mode<synchronous>, transform_indices = @transform_1, window_bounds = array<i64: 256, 128>}, {pipeline_mode = #tpu.pipeline_mode<synchronous>, transform_indices = @transform_2, window_bounds = array<i64: 1, 128>}, {transform_indices = @transform_3, window_bounds = array<i64: 1, 1024, 128>}]} {
    %c0 = arith.constant 0 : index
    %c0_0 = arith.constant 0 : index
    %c0_1 = arith.constant 0 : index
    %0 = vector.load %arg1[%c0, %c0_0, %c0_1] : memref<1x1024x256xbf16, #tpu.memory_space<vmem>>, vector<1x1024x256xbf16>
    %1 = vector.shape_cast %0 : vector<1x1024x256xbf16> to vector<1024x256xbf16>
    %c0_2 = arith.constant 0 : index
    %c0_3 = arith.constant 0 : index
    %2 = vector.load %arg2[%c0_2, %c0_3] : memref<256x128xbf16, #tpu.memory_space<vmem>>, vector<256x128xbf16>
    %cst = arith.constant dense<0.000000e+00> : vector<1024x128xf32>
    %3 = tpu.matmul %1, %2, %cst {dimension_numbers = #tpu.dot_dimension_numbers<[1], [0], [0], [1], [0, 0, 1, 1], [], []>} : vector<1024x256xbf16>, vector<256x128xbf16>, vector<1024x128xf32> -> vector<1024x128xf32>
    %c0_4 = arith.constant 0 : index
    %c0_5 = arith.constant 0 : index
    %4 = vector.load %arg3[%c0_4, %c0_5] : memref<1x128xf32, #tpu.memory_space<vmem>>, vector<1x128xf32>
    %5 = vector.broadcast %4 : vector<1x128xf32> to vector<1024x128xf32>
    %6 = arith.addf %3, %5 : vector<1024x128xf32>
    %c0_6 = arith.constant 0 : index
    %c0_7 = arith.constant 0 : index
    %c0_8 = arith.constant 0 : index
    %7 = vector.load %arg4[%c0_6, %c0_7, %c0_8] : memref<1x1024x128xf32, #tpu.memory_space<vmem>>, vector<1x1024x128xf32>
    %8 = vector.shape_cast %7 : vector<1x1024x128xf32> to vector<1024x128xf32>
    %9 = vector.shape_cast %6 : vector<1024x128xf32> to vector<1x1024x128xf32>
    tpu.vector_store %arg4[%c0_6, %c0_7, %c0_8], %9 {strides = array<i32>} : memref<1x1024x128xf32, #tpu.memory_space<vmem>>, vector<1x1024x128xf32>,
    return
  }
  func.func @transform_0(%arg0: i32) -> (i32, i32, i32) {
    %c0_i32 = arith.constant 0 : i32
    %c0_i32_0 = arith.constant 0 : i32
    %c0_i32_1 = arith.constant 0 : i32
    return %arg0, %c0_i32, %c0_i32_0 : i32, i32, i32
  }
  func.func @transform_1(%arg0: i32) -> (i32, i32) {
    %c0_i32 = arith.constant 0 : i32
    %c0_i32_0 = arith.constant 0 : i32
    %c0_i32_1 = arith.constant 0 : i32
    return %c0_i32, %c0_i32_0 : i32, i32
  }
  func.func @transform_2(%arg0: i32) -> (i32, i32) {
    %c0_i32 = arith.constant 0 : i32
    %c0_i32_0 = arith.constant 0 : i32
    %c0_i32_1 = arith.constant 0 : i32
    return %c0_i32, %c0_i32_0 : i32, i32
  }
  func.func @transform_3(%arg0: i32) -> (i32, i32, i32) {
    %c0_i32 = arith.constant 0 : i32
    %c0_i32_0 = arith.constant 0 : i32
    %c0_i32_1 = arith.constant 0 : i32
    return %arg0, %c0_i32, %c0_i32_0 : i32, i32, i32
  }
}

</mosaic_0001>

<bundles_post_ra>
// kernel: decoder_forward.5
= control target key start
LH: loop header
LB: loop body
LE: loop exit
PB: predicated region body
PF: predicated region fallthrough
CT: control target
= control target key end

     0   :  { %s1195_s12 = smov 0   ;;  %s1364_s0 = inlined_call_operand.vmem [shape: bf16[2,4,16,128], index: 0, kind: input, shape index: {}]   ;;  %s1365_s1 = inlined_call_operand.vmem [shape: bf16[4,128,128], index: 1, kind: input, shape index: {}]   ;;  %s1366_s2 = inlined_call_operand.vmem [shape: f32[1,128], index: 2, kind: input, shape index: {}]   ;;  %s1367_s3 = inlined_call_operand.vmem [shape: bf16[2,4,16,128], index: 3, kind: output, shape index: {}]  }
   0x1 LB: > { %s852_s13 = sadd.s32 4294967295, %s1171_s12   ;;  %p856_p0 = scmp.ge.s32.totalorder %s1171_s12, 1  ;;  %s1171_s12 = sphi %s1195_s12, %s13_s12  }
   0x2   : > { %p137_p1 = scmp.lt.s32.totalorder %s1171_s12, 3 }
   0x4   : > { %p138_p2 = pnand %p856_p0, %p137_p1 }
   0x5   : > { %p161_p3 = scmp.lt.s32.totalorder (!%p138_p2), %s852_s13, 1 }
   0x6   : > { %141 = sbr.rel (%p138_p2) target bundleno = 350 (0x15e), region = 32 }
   0xb   : > { %v1127_v0 = vld [vmem:[%s1365_s1 + $0x38] sm:$0xff]   ;;  %v1173_v1 = vmov 0.0   ;;  %v1129_v3 = vld [vmem:[%s1365_s1 + $0x30] sm:$0xff]   ;;  %vm1174_vm0 = vmmov 0   ;;  %v1131_v5 = vld [vmem:[%s1365_s1 + $0x28] sm:$0xff]   ;;  %s1369_s13 = smov (!%p161_p3, %s852_s13), 1 }
   0xc   : > { %1037 = vmatprep.subr.bf16.mxu0 %v1173_v1  ;;  %1057 = vmatprep.subr.bf16.mxu1 %v1173_v1  ;;  %v1128_v2 = vld [vmem:[%s1365_s1 + $0x78] sm:$0xff]   ;;  %v1130_v4 = vld [vmem:[%s1365_s1 + $0x70] sm:$0xff]   ;;  %v1132_v6 = vld [vmem:[%s1365_s1 + $0x68] sm:$0xff]   ;;  %s968_s30 = sshll.u32 %s1369_s13, 5 }
   0xd   : > { %1038 = vmatpush3.bf16.msra.mxu0 %v1127_v0  ;;  %1053 = vmatprep.mubr.msk.bf16.mxu0 %vm1174_vm0, %v1173_v1  ;;  %v1133_v7 = vld [vmem:[%s1365_s1 + $0x20] sm:$0xff]   ;;  %v1135_v9 = vld [vmem:[%s1365_s1 + $0x18] sm:$0xff]   ;;  %s1254_s10 = scalar_lea.vmem %s1364_s0, %s968_s30  ;;  %v1137_v11 = vld [vmem:[%s1365_s1 + $0x10] sm:$0xff]   ;;  %s170_s14 = scalar_lea.vmem %s1367_s3, %s968_s30 }
   0xe   : > { %1058 = vmatpush3.bf16.msra.mxu1 %v1128_v2  ;;  %1039 = vmatprep.subr.bf16.mxu0 %v1173_v1  ;;  %v1134_v8 = vld [vmem:[%s1365_s1 + $0x60] sm:$0xff]   ;;  %v1136_v10 = vld [vmem:[%s1365_s1 + $0x58] sm:$0xff]   ;;  %v1138_v12 = vld [vmem:[%s1365_s1 + $0x50] sm:$0xff]  }
   0xf   : > { %1059 = vmatprep.subr.bf16.mxu1 %v1173_v1  ;;  %1073 = vmatprep.mubr.msk.bf16.mxu1 %vm1174_vm0, %v1173_v1  ;;  %v1139_v13 = vld [vmem:[%s1365_s1 + $0x8] sm:$0xff]   ;;  %v1141_v15 = vld [vmem:[%s1365_s1] sm:$0xff]   ;;  %v1145_v19 = vld [vmem:[%s1365_s1 + $0xb8] sm:$0xff]  }
  0x10   : > { %v1140_v14 = vld [vmem:[%s1365_s1 + $0x48] sm:$0xff]   ;;  %v1142_v16 = vld [vmem:[%s1365_s1 + $0x40] sm:$0xff]   ;;  %v1146_v20 = vld [vmem:[%s1365_s1 + $0xf8] sm:$0xff]  }
  0x11   : > { %1040 = vmatpush3.bf16.msra.mxu0 %v1129_v3  ;;  %v1143_v17 = vld [vmem:[%s1254_s10] sm:$0xff]   ;;  %v1144_v18 = vld [vmem:[%s1254_s10 + $0x8] sm:$0xff]   ;;  %v1147_v21 = vld [vmem:[%s1365_s1 + $0xb0] sm:$0xff]  }
  0x12   : > { %1060 = vmatpush3.bf16.msra.mxu1 %v1130_v4  ;;  %1041 = vmatprep.subr.bf16.mxu0 %v1173_v1  ;;  %v1148_v22 = vld [vmem:[%s1365_s1 + $0xf0] sm:$0xff]   ;;  %v1149_v23 = vld [vmem:[%s1365_s1 + $0xa8] sm:$0xff]   ;;  %v1151_v25 = vld [vmem:[%s1365_s1 + $0xa0] sm:$0xff]  }
  0x13   : > { %1061 = vmatprep.subr.bf16.mxu1 %v1173_v1  ;;  %v1150_v24 = vld [vmem:[%s1365_s1 + $0xe8] sm:$0xff]   ;;  %v1152_v26 = vld [vmem:[%s1365_s1 + $0xe0] sm:$0xff]   ;;  %v1153_v27 = vld [vmem:[%s1365_s1 + $0x98] sm:$0xff]  }
  0x14   : > { %v1154_v28 = vld [vmem:[%s1365_s1 + $0xd8] sm:$0xff]   ;;  %v1155_v29 = vld [vmem:[%s1365_s1 + $0x90] sm:$0xff]   ;;  %v1157_v31 = vld [vmem:[%s1365_s1 + $0x88] sm:$0xff]  }
  0x15   : > { %1042 = vmatpush3.bf16.msra.mxu0 %v1131_v5  ;;  %v1156_v30 = vld [vmem:[%s1365_s1 + $0xd0] sm:$0xff]   ;;  %v1158_v32 = vld [vmem:[%s1365_s1 + $0xc8] sm:$0xff]   ;;  %v1159_v33 = vld [vmem:[%s1365_s1 + $0x80] sm:$0xff]  }
  0x16   : > { %1062 = vmatpush3.bf16.msra.mxu1 %v1132_v6  ;;  %1043 = vmatprep.subr.bf16.mxu0 %v1173_v1  ;;  %v1160_v34 = vld [vmem:[%s1365_s1 + $0xc0] sm:$0xff]   ;;  %v1161_v35 = vld [vmem:[%s1254_s10 + $0x10] sm:$0xff]   ;;  %v1162_v36 = vld [vmem:[%s1254_s10 + $0x18] sm:$0xff]  }
  0x17   : > { %1063 = vmatprep.subr.bf16.mxu1 %v1173_v1  ;;  %v861_v45 = vld [vmem:[%s1366_s2] ss:$0 sm:$0xff] }
  0x19   : > { %1044 = vmatpush3.bf16.msra.mxu0 %v1133_v7 }
  0x1a   : > { %1064 = vmatpush3.bf16.msra.mxu1 %v1134_v8  ;;  %1045 = vmatprep.subr.bf16.mxu0 %v1173_v1 }
  0x1b   : > { %1065 = vmatprep.subr.bf16.mxu1 %v1173_v1 }
  0x1d   : > { %1046 = vmatpush3.bf16.msra.mxu0 %v1135_v9 }
  0x1e   : > { %1066 = vmatpush3.bf16.msra.mxu1 %v1136_v10  ;;  %1047 = vmatprep.subr.bf16.mxu0 %v1173_v1 }
  0x1f   : > { %1067 = vmatprep.subr.bf16.mxu1 %v1173_v1 }
  0x21   : > { %1048 = vmatpush3.bf16.msra.mxu0 %v1137_v11 }
  0x22   : > { %1068 = vmatpush3.bf16.msra.mxu1 %v1138_v12  ;;  %1049 = vmatprep.subr.bf16.mxu0 %v1173_v1 }
  0x23   : > { %1069 = vmatprep.subr.bf16.mxu1 %v1173_v1 }
  0x25   : > { %1050 = vmatpush3.bf16.msra.mxu0 %v1139_v13 }
  0x26   : > { %1070 = vmatpush3.bf16.msra.mxu1 %v1140_v14  ;;  %1051 = vmatprep.subr.bf16.mxu0 %v1173_v1 }
  0x27   : > { %1071 = vmatprep.subr.bf16.mxu1 %v1173_v1 }
  0x29   : > { %1052 = vmatpush3.bf16.msra.mxu0 %v1141_v15 }
  0x2a   : > { %1072 = vmatpush3.bf16.msra.mxu1 %v1142_v16  ;;  %1077 = vmatprep.subr.bf16.mxu0 %v1173_v1 }
  0x2b   : > { %1097 = vmatprep.subr.bf16.mxu1 %v1173_v1 }
  0x2c   : > { %1054 = vmatmul.mubr.bf16.vlgmr.msra.gmra.mxu0 %v1143_v17 }
  0x2d   : > { %1074 = vmatmul.mubr.bf16.vlgmr.msra.gmra.mxu1 %v1144_v18  ;;  %1078 = vmatpush3.bf16.msra.mxu0 %v1145_v19 }
  0x2e   : > { %1098 = vmatpush3.bf16.msra.mxu1 %v1146_v20  ;;  %1079 = vmatprep.subr.bf16.mxu0 %v1173_v1 }
  0x2f   : > { %1099 = vmatprep.subr.bf16.mxu1 %v1173_v1  ;;  %1093 = vmatprep.mubr.msk.bf16.mxu0 %vm1174_vm0, %v1173_v1 }
  0x30   : > { %1113 = vmatprep.mubr.msk.bf16.mxu1 %vm1174_vm0, %v1173_v1 }
  0x31   : > { %1080 = vmatpush3.bf16.msra.mxu0 %v1147_v21 }
  0x32   : > { %1100 = vmatpush3.bf16.msra.mxu1 %v1148_v22  ;;  %1081 = vmatprep.subr.bf16.mxu0 %v1173_v1 }
  0x33   : > { %1101 = vmatprep.subr.bf16.mxu1 %v1173_v1 }
  0x35   : > { %1082 = vmatpush3.bf16.msra.mxu0 %v1149_v23 }
  0x36   : > { %1102 = vmatpush3.bf16.msra.mxu1 %v1150_v24  ;;  %1083 = vmatprep.subr.bf16.mxu0 %v1173_v1 }
  0x37   : > { %1103 = vmatprep.subr.bf16.mxu1 %v1173_v1 }
  0x39   : > { %1084 = vmatpush3.bf16.msra.mxu0 %v1151_v25 }
  0x3a   : > { %1104 = vmatpush3.bf16.msra.mxu1 %v1152_v26  ;;  %1085 = vmatprep.subr.bf16.mxu0 %v1173_v1 }
  0x3b   : > { %1105 = vmatprep.subr.bf16.mxu1 %v1173_v1 }
  0x3d   : > { %1086 = vmatpush3.bf16.msra.mxu0 %v1153_v27 }
  0x3e   : > { %1106 = vmatpush3.bf16.msra.mxu1 %v1154_v28  ;;  %1087 = vmatprep.subr.bf16.mxu0 %v1173_v1 }
  0x3f   : > { %1107 = vmatprep.subr.bf16.mxu1 %v1173_v1 }
  0x41   : > { %1088 = vmatpush3.bf16.msra.mxu0 %v1155_v29 }
  0x42   : > { %1108 = vmatpush3.bf16.msra.mxu1 %v1156_v30  ;;  %1089 = vmatprep.subr.bf16.mxu0 %v1173_v1 }
  0x43   : > { %1109 = vmatprep.subr.bf16.mxu1 %v1173_v1 }
  0x45   : > { %1090 = vmatpush3.bf16.msra.mxu0 %v1157_v31 }
  0x46   : > { %1110 = vmatpush3.bf16.msra.mxu1 %v1158_v32  ;;  %1091 = vmatprep.subr.bf16.mxu0 %v1173_v1 }
  0x47   : > { %1111 = vmatprep.subr.bf16.mxu1 %v1173_v1 }
  0x49   : > { %1092 = vmatpush3.bf16.msra.mxu0 %v1159_v33 }
  0x4a   : > { %1112 = vmatpush3.bf16.msra.mxu1 %v1160_v34 }
  0x4c   : > { %1094 = vmatmul.mubr.bf16.vlgmr.msra.gmra.mxu0 %v1161_v35 }
  0x4d   : > { %1114 = vmatmul.mubr.bf16.vlgmr.msra.gmra.mxu1 %v1162_v36 }
  0xec   : > { %v285_v37 = vpop.f32.mrf.mxu0 }
  0xed   : > { %v408_v38 = vpop.f32.mrf.mxu1  ;;  %v286_v49 = vadd.f32 %v861_v45, %v285_v37 }
  0xee   : > { %v1055_v39 = vpop.f32.mrf.mxu0  ;;  %v409_v46 = vadd.f32 %v861_v45, %v408_v38 }
  0xef   : > { %v1075_v40 = vpop.f32.mrf.mxu1 }
  0xf0   : > { %v288_v41 = vpop.f32.mrf.mxu0 }
  0xf1   : > { %v411_v42 = vpop.f32.mrf.mxu1  ;;  %v289_v47 = vadd.f32 %v861_v45, %v288_v41 }
  0xf2   : > { %v1056_v43 = vpop.f32.mrf.mxu0  ;;  %v412_v48 = vadd.f32 %v861_v45, %v411_v42 }
  0xf3   : > { %v1076_v44 = vpop.f32.mrf.mxu1  ;;  %v292_v50 = vadd.f32 %v289_v47, %v286_v49 }
  0xf4   : > { %v415_v51 = vadd.f32 %v412_v48, %v409_v46 }
  0xf5   : > { %v293_v52 = vrot.slane %v292_v50, 4 }
  0xf6   : > { %v416_v53 = vrot.slane %v415_v51, 4 }
  0xf7   : > { %v294_v54 = vadd.f32 %v293_v52, %v292_v50 }
  0xf8   : > { %v417_v55 = vadd.f32 %v416_v53, %v415_v51 }
  0xf9   : > { %v295_v59 = vrot.slane %v294_v54, 2 }
  0xfa   : > { %v418_v60 = vrot.slane %v417_v55, 2 }
  0xfb   : > { %v296_v5 = vadd.f32 %v295_v59, %v294_v54 }
  0xfc   : > { %v419_v6 = vadd.f32 %v418_v60, %v417_v55 }
  0xfd   : > { %v297_v12 = vrot.slane %v296_v5, 1 }
  0xfe   : > { %v420_v13 = vrot.slane %v419_v6, 1 }
  0xff   : > { %v298_v18 = vadd.f32 %v297_v12, %v296_v5 }
 0x100   : > { %v421_v19 = vadd.f32 %v420_v13, %v419_v6 }
 0x102   : > { %v422_v24 = vadd.f32 %v421_v19, %v298_v18 }
 0x10c   : > { %v531_v56 = vpop.f32.mrf.mxu0 }
 0x10d   : > { %v654_v57 = vpop.f32.mrf.mxu1  ;;  %v532_v63 = vadd.f32 %v861_v45, %v531_v56 }
 0x10e   : > { %v1095_v58 = vpop.f32.mrf.mxu0  ;;  %v655_v2 = vadd.f32 %v861_v45, %v654_v57 }
 0x10f   : > { %v1115_v61 = vpop.f32.mrf.mxu1 }
 0x110   : > { %v534_v62 = vpop.f32.mrf.mxu0 }
 0x111   : > { %v535_v0 = vadd.f32 %v861_v45, %v534_v62  ;;  %v657_v1 = vpop.f32.mrf.mxu1 }
 0x112   : > { %v658_v3 = vadd.f32 %v861_v45, %v657_v1  ;;  %v1096_v4 = vpop.f32.mrf.mxu0 }
 0x113   : > { %v538_v7 = vadd.f32 %v535_v0, %v532_v63  ;;  %v1116_v8 = vpop.f32.mrf.mxu1 }
 0x114   : > { %v661_v9 = vadd.f32 %v658_v3, %v655_v2 }
 0x115   : > { %v539_v10 = vrot.slane %v538_v7, 4 }
 0x116   : > { %v662_v11 = vrot.slane %v661_v9, 4 }
 0x117   : > { %v540_v14 = vadd.f32 %v539_v10, %v538_v7 }
 0x118   : > { %v663_v15 = vadd.f32 %v662_v11, %v661_v9 }
 0x119   : > { %v541_v16 = vrot.slane %v540_v14, 2 }
 0x11a   : > { %v664_v17 = vrot.slane %v663_v15, 2 }
 0x11b   : > { %v542_v20 = vadd.f32 %v541_v16, %v540_v14 }
 0x11c   : > { %v665_v21 = vadd.f32 %v664_v17, %v663_v15 }
 0x11d   : > { %v543_v22 = vrot.slane %v542_v20, 1 }
 0x11e   : > { %v666_v23 = vrot.slane %v665_v21, 1 }
 0x11f   : > { %v544_v25 = vadd.f32 %v543_v22, %v542_v20 }
 0x120   : > { %v667_v27 = vadd.f32 %v666_v23, %v665_v21 }
 0x121   : > { %v545_v26 = vadd.f32 %v544_v25, %v422_v24 }
 0x123   : > { %v668_v28 = vadd.f32 %v667_v27, %v545_v26 }
 0x125   : > { %v670_v29 = vmul.f32 0.015625, %v668_v28 }
 0x127   : > { %v671_v30 = vsub.f32 %v286_v49, %v670_v29  ;;  %v672_v31 = vsub.f32 %v289_v47, %v670_v29  ;;  %v683_v32 = vsub.f32 %v409_v46, %v670_v29  ;;  %v684_v33 = vsub.f32 %v412_v48, %v670_v29 }
 0x128   : > { %v695_v34 = vsub.f32 %v532_v63, %v670_v29  ;;  %v696_v35 = vsub.f32 %v535_v0, %v670_v29  ;;  %v707_v36 = vsub.f32 %v655_v2, %v670_v29  ;;  %v708_v37 = vsub.f32 %v658_v3, %v670_v29 }
 0x129   : > { %v673_v38 = vmul.f32 %v671_v30, %v671_v30  ;;  %v674_v39 = vmul.f32 %v672_v31, %v672_v31  ;;  %v685_v40 = vmul.f32 %v683_v32, %v683_v32  ;;  %v686_v41 = vmul.f32 %v684_v33, %v684_v33 }
 0x12a   : > { %v697_v42 = vmul.f32 %v695_v34, %v695_v34  ;;  %v698_v43 = vmul.f32 %v696_v35, %v696_v35  ;;  %v709_v44 = vmul.f32 %v707_v36, %v707_v36  ;;  %v710_v45 = vmul.f32 %v708_v37, %v708_v37 }
 0x12b   : > { %v675_v50 = vadd.f32 %v674_v39, %v673_v38  ;;  %v687_v51 = vadd.f32 %v686_v41, %v685_v40 }
 0x12c   : > { %v699_v52 = vadd.f32 %v698_v43, %v697_v42  ;;  %v711_v53 = vadd.f32 %v710_v45, %v709_v44 }
 0x12d   : > { %v676_v49 = vrot.slane %v675_v50, 4  ;;  %v688_v47 = vrot.slane %v687_v51, 4 }
 0x12e   : > { %v700_v46 = vrot.slane %v699_v52, 4  ;;  %v712_v48 = vrot.slane %v711_v53, 4 }
 0x12f   : > { %v677_v54 = vadd.f32 %v676_v49, %v675_v50  ;;  %v689_v55 = vadd.f32 %v688_v47, %v687_v51 }
 0x130   : > { %v701_v56 = vadd.f32 %v700_v46, %v699_v52  ;;  %v713_v57 = vadd.f32 %v712_v48, %v711_v53 }
 0x131   : > { %v678_v58 = vrot.slane %v677_v54, 2  ;;  %v690_v59 = vrot.slane %v689_v55, 2 }
 0x132   : > { %v702_v60 = vrot.slane %v701_v56, 2  ;;  %v714_v61 = vrot.slane %v713_v57, 2 }
 0x133   : > { %v679_v62 = vadd.f32 %v678_v58, %v677_v54  ;;  %v691_v63 = vadd.f32 %v690_v59, %v689_v55 }
 0x134   : > { %v703_v0 = vadd.f32 %v702_v60, %v701_v56  ;;  %v715_v1 = vadd.f32 %v714_v61, %v713_v57 }
 0x135   : > { %v680_v2 = vrot.slane %v679_v62, 1  ;;  %v692_v3 = vrot.slane %v691_v63, 1 }
 0x136   : > { %v704_v4 = vrot.slane %v703_v0, 1  ;;  %v716_v7 = vrot.slane %v715_v1, 1 }
 0x137   : > { %v681_v5 = vadd.f32 %v680_v2, %v679_v62  ;;  %v693_v6 = vadd.f32 %v692_v3, %v691_v63 }
 0x138   : > { %v705_v9 = vadd.f32 %v704_v4, %v703_v0  ;;  %v717_v11 = vadd.f32 %v716_v7, %v715_v1 }
 0x139   : > { %v694_v8 = vadd.f32 %v693_v6, %v681_v5 }
 0x13b   : > { %v706_v10 = vadd.f32 %v705_v9, %v694_v8 }
 0x13d   : > { %v718_v12 = vadd.f32 %v717_v11, %v706_v10 }
 0x13f   : > { %v719_v13 = vmul.f32 0.015625, %v718_v12 }
 0x141   : > { %v720_v14 = vadd.f32 1e-05, %v719_v13 }
 0x143   : > { %1163 = vrsqrt.f32 %v720_v14 }
 0x150   : > { %v1164_v15 = vpop.eup %1163 }
 0x151   : > { %v722_v16 = vmul.f32 %v1164_v15, %v671_v30  ;;  %v723_v17 = vmul.f32 %v1164_v15, %v672_v31  ;;  %v740_v18 = vmul.f32 %v1164_v15, %v683_v32  ;;  %v741_v19 = vmul.f32 %v1164_v15, %v684_v33 }
 0x152   : > { %v759_v20 = vmul.f32 %v1164_v15, %v695_v34  ;;  %v760_v21 = vmul.f32 %v1164_v15, %v696_v35  ;;  %v778_v22 = vmul.f32 %v1164_v15, %v707_v36  ;;  %v779_v23 = vmul.f32 %v1164_v15, %v708_v37 }
 0x153   : > { %vm724_vm1 = vcmp.gt.f32.partialorder %v722_v16, 0.0  ;;  %vm725_vm2 = vcmp.gt.f32.partialorder %v723_v17, 0.0  ;;  %v726_v24 = vmul.f32 0.2, %v722_v16  ;;  %v727_v25 = vmul.f32 0.2, %v723_v17 }
 0x154   : > { %vm742_vm3 = vcmp.gt.f32.partialorder %v740_v18, 0.0  ;;  %vm743_vm4 = vcmp.gt.f32.partialorder %v741_v19, 0.0  ;;  %v744_v26 = vmul.f32 0.2, %v740_v18  ;;  %v745_v27 = vmul.f32 0.2, %v741_v19 }
 0x155   : > { %v728_v28 = vsel %vm724_vm1, %v722_v16, %v726_v24  ;;  %v729_v29 = vsel %vm725_vm2, %v723_v17, %v727_v25  ;;  %vm761_vm5 = vcmp.gt.f32.partialorder %v759_v20, 0.0  ;;  %vm762_vm6 = vcmp.gt.f32.partialorder %v760_v21, 0.0 }
 0x156   : > { %v981_v30 = vpack.c.bf16 %v729_v29, %v728_v28  ;;  %v746_v31 = vsel %vm742_vm3, %v740_v18, %v744_v26  ;;  %v747_v32 = vsel %vm743_vm4, %v741_v19, %v745_v27  ;;  %v763_v33 = vmul.f32 0.2, %v759_v20 }
 0x157   : > { %v986_v34 = vpack.c.bf16 %v747_v32, %v746_v31  ;;  %v764_v35 = vmul.f32 0.2, %v760_v21  ;;  %vm780_vm7 = vcmp.gt.f32.partialorder %v778_v22, 0.0  ;;  %vm781_vm8 = vcmp.gt.f32.partialorder %v779_v23, 0.0 }
 0x158   : > { %982 = vst [vmem:[%s170_s14] sm:$0xff] %v981_v30   ;;  %v765_v36 = vsel %vm761_vm5, %v759_v20, %v763_v33  ;;  %v782_v37 = vmul.f32 0.2, %v778_v22  ;;  %v783_v38 = vmul.f32 0.2, %v779_v23 }
 0x159   : > { %998 = vst [vmem:[%s170_s14 + $0x8] sm:$0xff] %v986_v34   ;;  %v766_v39 = vsel %vm762_vm6, %v760_v21, %v764_v35 }
 0x15a   : > { %v991_v40 = vpack.c.bf16 %v766_v39, %v765_v36  ;;  %v784_v41 = vsel %vm780_vm7, %v778_v22, %v782_v37  ;;  %v785_v42 = vsel %vm781_vm8, %v779_v23, %v783_v38 }
 0x15b   : > { %v996_v43 = vpack.c.bf16 %v785_v42, %v784_v41 }
 0x15c   : > { %999 = vst [vmem:[%s170_s14 + $0x10] sm:$0xff] %v991_v40  }
 0x15d   : > { %1000 = vst [vmem:[%s170_s14 + $0x18] sm:$0xff] %v996_v43  }
 0x15e PF: > { %s13_s12 = sadd.s32 1, %s1171_s12  }
 0x15f   : > { %p10_p4 = scmp.ge.s32.totalorder %s13_s12, 4  }
 0x161   :  { %12 = sbr.rel (!%p10_p4) target bundleno = 1 (0x1), region = 71 }

// kernel: decoder_forward.6
= control target key start
LH: loop header
LB: loop body
LE: loop exit
PB: predicated region body
PF: predicated region fallthrough
CT: control target
= control target key end

     0   :  { %s1903_s12 = smov 0   ;;  %s2484_s0 = inlined_call_operand.vmem [shape: bf16[2,4,64,128], index: 0, kind: input, shape index: {}]   ;;  %s2485_s1 = inlined_call_operand.vmem [shape: bf16[4,128,128], index: 1, kind: input, shape index: {}]   ;;  %s2486_s2 = inlined_call_operand.vmem [shape: f32[1,128], index: 2, kind: input, shape index: {}]   ;;  %s2487_s3 = inlined_call_operand.vmem [shape: bf16[2,4,64,128], index: 3, kind: output, shape index: {}]  }
   0x1 LB: > { %s1356_s13 = sadd.s32 4294967295, %s1881_s12   ;;  %p1360_p0 = scmp.ge.s32.totalorder %s1881_s12, 1  ;;  %s1881_s12 = sphi %s1903_s12, %s13_s12  }
   0x2   : > { %p137_p1 = scmp.lt.s32.totalorder %s1881_s12, 3 }
   0x4   : > { %p138_p2 = pnand %p1360_p0, %p137_p1 }
   0x5   : > { %p161_p3 = scmp.lt.s32.totalorder (!%p138_p2), %s1356_s13, 1 }
   0x6   : > { %141 = sbr.rel (%p138_p2) target bundleno = 411 (0x19b), region = 32 }
   0xb   : > { %v1825_v0 = vld [vmem:[%s2485_s1 + $0x38] sm:$0xff]   ;;  %v1827_v2 = vld [vmem:[%s2485_s1 + $0x30] sm:$0xff]   ;;  %v1829_v4 = vld [vmem:[%s2485_s1 + $0x28] sm:$0xff]   ;;  %s2489_s13 = smov (!%p161_p3, %s1356_s13), 1 }
   0xc   : > { %v1826_v1 = vld [vmem:[%s2485_s1 + $0x78] sm:$0xff]   ;;  %1721 = vmatprep.subr.bf16.mxu0 %v1825_v0  ;;  %v1828_v3 = vld [vmem:[%s2485_s1 + $0x70] sm:$0xff]   ;;  %v1830_v5 = vld [vmem:[%s2485_s1 + $0x68] sm:$0xff]   ;;  %s1544_s30 = sshll.u32 %s2489_s13, 7 }
   0xd   : > { %1745 = vmatprep.subr.bf16.mxu1 %v1826_v1  ;;  %1722 = vmatpush3.bf16.msra.mxu0 %v1825_v0  ;;  %v1831_v6 = vld [vmem:[%s2485_s1 + $0x20] sm:$0xff]   ;;  %v1833_v8 = vld [vmem:[%s2485_s1 + $0x18] sm:$0xff]   ;;  %s1949_s10 = scalar_lea.vmem %s2484_s0, %s1544_s30  ;;  %v1835_v10 = vld [vmem:[%s2485_s1 + $0x10] sm:$0xff]   ;;  %s2389_s14 = scalar_lea.vmem %s2487_s3, %s1544_s30 }
   0xe   : > { %1746 = vmatpush3.bf16.msra.mxu1 %v1826_v1  ;;  %1723 = vmatprep.subr.bf16.mxu0 %v1827_v2  ;;  %v1832_v7 = vld [vmem:[%s2485_s1 + $0x60] sm:$0xff]   ;;  %v1834_v9 = vld [vmem:[%s2485_s1 + $0x58] sm:$0xff]   ;;  %v1836_v11 = vld [vmem:[%s2485_s1 + $0x50] sm:$0xff]  }
   0xf   : > { %1747 = vmatprep.subr.bf16.mxu1 %v1828_v3  ;;  %v1841_v12 = vld [vmem:[%s1949_s10] sm:$0xff]   ;;  %v1837_v14 = vld [vmem:[%s2485_s1 + $0x8] sm:$0xff]   ;;  %v1845_v19 = vld [vmem:[%s2485_s1 + $0xb8] sm:$0xff]  }
  0x10   : > { %v1842_v13 = vld [vmem:[%s1949_s10 + $0x20] sm:$0xff]   ;;  %1737 = vmatprep.mubr.bf16.mxu0 %v1841_v12  ;;  %v1838_v15 = vld [vmem:[%s2485_s1 + $0x48] sm:$0xff]   ;;  %v1846_v20 = vld [vmem:[%s2485_s1 + $0xf8] sm:$0xff]  }
  0x11   : > { %1724 = vmatpush3.bf16.msra.mxu0 %v1827_v2  ;;  %1761 = vmatprep.mubr.bf16.mxu1 %v1842_v13  ;;  %v1839_v16 = vld [vmem:[%s2485_s1] sm:$0xff]   ;;  %v1843_v18 = vld [vmem:[%s1949_s10 + $0x8] sm:$0xff]   ;;  %v1847_v22 = vld [vmem:[%s2485_s1 + $0xb0] sm:$0xff]  }
  0x12   : > { %1748 = vmatpush3.bf16.msra.mxu1 %v1828_v3  ;;  %1725 = vmatprep.subr.bf16.mxu0 %v1829_v4  ;;  %v1840_v17 = vld [vmem:[%s2485_s1 + $0x40] sm:$0xff]   ;;  %v1844_v21 = vld [vmem:[%s1949_s10 + $0x28] sm:$0xff]   ;;  %v1848_v23 = vld [vmem:[%s2485_s1 + $0xf0] sm:$0xff]  }
  0x13   : > { %1749 = vmatprep.subr.bf16.mxu1 %v1830_v5  ;;  %v1849_v24 = vld [vmem:[%s1949_s10 + $0x10] sm:$0xff]   ;;  %v1851_v26 = vld [vmem:[%s1949_s10 + $0x18] sm:$0xff]   ;;  %v1853_v27 = vld [vmem:[%s2485_s1 + $0xa8] sm:$0xff]  }
  0x14   : > { %v1850_v25 = vld [vmem:[%s1949_s10 + $0x30] sm:$0xff]   ;;  %v1854_v28 = vld [vmem:[%s2485_s1 + $0xe8] sm:$0xff]   ;;  %v1852_v29 = vld [vmem:[%s1949_s10 + $0x38] sm:$0xff]  }
  0x15   : > { %1726 = vmatpush3.bf16.msra.mxu0 %v1829_v4  ;;  %v1855_v30 = vld [vmem:[%s2485_s1 + $0xa0] sm:$0xff]   ;;  %v1857_v34 = vld [vmem:[%s2485_s1 + $0x98] sm:$0xff]   ;;  %v1859_v36 = vld [vmem:[%s2485_s1 + $0x90] sm:$0xff]  }
  0x16   : > { %1750 = vmatpush3.bf16.msra.mxu1 %v1830_v5  ;;  %1727 = vmatprep.subr.bf16.mxu0 %v1831_v6  ;;  %v1856_v31 = vld [vmem:[%s2485_s1 + $0xe0] sm:$0xff]   ;;  %v1858_v35 = vld [vmem:[%s2485_s1 + $0xd8] sm:$0xff]   ;;  %v1860_v37 = vld [vmem:[%s2485_s1 + $0xd0] sm:$0xff]  }
  0x17   : > { %1751 = vmatprep.subr.bf16.mxu1 %v1832_v7  ;;  %v1865_v32 = vld [vmem:[%s1949_s10 + $0x40] sm:$0xff]   ;;  %v1861_v38 = vld [vmem:[%s2485_s1 + $0x88] sm:$0xff]   ;;  %v1869_v44 = vld [vmem:[%s1949_s10 + $0x50] sm:$0xff]  }
  0x18   : > { %v1866_v33 = vld [vmem:[%s1949_s10 + $0x60] sm:$0xff]   ;;  %v1862_v39 = vld [vmem:[%s2485_s1 + $0xc8] sm:$0xff]   ;;  %v1870_v45 = vld [vmem:[%s1949_s10 + $0x70] sm:$0xff]  }
  0x19   : > { %1728 = vmatpush3.bf16.msra.mxu0 %v1831_v6  ;;  %v1863_v40 = vld [vmem:[%s2485_s1 + $0x80] sm:$0xff]   ;;  %v1867_v42 = vld [vmem:[%s1949_s10 + $0x48] sm:$0xff]   ;;  %v1871_v46 = vld [vmem:[%s1949_s10 + $0x58] sm:$0xff]  }
  0x1a   : > { %1752 = vmatpush3.bf16.msra.mxu1 %v1832_v7  ;;  %1729 = vmatprep.subr.bf16.mxu0 %v1833_v8  ;;  %v1864_v41 = vld [vmem:[%s2485_s1 + $0xc0] sm:$0xff]   ;;  %v1868_v43 = vld [vmem:[%s1949_s10 + $0x68] sm:$0xff]   ;;  %v1872_v47 = vld [vmem:[%s1949_s10 + $0x78] sm:$0xff]  }
  0x1b   : > { %1753 = vmatprep.subr.bf16.mxu1 %v1834_v9  ;;  %v2036_v56 = vld [vmem:[%s2486_s2] ss:$0 sm:$0xff] }
  0x1d   : > { %1730 = vmatpush3.bf16.msra.mxu0 %v1833_v8 }
  0x1e   : > { %1754 = vmatpush3.bf16.msra.mxu1 %v1834_v9  ;;  %1731 = vmatprep.subr.bf16.mxu0 %v1835_v10 }
  0x1f   : > { %1755 = vmatprep.subr.bf16.mxu1 %v1836_v11 }
  0x21   : > { %1732 = vmatpush3.bf16.msra.mxu0 %v1835_v10 }
  0x22   : > { %1756 = vmatpush3.bf16.msra.mxu1 %v1836_v11  ;;  %1733 = vmatprep.subr.bf16.mxu0 %v1837_v14 }
  0x23   : > { %1757 = vmatprep.subr.bf16.mxu1 %v1838_v15 }
  0x25   : > { %1734 = vmatpush3.bf16.msra.mxu0 %v1837_v14 }
  0x26   : > { %1758 = vmatpush3.bf16.msra.mxu1 %v1838_v15  ;;  %1735 = vmatprep.subr.bf16.mxu0 %v1839_v16 }
  0x27   : > { %1759 = vmatprep.subr.bf16.mxu1 %v1840_v17 }
  0x29   : > { %1736 = vmatpush3.bf16.msra.mxu0 %v1839_v16 }
  0x2a   : > { %1760 = vmatpush3.bf16.msra.mxu1 %v1840_v17  ;;  %1769 = vmatprep.subr.bf16.mxu0 %v1845_v19 }
  0x2b   : > { %1793 = vmatprep.subr.bf16.mxu1 %v1846_v20 }
  0x2c   : > { %1738 = vmatmul.mubr.bf16.vlgmr.msra.gmra.mxu0 %v1843_v18 }
  0x2d   : > { %1762 = vmatmul.mubr.bf16.vlgmr.msra.gmra.mxu1 %v1844_v21  ;;  %1770 = vmatpush3.bf16.msra.mxu0 %v1845_v19 }
  0x2e   : > { %1794 = vmatpush3.bf16.msra.mxu1 %v1846_v20  ;;  %1771 = vmatprep.subr.bf16.mxu0 %v1847_v22 }
  0x2f   : > { %1795 = vmatprep.subr.bf16.mxu1 %v1848_v23  ;;  %1741 = vmatprep.mubr.bf16.mxu0 %v1849_v24 }
  0x30   : > { %1765 = vmatprep.mubr.bf16.mxu1 %v1850_v25 }
  0x31   : > { %1772 = vmatpush3.bf16.msra.mxu0 %v1847_v22 }
  0x32   : > { %1796 = vmatpush3.bf16.msra.mxu1 %v1848_v23  ;;  %1773 = vmatprep.subr.bf16.mxu0 %v1853_v27 }
  0x33   : > { %1797 = vmatprep.subr.bf16.mxu1 %v1854_v28 }
  0x34   : > { %1742 = vmatmul.mubr.bf16.gmra.mxu0 %v1851_v26 }
  0x35   : > { %1766 = vmatmul.mubr.bf16.gmra.mxu1 %v1852_v29  ;;  %1774 = vmatpush3.bf16.msra.mxu0 %v1853_v27 }
  0x36   : > { %1798 = vmatpush3.bf16.msra.mxu1 %v1854_v28  ;;  %1775 = vmatprep.subr.bf16.mxu0 %v1855_v30 }
  0x37   : > { %1799 = vmatprep.subr.bf16.mxu1 %v1856_v31  ;;  %1785 = vmatprep.mubr.bf16.mxu0 %v1865_v32 }
  0x38   : > { %1809 = vmatprep.mubr.bf16.mxu1 %v1866_v33 }
  0x39   : > { %1776 = vmatpush3.bf16.msra.mxu0 %v1855_v30 }
  0x3a   : > { %1800 = vmatpush3.bf16.msra.mxu1 %v1856_v31  ;;  %1777 = vmatprep.subr.bf16.mxu0 %v1857_v34 }
  0x3b   : > { %1801 = vmatprep.subr.bf16.mxu1 %v1858_v35 }
  0x3d   : > { %1778 = vmatpush3.bf16.msra.mxu0 %v1857_v34 }
  0x3e   : > { %1802 = vmatpush3.bf16.msra.mxu1 %v1858_v35  ;;  %1779 = vmatprep.subr.bf16.mxu0 %v1859_v36 }
  0x3f   : > { %1803 = vmatprep.subr.bf16.mxu1 %v1860_v37 }
  0x41   : > { %1780 = vmatpush3.bf16.msra.mxu0 %v1859_v36 }
  0x42   : > { %1804 = vmatpush3.bf16.msra.mxu1 %v1860_v37  ;;  %1781 = vmatprep.subr.bf16.mxu0 %v1861_v38 }
  0x43   : > { %1805 = vmatprep.subr.bf16.mxu1 %v1862_v39 }
  0x45   : > { %1782 = vmatpush3.bf16.msra.mxu0 %v1861_v38 }
  0x46   : > { %1806 = vmatpush3.bf16.msra.mxu1 %v1862_v39  ;;  %1783 = vmatprep.subr.bf16.mxu0 %v1863_v40 }
  0x47   : > { %1807 = vmatprep.subr.bf16.mxu1 %v1864_v41 }
  0x49   : > { %1784 = vmatpush3.bf16.msra.mxu0 %v1863_v40 }
  0x4a   : > { %1808 = vmatpush3.bf16.msra.mxu1 %v1864_v41 }
  0x4c   : > { %1786 = vmatmul.mubr.bf16.vlgmr.msra.gmra.mxu0 %v1867_v42 }
  0x4d   : > { %1810 = vmatmul.mubr.bf16.vlgmr.msra.gmra.mxu1 %v1868_v43  ;;  %1789 = vmatprep.mubr.bf16.mxu0 %v1869_v44 }
  0x4e   : > { %1813 = vmatprep.mubr.bf16.mxu1 %v1870_v45 }
  0x54   : > { %1790 = vmatmul.mubr.bf16.gmra.mxu0 %v1871_v46 }
  0x55   : > { %1814 = vmatmul.mubr.bf16.gmra.mxu1 %v1872_v47 }
  0xec   : > { %v1739_v48 = vpop.f32.mrf.mxu0 }
  0xed   : > { %v1763_v49 = vpop.f32.mrf.mxu1  ;;  %v2055_v3 = vadd.f32 %v1739_v48, %v2036_v56 }
  0xee   : > { %v309_v50 = vpop.f32.mrf.mxu0  ;;  %v2058_v4 = vadd.f32 %v1763_v49, %v2036_v56 }
  0xef   : > { %v486_v51 = vpop.f32.mrf.mxu1  ;;  %v2045_v61 = vadd.f32 %v2036_v56, %v309_v50 }
  0xf0   : > { %v1740_v52 = vpop.f32.mrf.mxu0  ;;  %v2048_v62 = vadd.f32 %v2036_v56, %v486_v51 }
  0xf1   : > { %v1764_v53 = vpop.f32.mrf.mxu1  ;;  %v2063_v9 = vadd.f32 %v1740_v52, %v2036_v56 }
  0xf2   : > { %v312_v54 = vpop.f32.mrf.mxu0  ;;  %v2066_v10 = vadd.f32 %v1764_v53, %v2036_v56 }
  0xf3   : > { %v489_v55 = vpop.f32.mrf.mxu1  ;;  %v2039_v57 = vadd.f32 %v2036_v56, %v312_v54 }
  0xf4   : > { %v2042_v58 = vadd.f32 %v2036_v56, %v489_v55  ;;  %v1743_v59 = vpop.f32.mrf.mxu0 }
  0xf5   : > { %v1767_v60 = vpop.f32.mrf.mxu1  ;;  %v340_v63 = vadd.f32 %v2039_v57, %v2045_v61  ;;  %v2085_v21 = vadd.f32 %v1743_v59, %v2036_v56 }
  0xf6   : > { %v517_v0 = vadd.f32 %v2042_v58, %v2048_v62  ;;  %v325_v1 = vpop.f32.mrf.mxu0  ;;  %v2088_v22 = vadd.f32 %v1767_v60, %v2036_v56 }
  0xf7   : > { %v502_v2 = vpop.f32.mrf.mxu1  ;;  %v341_v5 = vadd.f32 %v340_v63, %v2055_v3  ;;  %v2069_v11 = vadd.f32 %v2036_v56, %v325_v1 }
  0xf8   : > { %v518_v6 = vadd.f32 %v517_v0, %v2058_v4  ;;  %v1744_v7 = vpop.f32.mrf.mxu0  ;;  %v2073_v13 = vadd.f32 %v2036_v56, %v502_v2 }
  0xf9   : > { %v1768_v8 = vpop.f32.mrf.mxu1  ;;  %v342_v12 = vadd.f32 %v341_v5, %v2063_v9  ;;  %v2093_v26 = vadd.f32 %v1744_v7, %v2036_v56 }
  0xfa   : > { %v519_v14 = vadd.f32 %v518_v6, %v2066_v10  ;;  %v328_v15 = vpop.f32.mrf.mxu0  ;;  %v2096_v27 = vadd.f32 %v1768_v8, %v2036_v56 }
  0xfb   : > { %v505_v16 = vpop.f32.mrf.mxu1  ;;  %v343_v17 = vadd.f32 %v342_v12, %v2069_v11  ;;  %v2079_v19 = vadd.f32 %v2036_v56, %v328_v15 }
  0xfc   : > { %v520_v18 = vadd.f32 %v519_v14, %v2073_v13  ;;  %v2082_v20 = vadd.f32 %v2036_v56, %v505_v16 }
  0xfd   : > { %v344_v23 = vadd.f32 %v343_v17, %v2079_v19 }
  0xfe   : > { %v521_v24 = vadd.f32 %v520_v18, %v2082_v20 }
  0xff   : > { %v345_v28 = vadd.f32 %v344_v23, %v2085_v21 }
 0x100   : > { %v522_v29 = vadd.f32 %v521_v24, %v2088_v22 }
 0x101   : > { %v346_v34 = vadd.f32 %v345_v28, %v2093_v26 }
 0x102   : > { %v523_v35 = vadd.f32 %v522_v29, %v2096_v27 }
 0x103   : > { %v347_v44 = vrot.slane %v346_v34, 4 }
 0x104   : > { %v524_v45 = vrot.slane %v523_v35, 4 }
 0x105   : > { %v348_v63 = vadd.f32 %v347_v44, %v346_v34 }
 0x106   : > { %v525_v0 = vadd.f32 %v524_v45, %v523_v35 }
 0x107   : > { %v349_v18 = vrot.slane %v348_v63, 2 }
 0x108   : > { %v526_v23 = vrot.slane %v525_v0, 2 }
 0x109   : > { %v350_v34 = vadd.f32 %v349_v18, %v348_v63 }
 0x10a   : > { %v527_v35 = vadd.f32 %v526_v23, %v525_v0 }
 0x10b   : > { %v351_v44 = vrot.slane %v350_v34, 1 }
 0x10c   : > { %v1787_v25 = vpop.f32.mrf.mxu0  ;;  %v528_v45 = vrot.slane %v527_v35, 1 }
 0x10d   : > { %v1811_v30 = vpop.f32.mrf.mxu1  ;;  %v2115_v46 = vadd.f32 %v1787_v25, %v2036_v56 }
 0x10e   : > { %v663_v31 = vpop.f32.mrf.mxu0  ;;  %v2120_v49 = vadd.f32 %v1811_v30, %v2036_v56 }
 0x10f   : > { %v840_v32 = vpop.f32.mrf.mxu1  ;;  %v2103_v38 = vadd.f32 %v2036_v56, %v663_v31 }
 0x110   : > { %v1788_v33 = vpop.f32.mrf.mxu0  ;;  %v2109_v41 = vadd.f32 %v2036_v56, %v840_v32 }
 0x111   : > { %v1812_v36 = vpop.f32.mrf.mxu1  ;;  %v2125_v52 = vadd.f32 %v1788_v33, %v2036_v56 }
 0x112   : > { %v666_v37 = vpop.f32.mrf.mxu0  ;;  %v2129_v55 = vadd.f32 %v1812_v36, %v2036_v56 }
 0x113   : > { %v2106_v39 = vadd.f32 %v2036_v56, %v666_v37  ;;  %v843_v40 = vpop.f32.mrf.mxu1 }
 0x114   : > { %v2112_v42 = vadd.f32 %v2036_v56, %v843_v40  ;;  %v1791_v43 = vpop.f32.mrf.mxu0 }
 0x115   : > { %v694_v47 = vadd.f32 %v2106_v39, %v2103_v38  ;;  %v1815_v48 = vpop.f32.mrf.mxu1  ;;  %v2149_v24 = vadd.f32 %v1791_v43, %v2036_v56 }
 0x116   : > { %v871_v50 = vadd.f32 %v2112_v42, %v2109_v41  ;;  %v679_v51 = vpop.f32.mrf.mxu0  ;;  %v2153_v28 = vadd.f32 %v1815_v48, %v2036_v56 }
 0x117   : > { %v695_v53 = vadd.f32 %v694_v47, %v2115_v46  ;;  %v856_v54 = vpop.f32.mrf.mxu1  ;;  %v2133_v1 = vadd.f32 %v2036_v56, %v679_v51 }
 0x118   : > { %v872_v59 = vadd.f32 %v871_v50, %v2120_v49  ;;  %v1792_v60 = vpop.f32.mrf.mxu0  ;;  %v2137_v6 = vadd.f32 %v2036_v56, %v856_v54  ;;  %v529_v54 = vadd.f32 %v528_v45, %v527_v35 }
 0x119   : > { %v696_v2 = vadd.f32 %v695_v53, %v2125_v52  ;;  %v1816_v5 = vpop.f32.mrf.mxu1  ;;  %v2157_v30 = vadd.f32 %v1792_v60, %v2036_v56  ;;  %v352_v53 = vadd.f32 %v351_v44, %v350_v34 }
 0x11a   : > { %v873_v7 = vadd.f32 %v872_v59, %v2129_v55  ;;  %v682_v8 = vpop.f32.mrf.mxu0  ;;  %v2161_v32 = vadd.f32 %v1816_v5, %v2036_v56 }
 0x11b   : > { %v697_v12 = vadd.f32 %v696_v2, %v2133_v1  ;;  %v2142_v14 = vadd.f32 %v2036_v56, %v682_v8  ;;  %v859_v15 = vpop.f32.mrf.mxu1  ;;  %v530_v63 = vadd.f32 %v529_v54, %v352_v53 }
 0x11c   : > { %v874_v16 = vadd.f32 %v873_v7, %v2137_v6  ;;  %v2146_v17 = vadd.f32 %v2036_v56, %v859_v15 }
 0x11d   : > { %v698_v25 = vadd.f32 %v697_v12, %v2142_v14 }
 0x11e   : > { %v875_v29 = vadd.f32 %v874_v16, %v2146_v17 }
 0x11f   : > { %v699_v31 = vadd.f32 %v698_v25, %v2149_v24 }
 0x120   : > { %v876_v33 = vadd.f32 %v875_v29, %v2153_v28 }
 0x121   : > { %v700_v36 = vadd.f32 %v699_v31, %v2157_v30 }
 0x122   : > { %v877_v37 = vadd.f32 %v876_v33, %v2161_v32 }
 0x123   : > { %v701_v40 = vrot.slane %v700_v36, 4 }
 0x124   : > { %v878_v43 = vrot.slane %v877_v37, 4 }
 0x125   : > { %v702_v47 = vadd.f32 %v701_v40, %v700_v36 }
 0x126   : > { %v879_v48 = vadd.f32 %v878_v43, %v877_v37 }
 0x127   : > { %v703_v50 = vrot.slane %v702_v47, 2 }
 0x128   : > { %v880_v51 = vrot.slane %v879_v48, 2 }
 0x129   : > { %v704_v56 = vadd.f32 %v703_v50, %v702_v47 }
 0x12a   : > { %v881_v59 = vadd.f32 %v880_v51, %v879_v48 }
 0x12b   : > { %v705_v60 = vrot.slane %v704_v56, 1 }
 0x12c   : > { %v882_v2 = vrot.slane %v881_v59, 1 }
 0x12d   : > { %v706_v0 = vadd.f32 %v705_v60, %v704_v56 }
 0x12e   : > { %v883_v7 = vadd.f32 %v882_v2, %v881_v59 }
 0x12f   : > { %v707_v5 = vadd.f32 %v706_v0, %v530_v63 }
 0x131   : > { %v884_v8 = vadd.f32 %v883_v7, %v707_v5 }
 0x133   : > { %v2166_v12 = vmul.f32 0.00390625, %v884_v8 }
 0x135   : > { %v2170_v15 = vsub.f32 %v2045_v61, %v2166_v12  ;;  %v2174_v16 = vsub.f32 %v2039_v57, %v2166_v12  ;;  %v2178_v18 = vsub.f32 %v2055_v3, %v2166_v12  ;;  %v2182_v23 = vsub.f32 %v2063_v9, %v2166_v12 }
 0x136   : > { %v2190_v61 = vsub.f32 %v2069_v11, %v2166_v12  ;;  %v2194_v57 = vsub.f32 %v2079_v19, %v2166_v12  ;;  %v2200_v9 = vsub.f32 %v2048_v62, %v2166_v12  ;;  %v2204_v33 = vsub.f32 %v2042_v58, %v2166_v12 }
 0x137   : > { %v895_v25 = vmul.f32 %v2170_v15, %v2170_v15  ;;  %v896_v29 = vmul.f32 %v2174_v16, %v2174_v16  ;;  %v897_v3 = vmul.f32 %v2178_v18, %v2178_v18  ;;  %v2208_v11 = vsub.f32 %v2058_v4, %v2166_v12 }
 0x138   : > { %v2212_v19 = vsub.f32 %v2085_v21, %v2166_v12  ;;  %v898_v34 = vmul.f32 %v2182_v23, %v2182_v23  ;;  %v2218_v62 = vsub.f32 %v2066_v10, %v2166_v12  ;;  %v925_v58 = vmul.f32 %v2200_v9, %v2200_v9 }
 0x139   : > { %v903_v31 = vadd.f32 %v896_v29, %v895_v25  ;;  %v926_v36 = vmul.f32 %v2204_v33, %v2204_v33  ;;  %v2226_v4 = vsub.f32 %v2093_v26, %v2166_v12  ;;  %v899_v21 = vmul.f32 %v2190_v61, %v2190_v61 }
 0x13a   : > { %v900_v37 = vmul.f32 %v2194_v57, %v2194_v57  ;;  %v2234_v10 = vsub.f32 %v2073_v13, %v2166_v12  ;;  %v927_v43 = vmul.f32 %v2208_v11, %v2208_v11  ;;  %v2240_v45 = vsub.f32 %v2082_v20, %v2166_v12 }
 0x13b   : > { %v904_v35 = vadd.f32 %v903_v31, %v897_v3  ;;  %v933_v44 = vadd.f32 %v926_v36, %v925_v58  ;;  %v2244_v26 = vsub.f32 %v2103_v38, %v2166_v12  ;;  %v2248_v47 = vsub.f32 %v2106_v39, %v2166_v12 }
 0x13c   : > { %v2252_v13 = vsub.f32 %v2115_v46, %v2166_v12  ;;  %v901_v48 = vmul.f32 %v2212_v19, %v2212_v19  ;;  %v928_v20 = vmul.f32 %v2218_v62, %v2218_v62  ;;  %v2260_v38 = vsub.f32 %v2088_v22, %v2166_v12 }
 0x13d   : > { %v905_v40 = vadd.f32 %v904_v35, %v898_v34  ;;  %v934_v51 = vadd.f32 %v933_v44, %v927_v43  ;;  %v2264_v39 = vsub.f32 %v2096_v27, %v2166_v12  ;;  %v955_v46 = vmul.f32 %v2244_v26, %v2244_v26 }
 0x13e   : > { %v956_v53 = vmul.f32 %v2248_v47, %v2248_v47  ;;  %v929_v56 = vmul.f32 %v2234_v10, %v2234_v10  ;;  %v2274_v60 = vsub.f32 %v2125_v52, %v2166_v12  ;;  %v902_v22 = vmul.f32 %v2226_v4, %v2226_v4 }
 0x13f   : > { %v906_v50 = vadd.f32 %v905_v40, %v899_v21  ;;  %v935_v59 = vadd.f32 %v934_v51, %v928_v20  ;;  %v930_v27 = vmul.f32 %v2240_v45, %v2240_v45  ;;  %v2282_v2 = vsub.f32 %v2133_v1, %v2166_v12 }
 0x140   : > { %v957_v63 = vmul.f32 %v2252_v13, %v2252_v13  ;;  %v963_v7 = vadd.f32 %v956_v53, %v955_v46  ;;  %v2288_v52 = vsub.f32 %v2109_v41, %v2166_v12  ;;  %v931_v8 = vmul.f32 %v2260_v38, %v2260_v38 }
 0x141   : > { %v907_v54 = vadd.f32 %v906_v50, %v900_v37  ;;  %v936_v5 = vadd.f32 %v935_v59, %v929_v56  ;;  %v932_v25 = vmul.f32 %v2264_v39, %v2264_v39  ;;  %v2296_v1 = vsub.f32 %v2142_v14, %v2166_v12 }
 0x142   : > { %v2300_v29 = vsub.f32 %v2112_v42, %v2166_v12  ;;  %v958_v41 = vmul.f32 %v2274_v60, %v2274_v60  ;;  %v964_v34 = vadd.f32 %v963_v7, %v957_v63  ;;  %v2306_v35 = vsub.f32 %v2149_v24, %v2166_v12 }
 0x143   : > { %v908_v0 = vadd.f32 %v907_v54, %v901_v48  ;;  %v937_v31 = vadd.f32 %v936_v5, %v930_v27  ;;  %v2310_v58 = vsub.f32 %v2120_v49, %v2166_v12  ;;  %v985_v14 = vmul.f32 %v2288_v52, %v2288_v52 }
 0x144   : > { %v986_v42 = vmul.f32 %v2300_v29, %v2300_v29  ;;  %v959_v37 = vmul.f32 %v2282_v2, %v2282_v2  ;;  %v965_v40 = vadd.f32 %v964_v34, %v958_v41  ;;  %v2320_v24 = vsub.f32 %v2157_v30, %v2166_v12 }
 0x145   : > { %v909_v3 = vadd.f32 %v908_v0, %v902_v22  ;;  %v938_v21 = vadd.f32 %v937_v31, %v931_v8  ;;  %v2324_v49 = vsub.f32 %v2129_v55, %v2166_v12  ;;  %v960_v48 = vmul.f32 %v2296_v1, %v2296_v1 }
 0x146   : > { %v966_v50 = vadd.f32 %v965_v40, %v959_v37  ;;  %v2330_v20 = vsub.f32 %v2137_v6, %v2166_v12  ;;  %v987_v51 = vmul.f32 %v2310_v58, %v2310_v58  ;;  %v993_v46 = vadd.f32 %v986_v42, %v985_v14 }
 0x147   : > { %v910_v36 = vrot.slane %v909_v3, 4  ;;  %v939_v44 = vadd.f32 %v938_v21, %v932_v25  ;;  %v961_v53 = vmul.f32 %v2306_v35, %v2306_v35  ;;  %v2338_v56 = vsub.f32 %v2146_v17, %v2166_v12 }
 0x148   : > { %v967_v55 = vadd.f32 %v966_v50, %v960_v48  ;;  %v988_v59 = vmul.f32 %v2324_v49, %v2324_v49  ;;  %v994_v22 = vadd.f32 %v993_v46, %v987_v51  ;;  %v962_v27 = vmul.f32 %v2320_v24, %v2320_v24 }
 0x149   : > { %v911_v43 = vadd.f32 %v910_v36, %v909_v3  ;;  %v940_v30 = vrot.slane %v939_v44, 4  ;;  %v2346_v0 = vsub.f32 %v2153_v28, %v2166_v12  ;;  %v989_v5 = vmul.f32 %v2330_v20, %v2330_v20 }
 0x14a   : > { %v968_v63 = vadd.f32 %v967_v55, %v961_v53  ;;  %v995_v7 = vadd.f32 %v994_v22, %v988_v59  ;;  %v2352_v3 = vsub.f32 %v2161_v32, %v2166_v12  ;;  %v990_v31 = vmul.f32 %v2338_v56, %v2338_v56 }
 0x14b   : > { %v912_v54 = vrot.slane %v911_v43, 2  ;;  %v941_v6 = vadd.f32 %v940_v30, %v939_v44  ;;  %v991_v28 = vmul.f32 %v2346_v0, %v2346_v0 }
 0x14c   : > { %v969_v17 = vadd.f32 %v968_v63, %v962_v27  ;;  %v996_v41 = vadd.f32 %v995_v7, %v989_v5  ;;  %v992_v40 = vmul.f32 %v2352_v3, %v2352_v3 }
 0x14d   : > { %v942_v8 = vrot.slane %v941_v6, 2  ;;  %v913_v25 = vadd.f32 %v912_v54, %v911_v43 }
 0x14e   : > { %v970_v14 = vrot.slane %v969_v17, 4  ;;  %v997_v42 = vadd.f32 %v996_v41, %v990_v31 }
 0x14f   : > { %v943_v34 = vadd.f32 %v942_v8, %v941_v6  ;;  %v914_v21 = vrot.slane %v913_v25, 1 }
 0x150   : > { %v971_v36 = vadd.f32 %v970_v14, %v969_v17  ;;  %v998_v43 = vadd.f32 %v997_v42, %v991_v28 }
 0x151   : > { %v944_v37 = vrot.slane %v943_v34, 1  ;;  %v915_v48 = vadd.f32 %v914_v21, %v913_v25 }
 0x152   : > { %v972_v44 = vrot.slane %v971_v36, 2  ;;  %v999_v32 = vadd.f32 %v998_v43, %v992_v40 }
 0x153   : > { %v945_v50 = vadd.f32 %v944_v37, %v943_v34 }
 0x154   : > { %v973_v12 = vadd.f32 %v972_v44, %v971_v36  ;;  %v1000_v51 = vrot.slane %v999_v32, 4 }
 0x155   : > { %v946_v53 = vadd.f32 %v945_v50, %v915_v48 }
 0x156   : > { %v974_v46 = vrot.slane %v973_v12, 1  ;;  %v1001_v30 = vadd.f32 %v1000_v51, %v999_v32 }
 0x158   : > { %v1002_v55 = vrot.slane %v1001_v30, 2  ;;  %v975_v54 = vadd.f32 %v974_v46, %v973_v12 }
 0x15a   : > { %v1003_v59 = vadd.f32 %v1002_v55, %v1001_v30  ;;  %v976_v22 = vadd.f32 %v975_v54, %v946_v53 }
 0x15c   : > { %v1004_v6 = vrot.slane %v1003_v59, 1 }
 0x15e   : > { %v1005_v27 = vadd.f32 %v1004_v6, %v1003_v59 }
 0x160   : > { %v1006_v63 = vadd.f32 %v1005_v27, %v976_v22 }
 0x162   : > { %v1007_v5 = vmul.f32 0.00390625, %v1006_v63 }
 0x164   : > { %v1008_v7 = vadd.f32 1e-05, %v1007_v5 }
 0x166   : > { %1873 = vrsqrt.f32 %v1008_v7 }
 0x173   : > { %v2360_v8 = vpop.eup %1873 }
 0x174   : > { %v1010_v17 = vmul.f32 %v2360_v8, %v2170_v15  ;;  %v1011_v25 = vmul.f32 %v2360_v8, %v2174_v16  ;;  %v1012_v31 = vmul.f32 %v2360_v8, %v2178_v18  ;;  %v1013_v41 = vmul.f32 %v2360_v8, %v2182_v23 }
 0x175   : > { %v1014_v34 = vmul.f32 %v2360_v8, %v2190_v61  ;;  %v1015_v14 = vmul.f32 %v2360_v8, %v2194_v57  ;;  %v1016_v28 = vmul.f32 %v2360_v8, %v2212_v19  ;;  %v1017_v15 = vmul.f32 %v2360_v8, %v2226_v4 }
 0x176   : > { %vm1018_vm0 = vcmp.gt.f32.partialorder %v1010_v17, 0.0  ;;  %vm1019_vm1 = vcmp.gt.f32.partialorder %v1011_v25, 0.0  ;;  %vm1020_vm2 = vcmp.gt.f32.partialorder %v1012_v31, 0.0  ;;  %vm1021_vm3 = vcmp.gt.f32.partialorder %v1013_v41, 0.0 }
 0x177   : > { %vm1022_vm4 = vcmp.gt.f32.partialorder %v1014_v34, 0.0  ;;  %vm1023_vm5 = vcmp.gt.f32.partialorder %v1015_v14, 0.0  ;;  %vm1024_vm6 = vcmp.gt.f32.partialorder %v1016_v28, 0.0  ;;  %vm1025_vm7 = vcmp.gt.f32.partialorder %v1017_v15, 0.0 }
 0x178   : > { %v1026_v16 = vmul.f32 0.2, %v1010_v17  ;;  %v1027_v18 = vmul.f32 0.2, %v1011_v25  ;;  %v1028_v23 = vmul.f32 0.2, %v1012_v31  ;;  %v1082_v61 = vmul.f32 %v2360_v8, %v2200_v9 }
 0x179   : > { %v1029_v57 = vmul.f32 0.2, %v1013_v41  ;;  %v1030_v19 = vmul.f32 0.2, %v1014_v34  ;;  %v1031_v42 = vmul.f32 0.2, %v1015_v14  ;;  %v1083_v4 = vmul.f32 %v2360_v8, %v2204_v33 }
 0x17a   : > { %v1032_v36 = vmul.f32 0.2, %v1016_v28  ;;  %v1033_v21 = vmul.f32 0.2, %v1017_v15  ;;  %v1034_v37 = vsel %vm1018_vm0, %v1010_v17, %v1026_v16  ;;  %v1035_v40 = vsel %vm1019_vm1, %v1011_v25, %v1027_v18 }
 0x17b   : > { %v1036_v9 = vsel %vm1020_vm2, %v1012_v31, %v1028_v23  ;;  %v1037_v43 = vsel %vm1021_vm3, %v1013_v41, %v1029_v57  ;;  %v1038_v33 = vsel %vm1022_vm4, %v1014_v34, %v1030_v19  ;;  %v1039_v44 = vsel %vm1023_vm5, %v1015_v14, %v1031_v42 }
 0x17c   : > { %v1040_v32 = vsel %vm1024_vm6, %v1016_v28, %v1032_v36  ;;  %v1041_v12 = vsel %vm1025_vm7, %v1017_v15, %v1033_v21  ;;  %v1581_v48 = vpack.c.bf16 %v1035_v40, %v1034_v37  ;;  %v1586_v50 = vpack.c.bf16 %v1037_v43, %v1036_v9 }
 0x17d   : > { %v1591_v51 = vpack.c.bf16 %v1039_v44, %v1038_v33  ;;  %v1596_v46 = vpack.c.bf16 %v1041_v12, %v1040_v32  ;;  %v1084_v30 = vmul.f32 %v2360_v8, %v2208_v11  ;;  %v1085_v53 = vmul.f32 %v2360_v8, %v2218_v62 }
 0x17e   : > { %1582 = vst [vmem:[%s2389_s14] sm:$0xff] %v1581_v48   ;;  %1658 = vst [vmem:[%s2389_s14 + $0x8] sm:$0xff] %v1586_v50   ;;  %v1086_v55 = vmul.f32 %v2360_v8, %v2234_v10  ;;  %v1087_v54 = vmul.f32 %v2360_v8, %v2240_v45  ;;  %v1088_v59 = vmul.f32 %v2360_v8, %v2260_v38  ;;  %vm1090_vm8 = vcmp.gt.f32.partialorder %v1082_v61, 0.0 }
 0x17f   : > { %v1089_v22 = vmul.f32 %v2360_v8, %v2264_v39  ;;  %1659 = vst [vmem:[%s2389_s14 + $0x10] sm:$0xff] %v1591_v51   ;;  %1660 = vst [vmem:[%s2389_s14 + $0x18] sm:$0xff] %v1596_v46   ;;  %vm1091_vm9 = vcmp.gt.f32.partialorder %v1083_v4, 0.0  ;;  %vm1092_vm10 = vcmp.gt.f32.partialorder %v1084_v30, 0.0  ;;  %vm1093_vm11 = vcmp.gt.f32.partialorder %v1085_v53, 0.0 }
 0x180   : > { %vm1094_vm12 = vcmp.gt.f32.partialorder %v1086_v55, 0.0  ;;  %vm1095_vm13 = vcmp.gt.f32.partialorder %v1087_v54, 0.0  ;;  %vm1096_vm14 = vcmp.gt.f32.partialorder %v1088_v59, 0.0  ;;  %v1098_v11 = vmul.f32 0.2, %v1082_v61 }
 0x181   : > { %vm1097_vm15 = vcmp.gt.f32.partialorder %v1089_v22, 0.0  ;;  %v1099_v62 = vmul.f32 0.2, %v1083_v4  ;;  %v1100_v10 = vmul.f32 0.2, %v1084_v30  ;;  %v1155_v45 = vmul.f32 %v2360_v8, %v2244_v26 }
 0x182   : > { %v1101_v38 = vmul.f32 0.2, %v1085_v53  ;;  %v1102_v6 = vmul.f32 0.2, %v1086_v55  ;;  %v1103_v27 = vmul.f32 0.2, %v1087_v54  ;;  %v1156_v39 = vmul.f32 %v2360_v8, %v2248_v47 }
 0x183   : > { %v1104_v63 = vmul.f32 0.2, %v1088_v59  ;;  %v1105_v5 = vmul.f32 0.2, %v1089_v22  ;;  %v1106_v7 = vsel %vm1090_vm8, %v1082_v61, %v1098_v11  ;;  %v1107_v17 = vsel %vm1091_vm9, %v1083_v4, %v1099_v62 }
 0x184   : > { %v1108_v25 = vsel %vm1092_vm10, %v1084_v30, %v1100_v10  ;;  %v1109_v31 = vsel %vm1093_vm11, %v1085_v53, %v1101_v38  ;;  %v1110_v26 = vsel %vm1094_vm12, %v1086_v55, %v1102_v6  ;;  %v1111_v41 = vsel %vm1095_vm13, %v1087_v54, %v1103_v27 }
 0x185   : > { %v1112_v47 = vsel %vm1096_vm14, %v1088_v59, %v1104_v63  ;;  %v1113_v34 = vsel %vm1097_vm15, %v1089_v22, %v1105_v5  ;;  %v1601_v14 = vpack.c.bf16 %v1107_v17, %v1106_v7  ;;  %v1606_v28 = vpack.c.bf16 %v1109_v31, %v1108_v25 }
 0x186   : > { %v1611_v15 = vpack.c.bf16 %v1111_v41, %v1110_v26  ;;  %v1616_v16 = vpack.c.bf16 %v1113_v34, %v1112_v47  ;;  %v1157_v18 = vmul.f32 %v2360_v8, %v2252_v13  ;;  %v1158_v23 = vmul.f32 %v2360_v8, %v2274_v60 }
 0x187   : > { %1661 = vst [vmem:[%s2389_s14 + $0x20] sm:$0xff] %v1601_v14   ;;  %1662 = vst [vmem:[%s2389_s14 + $0x28] sm:$0xff] %v1606_v28   ;;  %v1159_v61 = vmul.f32 %v2360_v8, %v2282_v2  ;;  %v1160_v57 = vmul.f32 %v2360_v8, %v2296_v1  ;;  %v1161_v19 = vmul.f32 %v2360_v8, %v2306_v35  ;;  %vm1163_vm0 = vcmp.gt.f32.partialorder %v1155_v45, 0.0 }
 0x188   : > { %v1162_v42 = vmul.f32 %v2360_v8, %v2320_v24  ;;  %1663 = vst [vmem:[%s2389_s14 + $0x30] sm:$0xff] %v1611_v15   ;;  %1664 = vst [vmem:[%s2389_s14 + $0x38] sm:$0xff] %v1616_v16   ;;  %vm1164_vm1 = vcmp.gt.f32.partialorder %v1156_v39, 0.0  ;;  %vm1165_vm2 = vcmp.gt.f32.partialorder %v1157_v18, 0.0  ;;  %vm1166_vm3 = vcmp.gt.f32.partialorder %v1158_v23, 0.0 }
 0x189   : > { %vm1167_vm4 = vcmp.gt.f32.partialorder %v1159_v61, 0.0  ;;  %vm1168_vm5 = vcmp.gt.f32.partialorder %v1160_v57, 0.0  ;;  %vm1169_vm6 = vcmp.gt.f32.partialorder %v1161_v19, 0.0  ;;  %v1171_v13 = vmul.f32 0.2, %v1155_v45 }
 0x18a   : > { %vm1170_vm7 = vcmp.gt.f32.partialorder %v1162_v42, 0.0  ;;  %v1172_v60 = vmul.f32 0.2, %v1156_v39  ;;  %v1173_v2 = vmul.f32 0.2, %v1157_v18  ;;  %v1228_v1 = vmul.f32 %v2360_v8, %v2288_v52 }
 0x18b   : > { %v1174_v35 = vmul.f32 0.2, %v1158_v23  ;;  %v1175_v4 = vmul.f32 0.2, %v1159_v61  ;;  %v1176_v36 = vmul.f32 0.2, %v1160_v57  ;;  %v1229_v24 = vmul.f32 %v2360_v8, %v2300_v29 }
 0x18c   : > { %v1177_v21 = vmul.f32 0.2, %v1161_v19  ;;  %v1178_v37 = vmul.f32 0.2, %v1162_v42  ;;  %v1179_v40 = vsel %vm1163_vm0, %v1155_v45, %v1171_v13  ;;  %v1180_v9 = vsel %vm1164_vm1, %v1156_v39, %v1172_v60 }
 0x18d   : > { %v1181_v43 = vsel %vm1165_vm2, %v1157_v18, %v1173_v2  ;;  %v1182_v33 = vsel %vm1166_vm3, %v1158_v23, %v1174_v35  ;;  %v1183_v52 = vsel %vm1167_vm4, %v1159_v61, %v1175_v4  ;;  %v1184_v44 = vsel %vm1168_vm5, %v1160_v57, %v1176_v36 }
 0x18e   : > { %v1185_v29 = vsel %vm1169_vm6, %v1161_v19, %v1177_v21  ;;  %v1186_v32 = vsel %vm1170_vm7, %v1162_v42, %v1178_v37  ;;  %v1621_v12 = vpack.c.bf16 %v1180_v9, %v1179_v40  ;;  %v1626_v48 = vpack.c.bf16 %v1182_v33, %v1181_v43 }
 0x18f   : > { %v1631_v50 = vpack.c.bf16 %v1184_v44, %v1183_v52  ;;  %v1636_v51 = vpack.c.bf16 %v1186_v32, %v1185_v29  ;;  %v1230_v46 = vmul.f32 %v2360_v8, %v2310_v58  ;;  %v1231_v30 = vmul.f32 %v2360_v8, %v2324_v49 }
 0x190   : > { %1665 = vst [vmem:[%s2389_s14 + $0x40] sm:$0xff] %v1621_v12   ;;  %1666 = vst [vmem:[%s2389_s14 + $0x48] sm:$0xff] %v1626_v48   ;;  %v1232_v53 = vmul.f32 %v2360_v8, %v2330_v20  ;;  %v1233_v55 = vmul.f32 %v2360_v8, %v2338_v56  ;;  %v1234_v54 = vmul.f32 %v2360_v8, %v2346_v0  ;;  %vm1236_vm8 = vcmp.gt.f32.partialorder %v1228_v1, 0.0 }
 0x191   : > { %v1235_v59 = vmul.f32 %v2360_v8, %v2352_v3  ;;  %1667 = vst [vmem:[%s2389_s14 + $0x50] sm:$0xff] %v1631_v50   ;;  %1668 = vst [vmem:[%s2389_s14 + $0x58] sm:$0xff] %v1636_v51   ;;  %vm1237_vm9 = vcmp.gt.f32.partialorder %v1229_v24, 0.0  ;;  %vm1238_vm10 = vcmp.gt.f32.partialorder %v1230_v46, 0.0  ;;  %vm1239_vm11 = vcmp.gt.f32.partialorder %v1231_v30, 0.0 }
 0x192   : > { %vm1240_vm12 = vcmp.gt.f32.partialorder %v1232_v53, 0.0  ;;  %vm1241_vm13 = vcmp.gt.f32.partialorder %v1233_v55, 0.0  ;;  %vm1242_vm14 = vcmp.gt.f32.partialorder %v1234_v54, 0.0  ;;  %v1244_v58 = vmul.f32 0.2, %v1228_v1 }
 0x193   : > { %vm1243_vm15 = vcmp.gt.f32.partialorder %v1235_v59, 0.0  ;;  %v1245_v49 = vmul.f32 0.2, %v1229_v24  ;;  %v1246_v20 = vmul.f32 0.2, %v1230_v46 }
 0x194   : > { %v1247_v56 = vmul.f32 0.2, %v1231_v30  ;;  %v1248_v22 = vmul.f32 0.2, %v1232_v53  ;;  %v1249_v0 = vmul.f32 0.2, %v1233_v55  ;;  %v1252_v8 = vsel %vm1236_vm8, %v1228_v1, %v1244_v58 }
 0x195   : > { %v1250_v11 = vmul.f32 0.2, %v1234_v54  ;;  %v1251_v3 = vmul.f32 0.2, %v1235_v59  ;;  %v1253_v62 = vsel %vm1237_vm9, %v1229_v24, %v1245_v49  ;;  %v1254_v10 = vsel %vm1238_vm10, %v1230_v46, %v1246_v20 }
 0x196   : > { %v1255_v45 = vsel %vm1239_vm11, %v1231_v30, %v1247_v56  ;;  %v1256_v38 = vsel %vm1240_vm12, %v1232_v53, %v1248_v22  ;;  %v1257_v6 = vsel %vm1241_vm13, %v1233_v55, %v1249_v0  ;;  %v1641_v63 = vpack.c.bf16 %v1253_v62, %v1252_v8 }
 0x197   : > { %v1258_v27 = vsel %vm1242_vm14, %v1234_v54, %v1250_v11  ;;  %v1259_v39 = vsel %vm1243_vm15, %v1235_v59, %v1251_v3  ;;  %v1646_v5 = vpack.c.bf16 %v1255_v45, %v1254_v10  ;;  %v1651_v7 = vpack.c.bf16 %v1257_v6, %v1256_v38 }
 0x198   : > { %v1656_v17 = vpack.c.bf16 %v1259_v39, %v1258_v27  ;;  %1669 = vst [vmem:[%s2389_s14 + $0x60] sm:$0xff] %v1641_v63  }
 0x199   : > { %1670 = vst [vmem:[%s2389_s14 + $0x68] sm:$0xff] %v1646_v5   ;;  %1671 = vst [vmem:[%s2389_s14 + $0x70] sm:$0xff] %v1651_v7  }
 0x19a   : > { %1672 = vst [vmem:[%s2389_s14 + $0x78] sm:$0xff] %v1656_v17  }
 0x19b PF: > { %s13_s12 = sadd.s32 1, %s1881_s12  }
 0x19c   : > { %p10_p4 = scmp.ge.s32.totalorder %s13_s12, 4  }
 0x19e   :  { %12 = sbr.rel (!%p10_p4) target bundleno = 1 (0x1), region = 71 }

// kernel: decoder_forward.7
= control target key start
LH: loop header
LB: loop body
LE: loop exit
PB: predicated region body
PF: predicated region fallthrough
CT: control target
= control target key end

     0   :  { %s4783_s12 = smov 0   ;;  %s7581_s0 = inlined_call_operand.vmem [shape: bf16[2,4,256,128], index: 0, kind: input, shape index: {}]   ;;  %s7582_s1 = inlined_call_operand.vmem [shape: bf16[4,128,128], index: 1, kind: input, shape index: {}]   ;;  %s7583_s2 = inlined_call_operand.vmem [shape: f32[1,128], index: 2, kind: input, shape index: {}]   ;;  %s7584_s3 = inlined_call_operand.vmem [shape: bf16[2,4,256,128], index: 3, kind: output, shape index: {}]  }
   0x1 LB: > { %s3372_s13 = sadd.s32 4294967295, %s4761_s12   ;;  %p3376_p0 = scmp.ge.s32.totalorder %s4761_s12, 1  ;;  %s4761_s12 = sphi %s4783_s12, %s13_s12  }
   0x2   : > { %p137_p1 = scmp.lt.s32.totalorder %s4761_s12, 3 }
   0x4   : > { %p138_p2 = pnand %p3376_p0, %p137_p1 }
   0x6   : > { %141 = sbr.rel (%p138_p2) target bundleno = 698 (0x2ba), region = 32 }
   0xb   : > { %v4657_v0 = vld [vmem:[%s7582_s1 + $0x38] sm:$0xff]   ;;  %v4659_v2 = vld [vmem:[%s7582_s1 + $0x30] sm:$0xff]   ;;  %p161_p3 = scmp.lt.s32.totalorder %s3372_s13, 1  ;;  %v4661_v4 = vld [vmem:[%s7582_s1 + $0x28] sm:$0xff]  }
   0xc   : > { %v4658_v1 = vld [vmem:[%s7582_s1 + $0x78] sm:$0xff]   ;;  %4457 = vmatprep.subr.bf16.mxu0 %v4657_v0  ;;  %v4660_v3 = vld [vmem:[%s7582_s1 + $0x70] sm:$0xff]   ;;  %v4662_v5 = vld [vmem:[%s7582_s1 + $0x68] sm:$0xff]  }
   0xd   : > { %4505 = vmatprep.subr.bf16.mxu1 %v4658_v1  ;;  %4458 = vmatpush3.bf16.msra.mxu0 %v4657_v0  ;;  %s8194_s13 = smov (!%p161_p3, %s3372_s13), 1  ;;  %v4663_v6 = vld [vmem:[%s7582_s1 + $0x20] sm:$0xff]   ;;  %v4665_v8 = vld [vmem:[%s7582_s1 + $0x18] sm:$0xff]   ;;  %v4667_v10 = vld [vmem:[%s7582_s1 + $0x10] sm:$0xff]  }
   0xe   : > { %4506 = vmatpush3.bf16.msra.mxu1 %v4658_v1  ;;  %4459 = vmatprep.subr.bf16.mxu0 %v4659_v2  ;;  %v4664_v7 = vld [vmem:[%s7582_s1 + $0x60] sm:$0xff]   ;;  %s3848_s30 = sshll.u32 %s8194_s13, 9  ;;  %v4666_v9 = vld [vmem:[%s7582_s1 + $0x58] sm:$0xff]   ;;  %v4668_v11 = vld [vmem:[%s7582_s1 + $0x50] sm:$0xff]  }
   0xf   : > { %4507 = vmatprep.subr.bf16.mxu1 %v4660_v3  ;;  %s4829_s10 = scalar_lea.vmem %s7581_s0, %s3848_s30  ;;  %v4669_v14 = vld [vmem:[%s7582_s1 + $0x8] sm:$0xff]   ;;  %v4671_v16 = vld [vmem:[%s7582_s1] sm:$0xff]   ;;  %v4677_v19 = vld [vmem:[%s7582_s1 + $0xb8] sm:$0xff]   ;;  %s6610_s14 = scalar_lea.vmem %s7584_s3, %s3848_s30 }
  0x10   : > { %v4673_v12 = vld [vmem:[%s4829_s10] sm:$0xff]   ;;  %v4670_v15 = vld [vmem:[%s7582_s1 + $0x48] sm:$0xff]   ;;  %v4678_v20 = vld [vmem:[%s7582_s1 + $0xf8] sm:$0xff]  }
  0x11   : > { %4460 = vmatpush3.bf16.msra.mxu0 %v4659_v2  ;;  %v4674_v13 = vld [vmem:[%s4829_s10 + $0x80] sm:$0xff]   ;;  %4473 = vmatprep.mubr.bf16.mxu0 %v4673_v12  ;;  %v4675_v18 = vld [vmem:[%s4829_s10 + $0x8] sm:$0xff]   ;;  %v4679_v22 = vld [vmem:[%s4829_s10 + $0x10] sm:$0xff]  }
  0x12   : > { %4508 = vmatpush3.bf16.msra.mxu1 %v4660_v3  ;;  %4461 = vmatprep.subr.bf16.mxu0 %v4661_v4  ;;  %v4672_v17 = vld [vmem:[%s7582_s1 + $0x40] sm:$0xff]   ;;  %v4676_v21 = vld [vmem:[%s4829_s10 + $0x88] sm:$0xff]   ;;  %v4680_v23 = vld [vmem:[%s4829_s10 + $0x90] sm:$0xff]  }
  0x13   : > { %4509 = vmatprep.subr.bf16.mxu1 %v4662_v5  ;;  %4521 = vmatprep.mubr.bf16.mxu1 %v4674_v13  ;;  %v4683_v24 = vld [vmem:[%s7582_s1 + $0xb0] sm:$0xff]   ;;  %v4681_v26 = vld [vmem:[%s4829_s10 + $0x18] sm:$0xff]   ;;  %v4689_v27 = vld [vmem:[%s7582_s1 + $0xa8] sm:$0xff]  }
  0x14   : > { %v4684_v25 = vld [vmem:[%s7582_s1 + $0xf0] sm:$0xff]   ;;  %v4690_v28 = vld [vmem:[%s7582_s1 + $0xe8] sm:$0xff]   ;;  %v4682_v29 = vld [vmem:[%s4829_s10 + $0x98] sm:$0xff]  }
  0x15   : > { %4462 = vmatpush3.bf16.msra.mxu0 %v4661_v4  ;;  %v4685_v30 = vld [vmem:[%s4829_s10 + $0x20] sm:$0xff]   ;;  %v4687_v34 = vld [vmem:[%s4829_s10 + $0x28] sm:$0xff]   ;;  %v4701_v36 = vld [vmem:[%s7582_s1 + $0x98] sm:$0xff]  }
  0x16   : > { %4510 = vmatpush3.bf16.msra.mxu1 %v4662_v5  ;;  %4463 = vmatprep.subr.bf16.mxu0 %v4663_v6  ;;  %v4686_v31 = vld [vmem:[%s4829_s10 + $0xa0] sm:$0xff]   ;;  %v4688_v35 = vld [vmem:[%s4829_s10 + $0xa8] sm:$0xff]   ;;  %v4702_v37 = vld [vmem:[%s7582_s1 + $0xd8] sm:$0xff]  }
  0x17   : > { %4511 = vmatprep.subr.bf16.mxu1 %v4664_v7  ;;  %v4695_v32 = vld [vmem:[%s7582_s1 + $0xa0] sm:$0xff]   ;;  %v4691_v38 = vld [vmem:[%s4829_s10 + $0x30] sm:$0xff]   ;;  %v4693_v42 = vld [vmem:[%s4829_s10 + $0x38] sm:$0xff]  }
  0x18   : > { %v4696_v33 = vld [vmem:[%s7582_s1 + $0xe0] sm:$0xff]   ;;  %v4692_v39 = vld [vmem:[%s4829_s10 + $0xb0] sm:$0xff]   ;;  %v4694_v43 = vld [vmem:[%s4829_s10 + $0xb8] sm:$0xff]  }
  0x19   : > { %4464 = vmatpush3.bf16.msra.mxu0 %v4663_v6  ;;  %v4707_v40 = vld [vmem:[%s7582_s1 + $0x90] sm:$0xff]   ;;  %v4697_v44 = vld [vmem:[%s4829_s10 + $0x40] sm:$0xff]   ;;  %v4713_v46 = vld [vmem:[%s7582_s1 + $0x88] sm:$0xff]  }
  0x1a   : > { %4512 = vmatpush3.bf16.msra.mxu1 %v4664_v7  ;;  %4465 = vmatprep.subr.bf16.mxu0 %v4665_v8  ;;  %v4708_v41 = vld [vmem:[%s7582_s1 + $0xd0] sm:$0xff]   ;;  %v4698_v45 = vld [vmem:[%s4829_s10 + $0xc0] sm:$0xff]   ;;  %v4714_v47 = vld [vmem:[%s7582_s1 + $0xc8] sm:$0xff]  }
  0x1b   : > { %4513 = vmatprep.subr.bf16.mxu1 %v4666_v9  ;;  %v4699_v48 = vld [vmem:[%s4829_s10 + $0x48] sm:$0xff]   ;;  %v4703_v50 = vld [vmem:[%s4829_s10 + $0x50] sm:$0xff]   ;;  %v4719_v51 = vld [vmem:[%s7582_s1 + $0x80] sm:$0xff]  }
  0x1c   : > { %v4700_v49 = vld [vmem:[%s4829_s10 + $0xc8] sm:$0xff]   ;;  %v4720_v52 = vld [vmem:[%s7582_s1 + $0xc0] sm:$0xff]   ;;  %v4704_v53 = vld [vmem:[%s4829_s10 + $0xd0] sm:$0xff]  }
  0x1d   : > { %4466 = vmatpush3.bf16.msra.mxu0 %v4665_v8  ;;  %v4705_v54 = vld [vmem:[%s4829_s10 + $0x58] sm:$0xff]   ;;  %v4709_v56 = vld [vmem:[%s4829_s10 + $0x60] sm:$0xff]   ;;  %v4711_v58 = vld [vmem:[%s4829_s10 + $0x68] sm:$0xff]  }
  0x1e   : > { %4514 = vmatpush3.bf16.msra.mxu1 %v4666_v9  ;;  %4467 = vmatprep.subr.bf16.mxu0 %v4667_v10  ;;  %v4706_v55 = vld [vmem:[%s4829_s10 + $0xd8] sm:$0xff]   ;;  %v4710_v57 = vld [vmem:[%s4829_s10 + $0xe0] sm:$0xff]   ;;  %v4712_v59 = vld [vmem:[%s4829_s10 + $0xe8] sm:$0xff]  }
  0x1f   : > { %4515 = vmatprep.subr.bf16.mxu1 %v4668_v11  ;;  %v4715_v60 = vld [vmem:[%s4829_s10 + $0x70] sm:$0xff]   ;;  %v4717_v62 = vld [vmem:[%s4829_s10 + $0x78] sm:$0xff]   ;;  %v4721_v0 = vld [vmem:[%s4829_s10 + $0x100] sm:$0xff]  }
  0x20   : > { %v4716_v61 = vld [vmem:[%s4829_s10 + $0xf0] sm:$0xff]   ;;  %v4718_v63 = vld [vmem:[%s4829_s10 + $0xf8] sm:$0xff]   ;;  %v4722_v1 = vld [vmem:[%s4829_s10 + $0x180] sm:$0xff]  }
  0x21   : > { %4468 = vmatpush3.bf16.msra.mxu0 %v4667_v10  ;;  %v4723_v2 = vld [vmem:[%s4829_s10 + $0x108] sm:$0xff]   ;;  %v4725_v4 = vld [vmem:[%s4829_s10 + $0x110] sm:$0xff]   ;;  %v4727_v6 = vld [vmem:[%s4829_s10 + $0x118] sm:$0xff]  }
  0x22   : > { %4516 = vmatpush3.bf16.msra.mxu1 %v4668_v11  ;;  %4469 = vmatprep.subr.bf16.mxu0 %v4669_v14  ;;  %v4724_v3 = vld [vmem:[%s4829_s10 + $0x188] sm:$0xff]   ;;  %v4726_v5 = vld [vmem:[%s4829_s10 + $0x190] sm:$0xff]   ;;  %v4728_v7 = vld [vmem:[%s4829_s10 + $0x198] sm:$0xff]  }
  0x23   : > { %4517 = vmatprep.subr.bf16.mxu1 %v4670_v15  ;;  %v4729_v8 = vld [vmem:[%s4829_s10 + $0x120] sm:$0xff]   ;;  %v4731_v10 = vld [vmem:[%s4829_s10 + $0x128] sm:$0xff]   ;;  %v4733_v12 = vld [vmem:[%s4829_s10 + $0x130] sm:$0xff]  }
  0x24   : > { %v4730_v9 = vld [vmem:[%s4829_s10 + $0x1a0] sm:$0xff]   ;;  %v4732_v11 = vld [vmem:[%s4829_s10 + $0x1a8] sm:$0xff]   ;;  %v4734_v13 = vld [vmem:[%s4829_s10 + $0x1b0] sm:$0xff]  }
  0x25   : > { %4470 = vmatpush3.bf16.msra.mxu0 %v4669_v14  ;;  %v4735_v14 = vld [vmem:[%s4829_s10 + $0x138] sm:$0xff]  }
  0x26   : > { %4518 = vmatpush3.bf16.msra.mxu1 %v4670_v15  ;;  %4471 = vmatprep.subr.bf16.mxu0 %v4671_v16  ;;  %v4736_v15 = vld [vmem:[%s4829_s10 + $0x1b8] sm:$0xff]  }
  0x27   : > { %4519 = vmatprep.subr.bf16.mxu1 %v4672_v17 }
  0x29   : > { %4472 = vmatpush3.bf16.msra.mxu0 %v4671_v16  ;;  %v4737_v16 = vld [vmem:[%s4829_s10 + $0x140] sm:$0xff]  }
  0x2a   : > { %4520 = vmatpush3.bf16.msra.mxu1 %v4672_v17  ;;  %4553 = vmatprep.subr.bf16.mxu0 %v4677_v19  ;;  %v4738_v17 = vld [vmem:[%s4829_s10 + $0x1c0] sm:$0xff]  }
  0x2b   : > { %4601 = vmatprep.subr.bf16.mxu1 %v4678_v20 }
  0x2c   : > { %4474 = vmatmul.mubr.bf16.vlgmr.msra.gmra.mxu0 %v4675_v18  ;;  %v4739_v18 = vld [vmem:[%s4829_s10 + $0x148] sm:$0xff]  }
  0x2d   : > { %4522 = vmatmul.mubr.bf16.vlgmr.msra.gmra.mxu1 %v4676_v21  ;;  %4554 = vmatpush3.bf16.msra.mxu0 %v4677_v19  ;;  %v4740_v19 = vld [vmem:[%s4829_s10 + $0x1c8] sm:$0xff]   ;;  %v4742_v21 = vld [vmem:[%s4829_s10 + $0x1d0] sm:$0xff]  }
  0x2e   : > { %4602 = vmatpush3.bf16.msra.mxu1 %v4678_v20  ;;  %4477 = vmatprep.mubr.bf16.mxu0 %v4679_v22  ;;  %v4741_v20 = vld [vmem:[%s4829_s10 + $0x150] sm:$0xff]   ;;  %v4743_v22 = vld [vmem:[%s4829_s10 + $0x158] sm:$0xff]  }
  0x2f   : > { %4525 = vmatprep.mubr.bf16.mxu1 %v4680_v23  ;;  %4555 = vmatprep.subr.bf16.mxu0 %v4683_v24  ;;  %v4744_v23 = vld [vmem:[%s4829_s10 + $0x1d8] sm:$0xff]  }
  0x30   : > { %4603 = vmatprep.subr.bf16.mxu1 %v4684_v25 }
  0x31   : > { %4556 = vmatpush3.bf16.msra.mxu0 %v4683_v24  ;;  %v4745_v24 = vld [vmem:[%s4829_s10 + $0x160] sm:$0xff]  }
  0x32   : > { %4604 = vmatpush3.bf16.msra.mxu1 %v4684_v25  ;;  %4557 = vmatprep.subr.bf16.mxu0 %v4689_v27  ;;  %v4746_v25 = vld [vmem:[%s4829_s10 + $0x1e0] sm:$0xff]  }
  0x33   : > { %4605 = vmatprep.subr.bf16.mxu1 %v4690_v28 }
  0x34   : > { %4478 = vmatmul.mubr.bf16.gmra.mxu0 %v4681_v26  ;;  %v4747_v26 = vld [vmem:[%s4829_s10 + $0x168] sm:$0xff]  }
  0x35   : > { %4526 = vmatmul.mubr.bf16.gmra.mxu1 %v4682_v29  ;;  %4481 = vmatprep.mubr.bf16.mxu0 %v4685_v30  ;;  %v4750_v29 = vld [vmem:[%s4829_s10 + $0x1f0] sm:$0xff]   ;;  %v4751_v30 = vld [vmem:[%s4829_s10 + $0x178] sm:$0xff]  }
  0x36   : > { %4529 = vmatprep.mubr.bf16.mxu1 %v4686_v31  ;;  %4558 = vmatpush3.bf16.msra.mxu0 %v4689_v27  ;;  %v4748_v27 = vld [vmem:[%s4829_s10 + $0x1e8] sm:$0xff]   ;;  %v4752_v31 = vld [vmem:[%s4829_s10 + $0x1f8] sm:$0xff]  }
  0x37   : > { %4606 = vmatpush3.bf16.msra.mxu1 %v4690_v28  ;;  %4559 = vmatprep.subr.bf16.mxu0 %v4695_v32  ;;  %v4749_v28 = vld [vmem:[%s4829_s10 + $0x170] sm:$0xff]  }
  0x38   : > { %4607 = vmatprep.subr.bf16.mxu1 %v4696_v33 }
  0x3a   : > { %4560 = vmatpush3.bf16.msra.mxu0 %v4695_v32 }
  0x3b   : > { %4608 = vmatpush3.bf16.msra.mxu1 %v4696_v33  ;;  %4561 = vmatprep.subr.bf16.mxu0 %v4701_v36 }
  0x3c   : > { %4482 = vmatmul.mubr.bf16.gmra.mxu0 %v4687_v34  ;;  %4609 = vmatprep.subr.bf16.mxu1 %v4702_v37 }
  0x3d   : > { %4530 = vmatmul.mubr.bf16.gmra.mxu1 %v4688_v35  ;;  %4485 = vmatprep.mubr.bf16.mxu0 %v4691_v38  ;;  %v4964_v38 = vld [vmem:[%s7583_s2] ss:$0 sm:$0xff] }
  0x3e   : > { %4533 = vmatprep.mubr.bf16.mxu1 %v4692_v39  ;;  %4562 = vmatpush3.bf16.msra.mxu0 %v4701_v36 }
  0x3f   : > { %4610 = vmatpush3.bf16.msra.mxu1 %v4702_v37  ;;  %4563 = vmatprep.subr.bf16.mxu0 %v4707_v40 }
  0x40   : > { %4611 = vmatprep.subr.bf16.mxu1 %v4708_v41 }
  0x42   : > { %4564 = vmatpush3.bf16.msra.mxu0 %v4707_v40 }
  0x43   : > { %4612 = vmatpush3.bf16.msra.mxu1 %v4708_v41  ;;  %4565 = vmatprep.subr.bf16.mxu0 %v4713_v46 }
  0x44   : > { %4486 = vmatmul.mubr.bf16.gmra.mxu0 %v4693_v42  ;;  %4613 = vmatprep.subr.bf16.mxu1 %v4714_v47 }
  0x45   : > { %4534 = vmatmul.mubr.bf16.gmra.mxu1 %v4694_v43  ;;  %4489 = vmatprep.mubr.bf16.mxu0 %v4697_v44 }
  0x46   : > { %4537 = vmatprep.mubr.bf16.mxu1 %v4698_v45  ;;  %4566 = vmatpush3.bf16.msra.mxu0 %v4713_v46 }
  0x47   : > { %4614 = vmatpush3.bf16.msra.mxu1 %v4714_v47  ;;  %4567 = vmatprep.subr.bf16.mxu0 %v4719_v51 }
  0x48   : > { %4615 = vmatprep.subr.bf16.mxu1 %v4720_v52 }
  0x4a   : > { %4568 = vmatpush3.bf16.msra.mxu0 %v4719_v51 }
  0x4b   : > { %4616 = vmatpush3.bf16.msra.mxu1 %v4720_v52 }
  0x4c   : > { %4490 = vmatmul.mubr.bf16.gmra.mxu0 %v4699_v48 }
  0x4d   : > { %4538 = vmatmul.mubr.bf16.gmra.mxu1 %v4700_v49  ;;  %4493 = vmatprep.mubr.bf16.mxu0 %v4703_v50 }
  0x4e   : > { %4541 = vmatprep.mubr.bf16.mxu1 %v4704_v53 }
  0x54   : > { %4494 = vmatmul.mubr.bf16.gmra.mxu0 %v4705_v54 }
  0x55   : > { %4542 = vmatmul.mubr.bf16.gmra.mxu1 %v4706_v55  ;;  %4497 = vmatprep.mubr.bf16.mxu0 %v4709_v56 }
  0x56   : > { %4545 = vmatprep.mubr.bf16.mxu1 %v4710_v57 }
  0x5c   : > { %4498 = vmatmul.mubr.bf16.gmra.mxu0 %v4711_v58 }
  0x5d   : > { %4546 = vmatmul.mubr.bf16.gmra.mxu1 %v4712_v59  ;;  %4501 = vmatprep.mubr.bf16.mxu0 %v4715_v60 }
  0x5e   : > { %4549 = vmatprep.mubr.bf16.mxu1 %v4716_v61 }
  0x64   : > { %4502 = vmatmul.mubr.bf16.gmra.mxu0 %v4717_v62 }
  0x65   : > { %4550 = vmatmul.mubr.bf16.gmra.mxu1 %v4718_v63  ;;  %4569 = vmatprep.mubr.bf16.mxu0 %v4721_v0 }
  0x66   : > { %4617 = vmatprep.mubr.bf16.mxu1 %v4722_v1 }
  0x6c   : > { %4570 = vmatmul.mubr.bf16.vlgmr.msra.gmra.mxu0 %v4723_v2 }
  0x6d   : > { %4618 = vmatmul.mubr.bf16.vlgmr.msra.gmra.mxu1 %v4724_v3  ;;  %4573 = vmatprep.mubr.bf16.mxu0 %v4725_v4 }
  0x6e   : > { %4621 = vmatprep.mubr.bf16.mxu1 %v4726_v5 }
  0x74   : > { %4574 = vmatmul.mubr.bf16.gmra.mxu0 %v4727_v6 }
  0x75   : > { %4622 = vmatmul.mubr.bf16.gmra.mxu1 %v4728_v7  ;;  %4577 = vmatprep.mubr.bf16.mxu0 %v4729_v8 }
  0x76   : > { %4625 = vmatprep.mubr.bf16.mxu1 %v4730_v9 }
  0x7c   : > { %4578 = vmatmul.mubr.bf16.gmra.mxu0 %v4731_v10 }
  0x7d   : > { %4626 = vmatmul.mubr.bf16.gmra.mxu1 %v4732_v11  ;;  %4581 = vmatprep.mubr.bf16.mxu0 %v4733_v12 }
  0x7e   : > { %4629 = vmatprep.mubr.bf16.mxu1 %v4734_v13 }
  0x84   : > { %4582 = vmatmul.mubr.bf16.gmra.mxu0 %v4735_v14 }
  0x85   : > { %4630 = vmatmul.mubr.bf16.gmra.mxu1 %v4736_v15  ;;  %4585 = vmatprep.mubr.bf16.mxu0 %v4737_v16 }
  0x86   : > { %4633 = vmatprep.mubr.bf16.mxu1 %v4738_v17 }
  0x8c   : > { %4586 = vmatmul.mubr.bf16.gmra.mxu0 %v4739_v18 }
  0x8d   : > { %4634 = vmatmul.mubr.bf16.gmra.mxu1 %v4740_v19  ;;  %4589 = vmatprep.mubr.bf16.mxu0 %v4741_v20 }
  0x8e   : > { %4637 = vmatprep.mubr.bf16.mxu1 %v4742_v21 }
  0x94   : > { %4590 = vmatmul.mubr.bf16.gmra.mxu0 %v4743_v22 }
  0x95   : > { %4638 = vmatmul.mubr.bf16.gmra.mxu1 %v4744_v23  ;;  %4593 = vmatprep.mubr.bf16.mxu0 %v4745_v24 }
  0x96   : > { %4641 = vmatprep.mubr.bf16.mxu1 %v4746_v25 }
  0x9c   : > { %4594 = vmatmul.mubr.bf16.gmra.mxu0 %v4747_v26 }
  0x9d   : > { %4642 = vmatmul.mubr.bf16.gmra.mxu1 %v4748_v27  ;;  %4597 = vmatprep.mubr.bf16.mxu0 %v4749_v28 }
  0x9e   : > { %4645 = vmatprep.mubr.bf16.mxu1 %v4750_v29 }
  0xa4   : > { %4598 = vmatmul.mubr.bf16.gmra.mxu0 %v4751_v30 }
  0xa5   : > { %4646 = vmatmul.mubr.bf16.gmra.mxu1 %v4752_v31 }
  0xec   : > { %v4475_v32 = vpop.f32.mrf.mxu0 }
  0xed   : > { %v4523_v33 = vpop.f32.mrf.mxu1  ;;  %v4979_v46 = vadd.f32 %v4475_v32, %v4964_v38 }
  0xee   : > { %v405_v34 = vpop.f32.mrf.mxu0  ;;  %v4984_v49 = vadd.f32 %v4523_v33, %v4964_v38 }
  0xef   : > { %v798_v35 = vpop.f32.mrf.mxu1  ;;  %v4967_v40 = vadd.f32 %v4964_v38, %v405_v34 }
  0xf0   : > { %v4476_v36 = vpop.f32.mrf.mxu0  ;;  %v4973_v43 = vadd.f32 %v4964_v38, %v798_v35 }
  0xf1   : > { %v4524_v37 = vpop.f32.mrf.mxu1  ;;  %v4989_v52 = vadd.f32 %v4476_v36, %v4964_v38 }
  0xf2   : > { %v408_v39 = vpop.f32.mrf.mxu0  ;;  %v4993_v55 = vadd.f32 %v4524_v37, %v4964_v38 }
  0xf3   : > { %v4970_v41 = vadd.f32 %v4964_v38, %v408_v39  ;;  %v801_v42 = vpop.f32.mrf.mxu1 }
  0xf4   : > { %v4976_v44 = vadd.f32 %v4964_v38, %v801_v42  ;;  %v4479_v45 = vpop.f32.mrf.mxu0 }
  0xf5   : > { %v532_v47 = vadd.f32 %v4970_v41, %v4967_v40  ;;  %v4527_v48 = vpop.f32.mrf.mxu1  ;;  %v5013_v6 = vadd.f32 %v4479_v45, %v4964_v38 }
  0xf6   : > { %v925_v50 = vadd.f32 %v4976_v44, %v4973_v43  ;;  %v421_v51 = vpop.f32.mrf.mxu0  ;;  %v5017_v9 = vadd.f32 %v4527_v48, %v4964_v38 }
  0xf7   : > { %v533_v53 = vadd.f32 %v532_v47, %v4979_v46  ;;  %v814_v54 = vpop.f32.mrf.mxu1  ;;  %v4997_v58 = vadd.f32 %v4964_v38, %v421_v51 }
  0xf8   : > { %v926_v56 = vadd.f32 %v925_v50, %v4984_v49  ;;  %v4480_v57 = vpop.f32.mrf.mxu0  ;;  %v5001_v61 = vadd.f32 %v4964_v38, %v814_v54  ;;  %7769 = vst [vmem:[#allocation2_spill] sm:$0xff] %v5017_v9 }
  0xf9   : > { %v534_v59 = vadd.f32 %v533_v53, %v4989_v52  ;;  %v4528_v60 = vpop.f32.mrf.mxu1  ;;  %v5022_v14 = vadd.f32 %v4480_v57, %v4964_v38 }
  0xfa   : > { %v927_v62 = vadd.f32 %v926_v56, %v4993_v55  ;;  %v424_v63 = vpop.f32.mrf.mxu0  ;;  %v5026_v17 = vadd.f32 %v4528_v60, %v4964_v38 }
  0xfb   : > { %v535_v0 = vadd.f32 %v534_v59, %v4997_v58  ;;  %v5006_v1 = vadd.f32 %v4964_v38, %v424_v63  ;;  %v817_v2 = vpop.f32.mrf.mxu1 }
  0xfc   : > { %v928_v3 = vadd.f32 %v927_v62, %v5001_v61  ;;  %v5010_v4 = vadd.f32 %v4964_v38, %v817_v2  ;;  %v4483_v5 = vpop.f32.mrf.mxu0  ;;  %7770 = vst [vmem:[#allocation3_spill] sm:$0xff] %v5026_v17 }
  0xfd   : > { %v536_v7 = vadd.f32 %v535_v0, %v5006_v1  ;;  %v4531_v8 = vpop.f32.mrf.mxu1  ;;  %v5047_v42 = vadd.f32 %v4483_v5, %v4964_v38 }
  0xfe   : > { %v929_v10 = vadd.f32 %v928_v3, %v5010_v4  ;;  %v437_v11 = vpop.f32.mrf.mxu0  ;;  %v5052_v47 = vadd.f32 %v4531_v8, %v4964_v38 }
  0xff   : > { %v537_v12 = vadd.f32 %v536_v7, %v5013_v6  ;;  %v830_v13 = vpop.f32.mrf.mxu1  ;;  %v5031_v23 = vadd.f32 %v4964_v38, %v437_v11 }
 0x100   : > { %v930_v15 = vadd.f32 %v929_v10, %v5017_v9  ;;  %v4484_v16 = vpop.f32.mrf.mxu0  ;;  %v5034_v25 = vadd.f32 %v4964_v38, %v830_v13  ;;  %7773 = vst [vmem:[#allocation6_spill] sm:$0xff] %v5052_v47 }
 0x101   : > { %v4532_v18 = vpop.f32.mrf.mxu1  ;;  %v538_v19 = vadd.f32 %v537_v12, %v5022_v14  ;;  %v5059_v56 = vadd.f32 %v4484_v16, %v4964_v38 }
 0x102   : > { %v440_v20 = vpop.f32.mrf.mxu0  ;;  %v931_v21 = vadd.f32 %v930_v15, %v5026_v17  ;;  %7771 = vst [vmem:[#allocation4_spill] sm:$0xff] %v5034_v25  ;;  %v5064_v59 = vadd.f32 %v4532_v18, %v4964_v38 }
 0x103   : > { %v833_v22 = vpop.f32.mrf.mxu1  ;;  %v539_v27 = vadd.f32 %v538_v19, %v5031_v23  ;;  %v5038_v28 = vadd.f32 %v4964_v38, %v440_v20 }
 0x104   : > { %v4487_v24 = vpop.f32.mrf.mxu0  ;;  %v932_v30 = vadd.f32 %v931_v21, %v5034_v25  ;;  %v5042_v31 = vadd.f32 %v4964_v38, %v833_v22  ;;  %7774 = vst [vmem:[#allocation7_spill] sm:$0xff] %v5064_v59 }
 0x105   : > { %v4535_v26 = vpop.f32.mrf.mxu1  ;;  %v540_v35 = vadd.f32 %v539_v27, %v5038_v28 }
 0x106   : > { %v453_v29 = vpop.f32.mrf.mxu0  ;;  %7772 = vst [vmem:[#allocation5_spill] sm:$0xff] %v5042_v31  ;;  %v933_v37 = vadd.f32 %v932_v30, %v5042_v31 }
 0x107   : > { %v846_v32 = vpop.f32.mrf.mxu1  ;;  %v541_v50 = vadd.f32 %v540_v35, %v5047_v42  ;;  %v5071_v3 = vadd.f32 %v4964_v38, %v453_v29  ;;  %v5097_v29 = vadd.f32 %v4487_v24, %v4964_v38 }
 0x108   : > { %v4488_v33 = vpop.f32.mrf.mxu0  ;;  %v934_v53 = vadd.f32 %v933_v37, %v5052_v47  ;;  %v5076_v7 = vadd.f32 %v4964_v38, %v846_v32  ;;  %v5102_v32 = vadd.f32 %v4535_v26, %v4964_v38 }
 0x109   : > { %v4536_v34 = vpop.f32.mrf.mxu1  ;;  %v542_v62 = vadd.f32 %v541_v50, %v5059_v56  ;;  %7778 = vst [vmem:[#allocation11_spill] sm:$0xff] %v5097_v29 }
 0x10a   : > { %v456_v36 = vpop.f32.mrf.mxu0  ;;  %v935_v0 = vadd.f32 %v934_v53, %v5064_v59  ;;  %7775 = vst [vmem:[#allocation8_spill] sm:$0xff] %v5076_v7  ;;  %7779 = vst [vmem:[#allocation12_spill] sm:$0xff] %v5102_v32  ;;  %v5113_v53 = vadd.f32 %v4488_v33, %v4964_v38 }
 0x10b   : > { %v849_v39 = vpop.f32.mrf.mxu1  ;;  %v543_v10 = vadd.f32 %v542_v62, %v5071_v3  ;;  %v5082_v11 = vadd.f32 %v4964_v38, %v456_v36  ;;  %v5118_v62 = vadd.f32 %v4536_v34, %v4964_v38 }
 0x10c   : > { %v5049_v45 = vpop.f32.mrf.mxu0  ;;  %v936_v13 = vadd.f32 %v935_v0, %v5076_v7  ;;  %v5086_v15 = vadd.f32 %v4964_v38, %v849_v39  ;;  %7780 = vst [vmem:[#allocation13_spill] sm:$0xff] %v5113_v53 }
 0x10d   : > { %v5054_v48 = vpop.f32.mrf.mxu1  ;;  %7776 = vst [vmem:[#allocation9_spill] sm:$0xff] %v5082_v11  ;;  %v544_v20 = vadd.f32 %v543_v10, %v5082_v11  ;;  %7781 = vst [vmem:[#allocation14_spill] sm:$0xff] %v5118_v62 }
 0x10e   : > { %v469_v51 = vpop.f32.mrf.mxu0  ;;  %7777 = vst [vmem:[#allocation10_spill] sm:$0xff] %v5086_v15  ;;  %v937_v22 = vadd.f32 %v936_v13, %v5086_v15 }
 0x10f   : > { %v862_v54 = vpop.f32.mrf.mxu1  ;;  %v545_v36 = vadd.f32 %v544_v20, %v5097_v29 }
 0x110   : > { %v5061_v57 = vpop.f32.mrf.mxu0  ;;  %v938_v39 = vadd.f32 %v937_v22, %v5102_v32  ;;  %v5129_v22 = vadd.f32 %v4964_v38, %v469_v51  ;;  %v5134_v32 = vadd.f32 %v4964_v38, %v862_v54 }
 0x111   : > { %v5066_v60 = vpop.f32.mrf.mxu1  ;;  %v546_v0 = vadd.f32 %v545_v36, %v5113_v53 }
 0x112   : > { %v472_v63 = vpop.f32.mrf.mxu0  ;;  %v939_v13 = vadd.f32 %v938_v39, %v5118_v62  ;;  %7782 = vst [vmem:[#allocation15_spill] sm:$0xff] %v5129_v22  ;;  %7783 = vst [vmem:[#allocation16_spill] sm:$0xff] %v5134_v32 }
 0x113   : > { %v865_v2 = vpop.f32.mrf.mxu1  ;;  %v547_v15 = vadd.f32 %v546_v0, %v5129_v22  ;;  %v5140_v36 = vadd.f32 %v4964_v38, %v472_v63 }
 0x114   : > { %v5073_v5 = vpop.f32.mrf.mxu0  ;;  %v940_v39 = vadd.f32 %v939_v13, %v5134_v32  ;;  %v5146_v62 = vadd.f32 %v4964_v38, %v865_v2  ;;  %v5162_v13 = vadd.f32 %v5049_v45, %v4964_v38  ;;  %v5166_v32 = vadd.f32 %v5054_v48, %v4964_v38 }
 0x115   : > { %v5078_v8 = vpop.f32.mrf.mxu1  ;;  %7784 = vst [vmem:[#allocation17_spill] sm:$0xff] %v5140_v36  ;;  %v548_v53 = vadd.f32 %v547_v15, %v5140_v36  ;;  %v5176_v45 = vadd.f32 %v5066_v60, %v4964_v38 }
 0x116   : > { %v485_v12 = vpop.f32.mrf.mxu0  ;;  %7785 = vst [vmem:[#allocation18_spill] sm:$0xff] %v5146_v62  ;;  %v941_v63 = vadd.f32 %v940_v39, %v5146_v62  ;;  %7786 = vst [vmem:[#allocation19_spill] sm:$0xff] %v5162_v13  ;;  %v5172_v39 = vadd.f32 %v5061_v57, %v4964_v38 }
 0x117   : > { %v878_v16 = vpop.f32.mrf.mxu1  ;;  %7787 = vst [vmem:[#allocation20_spill] sm:$0xff] %v5166_v32  ;;  %v549_v31 = vadd.f32 %v548_v53, %v5162_v13  ;;  %7789 = vst [vmem:[#allocation22_spill] sm:$0xff] %v5176_v45  ;;  %v5187_v57 = vadd.f32 %v4964_v38, %v485_v12 }
 0x118   : > { %v5088_v18 = vpop.f32.mrf.mxu0  ;;  %v942_v15 = vadd.f32 %v941_v63, %v5166_v32  ;;  %7788 = vst [vmem:[#allocation21_spill] sm:$0xff] %v5172_v39 }
 0x119   : > { %v5090_v19 = vpop.f32.mrf.mxu1  ;;  %v550_v48 = vadd.f32 %v549_v31, %v5172_v39  ;;  %7792 = vst [vmem:[#allocation25_spill] sm:$0xff] %v5187_v57  ;;  %v5196_v39 = vadd.f32 %v4964_v38, %v878_v16 }
 0x11a   : > { %v488_v21 = vpop.f32.mrf.mxu0  ;;  %v943_v11 = vadd.f32 %v942_v15, %v5176_v45 }
 0x11b   : > { %v5094_v27 = vpop.f32.mrf.mxu1  ;;  %7795 = vst [vmem:[#allocation28_spill] sm:$0xff] %v5196_v39  ;;  %v551_v12 = vadd.f32 %v550_v48, %v5187_v57  ;;  %v5205_v45 = vadd.f32 %v4964_v38, %v488_v21 }
 0x11c   : > { %v5099_v30 = vpop.f32.mrf.mxu0  ;;  %v944_v9 = vadd.f32 %v943_v11, %v5196_v39 }
 0x11d   : > { %v5104_v35 = vpop.f32.mrf.mxu1 }
 0x11e   : > { %v5107_v37 = vpop.f32.mrf.mxu0 }
 0x11f   : > { %v5110_v50 = vpop.f32.mrf.mxu1 }
 0x120   : > { %v5115_v24 = vpop.f32.mrf.mxu0 }
 0x121   : > { %v5120_v26 = vpop.f32.mrf.mxu1 }
 0x122   : > { %v5123_v10 = vpop.f32.mrf.mxu0 }
 0x123   : > { %v5126_v20 = vpop.f32.mrf.mxu1 }
 0x124   : > { %v5131_v33 = vpop.f32.mrf.mxu0 }
 0x125   : > { %v5136_v34 = vpop.f32.mrf.mxu1 }
 0x126   : > { %v5142_v7 = vpop.f32.mrf.mxu0 }
 0x127   : > { %v5148_v51 = vpop.f32.mrf.mxu1 }
 0x128   : > { %v5150_v59 = vpop.f32.mrf.mxu0 }
 0x129   : > { %v5152_v54 = vpop.f32.mrf.mxu1 }
 0x12a   : > { %v5155_v47 = vpop.f32.mrf.mxu0 }
 0x12b   : > { %v5158_v0 = vpop.f32.mrf.mxu1 }
 0x12c   : > { %v4571_v2 = vpop.f32.mrf.mxu0 }
 0x12d   : > { %v4619_v22 = vpop.f32.mrf.mxu1 }
 0x12e   : > { %v1191_v29 = vpop.f32.mrf.mxu0 }
 0x12f   : > { %v1584_v36 = vpop.f32.mrf.mxu1  ;;  %v5181_v53 = vadd.f32 %v4964_v38, %v1191_v29  ;;  %v5199_v29 = vadd.f32 %v4571_v2, %v4964_v38  ;;  %v5215_v2 = vadd.f32 %v4964_v38, %v5094_v27  ;;  %v552_v27 = vadd.f32 %v551_v12, %v5205_v45 }
 0x130   : > { %v4572_v62 = vpop.f32.mrf.mxu0  ;;  %v5190_v13 = vadd.f32 %v4964_v38, %v1584_v36  ;;  %v5208_v36 = vadd.f32 %v4619_v22, %v4964_v38 }
 0x131   : > { %v4620_v25 = vpop.f32.mrf.mxu1  ;;  %7790 = vst [vmem:[#allocation23_spill] sm:$0xff] %v5181_v53  ;;  %7796 = vst [vmem:[#allocation29_spill] sm:$0xff] %v5199_v29 }
 0x132   : > { %v1194_v17 = vpop.f32.mrf.mxu0  ;;  %7793 = vst [vmem:[#allocation26_spill] sm:$0xff] %v5190_v13  ;;  %7797 = vst [vmem:[#allocation30_spill] sm:$0xff] %v5208_v36  ;;  %v5222_v57 = vadd.f32 %v4620_v25, %v4964_v38  ;;  %v945_v25 = vadd.f32 %v944_v9, %v5215_v2 }
 0x133   : > { %v5184_v63 = vadd.f32 %v4964_v38, %v1194_v17  ;;  %v1587_v32 = vpop.f32.mrf.mxu1  ;;  %7798 = vst [vmem:[#allocation31_spill] sm:$0xff] %v5215_v2 }
 0x134   : > { %v5193_v60 = vadd.f32 %v4964_v38, %v1587_v32  ;;  %v4575_v31 = vpop.f32.mrf.mxu0  ;;  %7799 = vst [vmem:[#allocation32_spill] sm:$0xff] %v5222_v57 }
 0x135   : > { %7791 = vst [vmem:[#allocation24_spill] sm:$0xff] %v5184_v63  ;;  %v1318_v17 = vadd.f32 %v5184_v63, %v5181_v53  ;;  %v4623_v15 = vpop.f32.mrf.mxu1  ;;  %v5218_v63 = vadd.f32 %v4572_v62, %v4964_v38  ;;  %v5252_v9 = vadd.f32 %v4575_v31, %v4964_v38 }
 0x136   : > { %7794 = vst [vmem:[#allocation27_spill] sm:$0xff] %v5193_v60  ;;  %v1711_v32 = vadd.f32 %v5193_v60, %v5190_v13  ;;  %v1207_v16 = vpop.f32.mrf.mxu0 }
 0x137   : > { %v1319_v48 = vadd.f32 %v1318_v17, %v5199_v29  ;;  %v1600_v21 = vpop.f32.mrf.mxu1  ;;  %v5226_v60 = vadd.f32 %v4964_v38, %v1207_v16 }
 0x138   : > { %v1712_v22 = vadd.f32 %v1711_v32, %v5208_v36  ;;  %v4576_v53 = vpop.f32.mrf.mxu0  ;;  %v5231_v62 = vadd.f32 %v4964_v38, %v1600_v21 }
 0x139   : > { %v1320_v11 = vadd.f32 %v1319_v48, %v5218_v63  ;;  %v4624_v13 = vpop.f32.mrf.mxu1  ;;  %v5241_v48 = vadd.f32 %v5073_v5, %v4964_v38  ;;  %v5257_v5 = vadd.f32 %v4623_v15, %v4964_v38  ;;  %v5262_v2 = vadd.f32 %v4576_v53, %v4964_v38 }
 0x13a   : > { %7800 = vst [vmem:[#allocation33_spill] sm:$0xff] %v5231_v62  ;;  %v1713_v17 = vadd.f32 %v1712_v22, %v5222_v57  ;;  %v1210_v39 = vpop.f32.mrf.mxu0  ;;  %v5249_v22 = vadd.f32 %v5078_v8, %v4964_v38 }
 0x13b   : > { %v1321_v29 = vadd.f32 %v1320_v11, %v5226_v60  ;;  %v5237_v32 = vadd.f32 %v4964_v38, %v1210_v39  ;;  %v1603_v16 = vpop.f32.mrf.mxu1  ;;  %7801 = vst [vmem:[#allocation34_spill] sm:$0xff] %v5241_v48  ;;  %v553_v57 = vadd.f32 %v552_v27, %v5241_v48  ;;  %7804 = vst [vmem:[#allocation37_spill] sm:$0xff] %v5257_v5 }
 0x13c   : > { %v1714_v12 = vadd.f32 %v1713_v17, %v5231_v62  ;;  %v5245_v21 = vadd.f32 %v4964_v38, %v1603_v16  ;;  %v4579_v36 = vpop.f32.mrf.mxu0  ;;  %7803 = vst [vmem:[#allocation36_spill] sm:$0xff] %v5249_v22  ;;  %v946_v62 = vadd.f32 %v945_v25, %v5249_v22  ;;  %v5270_v27 = vadd.f32 %v4624_v13, %v4964_v38 }
 0x13d   : > { %v1322_v39 = vadd.f32 %v1321_v29, %v5237_v32  ;;  %v4627_v11 = vpop.f32.mrf.mxu1  ;;  %v5267_v29 = vadd.f32 %v5088_v18, %v4964_v38 }
 0x13e   : > { %7802 = vst [vmem:[#allocation35_spill] sm:$0xff] %v5245_v21  ;;  %v1715_v17 = vadd.f32 %v1714_v12, %v5245_v21  ;;  %v1223_v16 = vpop.f32.mrf.mxu0  ;;  %7806 = vst [vmem:[#allocation39_spill] sm:$0xff] %v5270_v27  ;;  %v5275_v12 = vadd.f32 %v5090_v19, %v4964_v38 }
 0x13f   : > { %v1323_v8 = vadd.f32 %v1322_v39, %v5252_v9  ;;  %v1616_v31 = vpop.f32.mrf.mxu1  ;;  %7805 = vst [vmem:[#allocation38_spill] sm:$0xff] %v5267_v29  ;;  %v5278_v53 = vadd.f32 %v4964_v38, %v1223_v16  ;;  %v554_v21 = vadd.f32 %v553_v57, %v5267_v29 }
 0x140   : > { %v1716_v15 = vadd.f32 %v1715_v17, %v5257_v5  ;;  %v4580_v48 = vpop.f32.mrf.mxu0  ;;  %7807 = vst [vmem:[#allocation40_spill] sm:$0xff] %v5275_v12  ;;  %v5283_v18 = vadd.f32 %v4964_v38, %v1616_v31  ;;  %v947_v17 = vadd.f32 %v946_v62, %v5275_v12  ;;  %v5304_v62 = vadd.f32 %v4579_v36, %v4964_v38 }
 0x141   : > { %v1324_v25 = vadd.f32 %v1323_v8, %v5262_v2  ;;  %v4628_v39 = vpop.f32.mrf.mxu1  ;;  %v5293_v8 = vadd.f32 %v4964_v38, %v5107_v37  ;;  %v5310_v37 = vadd.f32 %v4964_v38, %v5123_v10  ;;  %v5319_v36 = vadd.f32 %v4964_v38, %v5126_v20 }
 0x142   : > { %7808 = vst [vmem:[#allocation41_spill] sm:$0xff] %v5283_v18  ;;  %v1717_v13 = vadd.f32 %v1716_v15, %v5270_v27  ;;  %v1226_v22 = vpop.f32.mrf.mxu0  ;;  %v5301_v15 = vadd.f32 %v4964_v38, %v5110_v50  ;;  %7812 = vst [vmem:[#allocation45_spill] sm:$0xff] %v5304_v62  ;;  %v5326_v10 = vadd.f32 %v4628_v39, %v4964_v38 }
 0x143   : > { %v1325_v5 = vadd.f32 %v1324_v25, %v5278_v53  ;;  %v5289_v19 = vadd.f32 %v4964_v38, %v1226_v22  ;;  %v1619_v16 = vpop.f32.mrf.mxu1  ;;  %7809 = vst [vmem:[#allocation42_spill] sm:$0xff] %v5293_v8  ;;  %v555_v27 = vadd.f32 %v554_v21, %v5293_v8  ;;  %7814 = vst [vmem:[#allocation47_spill] sm:$0xff] %v5319_v36 }
 0x144   : > { %v1718_v57 = vadd.f32 %v1717_v13, %v5283_v18  ;;  %v5297_v31 = vadd.f32 %v4964_v38, %v1619_v16  ;;  %v4583_v29 = vpop.f32.mrf.mxu0  ;;  %7811 = vst [vmem:[#allocation44_spill] sm:$0xff] %v5301_v15  ;;  %v5313_v13 = vadd.f32 %v4627_v11, %v4964_v38  ;;  %v948_v50 = vadd.f32 %v947_v17, %v5301_v15 }
 0x145   : > { %v1326_v22 = vadd.f32 %v1325_v5, %v5289_v19  ;;  %v4631_v25 = vpop.f32.mrf.mxu1  ;;  %v5322_v5 = vadd.f32 %v4580_v48, %v4964_v38  ;;  %7815 = vst [vmem:[#allocation48_spill] sm:$0xff] %v5326_v10  ;;  %v556_v20 = vadd.f32 %v555_v27, %v5310_v37 }
 0x146   : > { %7810 = vst [vmem:[#allocation43_spill] sm:$0xff] %v5297_v31  ;;  %7813 = vst [vmem:[#allocation46_spill] sm:$0xff] %v5313_v13  ;;  %v1719_v16 = vadd.f32 %v1718_v57, %v5297_v31  ;;  %v1239_v18 = vpop.f32.mrf.mxu0  ;;  %v949_v39 = vadd.f32 %v948_v50, %v5319_v36  ;;  %v5356_v50 = vadd.f32 %v4583_v29, %v4964_v38 }
 0x147   : > { %v1327_v21 = vadd.f32 %v1326_v22, %v5304_v62  ;;  %v1632_v12 = vpop.f32.mrf.mxu1  ;;  %v5330_v57 = vadd.f32 %v4964_v38, %v1239_v18 }
 0x148   : > { %v1720_v11 = vadd.f32 %v1719_v16, %v5313_v13  ;;  %v4584_v8 = vpop.f32.mrf.mxu0  ;;  %v5335_v48 = vadd.f32 %v4964_v38, %v1632_v12 }
 0x149   : > { %v1328_v17 = vadd.f32 %v1327_v21, %v5322_v5  ;;  %v4632_v31 = vpop.f32.mrf.mxu1  ;;  %v5345_v21 = vadd.f32 %v5099_v30, %v4964_v38  ;;  %v5361_v30 = vadd.f32 %v4631_v25, %v4964_v38  ;;  %v5366_v36 = vadd.f32 %v4584_v8, %v4964_v38 }
 0x14a   : > { %7816 = vst [vmem:[#allocation49_spill] sm:$0xff] %v5335_v48  ;;  %v1721_v22 = vadd.f32 %v1720_v11, %v5326_v10  ;;  %v1242_v15 = vpop.f32.mrf.mxu0  ;;  %v5353_v11 = vadd.f32 %v5104_v35, %v4964_v38 }
 0x14b   : > { %v1329_v62 = vadd.f32 %v1328_v17, %v5330_v57  ;;  %v5341_v16 = vadd.f32 %v4964_v38, %v1242_v15  ;;  %v1635_v18 = vpop.f32.mrf.mxu1  ;;  %v557_v10 = vadd.f32 %v556_v20, %v5345_v21  ;;  %7820 = vst [vmem:[#allocation53_spill] sm:$0xff] %v5361_v30  ;;  %7821 = vst [vmem:[#allocation54_spill] sm:$0xff] %v5366_v36 }
 0x14c   : > { %v1722_v27 = vadd.f32 %v1721_v22, %v5335_v48  ;;  %v5349_v12 = vadd.f32 %v4964_v38, %v1635_v18  ;;  %v4587_v13 = vpop.f32.mrf.mxu0  ;;  %7819 = vst [vmem:[#allocation52_spill] sm:$0xff] %v5353_v11  ;;  %v950_v48 = vadd.f32 %v949_v39, %v5353_v11  ;;  %v5374_v20 = vadd.f32 %v4632_v31, %v4964_v38 }
 0x14d   : > { %7817 = vst [vmem:[#allocation50_spill] sm:$0xff] %v5341_v16  ;;  %v1330_v15 = vadd.f32 %v1329_v62, %v5341_v16  ;;  %v4635_v17 = vpop.f32.mrf.mxu1  ;;  %v5371_v62 = vadd.f32 %v5115_v24, %v4964_v38 }
 0x14e   : > { %7818 = vst [vmem:[#allocation51_spill] sm:$0xff] %v5349_v12  ;;  %v1723_v22 = vadd.f32 %v1722_v27, %v5349_v12  ;;  %v1255_v18 = vpop.f32.mrf.mxu0  ;;  %7822 = vst [vmem:[#allocation55_spill] sm:$0xff] %v5374_v20  ;;  %v5379_v27 = vadd.f32 %v5120_v26, %v4964_v38 }
 0x14f   : > { %v1331_v35 = vadd.f32 %v1330_v15, %v5356_v50  ;;  %v1648_v29 = vpop.f32.mrf.mxu1  ;;  %v5382_v8 = vadd.f32 %v4964_v38, %v1255_v18  ;;  %v558_v12 = vadd.f32 %v557_v10, %v5371_v62 }
 0x150   : > { %v1724_v25 = vadd.f32 %v1723_v22, %v5361_v30  ;;  %v4588_v16 = vpop.f32.mrf.mxu0  ;;  %7823 = vst [vmem:[#allocation56_spill] sm:$0xff] %v5379_v27  ;;  %v5387_v24 = vadd.f32 %v4964_v38, %v1648_v29  ;;  %v951_v22 = vadd.f32 %v950_v48, %v5379_v27  ;;  %v5408_v48 = vadd.f32 %v4587_v13, %v4964_v38 }
 0x151   : > { %v1332_v39 = vadd.f32 %v1331_v35, %v5366_v36  ;;  %v4636_v15 = vpop.f32.mrf.mxu1  ;;  %v5397_v35 = vadd.f32 %v4964_v38, %v5142_v7  ;;  %v5414_v7 = vadd.f32 %v4964_v38, %v5155_v47  ;;  %v5423_v13 = vadd.f32 %v4964_v38, %v5158_v0 }
 0x152   : > { %7824 = vst [vmem:[#allocation57_spill] sm:$0xff] %v5387_v24  ;;  %v1725_v31 = vadd.f32 %v1724_v25, %v5374_v20  ;;  %v1258_v11 = vpop.f32.mrf.mxu0  ;;  %v5405_v25 = vadd.f32 %v4964_v38, %v5148_v51  ;;  %7828 = vst [vmem:[#allocation61_spill] sm:$0xff] %v5408_v48  ;;  %v5430_v47 = vadd.f32 %v4636_v15, %v4964_v38 }
 0x153   : > { %v1333_v30 = vadd.f32 %v1332_v39, %v5382_v8  ;;  %v5393_v26 = vadd.f32 %v4964_v38, %v1258_v11  ;;  %v1651_v18 = vpop.f32.mrf.mxu1  ;;  %v559_v20 = vadd.f32 %v558_v12, %v5397_v35  ;;  %7829 = vst [vmem:[#allocation62_spill] sm:$0xff] %v5414_v7  ;;  %7831 = vst [vmem:[#allocation64_spill] sm:$0xff] %v5423_v13 }
 0x154   : > { %v1726_v10 = vadd.f32 %v1725_v31, %v5387_v24  ;;  %v5401_v29 = vadd.f32 %v4964_v38, %v1651_v18  ;;  %v4591_v36 = vpop.f32.mrf.mxu0  ;;  %7827 = vst [vmem:[#allocation60_spill] sm:$0xff] %v5405_v25  ;;  %v5417_v31 = vadd.f32 %v4635_v17, %v4964_v38  ;;  %v952_v51 = vadd.f32 %v951_v22, %v5405_v25 }
 0x155   : > { %7825 = vst [vmem:[#allocation58_spill] sm:$0xff] %v5393_v26  ;;  %v1334_v11 = vadd.f32 %v1333_v30, %v5393_v26  ;;  %v4639_v39 = vpop.f32.mrf.mxu1  ;;  %v5426_v30 = vadd.f32 %v4588_v16, %v4964_v38  ;;  %7832 = vst [vmem:[#allocation65_spill] sm:$0xff] %v5430_v47 }
 0x156   : > { %7826 = vst [vmem:[#allocation59_spill] sm:$0xff] %v5401_v29  ;;  %7830 = vst [vmem:[#allocation63_spill] sm:$0xff] %v5417_v31  ;;  %v1727_v18 = vadd.f32 %v1726_v10, %v5401_v29  ;;  %v1271_v24 = vpop.f32.mrf.mxu0  ;;  %v953_v15 = vadd.f32 %v952_v51, %v5423_v13  ;;  %v5460_v51 = vadd.f32 %v4591_v36, %v4964_v38 }
 0x157   : > { %v1335_v12 = vadd.f32 %v1334_v11, %v5408_v48  ;;  %v1664_v27 = vpop.f32.mrf.mxu1  ;;  %v5434_v10 = vadd.f32 %v4964_v38, %v1271_v24  ;;  %v560_v11 = vadd.f32 %v559_v20, %v5414_v7  ;;  %v5457_v20 = vadd.f32 %v5136_v34, %v4964_v38 }
 0x158   : > { %v1728_v17 = vadd.f32 %v1727_v18, %v5417_v31  ;;  %v4592_v26 = vpop.f32.mrf.mxu0  ;;  %v5438_v0 = vadd.f32 %v4964_v38, %v1664_v27  ;;  %7838 = vst [vmem:[#allocation71_spill] sm:$0xff] %v5460_v51 }
 0x159   : > { %v1336_v22 = vadd.f32 %v1335_v12, %v5426_v30  ;;  %v4640_v29 = vpop.f32.mrf.mxu1  ;;  %7837 = vst [vmem:[#allocation70_spill] sm:$0xff] %v5457_v20  ;;  %v5470_v13 = vadd.f32 %v4592_v26, %v4964_v38 }
 0x15a   : > { %7833 = vst [vmem:[#allocation66_spill] sm:$0xff] %v5438_v0  ;;  %v1729_v16 = vadd.f32 %v1728_v17, %v5430_v47  ;;  %v1274_v25 = vpop.f32.mrf.mxu0  ;;  %v5453_v17 = vadd.f32 %v5131_v33, %v4964_v38  ;;  %v954_v33 = vadd.f32 %v953_v15, %v5457_v20  ;;  %v5474_v7 = vadd.f32 %v4640_v29, %v4964_v38 }
 0x15b   : > { %v1337_v48 = vadd.f32 %v1336_v22, %v5434_v10  ;;  %v5445_v18 = vadd.f32 %v4964_v38, %v1274_v25  ;;  %v1667_v24 = vpop.f32.mrf.mxu1  ;;  %7840 = vst [vmem:[#allocation73_spill] sm:$0xff] %v5470_v13 }
 0x15c   : > { %v1730_v31 = vadd.f32 %v1729_v16, %v5438_v0  ;;  %v5449_v12 = vadd.f32 %v4964_v38, %v1667_v24  ;;  %v4595_v27 = vpop.f32.mrf.mxu0  ;;  %7836 = vst [vmem:[#allocation69_spill] sm:$0xff] %v5453_v17  ;;  %v5464_v16 = vadd.f32 %v4639_v39, %v4964_v38  ;;  %v561_v47 = vadd.f32 %v560_v11, %v5453_v17 }
 0x15d   : > { %7834 = vst [vmem:[#allocation67_spill] sm:$0xff] %v5445_v18  ;;  %v1338_v25 = vadd.f32 %v1337_v48, %v5445_v18  ;;  %v4643_v22 = vpop.f32.mrf.mxu1  ;;  %7841 = vst [vmem:[#allocation74_spill] sm:$0xff] %v5474_v7  ;;  %v5483_v11 = vadd.f32 %v5152_v54, %v4964_v38 }
 0x15e   : > { %7835 = vst [vmem:[#allocation68_spill] sm:$0xff] %v5449_v12  ;;  %7839 = vst [vmem:[#allocation72_spill] sm:$0xff] %v5464_v16  ;;  %v1731_v24 = vadd.f32 %v1730_v31, %v5449_v12  ;;  %v1287_v0 = vpop.f32.mrf.mxu0  ;;  %v5479_v31 = vadd.f32 %v5150_v59, %v4964_v38 }
 0x15f   : > { %v1339_v34 = vadd.f32 %v1338_v25, %v5460_v51  ;;  %v1680_v36 = vpop.f32.mrf.mxu1  ;;  %7843 = vst [vmem:[#allocation76_spill] sm:$0xff] %v5483_v11  ;;  %v5486_v26 = vadd.f32 %v4964_v38, %v1287_v0  ;;  %v955_v59 = vadd.f32 %v954_v33, %v5483_v11  ;;  %v5508_v33 = vadd.f32 %v4643_v22, %v4964_v38 }
 0x160   : > { %v1732_v48 = vadd.f32 %v1731_v24, %v5464_v16  ;;  %v4596_v39 = vpop.f32.mrf.mxu0  ;;  %7842 = vst [vmem:[#allocation75_spill] sm:$0xff] %v5479_v31  ;;  %v5490_v29 = vadd.f32 %v4964_v38, %v1680_v36  ;;  %v562_v12 = vadd.f32 %v561_v47, %v5479_v31 }
 0x161   : > { %7844 = vst [vmem:[#allocation77_spill] sm:$0xff] %v5486_v26  ;;  %v1340_v15 = vadd.f32 %v1339_v34, %v5470_v13  ;;  %v4644_v25 = vpop.f32.mrf.mxu1  ;;  %v5504_v13 = vadd.f32 %v4595_v27, %v4964_v38  ;;  %7849 = vst [vmem:[#allocation82_spill] sm:$0xff] %v5508_v33  ;;  %v956_v11 = vrot.slane %v955_v59, 4 }
 0x162   : > { %7845 = vst [vmem:[#allocation78_spill] sm:$0xff] %v5490_v29  ;;  %v1733_v24 = vadd.f32 %v1732_v48, %v5474_v7  ;;  %v1290_v16 = vpop.f32.mrf.mxu0  ;;  %v563_v7 = vrot.slane %v562_v12, 4  ;;  %v5516_v27 = vadd.f32 %v4644_v25, %v4964_v38 }
 0x163   : > { %v1341_v20 = vadd.f32 %v1340_v15, %v5486_v26  ;;  %v5497_v54 = vadd.f32 %v4964_v38, %v1290_v16  ;;  %v1683_v0 = vpop.f32.mrf.mxu1  ;;  %7848 = vst [vmem:[#allocation81_spill] sm:$0xff] %v5504_v13 }
 0x164   : > { %v1734_v17 = vadd.f32 %v1733_v24, %v5490_v29  ;;  %v5501_v34 = vadd.f32 %v4964_v38, %v1683_v0  ;;  %v4599_v36 = vpop.f32.mrf.mxu0  ;;  %v5512_v24 = vadd.f32 %v4596_v39, %v4964_v38  ;;  %7851 = vst [vmem:[#allocation84_spill] sm:$0xff] %v5516_v27 }
 0x165   : > { %7846 = vst [vmem:[#allocation79_spill] sm:$0xff] %v5497_v54  ;;  %v1342_v48 = vadd.f32 %v1341_v20, %v5497_v54  ;;  %v4647_v47 = vpop.f32.mrf.mxu1 }
 0x166   : > { %7847 = vst [vmem:[#allocation80_spill] sm:$0xff] %v5501_v34  ;;  %v1735_v15 = vadd.f32 %v1734_v17, %v5501_v34  ;;  %v1303_v16 = vpop.f32.mrf.mxu0  ;;  %7850 = vst [vmem:[#allocation83_spill] sm:$0xff] %v5512_v24 }
 0x167   : > { %v1343_v0 = vadd.f32 %v1342_v48, %v5504_v13  ;;  %v1696_v29 = vpop.f32.mrf.mxu1  ;;  %v5520_v22 = vadd.f32 %v4964_v38, %v1303_v16  ;;  %v564_v48 = vadd.f32 %v563_v7, %v562_v12  ;;  %v957_v13 = vadd.f32 %v956_v11, %v955_v59 }
 0x168   : > { %v1736_v20 = vadd.f32 %v1735_v15, %v5508_v33  ;;  %v4600_v31 = vpop.f32.mrf.mxu0  ;;  %v5524_v54 = vadd.f32 %v4964_v38, %v1696_v29 }
 0x169   : > { %7852 = vst [vmem:[#allocation85_spill] sm:$0xff] %v5520_v22  ;;  %v1344_v17 = vadd.f32 %v1343_v0, %v5512_v24  ;;  %v4648_v34 = vpop.f32.mrf.mxu1  ;;  %v5536_v0 = vadd.f32 %v4599_v36, %v4964_v38  ;;  %v565_v12 = vrot.slane %v564_v48, 2  ;;  %v958_v11 = vrot.slane %v957_v13, 2 }
 0x16a   : > { %7853 = vst [vmem:[#allocation86_spill] sm:$0xff] %v5524_v54  ;;  %v1737_v39 = vadd.f32 %v1736_v20, %v5516_v27  ;;  %v1306_v26 = vpop.f32.mrf.mxu0  ;;  %v5540_v20 = vadd.f32 %v4647_v47, %v4964_v38 }
 0x16b   : > { %v1345_v25 = vadd.f32 %v1344_v17, %v5520_v22  ;;  %v5529_v51 = vadd.f32 %v4964_v38, %v1306_v26  ;;  %v1699_v15 = vpop.f32.mrf.mxu1  ;;  %7856 = vst [vmem:[#allocation89_spill] sm:$0xff] %v5536_v0  ;;  %v5544_v26 = vadd.f32 %v4600_v31, %v4964_v38  ;;  %v5548_v17 = vadd.f32 %v4648_v34, %v4964_v38 }
 0x16c   : > { %v1738_v16 = vadd.f32 %v1737_v39, %v5524_v54  ;;  %v5533_v33 = vadd.f32 %v4964_v38, %v1699_v15  ;;  %7857 = vst [vmem:[#allocation90_spill] sm:$0xff] %v5540_v20  ;;  %v566_v47 = vadd.f32 %v565_v12, %v564_v48  ;;  %v959_v15 = vadd.f32 %v958_v11, %v957_v13 }
 0x16d   : > { %7854 = vst [vmem:[#allocation87_spill] sm:$0xff] %v5529_v51  ;;  %v1346_v29 = vadd.f32 %v1345_v25, %v5529_v51  ;;  %7858 = vst [vmem:[#allocation91_spill] sm:$0xff] %v5544_v26 }
 0x16e   : > { %7855 = vst [vmem:[#allocation88_spill] sm:$0xff] %v5533_v33  ;;  %v1739_v7 = vadd.f32 %v1738_v16, %v5533_v33  ;;  %v567_v51 = vrot.slane %v566_v47, 1  ;;  %v960_v31 = vrot.slane %v959_v15, 1 }
 0x16f   : > { %v1347_v59 = vadd.f32 %v1346_v29, %v5536_v0 }
 0x170   : > { %v1740_v36 = vadd.f32 %v1739_v7, %v5540_v20  ;;  %v568_v0 = vadd.f32 %v567_v51, %v566_v47  ;;  %v961_v38 = vadd.f32 %v960_v31, %v959_v15 }
 0x171   : > { %v1348_v39 = vadd.f32 %v1347_v59, %v5544_v26 }
 0x172   : > { %v1741_v25 = vadd.f32 %v1740_v36, %v5548_v17  ;;  %v962_v20 = vadd.f32 %v961_v38, %v568_v0 }
 0x173   : > { %v1349_v54 = vrot.slane %v1348_v39, 4 }
 0x174   : > { %v1742_v16 = vrot.slane %v1741_v25, 4 }
 0x175   : > { %v1350_v33 = vadd.f32 %v1349_v54, %v1348_v39 }
 0x176   : > { %v1743_v27 = vadd.f32 %v1742_v16, %v1741_v25 }
 0x177   : > { %v1351_v22 = vrot.slane %v1350_v33, 2 }
 0x178   : > { %v1744_v24 = vrot.slane %v1743_v27, 2 }
 0x179   : > { %v1352_v29 = vadd.f32 %v1351_v22, %v1350_v33 }
 0x17a   : > { %v1745_v18 = vadd.f32 %v1744_v24, %v1743_v27 }
 0x17b   : > { %v1353_v34 = vrot.slane %v1352_v29, 1 }
 0x17c   : > { %v1746_v59 = vrot.slane %v1745_v18, 1 }
 0x17d   : > { %v1354_v7 = vadd.f32 %v1353_v34, %v1352_v29 }
 0x17e   : > { %v1747_v36 = vadd.f32 %v1746_v59, %v1745_v18 }
 0x17f   : > { %v1355_v26 = vadd.f32 %v1354_v7, %v962_v20 }
 0x181   : > { %v1748_v48 = vadd.f32 %v1747_v36, %v1355_v26 }
 0x183   : > { %v5553_v13 = vmul.f32 0.0009765625, %v1748_v48 }
 0x185   : > { %v5557_v54 = vsub.f32 %v4967_v40, %v5553_v13  ;;  %v5561_v12 = vsub.f32 %v4970_v41, %v5553_v13  ;;  %v5565_v51 = vsub.f32 %v4979_v46, %v5553_v13  ;;  %v5573_v24 = vsub.f32 %v4989_v52, %v5553_v13 }
 0x186   : > { %v5577_v40 = vsub.f32 %v4997_v58, %v5553_v13  ;;  %v5583_v46 = vsub.f32 %v5006_v1, %v5553_v13  ;;  %v5589_v52 = vsub.f32 %v5013_v6, %v5553_v13  ;;  %v5595_v11 = vsub.f32 %v5022_v14, %v5553_v13 }
 0x187   : > { %v1783_v33 = vmul.f32 %v5557_v54, %v5557_v54  ;;  %v1784_v18 = vmul.f32 %v5561_v12, %v5561_v12  ;;  %v1785_v41 = vmul.f32 %v5565_v51, %v5565_v51  ;;  %v1786_v22 = vmul.f32 %v5573_v24, %v5573_v24 }
 0x188   : > { %v1787_v58 = vmul.f32 %v5577_v40, %v5577_v40  ;;  %v1788_v1 = vmul.f32 %v5583_v46, %v5583_v46  ;;  %v5601_v39 = vsub.f32 %v5031_v23, %v5553_v13  ;;  %v1789_v6 = vmul.f32 %v5589_v52, %v5589_v52 }
 0x189   : > { %v1815_v27 = vadd.f32 %v1784_v18, %v1783_v33  ;;  %v5607_v47 = vsub.f32 %v5038_v28, %v5553_v13  ;;  %v1790_v14 = vmul.f32 %v5595_v11, %v5595_v11  ;;  %v5613_v16 = vsub.f32 %v4973_v43, %v5553_v13 }
 0x18a   : > { %v5617_v23 = vsub.f32 %v4976_v44, %v5553_v13  ;;  %v5621_v31 = vsub.f32 %v5047_v42, %v5553_v13  ;;  %v1791_v28 = vmul.f32 %v5601_v39, %v5601_v39  ;;  %v5629_v43 = vsub.f32 %v4984_v49, %v5553_v13 }
 0x18b   : > { %v1816_v0 = vadd.f32 %v1815_v27, %v1785_v41  ;;  %v1792_v38 = vmul.f32 %v5607_v47, %v5607_v47  ;;  %v1885_v44 = vmul.f32 %v5613_v16, %v5613_v16  ;;  %v5637_v42 = vsub.f32 %v5059_v56, %v5553_v13 }
 0x18c   : > { %7859 = vst [vmem:[#allocation92_spill] sm:$0xff] %v5617_v23  ;;  %7860 = vst [vmem:[#allocation93_spill] sm:$0xff] %v5629_v43  ;;  %v1886_v7 = vmul.f32 %v5617_v23, %v5617_v23  ;;  %v1793_v59 = vmul.f32 %v5621_v31, %v5621_v31  ;;  %v5643_v48 = vsub.f32 %v4993_v55, %v5553_v13 }
 0x18d   : > { %v1817_v20 = vadd.f32 %v1816_v0, %v1786_v22  ;;  %v5647_v33 = vsub.f32 %v5001_v61, %v5553_v13  ;;  %v1887_v18 = vmul.f32 %v5629_v43, %v5629_v43  ;;  %v5653_v56 = vsub.f32 %v5071_v3, %v5553_v13  ;;  %v7947_v43 = vld [vmem:[#allocation35_spill] sm:$0xff] }
 0x18e   : > { %7861 = vst [vmem:[#allocation94_spill] sm:$0xff] %v5643_v48  ;;  %v1917_v41 = vadd.f32 %v1886_v7, %v1885_v44  ;;  %v1794_v27 = vmul.f32 %v5637_v42, %v5637_v42  ;;  %v5659_v55 = vsub.f32 %v5010_v4, %v5553_v13  ;;  %v1888_v22 = vmul.f32 %v5643_v48, %v5643_v48  ;;  %v7945_v48 = vld [vmem:[#allocation61_spill] sm:$0xff] }
 0x18f   : > { %v1818_v26 = vadd.f32 %v1817_v20, %v1787_v58  ;;  %7862 = vst [vmem:[#allocation95_spill] sm:$0xff] %v5647_v33  ;;  %v7864_v58 = vld [vmem:[#allocation2_spill] sm:$0xff]  ;;  %v1889_v3 = vmul.f32 %v5647_v33, %v5647_v33  ;;  %v1795_v4 = vmul.f32 %v5653_v56, %v5653_v56 }
 0x190   : > { %7863 = vst [vmem:[#allocation96_spill] sm:$0xff] %v5659_v55  ;;  %v1918_v61 = vadd.f32 %v1917_v41, %v1887_v18  ;;  %v5665_v20 = vsub.f32 %v7864_v58, %v5553_v13  ;;  %v7872_v18 = vld [vmem:[#allocation5_spill] sm:$0xff] }
 0x191   : > { %v1819_v25 = vadd.f32 %v1818_v26, %v1788_v1  ;;  %v7866_v26 = vld [vmem:[#allocation9_spill] sm:$0xff]  ;;  %v5695_v41 = vsub.f32 %v7872_v18, %v5553_v13 }
 0x192   : > { %7865 = vst [vmem:[#allocation2_spill] sm:$0xff] %v5665_v20  ;;  %v1919_v1 = vadd.f32 %v1918_v61, %v1888_v22  ;;  %v1891_v44 = vmul.f32 %v5665_v20, %v5665_v20 }
 0x193   : > { %v1820_v15 = vadd.f32 %v1819_v25, %v1789_v6  ;;  %v5671_v6 = vsub.f32 %v7866_v26, %v5553_v13  ;;  %v7867_v25 = vld [vmem:[#allocation3_spill] sm:$0xff]  ;;  %v7876_v26 = vld [vmem:[#allocation13_spill] sm:$0xff] }
 0x195   : > { %v1821_v29 = vadd.f32 %v1820_v15, %v1790_v14  ;;  %v5677_v14 = vsub.f32 %v7867_v25, %v5553_v13  ;;  %v1890_v15 = vmul.f32 %v5659_v55, %v5659_v55  ;;  %v7877_v25 = vld [vmem:[#allocation23_spill] sm:$0xff]  ;;  %v7933_v55 = vld [vmem:[#allocation54_spill] sm:$0xff] }
 0x196   : > { %v5953_v33 = vsub.f32 %v7933_v55, %v5553_v13 }
 0x197   : > { %v1822_v34 = vadd.f32 %v1821_v29, %v1791_v28  ;;  %7868 = vst [vmem:[#allocation9_spill] sm:$0xff] %v5677_v14  ;;  %v1920_v28 = vadd.f32 %v1919_v1, %v1889_v3 }
 0x199   : > { %v1823_v36 = vadd.f32 %v1822_v34, %v1792_v38  ;;  %v7869_v38 = vld [vmem:[#allocation4_spill] sm:$0xff]  ;;  %v1921_v7 = vadd.f32 %v1920_v28, %v1890_v15  ;;  %v5711_v15 = vsub.f32 %v7877_v25, %v5553_v13  ;;  %v7885_v25 = vld [vmem:[#allocation15_spill] sm:$0xff] }
 0x19a   : > { %v5683_v34 = vsub.f32 %v7869_v38, %v5553_v13  ;;  %7873 = vst [vmem:[#allocation4_spill] sm:$0xff] %v5695_v41  ;;  %v7879_v28 = vld [vmem:[#allocation24_spill] sm:$0xff] }
 0x19b   : > { %v1824_v49 = vadd.f32 %v1823_v36, %v1793_v59  ;;  %v7871_v59 = vld [vmem:[#allocation11_spill] sm:$0xff]  ;;  %v1922_v22 = vadd.f32 %v1921_v7, %v1891_v44  ;;  %7878 = vst [vmem:[#allocation5_spill] sm:$0xff] %v5711_v15  ;;  %v5715_v38 = vsub.f32 %v7879_v28, %v5553_v13  ;;  %v5733_v28 = vsub.f32 %v7885_v25, %v5553_v13  ;;  %v7890_v25 = vld [vmem:[#allocation17_spill] sm:$0xff] }
 0x19c   : > { %7870 = vst [vmem:[#allocation3_spill] sm:$0xff] %v5683_v34  ;;  %v5689_v36 = vsub.f32 %v7871_v59, %v5553_v13  ;;  %v1893_v3 = vmul.f32 %v5683_v34, %v5683_v34  ;;  %v7881_v44 = vld [vmem:[#allocation7_spill] sm:$0xff]  ;;  %v1894_v59 = vmul.f32 %v5695_v41, %v5695_v41 }
 0x19d   : > { %v1825_v0 = vadd.f32 %v1824_v49, %v1794_v27  ;;  %v1796_v49 = vmul.f32 %v5671_v6, %v5671_v6  ;;  %v1892_v27 = vmul.f32 %v5677_v14, %v5677_v14  ;;  %v5721_v7 = vsub.f32 %v7881_v44, %v5553_v13  ;;  %v7886_v44 = vld [vmem:[#allocation29_spill] sm:$0xff] }
 0x19e   : > { %v5737_v34 = vsub.f32 %v7886_v44, %v5553_v13  ;;  %v5753_v44 = vsub.f32 %v7890_v25, %v5553_v13 }
 0x19f   : > { %v1826_v29 = vadd.f32 %v1825_v0, %v1795_v4  ;;  %v7874_v0 = vld [vmem:[#allocation6_spill] sm:$0xff]  ;;  %v1923_v1 = vadd.f32 %v1922_v22, %v1892_v27  ;;  %v5707_v4 = vsub.f32 %v7876_v26, %v5553_v13  ;;  %7882 = vst [vmem:[#allocation13_spill] sm:$0xff] %v5721_v7  ;;  %v7883_v27 = vld [vmem:[#allocation8_spill] sm:$0xff] }
 0x1a0   : > { %v5701_v58 = vsub.f32 %v7874_v0, %v5553_v13  ;;  %7880 = vst [vmem:[#allocation6_spill] sm:$0xff] %v5715_v38  ;;  %v5727_v22 = vsub.f32 %v7883_v27, %v5553_v13  ;;  %7887 = vst [vmem:[#allocation24_spill] sm:$0xff] %v5737_v34 }
 0x1a1   : > { %v1827_v61 = vadd.f32 %v1826_v29, %v1796_v49  ;;  %v1797_v29 = vmul.f32 %v5689_v36, %v5689_v36  ;;  %v1924_v49 = vadd.f32 %v1923_v1, %v1893_v3  ;;  %v1987_v3 = vmul.f32 %v5711_v15, %v5711_v15 }
 0x1a2   : > { %7875 = vst [vmem:[#allocation11_spill] sm:$0xff] %v5701_v58  ;;  %7884 = vst [vmem:[#allocation23_spill] sm:$0xff] %v5727_v22  ;;  %v1895_v0 = vmul.f32 %v5701_v58, %v5701_v58  ;;  %v1798_v1 = vmul.f32 %v5707_v4, %v5707_v4  ;;  %v5757_v15 = vsub.f32 %v5218_v63, %v5553_v13  ;;  %v7892_v58 = vld [vmem:[#allocation12_spill] sm:$0xff] }
 0x1a3   : > { %v1828_v18 = vadd.f32 %v1827_v61, %v1797_v29  ;;  %v1925_v26 = vadd.f32 %v1924_v49, %v1894_v59  ;;  %v1988_v61 = vmul.f32 %v5715_v38, %v5715_v38  ;;  %v7888_v29 = vld [vmem:[#allocation10_spill] sm:$0xff]  ;;  %v1896_v49 = vmul.f32 %v5721_v7, %v5721_v7  ;;  %v7894_v7 = vld [vmem:[#allocation19_spill] sm:$0xff] }
 0x1a4   : > { %v5747_v59 = vsub.f32 %v7888_v29, %v5553_v13  ;;  %7891 = vst [vmem:[#allocation8_spill] sm:$0xff] %v5757_v15  ;;  %v5761_v41 = vsub.f32 %v7892_v58, %v5553_v13  ;;  %v1897_v29 = vmul.f32 %v5727_v22, %v5727_v22  ;;  %v1989_v63 = vmul.f32 %v5737_v34, %v5737_v34 }
 0x1a5   : > { %v1926_v27 = vadd.f32 %v1925_v26, %v1895_v0  ;;  %v1829_v38 = vadd.f32 %v1828_v18, %v1798_v1  ;;  %v5767_v0 = vsub.f32 %v7894_v7, %v5553_v13  ;;  %v5771_v26 = vsub.f32 %v5226_v60, %v5553_v13  ;;  %v7896_v1 = vld [vmem:[#allocation14_spill] sm:$0xff] }
 0x1a6   : > { %7889 = vst [vmem:[#allocation7_spill] sm:$0xff] %v5747_v59  ;;  %7893 = vst [vmem:[#allocation15_spill] sm:$0xff] %v5761_v41  ;;  %v2019_v18 = vadd.f32 %v1988_v61, %v1987_v3  ;;  %v1799_v58 = vmul.f32 %v5733_v28, %v5733_v28  ;;  %v5779_v25 = vsub.f32 %v7896_v1, %v5553_v13  ;;  %v7900_v1 = vld [vmem:[#allocation16_spill] sm:$0xff] }
 0x1a7   : > { %v1927_v14 = vadd.f32 %v1926_v27, %v1896_v49  ;;  %7895 = vst [vmem:[#allocation29_spill] sm:$0xff] %v5771_v26  ;;  %v1898_v49 = vmul.f32 %v5747_v59, %v5747_v59  ;;  %v7898_v27 = vld [vmem:[#allocation21_spill] sm:$0xff]  ;;  %v5789_v60 = vsub.f32 %v5237_v32, %v5553_v13  ;;  %v1990_v3 = vmul.f32 %v5757_v15, %v5757_v15 }
 0x1a8   : > { %7897 = vst [vmem:[#allocation10_spill] sm:$0xff] %v5779_v25  ;;  %v5785_v22 = vsub.f32 %v7898_v27, %v5553_v13  ;;  %v2020_v61 = vadd.f32 %v2019_v18, %v1989_v63  ;;  %v1830_v34 = vadd.f32 %v1829_v38, %v1799_v58  ;;  %v5795_v20 = vsub.f32 %v7900_v1, %v5553_v13  ;;  %v7902_v27 = vld [vmem:[#allocation25_spill] sm:$0xff]  ;;  %v7904_v58 = vld [vmem:[#allocation18_spill] sm:$0xff] }
 0x1a9   : > { %v1928_v7 = vadd.f32 %v1927_v14, %v1897_v29  ;;  %7899 = vst [vmem:[#allocation17_spill] sm:$0xff] %v5789_v60  ;;  %v1899_v14 = vmul.f32 %v5761_v41, %v5761_v41  ;;  %v5801_v59 = vsub.f32 %v7902_v27, %v5553_v13  ;;  %v5805_v32 = vsub.f32 %v5252_v9, %v5553_v13 }
 0x1aa   : > { %7901 = vst [vmem:[#allocation12_spill] sm:$0xff] %v5795_v20  ;;  %v1991_v63 = vmul.f32 %v5771_v26, %v5771_v26  ;;  %v2021_v38 = vadd.f32 %v2020_v61, %v1990_v3  ;;  %v1800_v18 = vmul.f32 %v5753_v44, %v5753_v44  ;;  %v5813_v1 = vsub.f32 %v7904_v58, %v5553_v13  ;;  %v7907_v58 = vld [vmem:[#allocation20_spill] sm:$0xff] }
 0x1ab   : > { %v1929_v29 = vadd.f32 %v1928_v7, %v1898_v49  ;;  %7903 = vst [vmem:[#allocation19_spill] sm:$0xff] %v5805_v32  ;;  %v1900_v49 = vmul.f32 %v5779_v25, %v5779_v25  ;;  %v5819_v27 = vsub.f32 %v5205_v45, %v5553_v13  ;;  %v5823_v9 = vsub.f32 %v5262_v2, %v5553_v13  ;;  %v7909_v45 = vld [vmem:[#allocation34_spill] sm:$0xff] }
 0x1ac   : > { %7905 = vst [vmem:[#allocation14_spill] sm:$0xff] %v5813_v1  ;;  %v1992_v3 = vmul.f32 %v5789_v60, %v5789_v60  ;;  %v2022_v61 = vadd.f32 %v2021_v38, %v1991_v63  ;;  %v1831_v26 = vadd.f32 %v1830_v34, %v1800_v18  ;;  %v5829_v15 = vsub.f32 %v7907_v58, %v5553_v13  ;;  %v7911_v38 = vld [vmem:[#allocation38_spill] sm:$0xff] }
 0x1ad   : > { %v1930_v7 = vadd.f32 %v1929_v29, %v1899_v14  ;;  %7906 = vst [vmem:[#allocation21_spill] sm:$0xff] %v5823_v9  ;;  %v1901_v14 = vmul.f32 %v5795_v20, %v5795_v20  ;;  %v5835_v25 = vsub.f32 %v7909_v45, %v5553_v13  ;;  %v5839_v2 = vsub.f32 %v5278_v53, %v5553_v13  ;;  %v7912_v45 = vld [vmem:[#allocation22_spill] sm:$0xff] }
 0x1ae   : > { %7908 = vst [vmem:[#allocation16_spill] sm:$0xff] %v5829_v15  ;;  %v1993_v63 = vmul.f32 %v5805_v32, %v5805_v32  ;;  %v2023_v34 = vadd.f32 %v2022_v61, %v1992_v3  ;;  %v5845_v18 = vsub.f32 %v7911_v38, %v5553_v13  ;;  %v1801_v58 = vmul.f32 %v5767_v0, %v5767_v0  ;;  %v7915_v38 = vld [vmem:[#allocation42_spill] sm:$0xff] }
 0x1af   : > { %v1931_v29 = vadd.f32 %v1930_v7, %v1900_v49  ;;  %7910 = vst [vmem:[#allocation25_spill] sm:$0xff] %v5839_v2  ;;  %v1902_v49 = vmul.f32 %v5813_v1, %v5813_v1  ;;  %v5853_v60 = vsub.f32 %v7912_v45, %v5553_v13  ;;  %v5857_v53 = vsub.f32 %v5289_v19, %v5553_v13  ;;  %v7916_v19 = vld [vmem:[#allocation45_spill] sm:$0xff] }
 0x1b0   : > { %v1994_v3 = vmul.f32 %v5823_v9, %v5823_v9  ;;  %v2024_v61 = vadd.f32 %v2023_v34, %v1993_v63  ;;  %v5863_v32 = vsub.f32 %v7915_v38, %v5553_v13  ;;  %v1832_v20 = vadd.f32 %v1831_v26, %v1801_v58  ;;  %v7918_v58 = vld [vmem:[#allocation28_spill] sm:$0xff] }
 0x1b1   : > { %v1932_v7 = vadd.f32 %v1931_v29, %v1901_v14  ;;  %7913 = vst [vmem:[#allocation18_spill] sm:$0xff] %v5853_v60  ;;  %7914 = vst [vmem:[#allocation20_spill] sm:$0xff] %v5857_v53  ;;  %v1903_v14 = vmul.f32 %v5829_v15, %v5829_v15  ;;  %v5869_v45 = vsub.f32 %v5310_v37, %v5553_v13 }
 0x1b2   : > { %v5873_v1 = vsub.f32 %v7916_v19, %v5553_v13  ;;  %v1995_v63 = vmul.f32 %v5839_v2, %v5839_v2  ;;  %v2025_v34 = vadd.f32 %v2024_v61, %v1994_v3  ;;  %v5879_v38 = vsub.f32 %v5345_v21, %v5553_v13 }
 0x1b3   : > { %v1933_v29 = vadd.f32 %v1932_v7, %v1902_v49  ;;  %v1802_v26 = vmul.f32 %v5785_v22, %v5785_v22  ;;  %v5885_v49 = vsub.f32 %v7918_v58, %v5553_v13  ;;  %v1904_v7 = vmul.f32 %v5853_v60, %v5853_v60 }
 0x1b4   : > { %7917 = vst [vmem:[#allocation34_spill] sm:$0xff] %v5873_v1  ;;  %v5891_v19 = vsub.f32 %v5322_v5, %v5553_v13  ;;  %v1996_v3 = vmul.f32 %v5857_v53, %v5857_v53  ;;  %v2026_v21 = vadd.f32 %v2025_v34, %v1995_v63  ;;  %v5897_v61 = vsub.f32 %v5371_v62, %v5553_v13  ;;  %v7922_v53 = vld [vmem:[#allocation31_spill] sm:$0xff] }
 0x1b5   : > { %7919 = vst [vmem:[#allocation38_spill] sm:$0xff] %v5885_v49  ;;  %v1934_v37 = vadd.f32 %v1933_v29, %v1903_v14  ;;  %v5901_v58 = vsub.f32 %v5397_v35, %v5553_v13  ;;  %v1803_v14 = vmul.f32 %v5801_v59, %v5801_v59  ;;  %v1833_v29 = vadd.f32 %v1832_v20, %v1802_v26  ;;  %v7924_v20 = vld [vmem:[#allocation50_spill] sm:$0xff] }
 0x1b6   : > { %7920 = vst [vmem:[#allocation22_spill] sm:$0xff] %v5891_v19  ;;  %v5907_v5 = vsub.f32 %v5330_v57, %v5553_v13  ;;  %v1997_v63 = vmul.f32 %v5873_v1, %v5873_v1  ;;  %v2027_v34 = vadd.f32 %v2026_v21, %v1996_v3  ;;  %v1804_v62 = vmul.f32 %v5819_v27, %v5819_v27  ;;  %v7928_v21 = vld [vmem:[#allocation27_spill] sm:$0xff] }
 0x1b7   : > { %v1935_v2 = vadd.f32 %v1934_v37, %v1904_v7  ;;  %v5915_v35 = vsub.f32 %v7922_v53, %v5553_v13  ;;  %v1905_v9 = vmul.f32 %v5885_v49, %v5885_v49  ;;  %v5921_v26 = vsub.f32 %v7924_v20, %v5553_v13  ;;  %v7926_v7 = vld [vmem:[#allocation26_spill] sm:$0xff] }
 0x1b8   : > { %7921 = vst [vmem:[#allocation42_spill] sm:$0xff] %v5907_v5  ;;  %v1998_v57 = vmul.f32 %v5891_v19, %v5891_v19  ;;  %v2028_v37 = vadd.f32 %v2027_v34, %v1997_v63  ;;  %v5927_v3 = vsub.f32 %v7926_v7, %v5553_v13  ;;  %v5931_v1 = vsub.f32 %v7928_v21, %v5553_v13  ;;  %v7931_v21 = vld [vmem:[#allocation36_spill] sm:$0xff] }
 0x1b9   : > { %7923 = vst [vmem:[#allocation45_spill] sm:$0xff] %v5915_v35  ;;  %7925 = vst [vmem:[#allocation28_spill] sm:$0xff] %v5921_v26  ;;  %v1805_v53 = vmul.f32 %v5835_v25, %v5835_v25  ;;  %v1806_v49 = vmul.f32 %v5845_v18, %v5845_v18  ;;  %v1807_v20 = vmul.f32 %v5863_v32, %v5863_v32 }
 0x1ba   : > { %7927 = vst [vmem:[#allocation31_spill] sm:$0xff] %v5927_v3  ;;  %7929 = vst [vmem:[#allocation50_spill] sm:$0xff] %v5931_v1  ;;  %v1834_v60 = vadd.f32 %v1833_v29, %v1803_v14  ;;  %v1936_v19 = vadd.f32 %v1935_v2, %v1905_v9  ;;  %v5941_v63 = vsub.f32 %v5356_v50, %v5553_v13  ;;  %v7935_v2 = vld [vmem:[#allocation30_spill] sm:$0xff] }
 0x1bb   : > { %v1999_v34 = vmul.f32 %v5907_v5, %v5907_v5  ;;  %v2029_v7 = vadd.f32 %v2028_v37, %v1998_v57  ;;  %v5947_v15 = vsub.f32 %v7931_v21, %v5553_v13  ;;  %v1906_v41 = vmul.f32 %v5915_v35, %v5915_v35  ;;  %7934 = vst [vmem:[#allocation36_spill] sm:$0xff] %v5953_v33  ;;  %v7940_v5 = vld [vmem:[#allocation40_spill] sm:$0xff] }
 0x1bc   : > { %7930 = vst [vmem:[#allocation26_spill] sm:$0xff] %v5941_v63  ;;  %v2000_v9 = vmul.f32 %v5921_v26, %v5921_v26  ;;  %v5959_v14 = vsub.f32 %v7935_v2, %v5553_v13  ;;  %v2089_v29 = vmul.f32 %v5927_v3, %v5927_v3  ;;  %v2090_v57 = vmul.f32 %v5931_v1, %v5931_v1  ;;  %v7938_v1 = vld [vmem:[#allocation32_spill] sm:$0xff] }
 0x1bd   : > { %7932 = vst [vmem:[#allocation27_spill] sm:$0xff] %v5947_v15  ;;  %v2030_v50 = vadd.f32 %v2029_v7, %v1999_v34  ;;  %v5967_v37 = vmul.f32 %v5869_v45, %v5869_v45  ;;  %v5971_v55 = vmul.f32 %v5879_v38, %v5879_v38  ;;  %v1835_v21 = vadd.f32 %v1834_v60, %v1804_v62  ;;  %v7941_v62 = vld [vmem:[#allocation58_spill] sm:$0xff] }
 0x1be   : > { %7936 = vst [vmem:[#allocation54_spill] sm:$0xff] %v5959_v14  ;;  %v5975_v34 = vsub.f32 %v5382_v8, %v5553_v13  ;;  %v1937_v7 = vadd.f32 %v1936_v19, %v1906_v41  ;;  %v2001_v2 = vmul.f32 %v5941_v63, %v5941_v63  ;;  %v5981_v26 = vsub.f32 %v7938_v1, %v5553_v13 }
 0x1bf   : > { %v2031_v3 = vadd.f32 %v2030_v50, %v2000_v9  ;;  %v5985_v35 = vsub.f32 %v7940_v5, %v5553_v13  ;;  %v1907_v60 = vmul.f32 %v5947_v15, %v5947_v15  ;;  %v5991_v8 = vsub.f32 %v7941_v62, %v5553_v13  ;;  %v7943_v9 = vld [vmem:[#allocation33_spill] sm:$0xff] }
 0x1c0   : > { %7937 = vst [vmem:[#allocation30_spill] sm:$0xff] %v5975_v34  ;;  %7939 = vst [vmem:[#allocation32_spill] sm:$0xff] %v5981_v26  ;;  %v2002_v41 = vmul.f32 %v5953_v33, %v5953_v33  ;;  %v5997_v50 = vsub.f32 %v7943_v9, %v5553_v13  ;;  %v2091_v1 = vmul.f32 %v5959_v14, %v5959_v14 }
 0x1c1   : > { %7942 = vst [vmem:[#allocation40_spill] sm:$0xff] %v5991_v8  ;;  %v2032_v19 = vadd.f32 %v2031_v3, %v2001_v2  ;;  %v2121_v5 = vadd.f32 %v2090_v57, %v2089_v29  ;;  %v1836_v63 = vadd.f32 %v1835_v21, %v1805_v53  ;;  %v6003_v15 = vsub.f32 %v7945_v48, %v5553_v13  ;;  %v7949_v29 = vld [vmem:[#allocation44_spill] sm:$0xff] }
 0x1c2   : > { %7944 = vst [vmem:[#allocation58_spill] sm:$0xff] %v5997_v50  ;;  %v2003_v62 = vmul.f32 %v5975_v34, %v5975_v34  ;;  %v6009_v33 = vsub.f32 %v7947_v43, %v5553_v13  ;;  %v1938_v3 = vadd.f32 %v1937_v7, %v1907_v60  ;;  %v2092_v9 = vmul.f32 %v5981_v26, %v5981_v26  ;;  %v7952_v7 = vld [vmem:[#allocation37_spill] sm:$0xff] }
 0x1c3   : > { %7946 = vst [vmem:[#allocation33_spill] sm:$0xff] %v6003_v15  ;;  %v2033_v2 = vadd.f32 %v2032_v19, %v2002_v41  ;;  %v2122_v23 = vadd.f32 %v2121_v5, %v2091_v1  ;;  %v6015_v53 = vsub.f32 %v7949_v29, %v5553_v13  ;;  %v1908_v48 = vmul.f32 %v5985_v35, %v5985_v35  ;;  %v7955_v29 = vld [vmem:[#allocation39_spill] sm:$0xff] }
 0x1c4   : > { %7948 = vst [vmem:[#allocation61_spill] sm:$0xff] %v6009_v33  ;;  %v6021_v57 = vsub.f32 %v5426_v30, %v5553_v13  ;;  %v2004_v43 = vmul.f32 %v5991_v8, %v5991_v8  ;;  %v6027_v60 = vsub.f32 %v7952_v7, %v5553_v13  ;;  %v2093_v41 = vmul.f32 %v5997_v50, %v5997_v50  ;;  %v7965_v50 = vld [vmem:[#allocation43_spill] sm:$0xff] }
 0x1c5   : > { %7950 = vst [vmem:[#allocation35_spill] sm:$0xff] %v6015_v53  ;;  %v2034_v21 = vadd.f32 %v2033_v2, %v2003_v62  ;;  %v2123_v19 = vadd.f32 %v2122_v23, %v2092_v9  ;;  %v1837_v1 = vadd.f32 %v1836_v63, %v1806_v49  ;;  %v6033_v5 = vsub.f32 %v5434_v10, %v5553_v13  ;;  %v7957_v23 = vld [vmem:[#allocation47_spill] sm:$0xff] }
 0x1c6   : > { %7951 = vst [vmem:[#allocation44_spill] sm:$0xff] %v6021_v57  ;;  %7953 = vst [vmem:[#allocation37_spill] sm:$0xff] %v6027_v60  ;;  %v2005_v30 = vmul.f32 %v6003_v15, %v6003_v15  ;;  %v6039_v26 = vsub.f32 %v7955_v29, %v5553_v13  ;;  %v1939_v62 = vadd.f32 %v1938_v3, %v1908_v48  ;;  %v7959_v63 = vld [vmem:[#allocation67_spill] sm:$0xff]  ;;  %v7961_v48 = vld [vmem:[#allocation41_spill] sm:$0xff] }
 0x1c7   : > { %7954 = vst [vmem:[#allocation97_spill] sm:$0xff] %v6033_v5  ;;  %v2035_v2 = vadd.f32 %v2034_v21, %v2004_v43  ;;  %v2094_v7 = vmul.f32 %v6009_v33, %v6009_v33  ;;  %v2124_v14 = vadd.f32 %v2123_v19, %v2093_v41  ;;  %v6045_v49 = vsub.f32 %v7957_v23, %v5553_v13  ;;  %v7963_v23 = vld [vmem:[#allocation71_spill] sm:$0xff] }
 0x1c8   : > { %7956 = vst [vmem:[#allocation39_spill] sm:$0xff] %v6039_v26  ;;  %v1909_v10 = vmul.f32 %v6015_v53, %v6015_v53  ;;  %v6051_v9 = vsub.f32 %v7959_v63, %v5553_v13  ;;  %v2006_v29 = vmul.f32 %v6021_v57, %v6021_v57  ;;  %v6057_v43 = vsub.f32 %v7961_v48, %v5553_v13 }
 0x1c9   : > { %7958 = vst [vmem:[#allocation47_spill] sm:$0xff] %v6045_v49  ;;  %v2036_v3 = vadd.f32 %v2035_v2, %v2005_v30  ;;  %v2095_v21 = vmul.f32 %v6027_v60, %v6027_v60  ;;  %v2125_v41 = vadd.f32 %v2124_v14, %v2094_v7  ;;  %v1838_v19 = vadd.f32 %v1837_v1, %v1807_v20  ;;  %v7967_v14 = vld [vmem:[#allocation52_spill] sm:$0xff]  ;;  %v7969_v7 = vld [vmem:[#allocation73_spill] sm:$0xff] }
 0x1ca   : > { %7960 = vst [vmem:[#allocation67_spill] sm:$0xff] %v6051_v9  ;;  %7962 = vst [vmem:[#allocation41_spill] sm:$0xff] %v6057_v43  ;;  %v6063_v33 = vsub.f32 %v7963_v23, %v5553_v13  ;;  %v2007_v63 = vmul.f32 %v6033_v5, %v6033_v5  ;;  %v6069_v57 = vsub.f32 %v7965_v50, %v5553_v13  ;;  %v7975_v60 = vld [vmem:[#allocation48_spill] sm:$0xff] }
 0x1cb   : > { %v1940_v30 = vadd.f32 %v1939_v62, %v1909_v10  ;;  %v2037_v2 = vadd.f32 %v2036_v3, %v2006_v29  ;;  %v2096_v48 = vmul.f32 %v6039_v26, %v6039_v26  ;;  %v2126_v15 = vadd.f32 %v2125_v41, %v2095_v21  ;;  %v7971_v10 = vld [vmem:[#allocation46_spill] sm:$0xff] }
 0x1cc   : > { %7964 = vst [vmem:[#allocation71_spill] sm:$0xff] %v6063_v33  ;;  %7966 = vst [vmem:[#allocation43_spill] sm:$0xff] %v6069_v57  ;;  %v6075_v20 = vsub.f32 %v7967_v14, %v5553_v13  ;;  %v1910_v1 = vmul.f32 %v6045_v49, %v6045_v49  ;;  %v6081_v23 = vsub.f32 %v7969_v7, %v5553_v13  ;;  %v7973_v14 = vld [vmem:[#allocation77_spill] sm:$0xff] }
 0x1cd   : > { %v2008_v50 = vmul.f32 %v6051_v9, %v6051_v9  ;;  %v2038_v62 = vadd.f32 %v2037_v2, %v2007_v63  ;;  %v6087_v29 = vsub.f32 %v7971_v10, %v5553_v13  ;;  %v2097_v3 = vmul.f32 %v6057_v43, %v6057_v43 }
 0x1ce   : > { %7968 = vst [vmem:[#allocation52_spill] sm:$0xff] %v6075_v20  ;;  %7970 = vst [vmem:[#allocation73_spill] sm:$0xff] %v6081_v23  ;;  %v2127_v21 = vadd.f32 %v2126_v15, %v2096_v48  ;;  %v1839_v41 = vadd.f32 %v1838_v19, %v5967_v37  ;;  %v6094_v26 = vsub.f32 %v7973_v14, %v5553_v13  ;;  %v7977_v15 = vld [vmem:[#allocation56_spill] sm:$0xff]  ;;  %v7979_v48 = vld [vmem:[#allocation79_spill] sm:$0xff] }
 0x1cf   : > { %7972 = vst [vmem:[#allocation46_spill] sm:$0xff] %v6087_v29  ;;  %v2009_v7 = vmul.f32 %v6063_v33, %v6063_v33  ;;  %v6100_v63 = vsub.f32 %v7975_v60, %v5553_v13  ;;  %v1941_v2 = vadd.f32 %v1940_v30, %v1910_v1  ;;  %v2039_v10 = vadd.f32 %v2038_v62, %v2008_v50  ;;  %v7981_v1 = vld [vmem:[#allocation49_spill] sm:$0xff] }
 0x1d0   : > { %7974 = vst [vmem:[#allocation77_spill] sm:$0xff] %v6094_v26  ;;  %v2098_v9 = vmul.f32 %v6069_v57, %v6069_v57  ;;  %v2128_v43 = vadd.f32 %v2127_v21, %v2097_v3  ;;  %v6106_v37 = vsub.f32 %v7977_v15, %v5553_v13  ;;  %v1911_v19 = vmul.f32 %v6075_v20, %v6075_v20  ;;  %v7983_v15 = vld [vmem:[#allocation81_spill] sm:$0xff] }
 0x1d1   : > { %7976 = vst [vmem:[#allocation48_spill] sm:$0xff] %v6100_v63  ;;  %v6112_v14 = vsub.f32 %v7979_v48, %v5553_v13  ;;  %v2010_v60 = vmul.f32 %v6081_v23, %v6081_v23  ;;  %v2040_v30 = vadd.f32 %v2039_v10, %v2009_v7  ;;  %v6118_v50 = vsub.f32 %v7981_v1, %v5553_v13  ;;  %v7985_v23 = vld [vmem:[#allocation51_spill] sm:$0xff] }
 0x1d2   : > { %7978 = vst [vmem:[#allocation56_spill] sm:$0xff] %v6106_v37  ;;  %v2099_v62 = vmul.f32 %v6087_v29, %v6087_v29  ;;  %v2129_v3 = vadd.f32 %v2128_v43, %v2098_v9  ;;  %v1840_v21 = vadd.f32 %v1839_v41, %v5971_v55  ;;  %v6125_v57 = vsub.f32 %v7983_v15, %v5553_v13  ;;  %v7987_v9 = vld [vmem:[#allocation60_spill] sm:$0xff] }
 0x1d3   : > { %7980 = vst [vmem:[#allocation79_spill] sm:$0xff] %v6112_v14  ;;  %7982 = vst [vmem:[#allocation49_spill] sm:$0xff] %v6118_v50  ;;  %v2011_v48 = vmul.f32 %v6094_v26, %v6094_v26  ;;  %v6131_v7 = vsub.f32 %v7985_v23, %v5553_v13  ;;  %v1942_v10 = vadd.f32 %v1941_v2, %v1911_v19  ;;  %v7989_v2 = vld [vmem:[#allocation53_spill] sm:$0xff]  ;;  %v7993_v26 = vld [vmem:[#allocation55_spill] sm:$0xff] }
 0x1d4   : > { %7984 = vst [vmem:[#allocation81_spill] sm:$0xff] %v6125_v57  ;;  %v2041_v1 = vadd.f32 %v2040_v30, %v2010_v60  ;;  %v2100_v33 = vmul.f32 %v6100_v63, %v6100_v63  ;;  %v2130_v29 = vadd.f32 %v2129_v3, %v2099_v62  ;;  %v1810_v55 = vmul.f32 %v5897_v61, %v5897_v61  ;;  %v7991_v3 = vld [vmem:[#allocation83_spill] sm:$0xff] }
 0x1d5   : > { %7986 = vst [vmem:[#allocation51_spill] sm:$0xff] %v6131_v7  ;;  %v6139_v43 = vsub.f32 %v7987_v9, %v5553_v13  ;;  %v1912_v41 = vmul.f32 %v6106_v37, %v6106_v37  ;;  %v2012_v23 = vmul.f32 %v6112_v14, %v6112_v14  ;;  %v6147_v19 = vsub.f32 %v7989_v2, %v5553_v13 }
 0x1d6   : > { %v2042_v15 = vadd.f32 %v2041_v1, %v2011_v48  ;;  %v2101_v60 = vmul.f32 %v6118_v50, %v6118_v50  ;;  %v2131_v30 = vadd.f32 %v2130_v29, %v2100_v33  ;;  %v1841_v62 = vadd.f32 %v1840_v21, %v1810_v55  ;;  %v7995_v33 = vld [vmem:[#allocation62_spill] sm:$0xff]  ;;  %v7996_v55 = vld [vmem:[#allocation64_spill] sm:$0xff] }
 0x1d7   : > { %7988 = vst [vmem:[#allocation60_spill] sm:$0xff] %v6139_v43  ;;  %7990 = vst [vmem:[#allocation53_spill] sm:$0xff] %v6147_v19  ;;  %v6153_v9 = vsub.f32 %v7991_v3, %v5553_v13  ;;  %v2013_v63 = vmul.f32 %v6125_v57, %v6125_v57  ;;  %v6159_v14 = vsub.f32 %v7993_v26, %v5553_v13 }
 0x1d8   : > { %v1943_v48 = vadd.f32 %v1942_v10, %v1912_v41  ;;  %v2043_v1 = vadd.f32 %v2042_v15, %v2012_v23  ;;  %v2102_v2 = vmul.f32 %v6131_v7, %v6131_v7  ;;  %v2132_v5 = vadd.f32 %v2131_v30, %v2101_v60  ;;  %v7998_v41 = vld [vmem:[#allocation57_spill] sm:$0xff]  ;;  %v8002_v7 = vld [vmem:[#allocation59_spill] sm:$0xff] }
 0x1d9   : > { %7992 = vst [vmem:[#allocation83_spill] sm:$0xff] %v6153_v9  ;;  %7994 = vst [vmem:[#allocation55_spill] sm:$0xff] %v6159_v14  ;;  %v6165_v29 = vsub.f32 %v7995_v33, %v5553_v13  ;;  %v1811_v21 = vmul.f32 %v5901_v58, %v5901_v58  ;;  %v6171_v3 = vsub.f32 %v7996_v55, %v5553_v13  ;;  %v8000_v30 = vld [vmem:[#allocation85_spill] sm:$0xff] }
 0x1da   : > { %v1913_v26 = vmul.f32 %v6139_v43, %v6139_v43  ;;  %v2044_v10 = vadd.f32 %v2043_v1, %v2013_v63  ;;  %v6177_v23 = vsub.f32 %v7998_v41, %v5553_v13  ;;  %v2103_v15 = vmul.f32 %v6147_v19, %v6147_v19  ;;  %v8004_v19 = vld [vmem:[#allocation69_spill] sm:$0xff] }
 0x1db   : > { %7997 = vst [vmem:[#allocation62_spill] sm:$0xff] %v6171_v3  ;;  %v2133_v60 = vadd.f32 %v2132_v5, %v2102_v2  ;;  %v6183_v33 = vsub.f32 %v8000_v30, %v5553_v13  ;;  %v2014_v55 = vmul.f32 %v6153_v9, %v6153_v9  ;;  %v6189_v50 = vsub.f32 %v8002_v7, %v5553_v13  ;;  %v8005_v30 = vld [vmem:[#allocation70_spill] sm:$0xff] }
 0x1dc   : > { %7999 = vst [vmem:[#allocation64_spill] sm:$0xff] %v6177_v23  ;;  %v1842_v63 = vadd.f32 %v1841_v62, %v1811_v21  ;;  %v1944_v1 = vadd.f32 %v1943_v48, %v1913_v26  ;;  %v2104_v41 = vmul.f32 %v6159_v14, %v6159_v14  ;;  %v6195_v5 = vsub.f32 %v8004_v19, %v5553_v13  ;;  %v8007_v48 = vld [vmem:[#allocation63_spill] sm:$0xff]  ;;  %v8011_v14 = vld [vmem:[#allocation65_spill] sm:$0xff] }
 0x1dd   : > { %8001 = vst [vmem:[#allocation57_spill] sm:$0xff] %v6183_v33  ;;  %8003 = vst [vmem:[#allocation85_spill] sm:$0xff] %v6189_v50  ;;  %v2134_v57 = vadd.f32 %v2133_v60, %v2103_v15  ;;  %v1812_v2 = vmul.f32 %v6165_v29, %v6165_v29  ;;  %v6201_v9 = vsub.f32 %v8005_v30, %v5553_v13  ;;  %v8009_v15 = vld [vmem:[#allocation87_spill] sm:$0xff] }
 0x1de   : > { %v1914_v7 = vmul.f32 %v6171_v3, %v6171_v3  ;;  %v2045_v62 = vadd.f32 %v2044_v10, %v2014_v55  ;;  %v6207_v21 = vsub.f32 %v8007_v48, %v5553_v13  ;;  %v2105_v26 = vmul.f32 %v6177_v23, %v6177_v23  ;;  %v8013_v23 = vld [vmem:[#allocation75_spill] sm:$0xff] }
 0x1df   : > { %8006 = vst [vmem:[#allocation59_spill] sm:$0xff] %v6201_v9  ;;  %v2135_v19 = vadd.f32 %v2134_v57, %v2104_v41  ;;  %v6213_v60 = vsub.f32 %v8009_v15, %v5553_v13  ;;  %v2015_v30 = vmul.f32 %v6183_v33, %v6183_v33  ;;  %v6219_v8 = vsub.f32 %v8011_v14, %v5553_v13  ;;  %v8014_v15 = vld [vmem:[#allocation76_spill] sm:$0xff] }
 0x1e0   : > { %8008 = vst [vmem:[#allocation69_spill] sm:$0xff] %v6207_v21  ;;  %v1843_v10 = vadd.f32 %v1842_v63, %v1812_v2  ;;  %v1945_v55 = vadd.f32 %v1944_v1, %v1914_v7  ;;  %v2106_v48 = vmul.f32 %v6189_v50, %v6189_v50  ;;  %v6225_v57 = vsub.f32 %v8013_v23, %v5553_v13  ;;  %v8016_v1 = vld [vmem:[#allocation66_spill] sm:$0xff]  ;;  %v8020_v50 = vld [vmem:[#allocation68_spill] sm:$0xff] }
 0x1e1   : > { %8010 = vst [vmem:[#allocation70_spill] sm:$0xff] %v6213_v60  ;;  %8012 = vst [vmem:[#allocation63_spill] sm:$0xff] %v6219_v8  ;;  %v2136_v34 = vadd.f32 %v2135_v19, %v2105_v26  ;;  %v1813_v41 = vmul.f32 %v6195_v5, %v6195_v5  ;;  %v6231_v33 = vsub.f32 %v8014_v15, %v5553_v13  ;;  %v8018_v26 = vld [vmem:[#allocation89_spill] sm:$0xff] }
 0x1e2   : > { %v1915_v14 = vmul.f32 %v6201_v9, %v6201_v9  ;;  %v2046_v63 = vadd.f32 %v2045_v62, %v2015_v30  ;;  %v6237_v2 = vsub.f32 %v8016_v1, %v5553_v13  ;;  %v2107_v7 = vmul.f32 %v6207_v21, %v6207_v21  ;;  %v8022_v21 = vld [vmem:[#allocation72_spill] sm:$0xff] }
 0x1e3   : > { %8015 = vst [vmem:[#allocation87_spill] sm:$0xff] %v6231_v33  ;;  %v2137_v23 = vadd.f32 %v2136_v34, %v2106_v48  ;;  %v6243_v19 = vsub.f32 %v8018_v26, %v5553_v13  ;;  %v2016_v15 = vmul.f32 %v6213_v60, %v6213_v60  ;;  %v6249_v3 = vsub.f32 %v8020_v50, %v5553_v13 }
 0x1e4   : > { %8017 = vst [vmem:[#allocation65_spill] sm:$0xff] %v6237_v2  ;;  %v1844_v62 = vadd.f32 %v1843_v10, %v1813_v41  ;;  %v1946_v30 = vadd.f32 %v1945_v55, %v1915_v14  ;;  %v2108_v1 = vmul.f32 %v6219_v8, %v6219_v8  ;;  %v1814_v34 = vmul.f32 %v6225_v57, %v6225_v57  ;;  %v8024_v55 = vld [vmem:[#allocation91_spill] sm:$0xff] }
 0x1e5   : > { %8019 = vst [vmem:[#allocation75_spill] sm:$0xff] %v6243_v19  ;;  %8021 = vst [vmem:[#allocation76_spill] sm:$0xff] %v6249_v3  ;;  %v2138_v9 = vadd.f32 %v2137_v23, %v2107_v7  ;;  %v1916_v48 = vmul.f32 %v6231_v33, %v6231_v33  ;;  %v2047_v26 = vadd.f32 %v2046_v63, %v2016_v15  ;;  %v8026_v7 = vld [vmem:[#allocation74_spill] sm:$0xff] }
 0x1e6   : > { %v6259_v60 = vsub.f32 %v8022_v21, %v5553_v13  ;;  %v2109_v50 = vmul.f32 %v6237_v2, %v6237_v2  ;;  %v6265_v41 = vsub.f32 %v8024_v55, %v5553_v13  ;;  %v2017_v14 = vmul.f32 %v6243_v19, %v6243_v19 }
 0x1e7   : > { %v2139_v10 = vadd.f32 %v2138_v9, %v2108_v1  ;;  %v6271_v23 = vsub.f32 %v8026_v7, %v5553_v13  ;;  %v1845_v63 = vadd.f32 %v1844_v62, %v1814_v34  ;;  %v1947_v15 = vadd.f32 %v1946_v30, %v1916_v48  ;;  %v8028_v9 = vld [vmem:[#allocation78_spill] sm:$0xff]  ;;  %v8030_v7 = vld [vmem:[#allocation80_spill] sm:$0xff] }
 0x1e8   : > { %8023 = vst [vmem:[#allocation66_spill] sm:$0xff] %v6259_v60  ;;  %8025 = vst [vmem:[#allocation89_spill] sm:$0xff] %v6265_v41  ;;  %v2110_v21 = vmul.f32 %v6249_v3, %v6249_v3  ;;  %v2048_v33 = vadd.f32 %v2047_v26, %v2017_v14  ;;  %v6277_v1 = vsub.f32 %v8028_v9, %v5553_v13  ;;  %v8034_v9 = vld [vmem:[#allocation84_spill] sm:$0xff] }
 0x1e9   : > { %8027 = vst [vmem:[#allocation68_spill] sm:$0xff] %v6271_v23  ;;  %v2140_v8 = vadd.f32 %v2139_v10, %v2109_v50  ;;  %v2111_v55 = vmul.f32 %v6259_v60, %v6259_v60  ;;  %v2018_v19 = vmul.f32 %v6265_v41, %v6265_v41  ;;  %v6285_v62 = vsub.f32 %v8030_v7, %v5553_v13  ;;  %v8032_v10 = vld [vmem:[#allocation82_spill] sm:$0xff] }
 0x1ea   : > { %8029 = vst [vmem:[#allocation72_spill] sm:$0xff] %v6277_v1  ;;  %v1846_v30 = vrot.slane %v1845_v63, 4  ;;  %v1948_v34 = vrot.slane %v1947_v15, 4  ;;  %v2112_v48 = vmul.f32 %v6271_v23, %v6271_v23  ;;  %v6291_v14 = vsub.f32 %v8032_v10, %v5553_v13 }
 0x1eb   : > { %v2141_v2 = vadd.f32 %v2140_v8, %v2110_v21  ;;  %8031 = vst [vmem:[#allocation91_spill] sm:$0xff] %v6285_v62  ;;  %v2049_v50 = vadd.f32 %v2048_v33, %v2018_v19  ;;  %v2113_v8 = vmul.f32 %v6277_v1, %v6277_v1  ;;  %v6297_v60 = vsub.f32 %v8034_v9, %v5553_v13  ;;  %v8036_v33 = vld [vmem:[#allocation86_spill] sm:$0xff] }
 0x1ec   : > { %8033 = vst [vmem:[#allocation74_spill] sm:$0xff] %v6291_v14  ;;  %v1847_v7 = vadd.f32 %v1846_v30, %v1845_v63  ;;  %v1949_v3 = vadd.f32 %v1948_v34, %v1947_v15  ;;  %v2114_v41 = vmul.f32 %v6285_v62, %v6285_v62  ;;  %v6303_v19 = vsub.f32 %v8036_v33, %v5553_v13 }
 0x1ed   : > { %v2142_v26 = vadd.f32 %v2141_v2, %v2111_v55  ;;  %8035 = vst [vmem:[#allocation78_spill] sm:$0xff] %v6297_v60  ;;  %v2050_v2 = vrot.slane %v2049_v50, 4  ;;  %v2115_v55 = vmul.f32 %v6291_v14, %v6291_v14  ;;  %v2116_v15 = vmul.f32 %v6297_v60, %v6297_v60 }
 0x1ee   : > { %8037 = vst [vmem:[#allocation80_spill] sm:$0xff] %v6303_v19  ;;  %v1848_v9 = vrot.slane %v1847_v7, 2  ;;  %v1950_v63 = vrot.slane %v1949_v3, 2  ;;  %v2117_v33 = vmul.f32 %v6303_v19, %v6303_v19 }
 0x1ef   : > { %v2143_v21 = vadd.f32 %v2142_v26, %v2112_v48  ;;  %v8038_v48 = vld [vmem:[#allocation88_spill] sm:$0xff]  ;;  %v2051_v34 = vadd.f32 %v2050_v2, %v2049_v50 }
 0x1f0   : > { %v6309_v26 = vsub.f32 %v8038_v48, %v5553_v13  ;;  %v1951_v48 = vadd.f32 %v1950_v63, %v1949_v3 }
 0x1f1   : > { %v2144_v23 = vadd.f32 %v2143_v21, %v2113_v8  ;;  %v8040_v8 = vld [vmem:[#allocation90_spill] sm:$0xff] }
 0x1f2   : > { %8039 = vst [vmem:[#allocation82_spill] sm:$0xff] %v6309_v26  ;;  %v6315_v21 = vsub.f32 %v8040_v8, %v5553_v13  ;;  %v2118_v62 = vmul.f32 %v6309_v26, %v6309_v26  ;;  %v1952_v8 = vrot.slane %v1951_v48, 1 }
 0x1f3   : > { %v2145_v10 = vadd.f32 %v2144_v23, %v2114_v41  ;;  %v6321_v41 = vsub.f32 %v5548_v17, %v5553_v13  ;;  %v1849_v23 = vadd.f32 %v1848_v9, %v1847_v7 }
 0x1f4   : > { %8041 = vst [vmem:[#allocation84_spill] sm:$0xff] %v6315_v21  ;;  %v2119_v50 = vmul.f32 %v6315_v21, %v6315_v21  ;;  %v1953_v7 = vadd.f32 %v1952_v8, %v1951_v48 }
 0x1f5   : > { %v2146_v30 = vadd.f32 %v2145_v10, %v2115_v55  ;;  %8042 = vst [vmem:[#allocation86_spill] sm:$0xff] %v6321_v41  ;;  %v2052_v55 = vrot.slane %v2051_v34, 2  ;;  %v1850_v10 = vrot.slane %v1849_v23, 1 }
 0x1f7   : > { %v2147_v14 = vadd.f32 %v2146_v30, %v2116_v15  ;;  %v2120_v15 = vmul.f32 %v6321_v41, %v6321_v41  ;;  %v2053_v19 = vadd.f32 %v2052_v55, %v2051_v34  ;;  %v1851_v13 = vadd.f32 %v1850_v10, %v1849_v23 }
 0x1f9   : > { %v2148_v60 = vadd.f32 %v2147_v14, %v2117_v33  ;;  %v2054_v9 = vrot.slane %v2053_v19, 1  ;;  %v1954_v26 = vadd.f32 %v1953_v7, %v1851_v13 }
 0x1fb   : > { %v2149_v2 = vadd.f32 %v2148_v60, %v2118_v62  ;;  %v2055_v33 = vadd.f32 %v2054_v9, %v2053_v19 }
 0x1fd   : > { %v2150_v30 = vadd.f32 %v2149_v2, %v2119_v50  ;;  %v2056_v43 = vadd.f32 %v2055_v33, %v1954_v26 }
 0x1ff   : > { %v2151_v17 = vadd.f32 %v2150_v30, %v2120_v15 }
 0x201   : > { %v2152_v3 = vrot.slane %v2151_v17, 4 }
 0x203   : > { %v2153_v63 = vadd.f32 %v2152_v3, %v2151_v17 }
 0x205   : > { %v2154_v14 = vrot.slane %v2153_v63, 2 }
 0x207   : > { %v2155_v1 = vadd.f32 %v2154_v14, %v2153_v63 }
 0x209   : > { %v2156_v21 = vrot.slane %v2155_v1, 1 }
 0x20b   : > { %v2157_v60 = vadd.f32 %v2156_v21, %v2155_v1 }
 0x20d   : > { %v2158_v62 = vadd.f32 %v2157_v60, %v2056_v43 }
 0x20f   : > { %v2159_v37 = vmul.f32 0.0009765625, %v2158_v62 }
 0x211   : > { %v2160_v20 = vadd.f32 1e-05, %v2159_v37 }
 0x213   : > { %4753 = vrsqrt.f32 %v2160_v20 }
 0x220   : > { %v6329_v41 = vpop.eup %4753 }
 0x221   : > { %v6333_v34 = vmul.f32 %v6329_v41, %v5557_v54  ;;  %v6337_v23 = vmul.f32 %v6329_v41, %v5561_v12  ;;  %v6341_v19 = vmul.f32 %v6329_v41, %v5565_v51  ;;  %v6345_v43 = vmul.f32 %v6329_v41, %v5573_v24 }
 0x222   : > { %v6349_v20 = vmul.f32 %v6329_v41, %v5577_v40  ;;  %v6353_v54 = vmul.f32 %v6329_v41, %v5583_v46  ;;  %v6357_v12 = vmul.f32 %v6329_v41, %v5589_v52  ;;  %v6361_v51 = vmul.f32 %v6329_v41, %v5595_v11 }
 0x223   : > { %v6365_v24 = vmul.f32 %v6329_v41, %v5601_v39  ;;  %v6369_v40 = vmul.f32 %v6329_v41, %v5607_v47  ;;  %v6373_v46 = vmul.f32 %v6329_v41, %v5621_v31  ;;  %v6377_v52 = vmul.f32 %v6329_v41, %v5637_v42 }
 0x224   : > { %v6381_v11 = vmul.f32 %v6329_v41, %v5653_v56  ;;  %v6385_v39 = vmul.f32 %v6329_v41, %v5671_v6  ;;  %v6389_v47 = vmul.f32 %v6329_v41, %v5689_v36  ;;  %v6393_v31 = vmul.f32 %v6329_v41, %v5707_v4 }
 0x225   : > { %v6397_v42 = vmul.f32 %v6329_v41, %v5733_v28  ;;  %v6401_v56 = vmul.f32 %v6329_v41, %v5753_v44  ;;  %v6405_v6 = vmul.f32 %v6329_v41, %v5767_v0  ;;  %v6409_v36 = vmul.f32 %v6329_v41, %v5785_v22 }
 0x226   : > { %v6413_v4 = vmul.f32 %v6329_v41, %v5801_v59  ;;  %v6417_v28 = vmul.f32 %v6329_v41, %v5819_v27  ;;  %v6421_v44 = vmul.f32 %v6329_v41, %v5835_v25  ;;  %v6425_v0 = vmul.f32 %v6329_v41, %v5845_v18 }
 0x227   : > { %v6429_v22 = vmul.f32 %v6329_v41, %v5863_v32  ;;  %v6433_v59 = vmul.f32 %v6329_v41, %v5869_v45  ;;  %v6437_v27 = vmul.f32 %v6329_v41, %v5879_v38  ;;  %v6441_v25 = vmul.f32 %v6329_v41, %v5897_v61 }
 0x228   : > { %v6445_v18 = vmul.f32 %v6329_v41, %v5901_v58  ;;  %v6449_v32 = vmul.f32 %v6329_v41, %v6165_v29  ;;  %vm2194_vm0 = vcmp.gt.f32.partialorder %v6333_v34, 0.0  ;;  %vm2195_vm1 = vcmp.gt.f32.partialorder %v6337_v23, 0.0 }
 0x229   : > { %vm2196_vm2 = vcmp.gt.f32.partialorder %v6341_v19, 0.0  ;;  %vm2197_vm3 = vcmp.gt.f32.partialorder %v6345_v43, 0.0  ;;  %vm2198_vm4 = vcmp.gt.f32.partialorder %v6349_v20, 0.0  ;;  %vm2199_vm5 = vcmp.gt.f32.partialorder %v6353_v54, 0.0 }
 0x22a   : > { %vm2200_vm6 = vcmp.gt.f32.partialorder %v6357_v12, 0.0  ;;  %vm2201_vm7 = vcmp.gt.f32.partialorder %v6361_v51, 0.0  ;;  %vm2202_vm8 = vcmp.gt.f32.partialorder %v6365_v24, 0.0  ;;  %v6463_v45 = vmul.f32 %v6329_v41, %v6195_v5 }
 0x22b   : > { %v2226_v38 = vmul.f32 0.2, %v6333_v34  ;;  %v2227_v61 = vmul.f32 0.2, %v6337_v23  ;;  %v2228_v58 = vmul.f32 0.2, %v6341_v19  ;;  %v6474_v37 = vmul.f32 %v6329_v41, %v6225_v57 }
 0x22c   : > { %vm2209_vm15 = vcmp.gt.f32.partialorder %v6393_v31, 0.0  ;;  %vm2210_vm11 = vcmp.gt.f32.partialorder %v6397_v42, 0.0  ;;  %v2229_v29 = vmul.f32 0.2, %v6345_v43  ;;  %v2230_v5 = vmul.f32 0.2, %v6349_v20 }
 0x22d   : > { %v2231_v1 = vmul.f32 0.2, %v6353_v54  ;;  %vm2215_vm14 = vcmp.gt.f32.partialorder %v6417_v28, 0.0  ;;  %v2232_v57 = vmul.f32 0.2, %v6357_v12  ;;  %v6493_v48 = vsel %vm2194_vm0, %v6333_v34, %v2226_v38 }
 0x22e   : > { %v2233_v26 = vmul.f32 0.2, %v6361_v51  ;;  %v2234_v21 = vmul.f32 0.2, %v6365_v24  ;;  %vm2219_vm9 = vcmp.gt.f32.partialorder %v6433_v59, 0.0  ;;  %v6505_v10 = vsel %vm2195_vm1, %v6337_v23, %v2227_v61 }
 0x22f   : > { %v2235_v55 = vmul.f32 0.2, %v6369_v40  ;;  %v2236_v50 = vmul.f32 0.2, %v6373_v46  ;;  %v2237_v2 = vmul.f32 0.2, %v6377_v52  ;;  %v2260_v17 = vsel %vm2196_vm2, %v6341_v19, %v2228_v58 }
 0x230   : > { %vm2221_vm12 = vcmp.gt.f32.partialorder %v6441_v25, 0.0  ;;  %vm2222_vm13 = vcmp.gt.f32.partialorder %v6445_v18, 0.0  ;;  %vm2223_vm10 = vcmp.gt.f32.partialorder %v6449_v32, 0.0  ;;  %v2238_v8 = vmul.f32 0.2, %v6381_v11 }
 0x231   : > { %v2239_v15 = vmul.f32 0.2, %v6385_v39  ;;  %v2240_v30 = vmul.f32 0.2, %v6389_v47  ;;  %vm2224_vm1 = vcmp.gt.f32.partialorder %v6463_v45, 0.0  ;;  %vm2225_vm0 = vcmp.gt.f32.partialorder %v6474_v37, 0.0 }
 0x232   : > { %v2241_v13 = vmul.f32 0.2, %v6393_v31  ;;  %v2242_v7 = vmul.f32 0.2, %v6397_v42  ;;  %v2243_v3 = vmul.f32 0.2, %v6401_v56  ;;  %v2261_v9 = vsel %vm2197_vm3, %v6345_v43, %v2229_v29 }
 0x233   : > { %v2244_v63 = vmul.f32 0.2, %v6405_v6  ;;  %v2245_v14 = vmul.f32 0.2, %v6409_v36  ;;  %v2246_v33 = vmul.f32 0.2, %v6413_v4  ;;  %v2262_v60 = vsel %vm2198_vm4, %v6349_v20, %v2230_v5 }
 0x234   : > { %v2247_v62 = vmul.f32 0.2, %v6417_v28  ;;  %v2248_v34 = vmul.f32 0.2, %v6421_v44  ;;  %v2249_v23 = vmul.f32 0.2, %v6425_v0  ;;  %v2263_v19 = vsel %vm2199_vm5, %v6353_v54, %v2231_v1 }
 0x235   : > { %v2250_v43 = vmul.f32 0.2, %v6429_v22  ;;  %v2251_v38 = vmul.f32 0.2, %v6433_v59  ;;  %v2252_v61 = vmul.f32 0.2, %v6437_v27  ;;  %v2264_v20 = vsel %vm2200_vm6, %v6357_v12, %v2232_v57 }
 0x236   : > { %v2253_v58 = vmul.f32 0.2, %v6441_v25  ;;  %v2254_v29 = vmul.f32 0.2, %v6445_v18  ;;  %v2255_v5 = vmul.f32 0.2, %v6449_v32  ;;  %v2265_v54 = vsel %vm2201_vm7, %v6361_v51, %v2233_v26 }
 0x237   : > { %v2256_v1 = vmul.f32 0.2, %v6463_v45  ;;  %v2257_v49 = vmul.f32 0.2, %v6474_v37  ;;  %v2266_v53 = vsel %vm2202_vm8, %v6365_v24, %v2234_v21  ;;  %vm8043_vm2 = vcmp.gt.f32.partialorder %v6369_v40, 0.0 }
 0x238   : > { %v2267_v12 = vsel %vm8043_vm2, %v6369_v40, %v2235_v55  ;;  %vm8044_vm3 = vcmp.gt.f32.partialorder %v6373_v46, 0.0  ;;  %vm8045_vm4 = vcmp.gt.f32.partialorder %v6377_v52, 0.0  ;;  %vm8046_vm5 = vcmp.gt.f32.partialorder %v6381_v11, 0.0 }
 0x239   : > { %v2268_v57 = vsel %vm8044_vm3, %v6373_v46, %v2236_v50  ;;  %v2269_v51 = vsel %vm8045_vm4, %v6377_v52, %v2237_v2  ;;  %v2270_v26 = vsel %vm8046_vm5, %v6381_v11, %v2238_v8  ;;  %vm8047_vm6 = vcmp.gt.f32.partialorder %v6385_v39, 0.0 }
 0x23a   : > { %v2271_v24 = vsel %vm8047_vm6, %v6385_v39, %v2239_v15  ;;  %vm8048_vm7 = vcmp.gt.f32.partialorder %v6389_v47, 0.0  ;;  %v2273_v46 = vsel %vm2209_vm15, %v6393_v31, %v2241_v13  ;;  %v2274_v52 = vsel %vm2210_vm11, %v6397_v42, %v2242_v7  ;;  %v8057_v13 = vld [vmem:[#allocation92_spill] sm:$0xff] }
 0x23b   : > { %v2272_v40 = vsel %vm8048_vm7, %v6389_v47, %v2240_v30  ;;  %vm8049_vm8 = vcmp.gt.f32.partialorder %v6401_v56, 0.0  ;;  %vm8050_vm2 = vcmp.gt.f32.partialorder %v6405_v6, 0.0  ;;  %vm8051_vm3 = vcmp.gt.f32.partialorder %v6409_v36, 0.0 }
 0x23c   : > { %v2275_v11 = vsel %vm8049_vm8, %v6401_v56, %v2243_v3  ;;  %v2276_v39 = vsel %vm8050_vm2, %v6405_v6, %v2244_v63  ;;  %v2277_v47 = vsel %vm8051_vm3, %v6409_v36, %v2245_v14  ;;  %vm8052_vm4 = vcmp.gt.f32.partialorder %v6413_v4, 0.0  ;;  %v8058_v3 = vld [vmem:[#allocation93_spill] sm:$0xff]  ;;  %v8059_v63 = vld [vmem:[#allocation94_spill] sm:$0xff] }
 0x23d   : > { %v2278_v31 = vsel %vm8052_vm4, %v6413_v4, %v2246_v33  ;;  %v2279_v42 = vsel %vm2215_vm14, %v6417_v28, %v2247_v62  ;;  %vm8053_vm11 = vcmp.gt.f32.partialorder %v6421_v44, 0.0  ;;  %vm8054_vm15 = vcmp.gt.f32.partialorder %v6425_v0, 0.0  ;;  %v8060_v33 = vld [vmem:[#allocation95_spill] sm:$0xff]  ;;  %v8061_v62 = vld [vmem:[#allocation96_spill] sm:$0xff] }
 0x23e   : > { %v2280_v56 = vsel %vm8053_vm11, %v6421_v44, %v2248_v34  ;;  %v2281_v6 = vsel %vm8054_vm15, %v6425_v0, %v2249_v23  ;;  %vm8055_vm5 = vcmp.gt.f32.partialorder %v6429_v22, 0.0  ;;  %v2283_v4 = vsel %vm2219_vm9, %v6433_v59, %v2251_v38  ;;  %v8062_v34 = vld [vmem:[#allocation2_spill] sm:$0xff]  ;;  %v8064_v38 = vld [vmem:[#allocation3_spill] sm:$0xff] }
 0x23f   : > { %v2282_v36 = vsel %vm8055_vm5, %v6429_v22, %v2250_v43  ;;  %vm8056_vm14 = vcmp.gt.f32.partialorder %v6437_v27, 0.0  ;;  %v2285_v44 = vsel %vm2221_vm12, %v6441_v25, %v2253_v58  ;;  %v2286_v0 = vsel %vm2222_vm13, %v6445_v18, %v2254_v29  ;;  %v8066_v29 = vld [vmem:[#allocation11_spill] sm:$0xff] }
 0x240   : > { %v2284_v28 = vsel %vm8056_vm14, %v6437_v27, %v2252_v61  ;;  %v2287_v22 = vsel %vm2223_vm10, %v6449_v32, %v2255_v5  ;;  %v2288_v59 = vsel %vm2224_vm1, %v6463_v45, %v2256_v1  ;;  %v2289_v27 = vsel %vm2225_vm0, %v6474_v37, %v2257_v49 }
 0x241   : > { %v3981_v25 = vpack.c.bf16 %v6505_v10, %v6493_v48  ;;  %v3986_v18 = vpack.c.bf16 %v2261_v9, %v2260_v17  ;;  %v3991_v21 = vpack.c.bf16 %v2263_v19, %v2262_v60  ;;  %v3996_v55 = vpack.c.bf16 %v2265_v54, %v2264_v20  ;;  %v8063_v19 = vld [vmem:[#allocation9_spill] sm:$0xff]  ;;  %v8065_v20 = vld [vmem:[#allocation4_spill] sm:$0xff] }
 0x242   : > { %v4001_v50 = vpack.c.bf16 %v2267_v12, %v2266_v53  ;;  %v4006_v32 = vpack.c.bf16 %v2269_v51, %v2268_v57  ;;  %v4011_v45 = vpack.c.bf16 %v2271_v24, %v2270_v26  ;;  %v4016_v2 = vpack.c.bf16 %v2273_v46, %v2272_v40  ;;  %v8067_v54 = vld [vmem:[#allocation13_spill] sm:$0xff]  ;;  %v8068_v12 = vld [vmem:[#allocation23_spill] sm:$0xff]  ;;  %v8071_v46 = vld [vmem:[#allocation10_spill] sm:$0xff] }
 0x243   : > { %3982 = vst [vmem:[%s6610_s14] sm:$0xff] %v3981_v25   ;;  %4298 = vst [vmem:[%s6610_s14 + $0x8] sm:$0xff] %v3986_v18   ;;  %v4021_v8 = vpack.c.bf16 %v2275_v11, %v2274_v52  ;;  %v4026_v49 = vpack.c.bf16 %v2277_v47, %v2276_v39  ;;  %v4031_v53 = vpack.c.bf16 %v2279_v42, %v2278_v31  ;;  %v8069_v51 = vld [vmem:[#allocation7_spill] sm:$0xff]  ;;  %v8072_v11 = vld [vmem:[#allocation12_spill] sm:$0xff] }
 0x244   : > { %4299 = vst [vmem:[%s6610_s14 + $0x10] sm:$0xff] %v3991_v21   ;;  %4300 = vst [vmem:[%s6610_s14 + $0x18] sm:$0xff] %v3996_v55   ;;  %v4036_v37 = vpack.c.bf16 %v2281_v6, %v2280_v56  ;;  %v4041_v48 = vpack.c.bf16 %v2283_v4, %v2282_v36  ;;  %v4046_v10 = vpack.c.bf16 %v2285_v44, %v2284_v28  ;;  %v8070_v24 = vld [vmem:[#allocation15_spill] sm:$0xff]  ;;  %v8073_v47 = vld [vmem:[#allocation14_spill] sm:$0xff] }
 0x245   : > { %4301 = vst [vmem:[%s6610_s14 + $0x20] sm:$0xff] %v4001_v50   ;;  %4302 = vst [vmem:[%s6610_s14 + $0x28] sm:$0xff] %v4006_v32   ;;  %v4051_v15 = vpack.c.bf16 %v2287_v22, %v2286_v0  ;;  %v4056_v30 = vpack.c.bf16 %v2289_v27, %v2288_v59  ;;  %v6650_v17 = vmul.f32 %v6329_v41, %v5613_v16  ;;  %v8074_v42 = vld [vmem:[#allocation16_spill] sm:$0xff]  ;;  %v8075_v6 = vld [vmem:[#allocation18_spill] sm:$0xff] }
 0x246   : > { %4303 = vst [vmem:[%s6610_s14 + $0x30] sm:$0xff] %v4011_v45   ;;  %4304 = vst [vmem:[%s6610_s14 + $0x38] sm:$0xff] %v4016_v2   ;;  %v6654_v7 = vmul.f32 %v6329_v41, %v8057_v13  ;;  %v6658_v9 = vmul.f32 %v6329_v41, %v8058_v3  ;;  %v6662_v14 = vmul.f32 %v6329_v41, %v8059_v63  ;;  %v8076_v4 = vld [vmem:[#allocation38_spill] sm:$0xff]  ;;  %v8077_v44 = vld [vmem:[#allocation45_spill] sm:$0xff] }
 0x247   : > { %4305 = vst [vmem:[%s6610_s14 + $0x40] sm:$0xff] %v4021_v8   ;;  %4306 = vst [vmem:[%s6610_s14 + $0x48] sm:$0xff] %v4026_v49   ;;  %v6666_v60 = vmul.f32 %v6329_v41, %v8060_v33  ;;  %v6670_v16 = vmul.f32 %v6329_v41, %v8061_v62  ;;  %v6674_v23 = vmul.f32 %v6329_v41, %v8062_v34  ;;  %v8078_v22 = vld [vmem:[#allocation27_spill] sm:$0xff]  ;;  %v8081_v50 = vld [vmem:[#allocation52_spill] sm:$0xff]  ;;  %vm2482_vm9 = vcmp.gt.f32.partialorder %v6650_v17, 0.0 }
 0x248   : > { %4307 = vst [vmem:[%s6610_s14 + $0x50] sm:$0xff] %v4031_v53   ;;  %4308 = vst [vmem:[%s6610_s14 + $0x58] sm:$0xff] %v4036_v37   ;;  %v6678_v43 = vmul.f32 %v6329_v41, %v8063_v19  ;;  %v6682_v61 = vmul.f32 %v6329_v41, %v8064_v38  ;;  %v6686_v58 = vmul.f32 %v6329_v41, %v8065_v20  ;;  %v8079_v25 = vld [vmem:[#allocation35_spill] sm:$0xff]  ;;  %v8082_v45 = vld [vmem:[#allocation56_spill] sm:$0xff]  ;;  %vm2483_vm10 = vcmp.gt.f32.partialorder %v6654_v7, 0.0 }
 0x249   : > { %4309 = vst [vmem:[%s6610_s14 + $0x60] sm:$0xff] %v4041_v48   ;;  %4310 = vst [vmem:[%s6610_s14 + $0x68] sm:$0xff] %v4046_v10   ;;  %v6690_v5 = vmul.f32 %v6329_v41, %v8066_v29  ;;  %v6694_v1 = vmul.f32 %v6329_v41, %v8067_v54  ;;  %v6698_v57 = vmul.f32 %v6329_v41, %v8068_v12  ;;  %v8080_v21 = vld [vmem:[#allocation47_spill] sm:$0xff]  ;;  %v8083_v8 = vld [vmem:[#allocation60_spill] sm:$0xff]  ;;  %vm2484_vm12 = vcmp.gt.f32.partialorder %v6658_v9, 0.0 }
 0x24a   : > { %4311 = vst [vmem:[%s6610_s14 + $0x70] sm:$0xff] %v4051_v15   ;;  %4312 = vst [vmem:[%s6610_s14 + $0x78] sm:$0xff] %v4056_v30   ;;  %v6702_v26 = vmul.f32 %v6329_v41, %v8069_v51  ;;  %v6706_v40 = vmul.f32 %v6329_v41, %v8070_v24  ;;  %v6710_v52 = vmul.f32 %v6329_v41, %v8071_v46  ;;  %v8084_v49 = vld [vmem:[#allocation62_spill] sm:$0xff]  ;;  %vm2485_vm13 = vcmp.gt.f32.partialorder %v6662_v14, 0.0  ;;  %v8085_v37 = vld [vmem:[#allocation59_spill] sm:$0xff] }
 0x24b   : > { %v6714_v39 = vmul.f32 %v6329_v41, %v8072_v11  ;;  %v6718_v31 = vmul.f32 %v6329_v41, %v8073_v47  ;;  %v6722_v56 = vmul.f32 %v6329_v41, %v8074_v42  ;;  %v6726_v36 = vmul.f32 %v6329_v41, %v8075_v6  ;;  %v8086_v13 = vld [vmem:[#allocation87_spill] sm:$0xff] }
 0x24c   : > { %v6730_v28 = vmul.f32 %v6329_v41, %v8076_v4  ;;  %v6734_v0 = vmul.f32 %v6329_v41, %v8077_v44  ;;  %v6738_v59 = vmul.f32 %v6329_v41, %v8078_v22  ;;  %v6742_v27 = vmul.f32 %v6329_v41, %v5985_v35 }
 0x24d   : > { %v6746_v18 = vmul.f32 %v6329_v41, %v8079_v25  ;;  %v6750_v55 = vmul.f32 %v6329_v41, %v8080_v21  ;;  %v6754_v32 = vmul.f32 %v6329_v41, %v8081_v50  ;;  %v6758_v2 = vmul.f32 %v6329_v41, %v8082_v45 }
 0x24e   : > { %v6762_v35 = vmul.f32 %v6329_v41, %v8083_v8  ;;  %v6766_v53 = vmul.f32 %v6329_v41, %v8084_v49  ;;  %vm2486_vm0 = vcmp.gt.f32.partialorder %v6666_v60, 0.0  ;;  %vm2487_vm1 = vcmp.gt.f32.partialorder %v6670_v16, 0.0 }
 0x24f   : > { %vm2488_vm6 = vcmp.gt.f32.partialorder %v6674_v23, 0.0  ;;  %vm2489_vm7 = vcmp.gt.f32.partialorder %v6678_v43, 0.0  ;;  %vm2490_vm8 = vcmp.gt.f32.partialorder %v6682_v61, 0.0  ;;  %v6780_v48 = vmul.f32 %v6329_v41, %v8085_v37 }
 0x250   : > { %v2514_v10 = vmul.f32 0.2, %v6650_v17  ;;  %v2515_v15 = vmul.f32 0.2, %v6654_v7  ;;  %v2516_v30 = vmul.f32 0.2, %v6658_v9  ;;  %v6791_v3 = vmul.f32 %v6329_v41, %v8086_v13 }
 0x251   : > { %vm2497_vm14 = vcmp.gt.f32.partialorder %v6710_v52, 0.0  ;;  %vm2498_vm4 = vcmp.gt.f32.partialorder %v6714_v39, 0.0  ;;  %v2517_v63 = vmul.f32 0.2, %v6662_v14  ;;  %v2518_v33 = vmul.f32 0.2, %v6666_v60 }
 0x252   : > { %v2519_v62 = vmul.f32 0.2, %v6670_v16  ;;  %vm2503_vm5 = vcmp.gt.f32.partialorder %v6734_v0, 0.0  ;;  %v2520_v34 = vmul.f32 0.2, %v6674_v23  ;;  %v6810_v20 = vsel %vm2482_vm9, %v6650_v17, %v2514_v10 }
 0x253   : > { %v2521_v19 = vmul.f32 0.2, %v6678_v43  ;;  %v2522_v38 = vmul.f32 0.2, %v6682_v61  ;;  %vm2507_vm2 = vcmp.gt.f32.partialorder %v6750_v55, 0.0  ;;  %v6822_v51 = vsel %vm2483_vm10, %v6654_v7, %v2515_v15 }
 0x254   : > { %v2523_v29 = vmul.f32 0.2, %v6686_v58  ;;  %v2524_v54 = vmul.f32 0.2, %v6690_v5  ;;  %v2525_v12 = vmul.f32 0.2, %v6694_v1  ;;  %v2548_v11 = vsel %vm2484_vm12, %v6658_v9, %v2516_v30 }
 0x255   : > { %vm2509_vm11 = vcmp.gt.f32.partialorder %v6758_v2, 0.0  ;;  %vm2510_vm15 = vcmp.gt.f32.partialorder %v6762_v35, 0.0  ;;  %vm2511_vm3 = vcmp.gt.f32.partialorder %v6766_v53, 0.0  ;;  %v2526_v17 = vmul.f32 0.2, %v6698_v57 }
 0x256   : > { %v2527_v24 = vmul.f32 0.2, %v6702_v26  ;;  %v2528_v46 = vmul.f32 0.2, %v6706_v40  ;;  %vm2512_vm10 = vcmp.gt.f32.partialorder %v6780_v48, 0.0  ;;  %vm2513_vm9 = vcmp.gt.f32.partialorder %v6791_v3, 0.0 }
 0x257   : > { %v2529_v7 = vmul.f32 0.2, %v6710_v52  ;;  %v2530_v47 = vmul.f32 0.2, %v6714_v39  ;;  %v2531_v42 = vmul.f32 0.2, %v6718_v31  ;;  %v2549_v6 = vsel %vm2485_vm13, %v6662_v14, %v2517_v63 }
 0x258   : > { %v2532_v4 = vmul.f32 0.2, %v6722_v56  ;;  %v2533_v44 = vmul.f32 0.2, %v6726_v36  ;;  %v2534_v9 = vmul.f32 0.2, %v6730_v28  ;;  %v2550_v22 = vsel %vm2486_vm0, %v6666_v60, %v2518_v33 }
 0x259   : > { %v2535_v25 = vmul.f32 0.2, %v6734_v0  ;;  %v2536_v21 = vmul.f32 0.2, %v6738_v59  ;;  %v2537_v50 = vmul.f32 0.2, %v6742_v27  ;;  %v2551_v14 = vsel %vm2487_vm1, %v6670_v16, %v2519_v62 }
 0x25a   : > { %v2538_v45 = vmul.f32 0.2, %v6746_v18  ;;  %v2539_v8 = vmul.f32 0.2, %v6750_v55  ;;  %v2540_v49 = vmul.f32 0.2, %v6754_v32  ;;  %v2552_v60 = vsel %vm2488_vm6, %v6674_v23, %v2520_v34 }
 0x25b   : > { %v2541_v37 = vmul.f32 0.2, %v6758_v2  ;;  %v2542_v10 = vmul.f32 0.2, %v6762_v35  ;;  %v2543_v15 = vmul.f32 0.2, %v6766_v53  ;;  %v2553_v16 = vsel %vm2489_vm7, %v6678_v43, %v2521_v19 }
 0x25c   : > { %v2544_v30 = vmul.f32 0.2, %v6780_v48  ;;  %v2545_v13 = vmul.f32 0.2, %v6791_v3  ;;  %v2554_v63 = vsel %vm2490_vm8, %v6682_v61, %v2522_v38  ;;  %vm8087_vm12 = vcmp.gt.f32.partialorder %v6686_v58, 0.0 }
 0x25d   : > { %v2555_v23 = vsel %vm8087_vm12, %v6686_v58, %v2523_v29  ;;  %vm8088_vm13 = vcmp.gt.f32.partialorder %v6690_v5, 0.0  ;;  %vm8089_vm0 = vcmp.gt.f32.partialorder %v6694_v1, 0.0  ;;  %vm8090_vm1 = vcmp.gt.f32.partialorder %v6698_v57, 0.0 }
 0x25e   : > { %v2556_v33 = vsel %vm8088_vm13, %v6690_v5, %v2524_v54  ;;  %v2557_v43 = vsel %vm8089_vm0, %v6694_v1, %v2525_v12  ;;  %v2558_v62 = vsel %vm8090_vm1, %v6698_v57, %v2526_v17  ;;  %vm8091_vm6 = vcmp.gt.f32.partialorder %v6702_v26, 0.0 }
 0x25f   : > { %v2559_v61 = vsel %vm8091_vm6, %v6702_v26, %v2527_v24  ;;  %vm8092_vm7 = vcmp.gt.f32.partialorder %v6706_v40, 0.0  ;;  %v2561_v5 = vsel %vm2497_vm14, %v6710_v52, %v2529_v7  ;;  %v2562_v1 = vsel %vm2498_vm4, %v6714_v39, %v2530_v47  ;;  %v8102_v47 = vld [vmem:[#allocation6_spill] sm:$0xff] }
 0x260   : > { %v2560_v58 = vsel %vm8092_vm7, %v6706_v40, %v2528_v46  ;;  %vm8093_vm8 = vcmp.gt.f32.partialorder %v6718_v31, 0.0  ;;  %vm8094_vm12 = vcmp.gt.f32.partialorder %v6722_v56, 0.0  ;;  %vm8095_vm13 = vcmp.gt.f32.partialorder %v6726_v36, 0.0 }
 0x261   : > { %v2563_v57 = vsel %vm8093_vm8, %v6718_v31, %v2531_v42  ;;  %v2564_v26 = vsel %vm8094_vm12, %v6722_v56, %v2532_v4  ;;  %v2565_v40 = vsel %vm8095_vm13, %v6726_v36, %v2533_v44  ;;  %vm8096_vm0 = vcmp.gt.f32.partialorder %v6730_v28, 0.0  ;;  %v8104_v44 = vld [vmem:[#allocation8_spill] sm:$0xff] }
 0x262   : > { %v2566_v52 = vsel %vm8096_vm0, %v6730_v28, %v2534_v9  ;;  %v2567_v39 = vsel %vm2503_vm5, %v6734_v0, %v2535_v25  ;;  %vm8097_vm4 = vcmp.gt.f32.partialorder %v6738_v59, 0.0  ;;  %vm8098_vm14 = vcmp.gt.f32.partialorder %v6742_v27, 0.0 }
 0x263   : > { %v2568_v31 = vsel %vm8097_vm4, %v6738_v59, %v2536_v21  ;;  %v2569_v56 = vsel %vm8098_vm14, %v6742_v27, %v2537_v50  ;;  %vm8099_vm1 = vcmp.gt.f32.partialorder %v6746_v18, 0.0  ;;  %v2571_v28 = vsel %vm2507_vm2, %v6750_v55, %v2539_v8  ;;  %v8106_v21 = vld [vmem:[#allocation17_spill] sm:$0xff] }
 0x264   : > { %v2570_v36 = vsel %vm8099_vm1, %v6746_v18, %v2538_v45  ;;  %vm8100_vm5 = vcmp.gt.f32.partialorder %v6754_v32, 0.0  ;;  %v2573_v59 = vsel %vm2509_vm11, %v6758_v2, %v2541_v37  ;;  %v2574_v27 = vsel %vm2510_vm15, %v6762_v35, %v2542_v10  ;;  %v8108_v8 = vld [vmem:[#allocation21_spill] sm:$0xff]  ;;  %v8110_v10 = vld [vmem:[#allocation20_spill] sm:$0xff] }
 0x265   : > { %v2572_v0 = vsel %vm8100_vm5, %v6754_v32, %v2540_v49  ;;  %v2575_v18 = vsel %vm2511_vm3, %v6766_v53, %v2543_v15  ;;  %v2576_v55 = vsel %vm2512_vm10, %v6780_v48, %v2544_v30  ;;  %v2577_v32 = vsel %vm2513_vm9, %v6791_v3, %v2545_v13  ;;  %v8112_v13 = vld [vmem:[#allocation22_spill] sm:$0xff] }
 0x266   : > { %v4061_v2 = vpack.c.bf16 %v6822_v51, %v6810_v20  ;;  %v4066_v35 = vpack.c.bf16 %v2549_v6, %v2548_v11  ;;  %v4071_v34 = vpack.c.bf16 %v2551_v14, %v2550_v22  ;;  %v4076_v19 = vpack.c.bf16 %v2553_v16, %v2552_v60  ;;  %v8101_v11 = vld [vmem:[#allocation5_spill] sm:$0xff]  ;;  %v8103_v6 = vld [vmem:[#allocation24_spill] sm:$0xff]  ;;  %v8107_v14 = vld [vmem:[#allocation19_spill] sm:$0xff] }
 0x267   : > { %v4081_v38 = vpack.c.bf16 %v2555_v23, %v2554_v63  ;;  %v4086_v53 = vpack.c.bf16 %v2557_v43, %v2556_v33  ;;  %v4091_v48 = vpack.c.bf16 %v2559_v61, %v2558_v62  ;;  %v4096_v29 = vpack.c.bf16 %v2561_v5, %v2560_v58  ;;  %v8105_v22 = vld [vmem:[#allocation29_spill] sm:$0xff]  ;;  %v8111_v16 = vld [vmem:[#allocation34_spill] sm:$0xff]  ;;  %v8114_v43 = vld [vmem:[#allocation28_spill] sm:$0xff] }
 0x268   : > { %4313 = vst [vmem:[%s6610_s14 + $0x80] sm:$0xff] %v4061_v2   ;;  %4314 = vst [vmem:[%s6610_s14 + $0x88] sm:$0xff] %v4066_v35   ;;  %v4101_v54 = vpack.c.bf16 %v2563_v57, %v2562_v1  ;;  %v4106_v3 = vpack.c.bf16 %v2565_v40, %v2564_v26  ;;  %v4111_v20 = vpack.c.bf16 %v2567_v39, %v2566_v52  ;;  %v8109_v60 = vld [vmem:[#allocation25_spill] sm:$0xff]  ;;  %v8113_v23 = vld [vmem:[#allocation42_spill] sm:$0xff] }
 0x269   : > { %4315 = vst [vmem:[%s6610_s14 + $0x90] sm:$0xff] %v4071_v34   ;;  %4316 = vst [vmem:[%s6610_s14 + $0x98] sm:$0xff] %v4076_v19   ;;  %v4116_v12 = vpack.c.bf16 %v2569_v56, %v2568_v31  ;;  %v4121_v51 = vpack.c.bf16 %v2571_v28, %v2570_v36  ;;  %v4126_v17 = vpack.c.bf16 %v2573_v59, %v2572_v0  ;;  %v8115_v61 = vld [vmem:[#allocation26_spill] sm:$0xff]  ;;  %v8116_v5 = vld [vmem:[#allocation36_spill] sm:$0xff] }
 0x26a   : > { %4317 = vst [vmem:[%s6610_s14 + $0xa0] sm:$0xff] %v4081_v38   ;;  %4318 = vst [vmem:[%s6610_s14 + $0xa8] sm:$0xff] %v4086_v53   ;;  %v4131_v24 = vpack.c.bf16 %v2575_v18, %v2574_v27  ;;  %v4136_v46 = vpack.c.bf16 %v2577_v32, %v2576_v55  ;;  %v6960_v7 = vmul.f32 %v6329_v41, %v8101_v11  ;;  %v8117_v57 = vld [vmem:[#allocation30_spill] sm:$0xff]  ;;  %v8118_v40 = vld [vmem:[#allocation40_spill] sm:$0xff] }
 0x26b   : > { %4319 = vst [vmem:[%s6610_s14 + $0xb0] sm:$0xff] %v4091_v48   ;;  %4320 = vst [vmem:[%s6610_s14 + $0xb8] sm:$0xff] %v4096_v29   ;;  %v6964_v42 = vmul.f32 %v6329_v41, %v8102_v47  ;;  %v6968_v4 = vmul.f32 %v6329_v41, %v8103_v6  ;;  %v6972_v9 = vmul.f32 %v6329_v41, %v8104_v44  ;;  %v8119_v39 = vld [vmem:[#allocation33_spill] sm:$0xff]  ;;  %v8120_v56 = vld [vmem:[#allocation44_spill] sm:$0xff] }
 0x26c   : > { %4321 = vst [vmem:[%s6610_s14 + $0xc0] sm:$0xff] %v4101_v54   ;;  %4322 = vst [vmem:[%s6610_s14 + $0xc8] sm:$0xff] %v4106_v3   ;;  %v6976_v25 = vmul.f32 %v6329_v41, %v8105_v22  ;;  %v6980_v50 = vmul.f32 %v6329_v41, %v8106_v21  ;;  %v6984_v45 = vmul.f32 %v6329_v41, %v8107_v14  ;;  %v8121_v28 = vld [vmem:[#allocation97_spill] sm:$0xff]  ;;  %v8122_v59 = vld [vmem:[#allocation67_spill] sm:$0xff]  ;;  %vm2771_vm2 = vcmp.gt.f32.partialorder %v6960_v7, 0.0 }
 0x26d   : > { %4323 = vst [vmem:[%s6610_s14 + $0xd0] sm:$0xff] %v4111_v20   ;;  %4324 = vst [vmem:[%s6610_s14 + $0xd8] sm:$0xff] %v4116_v12   ;;  %v6988_v49 = vmul.f32 %v6329_v41, %v8108_v8  ;;  %v6992_v37 = vmul.f32 %v6329_v41, %v8109_v60  ;;  %v6996_v15 = vmul.f32 %v6329_v41, %v8110_v10  ;;  %v8123_v18 = vld [vmem:[#allocation71_spill] sm:$0xff]  ;;  %v8124_v32 = vld [vmem:[#allocation73_spill] sm:$0xff]  ;;  %vm2772_vm3 = vcmp.gt.f32.partialorder %v6964_v42, 0.0 }
 0x26e   : > { %4325 = vst [vmem:[%s6610_s14 + $0xe0] sm:$0xff] %v4121_v51   ;;  %4326 = vst [vmem:[%s6610_s14 + $0xe8] sm:$0xff] %v4126_v17   ;;  %v7000_v30 = vmul.f32 %v6329_v41, %v8111_v16  ;;  %v7004_v63 = vmul.f32 %v6329_v41, %v8112_v13  ;;  %v7008_v33 = vmul.f32 %v6329_v41, %v8113_v23  ;;  %v8125_v35 = vld [vmem:[#allocation77_spill] sm:$0xff]  ;;  %v8126_v19 = vld [vmem:[#allocation79_spill] sm:$0xff]  ;;  %vm2773_vm11 = vcmp.gt.f32.partialorder %v6968_v4, 0.0 }
 0x26f   : > { %4327 = vst [vmem:[%s6610_s14 + $0xf0] sm:$0xff] %v4131_v24   ;;  %4328 = vst [vmem:[%s6610_s14 + $0xf8] sm:$0xff] %v4136_v46   ;;  %v7012_v62 = vmul.f32 %v6329_v41, %v8114_v43  ;;  %v7016_v58 = vmul.f32 %v6329_v41, %v8115_v61  ;;  %v7020_v1 = vmul.f32 %v6329_v41, %v8116_v5  ;;  %v8127_v53 = vld [vmem:[#allocation81_spill] sm:$0xff]  ;;  %v8128_v29 = vld [vmem:[#allocation83_spill] sm:$0xff]  ;;  %vm2774_vm15 = vcmp.gt.f32.partialorder %v6972_v9, 0.0 }
 0x270   : > { %v7024_v26 = vmul.f32 %v6329_v41, %v8117_v57  ;;  %v7028_v52 = vmul.f32 %v6329_v41, %v8118_v40  ;;  %v7032_v31 = vmul.f32 %v6329_v41, %v8119_v39  ;;  %v7036_v36 = vmul.f32 %v6329_v41, %v8120_v56  ;;  %v8129_v3 = vld [vmem:[#allocation57_spill] sm:$0xff]  ;;  %v8130_v12 = vld [vmem:[#allocation70_spill] sm:$0xff]  ;;  %v8131_v17 = vld [vmem:[#allocation75_spill] sm:$0xff] }
 0x271   : > { %v7040_v0 = vmul.f32 %v6329_v41, %v8121_v28  ;;  %v7044_v27 = vmul.f32 %v6329_v41, %v8122_v59  ;;  %v7048_v55 = vmul.f32 %v6329_v41, %v8123_v18  ;;  %v7052_v2 = vmul.f32 %v6329_v41, %v8124_v32  ;;  %v8132_v6 = vld [vmem:[#allocation89_spill] sm:$0xff] }
 0x272   : > { %v7056_v34 = vmul.f32 %v6329_v41, %v8125_v35  ;;  %v7060_v38 = vmul.f32 %v6329_v41, %v8126_v19  ;;  %v7064_v48 = vmul.f32 %v6329_v41, %v8127_v53  ;;  %v7068_v54 = vmul.f32 %v6329_v41, %v8128_v29 }
 0x273   : > { %v7072_v20 = vmul.f32 %v6329_v41, %v8129_v3  ;;  %v7076_v51 = vmul.f32 %v6329_v41, %v8130_v12  ;;  %vm2775_vm9 = vcmp.gt.f32.partialorder %v6976_v25, 0.0  ;;  %vm2776_vm10 = vcmp.gt.f32.partialorder %v6980_v50, 0.0 }
 0x274   : > { %vm2777_vm6 = vcmp.gt.f32.partialorder %v6984_v45, 0.0  ;;  %vm2778_vm7 = vcmp.gt.f32.partialorder %v6988_v49, 0.0  ;;  %vm2779_vm8 = vcmp.gt.f32.partialorder %v6992_v37, 0.0  ;;  %v7090_v24 = vmul.f32 %v6329_v41, %v8131_v17 }
 0x275   : > { %v2803_v46 = vmul.f32 0.2, %v6960_v7  ;;  %v2804_v11 = vmul.f32 0.2, %v6964_v42  ;;  %v2805_v47 = vmul.f32 0.2, %v6968_v4  ;;  %v7101_v44 = vmul.f32 %v6329_v41, %v8132_v6 }
 0x276   : > { %vm2786_vm5 = vcmp.gt.f32.partialorder %v7020_v1, 0.0  ;;  %vm2787_vm0 = vcmp.gt.f32.partialorder %v7024_v26, 0.0  ;;  %v2806_v22 = vmul.f32 0.2, %v6972_v9  ;;  %v2807_v21 = vmul.f32 0.2, %v6976_v25 }
 0x277   : > { %v2808_v14 = vmul.f32 0.2, %v6980_v50  ;;  %vm2792_vm1 = vcmp.gt.f32.partialorder %v7044_v27, 0.0  ;;  %v2809_v8 = vmul.f32 0.2, %v6984_v45  ;;  %v7120_v16 = vsel %vm2771_vm2, %v6960_v7, %v2803_v46 }
 0x278   : > { %v2810_v60 = vmul.f32 0.2, %v6988_v49  ;;  %v2811_v10 = vmul.f32 0.2, %v6992_v37  ;;  %vm2796_vm12 = vcmp.gt.f32.partialorder %v7060_v38, 0.0  ;;  %v7132_v61 = vsel %vm2772_vm3, %v6964_v42, %v2804_v11 }
 0x279   : > { %v2812_v13 = vmul.f32 0.2, %v6996_v15  ;;  %v2813_v23 = vmul.f32 0.2, %v7000_v30  ;;  %v2814_v43 = vmul.f32 0.2, %v7004_v63  ;;  %v2837_v40 = vsel %vm2773_vm11, %v6968_v4, %v2805_v47 }
 0x27a   : > { %vm2798_vm4 = vcmp.gt.f32.partialorder %v7068_v54, 0.0  ;;  %vm2799_vm14 = vcmp.gt.f32.partialorder %v7072_v20, 0.0  ;;  %vm2800_vm13 = vcmp.gt.f32.partialorder %v7076_v51, 0.0  ;;  %v2815_v7 = vmul.f32 0.2, %v7008_v33 }
 0x27b   : > { %v2816_v5 = vmul.f32 0.2, %v7012_v62  ;;  %v2817_v57 = vmul.f32 0.2, %v7016_v58  ;;  %vm2801_vm3 = vcmp.gt.f32.partialorder %v7090_v24, 0.0  ;;  %vm2802_vm2 = vcmp.gt.f32.partialorder %v7101_v44, 0.0 }
 0x27c   : > { %v2818_v42 = vmul.f32 0.2, %v7020_v1  ;;  %v2819_v39 = vmul.f32 0.2, %v7024_v26  ;;  %v2820_v56 = vmul.f32 0.2, %v7028_v52  ;;  %v2838_v28 = vsel %vm2774_vm15, %v6972_v9, %v2806_v22 }
 0x27d   : > { %v2821_v59 = vmul.f32 0.2, %v7032_v31  ;;  %v2822_v18 = vmul.f32 0.2, %v7036_v36  ;;  %v2823_v4 = vmul.f32 0.2, %v7040_v0  ;;  %v2839_v32 = vsel %vm2775_vm9, %v6976_v25, %v2807_v21 }
 0x27e   : > { %v2824_v35 = vmul.f32 0.2, %v7044_v27  ;;  %v2825_v19 = vmul.f32 0.2, %v7048_v55  ;;  %v2826_v53 = vmul.f32 0.2, %v7052_v2  ;;  %v2840_v9 = vsel %vm2776_vm10, %v6980_v50, %v2808_v14 }
 0x27f   : > { %v2827_v29 = vmul.f32 0.2, %v7056_v34  ;;  %v2828_v3 = vmul.f32 0.2, %v7060_v38  ;;  %v2829_v12 = vmul.f32 0.2, %v7064_v48  ;;  %v2841_v25 = vsel %vm2777_vm6, %v6984_v45, %v2809_v8 }
 0x280   : > { %v2830_v17 = vmul.f32 0.2, %v7068_v54  ;;  %v2831_v46 = vmul.f32 0.2, %v7072_v20  ;;  %v2832_v11 = vmul.f32 0.2, %v7076_v51  ;;  %v2842_v50 = vsel %vm2778_vm7, %v6988_v49, %v2810_v60 }
 0x281   : > { %v2833_v47 = vmul.f32 0.2, %v7090_v24  ;;  %v2834_v6 = vmul.f32 0.2, %v7101_v44  ;;  %v2843_v22 = vsel %vm2779_vm8, %v6992_v37, %v2811_v10  ;;  %vm8133_vm11 = vcmp.gt.f32.partialorder %v6996_v15, 0.0 }
 0x282   : > { %v2844_v45 = vsel %vm8133_vm11, %v6996_v15, %v2812_v13  ;;  %vm8134_vm15 = vcmp.gt.f32.partialorder %v7000_v30, 0.0  ;;  %vm8135_vm9 = vcmp.gt.f32.partialorder %v7004_v63, 0.0  ;;  %vm8136_vm10 = vcmp.gt.f32.partialorder %v7008_v33, 0.0 }
 0x283   : > { %v2845_v21 = vsel %vm8134_vm15, %v7000_v30, %v2813_v23  ;;  %v2846_v49 = vsel %vm8135_vm9, %v7004_v63, %v2814_v43  ;;  %v2847_v14 = vsel %vm8136_vm10, %v7008_v33, %v2815_v7  ;;  %vm8137_vm6 = vcmp.gt.f32.partialorder %v7012_v62, 0.0 }
 0x284   : > { %v2848_v37 = vsel %vm8137_vm6, %v7012_v62, %v2816_v5  ;;  %vm8138_vm7 = vcmp.gt.f32.partialorder %v7016_v58, 0.0  ;;  %v2850_v30 = vsel %vm2786_vm5, %v7020_v1, %v2818_v42  ;;  %v2851_v63 = vsel %vm2787_vm0, %v7024_v26, %v2819_v39  ;;  %v8148_v39 = vld [vmem:[#allocation50_spill] sm:$0xff] }
 0x285   : > { %v2849_v15 = vsel %vm8138_vm7, %v7016_v58, %v2817_v57  ;;  %vm8139_vm8 = vcmp.gt.f32.partialorder %v7028_v52, 0.0  ;;  %vm8140_vm11 = vcmp.gt.f32.partialorder %v7032_v31, 0.0  ;;  %vm8141_vm15 = vcmp.gt.f32.partialorder %v7036_v36, 0.0 }
 0x286   : > { %v2852_v33 = vsel %vm8139_vm8, %v7028_v52, %v2820_v56  ;;  %v2853_v62 = vsel %vm8140_vm11, %v7032_v31, %v2821_v59  ;;  %v2854_v58 = vsel %vm8141_vm15, %v7036_v36, %v2822_v18  ;;  %vm8142_vm9 = vcmp.gt.f32.partialorder %v7040_v0, 0.0  ;;  %v8150_v18 = vld [vmem:[#allocation32_spill] sm:$0xff] }
 0x287   : > { %v2855_v1 = vsel %vm8142_vm9, %v7040_v0, %v2823_v4  ;;  %v2856_v26 = vsel %vm2792_vm1, %v7044_v27, %v2824_v35  ;;  %vm8143_vm0 = vcmp.gt.f32.partialorder %v7048_v55, 0.0  ;;  %vm8144_vm5 = vcmp.gt.f32.partialorder %v7052_v2, 0.0 }
 0x288   : > { %v2857_v52 = vsel %vm8143_vm0, %v7048_v55, %v2825_v19  ;;  %v2858_v31 = vsel %vm8144_vm5, %v7052_v2, %v2826_v53  ;;  %vm8145_vm10 = vcmp.gt.f32.partialorder %v7056_v34, 0.0  ;;  %v2860_v0 = vsel %vm2796_vm12, %v7060_v38, %v2828_v3  ;;  %v8152_v19 = vld [vmem:[#allocation61_spill] sm:$0xff]  ;;  %v8154_v3 = vld [vmem:[#allocation39_spill] sm:$0xff] }
 0x289   : > { %v2859_v36 = vsel %vm8145_vm10, %v7056_v34, %v2827_v29  ;;  %vm8146_vm1 = vcmp.gt.f32.partialorder %v7064_v48, 0.0  ;;  %v2862_v55 = vsel %vm2798_vm4, %v7068_v54, %v2830_v17  ;;  %v2863_v2 = vsel %vm2799_vm14, %v7072_v20, %v2831_v46  ;;  %v8156_v46 = vld [vmem:[#allocation43_spill] sm:$0xff] }
 0x28a   : > { %v2861_v27 = vsel %vm8146_vm1, %v7064_v48, %v2829_v12  ;;  %v2864_v34 = vsel %vm2800_vm13, %v7076_v51, %v2832_v11  ;;  %v2865_v38 = vsel %vm2801_vm3, %v7090_v24, %v2833_v47  ;;  %v2866_v48 = vsel %vm2802_vm2, %v7101_v44, %v2834_v6  ;;  %v8158_v6 = vld [vmem:[#allocation48_spill] sm:$0xff] }
 0x28b   : > { %v4141_v54 = vpack.c.bf16 %v7132_v61, %v7120_v16  ;;  %v4146_v20 = vpack.c.bf16 %v2838_v28, %v2837_v40  ;;  %v4151_v8 = vpack.c.bf16 %v2840_v9, %v2839_v32  ;;  %v4156_v60 = vpack.c.bf16 %v2842_v50, %v2841_v25  ;;  %v8147_v40 = vld [vmem:[#allocation31_spill] sm:$0xff]  ;;  %v8149_v28 = vld [vmem:[#allocation54_spill] sm:$0xff]  ;;  %v8153_v9 = vld [vmem:[#allocation37_spill] sm:$0xff] }
 0x28c   : > { %v4161_v10 = vpack.c.bf16 %v2844_v45, %v2843_v22  ;;  %v4166_v51 = vpack.c.bf16 %v2846_v49, %v2845_v21  ;;  %v4171_v24 = vpack.c.bf16 %v2848_v37, %v2847_v14  ;;  %v4176_v13 = vpack.c.bf16 %v2850_v30, %v2849_v15  ;;  %v8151_v32 = vld [vmem:[#allocation58_spill] sm:$0xff]  ;;  %v8155_v25 = vld [vmem:[#allocation41_spill] sm:$0xff]  ;;  %v8160_v49 = vld [vmem:[#allocation51_spill] sm:$0xff] }
 0x28d   : > { %4329 = vst [vmem:[%s6610_s14 + $0x100] sm:$0xff] %v4141_v54   ;;  %4330 = vst [vmem:[%s6610_s14 + $0x108] sm:$0xff] %v4146_v20   ;;  %v4181_v23 = vpack.c.bf16 %v2852_v33, %v2851_v63  ;;  %v4186_v44 = vpack.c.bf16 %v2854_v58, %v2853_v62  ;;  %v4191_v16 = vpack.c.bf16 %v2856_v26, %v2855_v1  ;;  %v8157_v50 = vld [vmem:[#allocation46_spill] sm:$0xff]  ;;  %v8159_v45 = vld [vmem:[#allocation49_spill] sm:$0xff] }
 0x28e   : > { %4331 = vst [vmem:[%s6610_s14 + $0x110] sm:$0xff] %v4151_v8   ;;  %4332 = vst [vmem:[%s6610_s14 + $0x118] sm:$0xff] %v4156_v60   ;;  %v4196_v43 = vpack.c.bf16 %v2858_v31, %v2857_v52  ;;  %v4201_v61 = vpack.c.bf16 %v2860_v0, %v2859_v36  ;;  %v4206_v7 = vpack.c.bf16 %v2862_v55, %v2861_v27  ;;  %v8161_v37 = vld [vmem:[#allocation53_spill] sm:$0xff]  ;;  %v8162_v30 = vld [vmem:[#allocation55_spill] sm:$0xff] }
 0x28f   : > { %4333 = vst [vmem:[%s6610_s14 + $0x120] sm:$0xff] %v4161_v10   ;;  %4334 = vst [vmem:[%s6610_s14 + $0x128] sm:$0xff] %v4166_v51   ;;  %v4211_v5 = vpack.c.bf16 %v2864_v34, %v2863_v2  ;;  %v4216_v57 = vpack.c.bf16 %v2866_v48, %v2865_v38  ;;  %v7270_v42 = vmul.f32 %v6329_v41, %v8147_v40  ;;  %v8163_v33 = vld [vmem:[#allocation64_spill] sm:$0xff]  ;;  %v8164_v58 = vld [vmem:[#allocation85_spill] sm:$0xff] }
 0x290   : > { %4335 = vst [vmem:[%s6610_s14 + $0x130] sm:$0xff] %v4171_v24   ;;  %4336 = vst [vmem:[%s6610_s14 + $0x138] sm:$0xff] %v4176_v13   ;;  %v7274_v56 = vmul.f32 %v6329_v41, %v8148_v39  ;;  %v7278_v59 = vmul.f32 %v6329_v41, %v8149_v28  ;;  %v7282_v4 = vmul.f32 %v6329_v41, %v8150_v18  ;;  %v8165_v26 = vld [vmem:[#allocation69_spill] sm:$0xff]  ;;  %v8166_v31 = vld [vmem:[#allocation63_spill] sm:$0xff] }
 0x291   : > { %4337 = vst [vmem:[%s6610_s14 + $0x140] sm:$0xff] %v4181_v23   ;;  %4338 = vst [vmem:[%s6610_s14 + $0x148] sm:$0xff] %v4186_v44   ;;  %v7286_v35 = vmul.f32 %v6329_v41, %v8151_v32  ;;  %v7290_v53 = vmul.f32 %v6329_v41, %v8152_v19  ;;  %v7294_v29 = vmul.f32 %v6329_v41, %v8153_v9  ;;  %v8167_v0 = vld [vmem:[#allocation65_spill] sm:$0xff]  ;;  %v8168_v55 = vld [vmem:[#allocation76_spill] sm:$0xff]  ;;  %vm3060_vm12 = vcmp.gt.f32.partialorder %v7270_v42, 0.0 }
 0x292   : > { %4339 = vst [vmem:[%s6610_s14 + $0x150] sm:$0xff] %v4191_v16   ;;  %4340 = vst [vmem:[%s6610_s14 + $0x158] sm:$0xff] %v4196_v43   ;;  %v7298_v12 = vmul.f32 %v6329_v41, %v8154_v3  ;;  %v7302_v17 = vmul.f32 %v6329_v41, %v8155_v25  ;;  %v7306_v11 = vmul.f32 %v6329_v41, %v8156_v46  ;;  %v8169_v34 = vld [vmem:[#allocation66_spill] sm:$0xff]  ;;  %v8170_v48 = vld [vmem:[#allocation68_spill] sm:$0xff]  ;;  %vm3061_vm13 = vcmp.gt.f32.partialorder %v7274_v56, 0.0 }
 0x293   : > { %4341 = vst [vmem:[%s6610_s14 + $0x160] sm:$0xff] %v4201_v61   ;;  %4342 = vst [vmem:[%s6610_s14 + $0x168] sm:$0xff] %v4206_v7   ;;  %v7310_v47 = vmul.f32 %v6329_v41, %v8157_v50  ;;  %v7314_v22 = vmul.f32 %v6329_v41, %v8158_v6  ;;  %v7318_v21 = vmul.f32 %v6329_v41, %v8159_v45  ;;  %v8171_v20 = vld [vmem:[#allocation72_spill] sm:$0xff]  ;;  %v8172_v60 = vld [vmem:[#allocation91_spill] sm:$0xff]  ;;  %vm3062_vm4 = vcmp.gt.f32.partialorder %v7278_v59, 0.0 }
 0x294   : > { %4343 = vst [vmem:[%s6610_s14 + $0x170] sm:$0xff] %v4211_v5   ;;  %4344 = vst [vmem:[%s6610_s14 + $0x178] sm:$0xff] %v4216_v57   ;;  %v7322_v14 = vmul.f32 %v6329_v41, %v8160_v49  ;;  %v7326_v15 = vmul.f32 %v6329_v41, %v8161_v37  ;;  %v7330_v63 = vmul.f32 %v6329_v41, %v8162_v30  ;;  %v8173_v51 = vld [vmem:[#allocation74_spill] sm:$0xff]  ;;  %v8175_v44 = vld [vmem:[#allocation80_spill] sm:$0xff]  ;;  %vm3063_vm14 = vcmp.gt.f32.partialorder %v7282_v4, 0.0 }
 0x295   : > { %v7334_v62 = vmul.f32 %v6329_v41, %v8163_v33  ;;  %v7338_v1 = vmul.f32 %v6329_v41, %v8164_v58  ;;  %v7342_v52 = vmul.f32 %v6329_v41, %v8165_v26  ;;  %v7346_v36 = vmul.f32 %v6329_v41, %v8166_v31  ;;  %v8174_v13 = vld [vmem:[#allocation78_spill] sm:$0xff]  ;;  %v8177_v7 = vld [vmem:[#allocation84_spill] sm:$0xff] }
 0x296   : > { %v7350_v27 = vmul.f32 %v6329_v41, %v8167_v0  ;;  %v7354_v2 = vmul.f32 %v6329_v41, %v8168_v55  ;;  %v7358_v38 = vmul.f32 %v6329_v41, %v8169_v34  ;;  %v7362_v54 = vmul.f32 %v6329_v41, %v8170_v48  ;;  %v8176_v43 = vld [vmem:[#allocation82_spill] sm:$0xff] }
 0x297   : > { %v7366_v8 = vmul.f32 %v6329_v41, %v8171_v20  ;;  %v7370_v10 = vmul.f32 %v6329_v41, %v8172_v60  ;;  %v7374_v24 = vmul.f32 %v6329_v41, %v8173_v51  ;;  %v7378_v23 = vmul.f32 %v6329_v41, %v8174_v13  ;;  %v8178_v28 = vld [vmem:[#allocation86_spill] sm:$0xff] }
 0x298   : > { %v7382_v16 = vmul.f32 %v6329_v41, %v8175_v44  ;;  %v7386_v61 = vmul.f32 %v6329_v41, %v8176_v43  ;;  %vm3064_vm2 = vcmp.gt.f32.partialorder %v7286_v35, 0.0  ;;  %vm3065_vm3 = vcmp.gt.f32.partialorder %v7290_v53, 0.0 }
 0x299   : > { %vm3066_vm6 = vcmp.gt.f32.partialorder %v7294_v29, 0.0  ;;  %vm3067_vm7 = vcmp.gt.f32.partialorder %v7298_v12, 0.0  ;;  %vm3068_vm8 = vcmp.gt.f32.partialorder %v7302_v17, 0.0  ;;  %v7400_v5 = vmul.f32 %v6329_v41, %v8177_v7 }
 0x29a   : > { %v3092_v57 = vmul.f32 0.2, %v7270_v42  ;;  %v3093_v40 = vmul.f32 0.2, %v7274_v56  ;;  %v3094_v39 = vmul.f32 0.2, %v7278_v59  ;;  %v7411_v18 = vmul.f32 %v6329_v41, %v8178_v28 }
 0x29b   : > { %vm3075_vm1 = vcmp.gt.f32.partialorder %v7330_v63, 0.0  ;;  %vm3076_vm9 = vcmp.gt.f32.partialorder %v7334_v62, 0.0  ;;  %v3095_v32 = vmul.f32 0.2, %v7282_v4  ;;  %v3096_v19 = vmul.f32 0.2, %v7286_v35 }
 0x29c   : > { %v3097_v9 = vmul.f32 0.2, %v7290_v53  ;;  %vm3081_vm10 = vcmp.gt.f32.partialorder %v7354_v2, 0.0  ;;  %v3098_v41 = vmul.f32 0.2, %v7294_v29  ;;  %v7430_v46 = vsel %vm3060_vm12, %v7270_v42, %v3092_v57 }
 0x29d   : > { %v3099_v3 = vmul.f32 0.2, %v7298_v12  ;;  %v3100_v25 = vmul.f32 0.2, %v7302_v17  ;;  %vm3085_vm11 = vcmp.gt.f32.partialorder %v7370_v10, 0.0  ;;  %v7442_v49 = vsel %vm3061_vm13, %v7274_v56, %v3093_v40 }
 0x29e   : > { %v3101_v50 = vmul.f32 0.2, %v7306_v11  ;;  %v3102_v6 = vmul.f32 0.2, %v7310_v47  ;;  %v3103_v45 = vmul.f32 0.2, %v7314_v22  ;;  %v3126_v33 = vsel %vm3062_vm4, %v7278_v59, %v3094_v39 }
 0x29f   : > { %vm3087_vm0 = vcmp.gt.f32.partialorder %v7378_v23, 0.0  ;;  %vm3088_vm5 = vcmp.gt.f32.partialorder %v7382_v16, 0.0  ;;  %vm3089_vm15 = vcmp.gt.f32.partialorder %v7386_v61, 0.0  ;;  %v3104_v42 = vmul.f32 0.2, %v7318_v21 }
 0x2a0   : > { %v3105_v37 = vmul.f32 0.2, %v7322_v14  ;;  %v3106_v30 = vmul.f32 0.2, %v7326_v15  ;;  %vm3090_vm13 = vcmp.gt.f32.partialorder %v7400_v5, 0.0  ;;  %vm3091_vm12 = vcmp.gt.f32.partialorder %v7411_v18, 0.0 }
 0x2a1   : > { %v3107_v56 = vmul.f32 0.2, %v7330_v63  ;;  %v3108_v58 = vmul.f32 0.2, %v7334_v62  ;;  %v3109_v26 = vmul.f32 0.2, %v7338_v1  ;;  %v3127_v31 = vsel %vm3063_vm14, %v7282_v4, %v3095_v32 }
 0x2a2   : > { %v3110_v0 = vmul.f32 0.2, %v7342_v52  ;;  %v3111_v55 = vmul.f32 0.2, %v7346_v36  ;;  %v3112_v59 = vmul.f32 0.2, %v7350_v27  ;;  %v3128_v34 = vsel %vm3064_vm2, %v7286_v35, %v3096_v19 }
 0x2a3   : > { %v3113_v48 = vmul.f32 0.2, %v7354_v2  ;;  %v3114_v20 = vmul.f32 0.2, %v7358_v38  ;;  %v3115_v60 = vmul.f32 0.2, %v7362_v54  ;;  %v3129_v4 = vsel %vm3065_vm3, %v7290_v53, %v3097_v9 }
 0x2a4   : > { %v3116_v51 = vmul.f32 0.2, %v7366_v8  ;;  %v3117_v13 = vmul.f32 0.2, %v7370_v10  ;;  %v3118_v44 = vmul.f32 0.2, %v7374_v24  ;;  %v3130_v35 = vsel %vm3066_vm6, %v7294_v29, %v3098_v41 }
 0x2a5   : > { %v3119_v43 = vmul.f32 0.2, %v7378_v23  ;;  %v3120_v7 = vmul.f32 0.2, %v7382_v16  ;;  %v3121_v57 = vmul.f32 0.2, %v7386_v61  ;;  %v3131_v53 = vsel %vm3067_vm7, %v7298_v12, %v3099_v3 }
 0x2a6   : > { %v3122_v40 = vmul.f32 0.2, %v7400_v5  ;;  %v3123_v39 = vmul.f32 0.2, %v7411_v18  ;;  %v3132_v28 = vsel %vm3068_vm8, %v7302_v17, %v3100_v25  ;;  %vm8179_vm4 = vcmp.gt.f32.partialorder %v7306_v11, 0.0 }
 0x2a7   : > { %v3133_v29 = vsel %vm8179_vm4, %v7306_v11, %v3101_v50  ;;  %vm8180_vm14 = vcmp.gt.f32.partialorder %v7310_v47, 0.0  ;;  %vm8181_vm2 = vcmp.gt.f32.partialorder %v7314_v22, 0.0  ;;  %vm8182_vm3 = vcmp.gt.f32.partialorder %v7318_v21, 0.0 }
 0x2a8   : > { %v3134_v32 = vsel %vm8180_vm14, %v7310_v47, %v3102_v6  ;;  %v3135_v12 = vsel %vm8181_vm2, %v7314_v22, %v3103_v45  ;;  %v3136_v19 = vsel %vm8182_vm3, %v7318_v21, %v3104_v42  ;;  %vm8183_vm6 = vcmp.gt.f32.partialorder %v7322_v14, 0.0 }
 0x2a9   : > { %v3137_v17 = vsel %vm8183_vm6, %v7322_v14, %v3105_v37  ;;  %vm8184_vm7 = vcmp.gt.f32.partialorder %v7326_v15, 0.0  ;;  %v3139_v47 = vsel %vm3075_vm1, %v7330_v63, %v3107_v56  ;;  %v3140_v22 = vsel %vm3076_vm9, %v7334_v62, %v3108_v58 }
 0x2aa   : > { %v3138_v11 = vsel %vm8184_vm7, %v7326_v15, %v3106_v30  ;;  %vm8185_vm8 = vcmp.gt.f32.partialorder %v7338_v1, 0.0  ;;  %vm8186_vm4 = vcmp.gt.f32.partialorder %v7342_v52, 0.0  ;;  %vm8187_vm14 = vcmp.gt.f32.partialorder %v7346_v36, 0.0 }
 0x2ab   : > { %v3141_v21 = vsel %vm8185_vm8, %v7338_v1, %v3109_v26  ;;  %v3142_v14 = vsel %vm8186_vm4, %v7342_v52, %v3110_v0  ;;  %v3143_v15 = vsel %vm8187_vm14, %v7346_v36, %v3111_v55  ;;  %vm8188_vm2 = vcmp.gt.f32.partialorder %v7350_v27, 0.0 }
 0x2ac   : > { %v3144_v63 = vsel %vm8188_vm2, %v7350_v27, %v3112_v59  ;;  %v3145_v62 = vsel %vm3081_vm10, %v7354_v2, %v3113_v48  ;;  %vm8189_vm9 = vcmp.gt.f32.partialorder %v7358_v38, 0.0  ;;  %vm8190_vm1 = vcmp.gt.f32.partialorder %v7362_v54, 0.0 }
 0x2ad   : > { %v3146_v1 = vsel %vm8189_vm9, %v7358_v38, %v3114_v20  ;;  %v3147_v52 = vsel %vm8190_vm1, %v7362_v54, %v3115_v60  ;;  %vm8191_vm3 = vcmp.gt.f32.partialorder %v7366_v8, 0.0  ;;  %v3149_v27 = vsel %vm3085_vm11, %v7370_v10, %v3117_v13 }
 0x2ae   : > { %v3148_v36 = vsel %vm8191_vm3, %v7366_v8, %v3116_v51  ;;  %vm8192_vm10 = vcmp.gt.f32.partialorder %v7374_v24, 0.0  ;;  %v3151_v38 = vsel %vm3087_vm0, %v7378_v23, %v3119_v43  ;;  %v3152_v54 = vsel %vm3088_vm5, %v7382_v16, %v3120_v7 }
 0x2af   : > { %v3150_v2 = vsel %vm8192_vm10, %v7374_v24, %v3118_v44  ;;  %v3153_v8 = vsel %vm3089_vm15, %v7386_v61, %v3121_v57  ;;  %v3154_v10 = vsel %vm3090_vm13, %v7400_v5, %v3122_v40  ;;  %v3155_v24 = vsel %vm3091_vm12, %v7411_v18, %v3123_v39 }
 0x2b0   : > { %v4221_v23 = vpack.c.bf16 %v7442_v49, %v7430_v46  ;;  %v4226_v16 = vpack.c.bf16 %v3127_v31, %v3126_v33  ;;  %v4231_v9 = vpack.c.bf16 %v3129_v4, %v3128_v34  ;;  %v4236_v41 = vpack.c.bf16 %v3131_v53, %v3130_v35 }
 0x2b1   : > { %v4241_v3 = vpack.c.bf16 %v3133_v29, %v3132_v28  ;;  %v4246_v61 = vpack.c.bf16 %v3135_v12, %v3134_v32  ;;  %v4251_v5 = vpack.c.bf16 %v3137_v17, %v3136_v19  ;;  %v4256_v25 = vpack.c.bf16 %v3139_v47, %v3138_v11 }
 0x2b2   : > { %4345 = vst [vmem:[%s6610_s14 + $0x180] sm:$0xff] %v4221_v23   ;;  %4346 = vst [vmem:[%s6610_s14 + $0x188] sm:$0xff] %v4226_v16   ;;  %v4261_v50 = vpack.c.bf16 %v3141_v21, %v3140_v22  ;;  %v4266_v18 = vpack.c.bf16 %v3143_v15, %v3142_v14  ;;  %v4271_v46 = vpack.c.bf16 %v3145_v62, %v3144_v63 }
 0x2b3   : > { %4347 = vst [vmem:[%s6610_s14 + $0x190] sm:$0xff] %v4231_v9   ;;  %4348 = vst [vmem:[%s6610_s14 + $0x198] sm:$0xff] %v4236_v41   ;;  %v4276_v6 = vpack.c.bf16 %v3147_v52, %v3146_v1  ;;  %v4281_v45 = vpack.c.bf16 %v3149_v27, %v3148_v36  ;;  %v4286_v49 = vpack.c.bf16 %v3151_v38, %v3150_v2 }
 0x2b4   : > { %4349 = vst [vmem:[%s6610_s14 + $0x1a0] sm:$0xff] %v4241_v3   ;;  %4350 = vst [vmem:[%s6610_s14 + $0x1a8] sm:$0xff] %v4246_v61   ;;  %v4291_v42 = vpack.c.bf16 %v3153_v8, %v3152_v54  ;;  %v4296_v37 = vpack.c.bf16 %v3155_v24, %v3154_v10 }
 0x2b5   : > { %4351 = vst [vmem:[%s6610_s14 + $0x1b0] sm:$0xff] %v4251_v5   ;;  %4352 = vst [vmem:[%s6610_s14 + $0x1b8] sm:$0xff] %v4256_v25  }
 0x2b6   : > { %4353 = vst [vmem:[%s6610_s14 + $0x1c0] sm:$0xff] %v4261_v50   ;;  %4354 = vst [vmem:[%s6610_s14 + $0x1c8] sm:$0xff] %v4266_v18  }
 0x2b7   : > { %4355 = vst [vmem:[%s6610_s14 + $0x1d0] sm:$0xff] %v4271_v46   ;;  %4356 = vst [vmem:[%s6610_s14 + $0x1d8] sm:$0xff] %v4276_v6  }
 0x2b8   : > { %4357 = vst [vmem:[%s6610_s14 + $0x1e0] sm:$0xff] %v4281_v45   ;;  %4358 = vst [vmem:[%s6610_s14 + $0x1e8] sm:$0xff] %v4286_v49  }
 0x2b9   : > { %4359 = vst [vmem:[%s6610_s14 + $0x1f0] sm:$0xff] %v4291_v42   ;;  %4360 = vst [vmem:[%s6610_s14 + $0x1f8] sm:$0xff] %v4296_v37  }
 0x2ba PF: > { %s13_s12 = sadd.s32 1, %s4761_s12  }
 0x2bb   : > { %p10_p4 = scmp.ge.s32.totalorder %s13_s12, 4  }
 0x2bd   :  { %12 = sbr.rel (!%p10_p4) target bundleno = 1 (0x1), region = 71 }

// kernel: decoder_forward.8
= control target key start
LH: loop header
LB: loop body
LE: loop exit
PB: predicated region body
PF: predicated region fallthrough
CT: control target
= control target key end

     0   :  { %s4335_s12 = smov 0   ;;  %s4958_s0 = inlined_call_operand.vmem [shape: bf16[2,1444,128], index: 0, kind: input, shape index: {}]   ;;  %s4959_s1 = inlined_call_operand.vmem [shape: bf16[128,128], index: 1, kind: input, shape index: {}]   ;;  %s4960_s2 = inlined_call_operand.vmem [shape: f32[1,128], index: 2, kind: input, shape index: {}]   ;;  %s4961_s3 = inlined_call_operand.vmem [shape: bf16[2,1444,128], index: 3, kind: output, shape index: {}]  }
   0x1 LB: > { %s2689_s13 = sadd.s32 4294967295, %s4311_s12   ;;  %p2693_p0 = scmp.ge.s32.totalorder %s4311_s12, 1  ;;  %s4311_s12 = sphi %s4335_s12, %s13_s12  }
   0x2   : > { %p137_p1 = scmp.lt.s32.totalorder %s4311_s12, 3 }
   0x4   : > { %p138_p2 = pnand %p2693_p0, %p137_p1 }
   0x5   : > { %p161_p3 = scmp.lt.s32.totalorder (!%p138_p2), %s2689_s13, 1 }
   0x6   : > { %141 = sbr.rel (%p138_p2) target bundleno = 606 (0x25e), region = 32 }
   0xb   : > { %v4205_v0 = vld [vmem:[%s4959_s1 + $0x38] sm:$0xff]   ;;  %v4313_v1 = vmov 0.0   ;;  %v4206_v2 = vld [vmem:[%s4959_s1 + $0x30] sm:$0xff]   ;;  %vm4314_vm0 = vmmov 0   ;;  %s4963_s13 = smov (!%p161_p3, %s2689_s13), 1  ;;  %v4207_v3 = vld [vmem:[%s4959_s1 + $0x28] sm:$0xff]  }
   0xc   : > { %3798 = vmatprep.subr.bf16.mxu0 %v4313_v1  ;;  %4178 = vmatprep.subr.bf16.mxu1 %v4313_v1  ;;  %s4194_s20 = smul.u32 724, %s4963_s13  ;;  %v4208_v4 = vld [vmem:[%s4959_s1 + $0x20] sm:$0xff]   ;;  %v4209_v5 = vld [vmem:[%s4959_s1 + $0x18] sm:$0xff]   ;;  %v4210_v6 = vld [vmem:[%s4959_s1 + $0x10] sm:$0xff]  }
   0xd   : > { %3799 = vmatpush3.bf16.msra.mxu0 %v4205_v0  ;;  %4186 = vmatpush3.bf16.msra.mxu1 %v4205_v0  ;;  %v4211_v7 = vld [vmem:[%s4959_s1 + $0x8] sm:$0xff]   ;;  %v4212_v8 = vld [vmem:[%s4959_s1] sm:$0xff]  }
   0xe   : > { %3800 = vmatprep.subr.bf16.mxu0 %v4313_v1  ;;  %4179 = vmatprep.subr.bf16.mxu1 %v4313_v1  ;;  %s4370_s23 = scalar_lea.vmem %s4958_s0, %s4194_s20  ;;  %v4550_v61 = vld [vmem:[%s4960_s2] ss:$0 sm:$0xff]  ;;  %s4563_s11 = scalar_lea.vmem %s4961_s3, %s4194_s20 }
   0xf   : > { %3814 = vmatprep.mubr.msk.bf16.mxu0 %vm4314_vm0, %v4313_v1  ;;  %3998 = vmatprep.mubr.msk.bf16.mxu1 %vm4314_vm0, %v4313_v1  ;;  %v4213_v9 = vld [vmem:[%s4370_s23] sm:$0xff]   ;;  %v4214_v10 = vld [vmem:[%s4370_s23 + $0x170] sm:$0xff]   ;;  %v4215_v11 = vld [vmem:[%s4370_s23 + $0x8] sm:$0xff]  }
  0x10   : > { %v4216_v12 = vld [vmem:[%s4370_s23 + $0x178] sm:$0xff]   ;;  %v4217_v13 = vld [vmem:[%s4370_s23 + $0x10] sm:$0xff]   ;;  %v4218_v14 = vld [vmem:[%s4370_s23 + $0x180] sm:$0xff]  }
  0x11   : > { %3801 = vmatpush3.bf16.msra.mxu0 %v4206_v2  ;;  %4187 = vmatpush3.bf16.msra.mxu1 %v4206_v2  ;;  %v4219_v15 = vld [vmem:[%s4370_s23 + $0x18] sm:$0xff]   ;;  %v4220_v16 = vld [vmem:[%s4370_s23 + $0x188] sm:$0xff]   ;;  %v4221_v17 = vld [vmem:[%s4370_s23 + $0x20] sm:$0xff]  }
  0x12   : > { %3802 = vmatprep.subr.bf16.mxu0 %v4313_v1  ;;  %4180 = vmatprep.subr.bf16.mxu1 %v4313_v1  ;;  %v4222_v18 = vld [vmem:[%s4370_s23 + $0x190] sm:$0xff]   ;;  %v4223_v19 = vld [vmem:[%s4370_s23 + $0x28] sm:$0xff]   ;;  %v4224_v20 = vld [vmem:[%s4370_s23 + $0x198] sm:$0xff]  }
  0x13   : > { %v4225_v21 = vld [vmem:[%s4370_s23 + $0x30] sm:$0xff]   ;;  %v4226_v22 = vld [vmem:[%s4370_s23 + $0x1a0] sm:$0xff]   ;;  %v4227_v23 = vld [vmem:[%s4370_s23 + $0x38] sm:$0xff]  }
  0x14   : > { %v4228_v24 = vld [vmem:[%s4370_s23 + $0x1a8] sm:$0xff]   ;;  %v4229_v25 = vld [vmem:[%s4370_s23 + $0x40] sm:$0xff]   ;;  %v4230_v26 = vld [vmem:[%s4370_s23 + $0x1b0] sm:$0xff]  }
  0x15   : > { %3803 = vmatpush3.bf16.msra.mxu0 %v4207_v3  ;;  %4188 = vmatpush3.bf16.msra.mxu1 %v4207_v3  ;;  %v4231_v27 = vld [vmem:[%s4370_s23 + $0x48] sm:$0xff]   ;;  %v4232_v28 = vld [vmem:[%s4370_s23 + $0x1b8] sm:$0xff]   ;;  %v4233_v29 = vld [vmem:[%s4370_s23 + $0x50] sm:$0xff]  }
  0x16   : > { %3804 = vmatprep.subr.bf16.mxu0 %v4313_v1  ;;  %4181 = vmatprep.subr.bf16.mxu1 %v4313_v1  ;;  %v4234_v30 = vld [vmem:[%s4370_s23 + $0x1c0] sm:$0xff]   ;;  %v4235_v31 = vld [vmem:[%s4370_s23 + $0x58] sm:$0xff]   ;;  %v4236_v32 = vld [vmem:[%s4370_s23 + $0x1c8] sm:$0xff]  }
  0x17   : > { %v4237_v33 = vld [vmem:[%s4370_s23 + $0x60] sm:$0xff]   ;;  %v4238_v34 = vld [vmem:[%s4370_s23 + $0x1d0] sm:$0xff]   ;;  %v4239_v35 = vld [vmem:[%s4370_s23 + $0x68] sm:$0xff]  }
  0x18   : > { %v4240_v36 = vld [vmem:[%s4370_s23 + $0x1d8] sm:$0xff]   ;;  %v4241_v37 = vld [vmem:[%s4370_s23 + $0x70] sm:$0xff]   ;;  %v4242_v38 = vld [vmem:[%s4370_s23 + $0x1e0] sm:$0xff]  }
  0x19   : > { %3805 = vmatpush3.bf16.msra.mxu0 %v4208_v4  ;;  %4189 = vmatpush3.bf16.msra.mxu1 %v4208_v4  ;;  %v4243_v39 = vld [vmem:[%s4370_s23 + $0x78] sm:$0xff]   ;;  %v4244_v40 = vld [vmem:[%s4370_s23 + $0x1e8] sm:$0xff]   ;;  %v4245_v41 = vld [vmem:[%s4370_s23 + $0x80] sm:$0xff]  }
  0x1a   : > { %3806 = vmatprep.subr.bf16.mxu0 %v4313_v1  ;;  %4182 = vmatprep.subr.bf16.mxu1 %v4313_v1  ;;  %v4246_v42 = vld [vmem:[%s4370_s23 + $0x1f0] sm:$0xff]   ;;  %v4247_v43 = vld [vmem:[%s4370_s23 + $0x88] sm:$0xff]   ;;  %v4248_v44 = vld [vmem:[%s4370_s23 + $0x1f8] sm:$0xff]  }
  0x1b   : > { %v4249_v45 = vld [vmem:[%s4370_s23 + $0x90] sm:$0xff]   ;;  %v4250_v46 = vld [vmem:[%s4370_s23 + $0x200] sm:$0xff]   ;;  %v4251_v47 = vld [vmem:[%s4370_s23 + $0x98] sm:$0xff]  }
  0x1c   : > { %v4252_v48 = vld [vmem:[%s4370_s23 + $0x208] sm:$0xff]   ;;  %v4253_v49 = vld [vmem:[%s4370_s23 + $0xa0] sm:$0xff]   ;;  %v4254_v50 = vld [vmem:[%s4370_s23 + $0x210] sm:$0xff]  }
  0x1d   : > { %3807 = vmatpush3.bf16.msra.mxu0 %v4209_v5  ;;  %4190 = vmatpush3.bf16.msra.mxu1 %v4209_v5  ;;  %v4255_v51 = vld [vmem:[%s4370_s23 + $0xa8] sm:$0xff]   ;;  %v4256_v52 = vld [vmem:[%s4370_s23 + $0x218] sm:$0xff]   ;;  %v4257_v53 = vld [vmem:[%s4370_s23 + $0xb0] sm:$0xff]  }
  0x1e   : > { %3808 = vmatprep.subr.bf16.mxu0 %v4313_v1  ;;  %4183 = vmatprep.subr.bf16.mxu1 %v4313_v1  ;;  %v4258_v54 = vld [vmem:[%s4370_s23 + $0x220] sm:$0xff]   ;;  %v4259_v55 = vld [vmem:[%s4370_s23 + $0xb8] sm:$0xff]   ;;  %v4260_v56 = vld [vmem:[%s4370_s23 + $0x228] sm:$0xff]  }
  0x1f   : > { %v4261_v57 = vld [vmem:[%s4370_s23 + $0xc0] sm:$0xff]   ;;  %v4262_v58 = vld [vmem:[%s4370_s23 + $0x230] sm:$0xff]   ;;  %v4263_v3 = vld [vmem:[%s4370_s23 + $0xc8] sm:$0xff]  }
  0x20   : > { %v4264_v5 = vld [vmem:[%s4370_s23 + $0x238] sm:$0xff]  }
  0x21   : > { %3809 = vmatpush3.bf16.msra.mxu0 %v4210_v6  ;;  %4191 = vmatpush3.bf16.msra.mxu1 %v4210_v6 }
  0x22   : > { %3810 = vmatprep.subr.bf16.mxu0 %v4313_v1  ;;  %4184 = vmatprep.subr.bf16.mxu1 %v4313_v1 }
  0x25   : > { %3811 = vmatpush3.bf16.msra.mxu0 %v4211_v7  ;;  %4192 = vmatpush3.bf16.msra.mxu1 %v4211_v7 }
  0x26   : > { %3812 = vmatprep.subr.bf16.mxu0 %v4313_v1  ;;  %4185 = vmatprep.subr.bf16.mxu1 %v4313_v1 }
  0x29   : > { %3813 = vmatpush3.bf16.msra.mxu0 %v4212_v8  ;;  %4193 = vmatpush3.bf16.msra.mxu1 %v4212_v8 }
  0x2c   : > { %3815 = vmatmul.mubr.bf16.vlgmr.msra.gmra.mxu0 %v4213_v9  ;;  %3999 = vmatmul.mubr.bf16.vlgmr.msra.gmra.mxu1 %v4214_v10 }
  0x2d   : > { %3818 = vmatprep.mubr.msk.bf16.mxu0 %vm4314_vm0, %v4313_v1  ;;  %4002 = vmatprep.mubr.msk.bf16.mxu1 %vm4314_vm0, %v4313_v1 }
  0x34   : > { %3819 = vmatmul.mubr.bf16.gmra.mxu0 %v4215_v11  ;;  %4003 = vmatmul.mubr.bf16.gmra.mxu1 %v4216_v12 }
  0x35   : > { %3822 = vmatprep.mubr.msk.bf16.mxu0 %vm4314_vm0, %v4313_v1  ;;  %4006 = vmatprep.mubr.msk.bf16.mxu1 %vm4314_vm0, %v4313_v1 }
  0x3c   : > { %3823 = vmatmul.mubr.bf16.gmra.mxu0 %v4217_v13  ;;  %4007 = vmatmul.mubr.bf16.gmra.mxu1 %v4218_v14 }
  0x3d   : > { %3826 = vmatprep.mubr.msk.bf16.mxu0 %vm4314_vm0, %v4313_v1  ;;  %4010 = vmatprep.mubr.msk.bf16.mxu1 %vm4314_vm0, %v4313_v1 }
  0x44   : > { %3827 = vmatmul.mubr.bf16.gmra.mxu0 %v4219_v15  ;;  %4011 = vmatmul.mubr.bf16.gmra.mxu1 %v4220_v16 }
  0x45   : > { %3830 = vmatprep.mubr.msk.bf16.mxu0 %vm4314_vm0, %v4313_v1  ;;  %4014 = vmatprep.mubr.msk.bf16.mxu1 %vm4314_vm0, %v4313_v1 }
  0x4c   : > { %3831 = vmatmul.mubr.bf16.gmra.mxu0 %v4221_v17  ;;  %4015 = vmatmul.mubr.bf16.gmra.mxu1 %v4222_v18 }
  0x4d   : > { %3834 = vmatprep.mubr.msk.bf16.mxu0 %vm4314_vm0, %v4313_v1  ;;  %4018 = vmatprep.mubr.msk.bf16.mxu1 %vm4314_vm0, %v4313_v1 }
  0x54   : > { %3835 = vmatmul.mubr.bf16.gmra.mxu0 %v4223_v19  ;;  %4019 = vmatmul.mubr.bf16.gmra.mxu1 %v4224_v20  ;;  %v4265_v19 = vld [vmem:[%s4370_s23 + $0xd0] sm:$0xff]  }
  0x55   : > { %3838 = vmatprep.mubr.msk.bf16.mxu0 %vm4314_vm0, %v4313_v1  ;;  %4022 = vmatprep.mubr.msk.bf16.mxu1 %vm4314_vm0, %v4313_v1 }
  0x5c   : > { %3839 = vmatmul.mubr.bf16.gmra.mxu0 %v4225_v21  ;;  %4023 = vmatmul.mubr.bf16.gmra.mxu1 %v4226_v22  ;;  %v4266_v21 = vld [vmem:[%s4370_s23 + $0x240] sm:$0xff]  }
  0x5d   : > { %3842 = vmatprep.mubr.msk.bf16.mxu0 %vm4314_vm0, %v4313_v1  ;;  %4026 = vmatprep.mubr.msk.bf16.mxu1 %vm4314_vm0, %v4313_v1 }
  0x64   : > { %3843 = vmatmul.mubr.bf16.gmra.mxu0 %v4227_v23  ;;  %4027 = vmatmul.mubr.bf16.gmra.mxu1 %v4228_v24 }
  0x65   : > { %3846 = vmatprep.mubr.msk.bf16.mxu0 %vm4314_vm0, %v4313_v1  ;;  %4030 = vmatprep.mubr.msk.bf16.mxu1 %vm4314_vm0, %v4313_v1 }
  0x6c   : > { %3847 = vmatmul.mubr.bf16.gmra.mxu0 %v4229_v25  ;;  %4031 = vmatmul.mubr.bf16.gmra.mxu1 %v4230_v26 }
  0x6d   : > { %3850 = vmatprep.mubr.msk.bf16.mxu0 %vm4314_vm0, %v4313_v1  ;;  %4034 = vmatprep.mubr.msk.bf16.mxu1 %vm4314_vm0, %v4313_v1 }
  0x74   : > { %3851 = vmatmul.mubr.bf16.gmra.mxu0 %v4231_v27  ;;  %4035 = vmatmul.mubr.bf16.gmra.mxu1 %v4232_v28 }
  0x75   : > { %3854 = vmatprep.mubr.msk.bf16.mxu0 %vm4314_vm0, %v4313_v1  ;;  %4038 = vmatprep.mubr.msk.bf16.mxu1 %vm4314_vm0, %v4313_v1 }
  0x7c   : > { %3855 = vmatmul.mubr.bf16.gmra.mxu0 %v4233_v29  ;;  %4039 = vmatmul.mubr.bf16.gmra.mxu1 %v4234_v30 }
  0x7d   : > { %3858 = vmatprep.mubr.msk.bf16.mxu0 %vm4314_vm0, %v4313_v1  ;;  %4042 = vmatprep.mubr.msk.bf16.mxu1 %vm4314_vm0, %v4313_v1 }
  0x84   : > { %3859 = vmatmul.mubr.bf16.gmra.mxu0 %v4235_v31  ;;  %4043 = vmatmul.mubr.bf16.gmra.mxu1 %v4236_v32 }
  0x85   : > { %3862 = vmatprep.mubr.msk.bf16.mxu0 %vm4314_vm0, %v4313_v1  ;;  %4046 = vmatprep.mubr.msk.bf16.mxu1 %vm4314_vm0, %v4313_v1 }
  0x8c   : > { %3863 = vmatmul.mubr.bf16.gmra.mxu0 %v4237_v33  ;;  %4047 = vmatmul.mubr.bf16.gmra.mxu1 %v4238_v34 }
  0x8d   : > { %3866 = vmatprep.mubr.msk.bf16.mxu0 %vm4314_vm0, %v4313_v1  ;;  %4050 = vmatprep.mubr.msk.bf16.mxu1 %vm4314_vm0, %v4313_v1 }
  0x94   : > { %3867 = vmatmul.mubr.bf16.gmra.mxu0 %v4239_v35  ;;  %4051 = vmatmul.mubr.bf16.gmra.mxu1 %v4240_v36  ;;  %v4267_v35 = vld [vmem:[%s4370_s23 + $0xd8] sm:$0xff]  }
  0x95   : > { %3870 = vmatprep.mubr.msk.bf16.mxu0 %vm4314_vm0, %v4313_v1  ;;  %4054 = vmatprep.mubr.msk.bf16.mxu1 %vm4314_vm0, %v4313_v1 }
  0x9c   : > { %3871 = vmatmul.mubr.bf16.gmra.mxu0 %v4241_v37  ;;  %4055 = vmatmul.mubr.bf16.gmra.mxu1 %v4242_v38  ;;  %v4268_v37 = vld [vmem:[%s4370_s23 + $0x248] sm:$0xff]  }
  0x9d   : > { %3874 = vmatprep.mubr.msk.bf16.mxu0 %vm4314_vm0, %v4313_v1  ;;  %4058 = vmatprep.mubr.msk.bf16.mxu1 %vm4314_vm0, %v4313_v1 }
  0xa4   : > { %3875 = vmatmul.mubr.bf16.gmra.mxu0 %v4243_v39  ;;  %4059 = vmatmul.mubr.bf16.gmra.mxu1 %v4244_v40 }
  0xa5   : > { %3878 = vmatprep.mubr.msk.bf16.mxu0 %vm4314_vm0, %v4313_v1  ;;  %4062 = vmatprep.mubr.msk.bf16.mxu1 %vm4314_vm0, %v4313_v1 }
  0xac   : > { %3879 = vmatmul.mubr.bf16.gmra.mxu0 %v4245_v41  ;;  %4063 = vmatmul.mubr.bf16.gmra.mxu1 %v4246_v42 }
  0xad   : > { %3882 = vmatprep.mubr.msk.bf16.mxu0 %vm4314_vm0, %v4313_v1  ;;  %4066 = vmatprep.mubr.msk.bf16.mxu1 %vm4314_vm0, %v4313_v1 }
  0xb4   : > { %3883 = vmatmul.mubr.bf16.gmra.mxu0 %v4247_v43  ;;  %4067 = vmatmul.mubr.bf16.gmra.mxu1 %v4248_v44 }
  0xb5   : > { %3886 = vmatprep.mubr.msk.bf16.mxu0 %vm4314_vm0, %v4313_v1  ;;  %4070 = vmatprep.mubr.msk.bf16.mxu1 %vm4314_vm0, %v4313_v1 }
  0xbc   : > { %3887 = vmatmul.mubr.bf16.gmra.mxu0 %v4249_v45  ;;  %4071 = vmatmul.mubr.bf16.gmra.mxu1 %v4250_v46 }
  0xbd   : > { %3890 = vmatprep.mubr.msk.bf16.mxu0 %vm4314_vm0, %v4313_v1  ;;  %4074 = vmatprep.mubr.msk.bf16.mxu1 %vm4314_vm0, %v4313_v1 }
  0xc4   : > { %3891 = vmatmul.mubr.bf16.gmra.mxu0 %v4251_v47  ;;  %4075 = vmatmul.mubr.bf16.gmra.mxu1 %v4252_v48 }
  0xc5   : > { %3894 = vmatprep.mubr.msk.bf16.mxu0 %vm4314_vm0, %v4313_v1  ;;  %4078 = vmatprep.mubr.msk.bf16.mxu1 %vm4314_vm0, %v4313_v1 }
  0xcc   : > { %3895 = vmatmul.mubr.bf16.gmra.mxu0 %v4253_v49  ;;  %4079 = vmatmul.mubr.bf16.gmra.mxu1 %v4254_v50 }
  0xcd   : > { %3898 = vmatprep.mubr.msk.bf16.mxu0 %vm4314_vm0, %v4313_v1  ;;  %4082 = vmatprep.mubr.msk.bf16.mxu1 %vm4314_vm0, %v4313_v1 }
  0xd4   : > { %3899 = vmatmul.mubr.bf16.gmra.mxu0 %v4255_v51  ;;  %4083 = vmatmul.mubr.bf16.gmra.mxu1 %v4256_v52  ;;  %v4269_v51 = vld [vmem:[%s4370_s23 + $0xe0] sm:$0xff]  }
  0xd5   : > { %3902 = vmatprep.mubr.msk.bf16.mxu0 %vm4314_vm0, %v4313_v1  ;;  %4086 = vmatprep.mubr.msk.bf16.mxu1 %vm4314_vm0, %v4313_v1 }
  0xdc   : > { %3903 = vmatmul.mubr.bf16.gmra.mxu0 %v4257_v53  ;;  %4087 = vmatmul.mubr.bf16.gmra.mxu1 %v4258_v54  ;;  %v4270_v53 = vld [vmem:[%s4370_s23 + $0x250] sm:$0xff]  }
  0xdd   : > { %3906 = vmatprep.mubr.msk.bf16.mxu0 %vm4314_vm0, %v4313_v1  ;;  %4090 = vmatprep.mubr.msk.bf16.mxu1 %vm4314_vm0, %v4313_v1 }
  0xe4   : > { %3907 = vmatmul.mubr.bf16.gmra.mxu0 %v4259_v55  ;;  %4091 = vmatmul.mubr.bf16.gmra.mxu1 %v4260_v56 }
  0xe5   : > { %3910 = vmatprep.mubr.msk.bf16.mxu0 %vm4314_vm0, %v4313_v1  ;;  %4094 = vmatprep.mubr.msk.bf16.mxu1 %vm4314_vm0, %v4313_v1 }
  0xec   : > { %v1002_v59 = vpop.f32.mrf.mxu0  ;;  %3911 = vmatmul.mubr.bf16.gmra.mxu0 %v4261_v57  ;;  %v1370_v60 = vpop.f32.mrf.mxu1  ;;  %4095 = vmatmul.mubr.bf16.gmra.mxu1 %v4262_v58 }
  0xed   : > { %3914 = vmatprep.mubr.msk.bf16.mxu0 %vm4314_vm0, %v4313_v1  ;;  %4098 = vmatprep.mubr.msk.bf16.mxu1 %vm4314_vm0, %v4313_v1  ;;  %v1371_v0 = vadd.f32 %v4550_v61, %v1370_v60  ;;  %v1003_v6 = vadd.f32 %v4550_v61, %v1002_v59 }
  0xee   : > { %v3816_v62 = vpop.f32.mrf.mxu0  ;;  %v4000_v63 = vpop.f32.mrf.mxu1 }
  0xf0   : > { %v1005_v2 = vpop.f32.mrf.mxu0  ;;  %v1373_v4 = vpop.f32.mrf.mxu1 }
  0xf1   : > { %v1006_v7 = vadd.f32 %v4550_v61, %v1005_v2  ;;  %v1374_v8 = vadd.f32 %v4550_v61, %v1373_v4 }
  0xf2   : > { %v3817_v9 = vpop.f32.mrf.mxu0  ;;  %v4001_v10 = vpop.f32.mrf.mxu1 }
  0xf3   : > { %v3163_v11 = vpack.c.bf16 %v1006_v7, %v1003_v6  ;;  %v3393_v12 = vpack.c.bf16 %v1374_v8, %v1371_v0  ;;  %v4272_v7 = vld [vmem:[%s4370_s23 + $0x258] sm:$0xff]  }
  0xf4   : > { %v1010_v13 = vpop.f32.mrf.mxu0  ;;  %3915 = vmatmul.mubr.bf16.gmra.mxu0 %v4263_v3  ;;  %v1378_v14 = vpop.f32.mrf.mxu1  ;;  %4099 = vmatmul.mubr.bf16.gmra.mxu1 %v4264_v5  ;;  %v4271_v5 = vld [vmem:[%s4370_s23 + $0xe8] sm:$0xff]  }
  0xf5   : > { %3164 = vst [vmem:[%s4563_s11] sm:$0xff] %v3163_v11   ;;  %3655 = vst [vmem:[%s4563_s11 + $0x170] sm:$0xff] %v3393_v12   ;;  %3918 = vmatprep.mubr.msk.bf16.mxu0 %vm4314_vm0, %v4313_v1  ;;  %4102 = vmatprep.mubr.msk.bf16.mxu1 %vm4314_vm0, %v4313_v1  ;;  %v1379_v17 = vadd.f32 %v4550_v61, %v1378_v14  ;;  %v1011_v22 = vadd.f32 %v4550_v61, %v1010_v13 }
  0xf6   : > { %v3820_v15 = vpop.f32.mrf.mxu0  ;;  %v4004_v16 = vpop.f32.mrf.mxu1 }
  0xf8   : > { %v1013_v18 = vpop.f32.mrf.mxu0  ;;  %v1381_v20 = vpop.f32.mrf.mxu1 }
  0xf9   : > { %v1014_v23 = vadd.f32 %v4550_v61, %v1013_v18  ;;  %v1382_v24 = vadd.f32 %v4550_v61, %v1381_v20 }
  0xfa   : > { %v3821_v25 = vpop.f32.mrf.mxu0  ;;  %v4005_v26 = vpop.f32.mrf.mxu1 }
  0xfb   : > { %v3168_v27 = vpack.c.bf16 %v1014_v23, %v1011_v22  ;;  %v3398_v28 = vpack.c.bf16 %v1382_v24, %v1379_v17  ;;  %v4274_v23 = vld [vmem:[%s4370_s23 + $0x260] sm:$0xff]  }
  0xfc   : > { %v1018_v29 = vpop.f32.mrf.mxu0  ;;  %3919 = vmatmul.mubr.bf16.gmra.mxu0 %v4265_v19  ;;  %v1386_v30 = vpop.f32.mrf.mxu1  ;;  %4103 = vmatmul.mubr.bf16.gmra.mxu1 %v4266_v21  ;;  %v4273_v21 = vld [vmem:[%s4370_s23 + $0xf0] sm:$0xff]  }
  0xfd   : > { %3610 = vst [vmem:[%s4563_s11 + $0x8] sm:$0xff] %v3168_v27   ;;  %3656 = vst [vmem:[%s4563_s11 + $0x178] sm:$0xff] %v3398_v28   ;;  %3922 = vmatprep.mubr.msk.bf16.mxu0 %vm4314_vm0, %v4313_v1  ;;  %4106 = vmatprep.mubr.msk.bf16.mxu1 %vm4314_vm0, %v4313_v1  ;;  %v1387_v33 = vadd.f32 %v4550_v61, %v1386_v30  ;;  %v1019_v38 = vadd.f32 %v4550_v61, %v1018_v29 }
  0xfe   : > { %v3824_v31 = vpop.f32.mrf.mxu0  ;;  %v4008_v32 = vpop.f32.mrf.mxu1 }
 0x100   : > { %v1021_v34 = vpop.f32.mrf.mxu0  ;;  %v1389_v36 = vpop.f32.mrf.mxu1 }
 0x101   : > { %v1022_v39 = vadd.f32 %v4550_v61, %v1021_v34  ;;  %v1390_v40 = vadd.f32 %v4550_v61, %v1389_v36 }
 0x102   : > { %v3825_v41 = vpop.f32.mrf.mxu0  ;;  %v4009_v42 = vpop.f32.mrf.mxu1 }
 0x103   : > { %v3173_v43 = vpack.c.bf16 %v1022_v39, %v1019_v38  ;;  %v3403_v44 = vpack.c.bf16 %v1390_v40, %v1387_v33  ;;  %v4276_v39 = vld [vmem:[%s4370_s23 + $0x268] sm:$0xff]  }
 0x104   : > { %v1026_v45 = vpop.f32.mrf.mxu0  ;;  %3923 = vmatmul.mubr.bf16.gmra.mxu0 %v4267_v35  ;;  %v1394_v46 = vpop.f32.mrf.mxu1  ;;  %4107 = vmatmul.mubr.bf16.gmra.mxu1 %v4268_v37  ;;  %v4275_v37 = vld [vmem:[%s4370_s23 + $0xf8] sm:$0xff]  }
 0x105   : > { %3611 = vst [vmem:[%s4563_s11 + $0x10] sm:$0xff] %v3173_v43   ;;  %3657 = vst [vmem:[%s4563_s11 + $0x180] sm:$0xff] %v3403_v44   ;;  %3926 = vmatprep.mubr.msk.bf16.mxu0 %vm4314_vm0, %v4313_v1  ;;  %4110 = vmatprep.mubr.msk.bf16.mxu1 %vm4314_vm0, %v4313_v1  ;;  %v1395_v49 = vadd.f32 %v4550_v61, %v1394_v46  ;;  %v1027_v54 = vadd.f32 %v4550_v61, %v1026_v45 }
 0x106   : > { %v3828_v47 = vpop.f32.mrf.mxu0  ;;  %v4012_v48 = vpop.f32.mrf.mxu1 }
 0x108   : > { %v1029_v50 = vpop.f32.mrf.mxu0  ;;  %v1397_v52 = vpop.f32.mrf.mxu1 }
 0x109   : > { %v1030_v55 = vadd.f32 %v4550_v61, %v1029_v50  ;;  %v1398_v56 = vadd.f32 %v4550_v61, %v1397_v52 }
 0x10a   : > { %v3829_v57 = vpop.f32.mrf.mxu0  ;;  %v4013_v58 = vpop.f32.mrf.mxu1 }
 0x10b   : > { %v3178_v59 = vpack.c.bf16 %v1030_v55, %v1027_v54  ;;  %v3408_v60 = vpack.c.bf16 %v1398_v56, %v1395_v49  ;;  %v4278_v55 = vld [vmem:[%s4370_s23 + $0x270] sm:$0xff]  }
 0x10c   : > { %v1034_v62 = vpop.f32.mrf.mxu0  ;;  %3927 = vmatmul.mubr.bf16.gmra.mxu0 %v4269_v51  ;;  %v1402_v63 = vpop.f32.mrf.mxu1  ;;  %4111 = vmatmul.mubr.bf16.gmra.mxu1 %v4270_v53  ;;  %v4277_v53 = vld [vmem:[%s4370_s23 + $0x100] sm:$0xff]  }
 0x10d   : > { %3612 = vst [vmem:[%s4563_s11 + $0x18] sm:$0xff] %v3178_v59   ;;  %3658 = vst [vmem:[%s4563_s11 + $0x188] sm:$0xff] %v3408_v60   ;;  %3930 = vmatprep.mubr.msk.bf16.mxu0 %vm4314_vm0, %v4313_v1  ;;  %4114 = vmatprep.mubr.msk.bf16.mxu1 %vm4314_vm0, %v4313_v1  ;;  %v1403_v3 = vadd.f32 %v4550_v61, %v1402_v63  ;;  %v1035_v8 = vadd.f32 %v4550_v61, %v1034_v62 }
 0x10e   : > { %v3832_v0 = vpop.f32.mrf.mxu0  ;;  %v4016_v2 = vpop.f32.mrf.mxu1 }
 0x110   : > { %v1037_v4 = vpop.f32.mrf.mxu0  ;;  %v1405_v6 = vpop.f32.mrf.mxu1 }
 0x111   : > { %v1038_v9 = vadd.f32 %v4550_v61, %v1037_v4  ;;  %v1406_v10 = vadd.f32 %v4550_v61, %v1405_v6 }
 0x112   : > { %v3833_v11 = vpop.f32.mrf.mxu0  ;;  %v4017_v12 = vpop.f32.mrf.mxu1 }
 0x113   : > { %v3183_v13 = vpack.c.bf16 %v1038_v9, %v1035_v8  ;;  %v3413_v14 = vpack.c.bf16 %v1406_v10, %v1403_v3  ;;  %v4280_v9 = vld [vmem:[%s4370_s23 + $0x278] sm:$0xff]  }
 0x114   : > { %v1042_v15 = vpop.f32.mrf.mxu0  ;;  %3931 = vmatmul.mubr.bf16.gmra.mxu0 %v4271_v5  ;;  %v1410_v16 = vpop.f32.mrf.mxu1  ;;  %4115 = vmatmul.mubr.bf16.gmra.mxu1 %v4272_v7  ;;  %v4279_v7 = vld [vmem:[%s4370_s23 + $0x108] sm:$0xff]  }
 0x115   : > { %3613 = vst [vmem:[%s4563_s11 + $0x20] sm:$0xff] %v3183_v13   ;;  %3659 = vst [vmem:[%s4563_s11 + $0x190] sm:$0xff] %v3413_v14   ;;  %3934 = vmatprep.mubr.msk.bf16.mxu0 %vm4314_vm0, %v4313_v1  ;;  %4118 = vmatprep.mubr.msk.bf16.mxu1 %vm4314_vm0, %v4313_v1  ;;  %v1411_v19 = vadd.f32 %v4550_v61, %v1410_v16  ;;  %v1043_v24 = vadd.f32 %v4550_v61, %v1042_v15 }
 0x116   : > { %v3836_v17 = vpop.f32.mrf.mxu0  ;;  %v4020_v18 = vpop.f32.mrf.mxu1 }
 0x118   : > { %v1045_v20 = vpop.f32.mrf.mxu0  ;;  %v1413_v22 = vpop.f32.mrf.mxu1 }
 0x119   : > { %v1046_v25 = vadd.f32 %v4550_v61, %v1045_v20  ;;  %v1414_v26 = vadd.f32 %v4550_v61, %v1413_v22 }
 0x11a   : > { %v3837_v27 = vpop.f32.mrf.mxu0  ;;  %v4021_v28 = vpop.f32.mrf.mxu1 }
 0x11b   : > { %v3188_v29 = vpack.c.bf16 %v1046_v25, %v1043_v24  ;;  %v3418_v30 = vpack.c.bf16 %v1414_v26, %v1411_v19  ;;  %v4282_v25 = vld [vmem:[%s4370_s23 + $0x280] sm:$0xff]  }
 0x11c   : > { %v1050_v31 = vpop.f32.mrf.mxu0  ;;  %3935 = vmatmul.mubr.bf16.gmra.mxu0 %v4273_v21  ;;  %v1418_v32 = vpop.f32.mrf.mxu1  ;;  %4119 = vmatmul.mubr.bf16.gmra.mxu1 %v4274_v23  ;;  %v4281_v23 = vld [vmem:[%s4370_s23 + $0x110] sm:$0xff]  }
 0x11d   : > { %3614 = vst [vmem:[%s4563_s11 + $0x28] sm:$0xff] %v3188_v29   ;;  %3660 = vst [vmem:[%s4563_s11 + $0x198] sm:$0xff] %v3418_v30   ;;  %3938 = vmatprep.mubr.msk.bf16.mxu0 %vm4314_vm0, %v4313_v1  ;;  %4122 = vmatprep.mubr.msk.bf16.mxu1 %vm4314_vm0, %v4313_v1  ;;  %v1419_v35 = vadd.f32 %v4550_v61, %v1418_v32  ;;  %v1051_v40 = vadd.f32 %v4550_v61, %v1050_v31 }
 0x11e   : > { %v3840_v33 = vpop.f32.mrf.mxu0  ;;  %v4024_v34 = vpop.f32.mrf.mxu1 }
 0x120   : > { %v1053_v36 = vpop.f32.mrf.mxu0  ;;  %v1421_v38 = vpop.f32.mrf.mxu1 }
 0x121   : > { %v1054_v41 = vadd.f32 %v4550_v61, %v1053_v36  ;;  %v1422_v42 = vadd.f32 %v4550_v61, %v1421_v38 }
 0x122   : > { %v3841_v43 = vpop.f32.mrf.mxu0  ;;  %v4025_v44 = vpop.f32.mrf.mxu1 }
 0x123   : > { %v3193_v45 = vpack.c.bf16 %v1054_v41, %v1051_v40  ;;  %v3423_v46 = vpack.c.bf16 %v1422_v42, %v1419_v35  ;;  %v4284_v41 = vld [vmem:[%s4370_s23 + $0x288] sm:$0xff]  }
 0x124   : > { %v1058_v47 = vpop.f32.mrf.mxu0  ;;  %3939 = vmatmul.mubr.bf16.gmra.mxu0 %v4275_v37  ;;  %v1426_v48 = vpop.f32.mrf.mxu1  ;;  %4123 = vmatmul.mubr.bf16.gmra.mxu1 %v4276_v39  ;;  %v4283_v39 = vld [vmem:[%s4370_s23 + $0x118] sm:$0xff]  }
 0x125   : > { %3615 = vst [vmem:[%s4563_s11 + $0x30] sm:$0xff] %v3193_v45   ;;  %3661 = vst [vmem:[%s4563_s11 + $0x1a0] sm:$0xff] %v3423_v46   ;;  %3942 = vmatprep.mubr.msk.bf16.mxu0 %vm4314_vm0, %v4313_v1  ;;  %4126 = vmatprep.mubr.msk.bf16.mxu1 %vm4314_vm0, %v4313_v1  ;;  %v1427_v51 = vadd.f32 %v4550_v61, %v1426_v48  ;;  %v1059_v56 = vadd.f32 %v4550_v61, %v1058_v47 }
 0x126   : > { %v3844_v49 = vpop.f32.mrf.mxu0  ;;  %v4028_v50 = vpop.f32.mrf.mxu1 }
 0x128   : > { %v1061_v52 = vpop.f32.mrf.mxu0  ;;  %v1429_v54 = vpop.f32.mrf.mxu1 }
 0x129   : > { %v1062_v57 = vadd.f32 %v4550_v61, %v1061_v52  ;;  %v1430_v58 = vadd.f32 %v4550_v61, %v1429_v54 }
 0x12a   : > { %v3845_v59 = vpop.f32.mrf.mxu0  ;;  %v4029_v60 = vpop.f32.mrf.mxu1 }
 0x12b   : > { %v3198_v62 = vpack.c.bf16 %v1062_v57, %v1059_v56  ;;  %v3428_v63 = vpack.c.bf16 %v1430_v58, %v1427_v51  ;;  %v4286_v57 = vld [vmem:[%s4370_s23 + $0x290] sm:$0xff]  }
 0x12c   : > { %v1066_v0 = vpop.f32.mrf.mxu0  ;;  %3943 = vmatmul.mubr.bf16.gmra.mxu0 %v4277_v53  ;;  %v1434_v2 = vpop.f32.mrf.mxu1  ;;  %4127 = vmatmul.mubr.bf16.gmra.mxu1 %v4278_v55  ;;  %v4285_v55 = vld [vmem:[%s4370_s23 + $0x120] sm:$0xff]  }
 0x12d   : > { %3616 = vst [vmem:[%s4563_s11 + $0x38] sm:$0xff] %v3198_v62   ;;  %3662 = vst [vmem:[%s4563_s11 + $0x1a8] sm:$0xff] %v3428_v63   ;;  %3946 = vmatprep.mubr.msk.bf16.mxu0 %vm4314_vm0, %v4313_v1  ;;  %4130 = vmatprep.mubr.msk.bf16.mxu1 %vm4314_vm0, %v4313_v1  ;;  %v1435_v5 = vadd.f32 %v4550_v61, %v1434_v2  ;;  %v1067_v10 = vadd.f32 %v4550_v61, %v1066_v0 }
 0x12e   : > { %v3848_v3 = vpop.f32.mrf.mxu0  ;;  %v4032_v4 = vpop.f32.mrf.mxu1 }
 0x130   : > { %v1069_v6 = vpop.f32.mrf.mxu0  ;;  %v1437_v8 = vpop.f32.mrf.mxu1 }
 0x131   : > { %v1070_v11 = vadd.f32 %v4550_v61, %v1069_v6  ;;  %v1438_v12 = vadd.f32 %v4550_v61, %v1437_v8 }
 0x132   : > { %v3849_v13 = vpop.f32.mrf.mxu0  ;;  %v4033_v14 = vpop.f32.mrf.mxu1 }
 0x133   : > { %v3203_v15 = vpack.c.bf16 %v1070_v11, %v1067_v10  ;;  %v3433_v16 = vpack.c.bf16 %v1438_v12, %v1435_v5  ;;  %v4288_v11 = vld [vmem:[%s4370_s23 + $0x298] sm:$0xff]  }
 0x134   : > { %v1074_v17 = vpop.f32.mrf.mxu0  ;;  %3947 = vmatmul.mubr.bf16.gmra.mxu0 %v4279_v7  ;;  %v1442_v18 = vpop.f32.mrf.mxu1  ;;  %4131 = vmatmul.mubr.bf16.gmra.mxu1 %v4280_v9  ;;  %v4287_v9 = vld [vmem:[%s4370_s23 + $0x128] sm:$0xff]  }
 0x135   : > { %3617 = vst [vmem:[%s4563_s11 + $0x40] sm:$0xff] %v3203_v15   ;;  %3663 = vst [vmem:[%s4563_s11 + $0x1b0] sm:$0xff] %v3433_v16   ;;  %3950 = vmatprep.mubr.msk.bf16.mxu0 %vm4314_vm0, %v4313_v1  ;;  %4134 = vmatprep.mubr.msk.bf16.mxu1 %vm4314_vm0, %v4313_v1  ;;  %v1443_v21 = vadd.f32 %v4550_v61, %v1442_v18  ;;  %v1075_v26 = vadd.f32 %v4550_v61, %v1074_v17 }
 0x136   : > { %v3852_v19 = vpop.f32.mrf.mxu0  ;;  %v4036_v20 = vpop.f32.mrf.mxu1 }
 0x138   : > { %v1077_v22 = vpop.f32.mrf.mxu0  ;;  %v1445_v24 = vpop.f32.mrf.mxu1 }
 0x139   : > { %v1078_v27 = vadd.f32 %v4550_v61, %v1077_v22  ;;  %v1446_v28 = vadd.f32 %v4550_v61, %v1445_v24 }
 0x13a   : > { %v3853_v29 = vpop.f32.mrf.mxu0  ;;  %v4037_v30 = vpop.f32.mrf.mxu1 }
 0x13b   : > { %v3208_v31 = vpack.c.bf16 %v1078_v27, %v1075_v26  ;;  %v3438_v32 = vpack.c.bf16 %v1446_v28, %v1443_v21  ;;  %v4290_v27 = vld [vmem:[%s4370_s23 + $0x2a0] sm:$0xff]  }
 0x13c   : > { %v1082_v33 = vpop.f32.mrf.mxu0  ;;  %3951 = vmatmul.mubr.bf16.gmra.mxu0 %v4281_v23  ;;  %v1450_v34 = vpop.f32.mrf.mxu1  ;;  %4135 = vmatmul.mubr.bf16.gmra.mxu1 %v4282_v25  ;;  %v4289_v25 = vld [vmem:[%s4370_s23 + $0x130] sm:$0xff]  }
 0x13d   : > { %3618 = vst [vmem:[%s4563_s11 + $0x48] sm:$0xff] %v3208_v31   ;;  %3664 = vst [vmem:[%s4563_s11 + $0x1b8] sm:$0xff] %v3438_v32   ;;  %3954 = vmatprep.mubr.msk.bf16.mxu0 %vm4314_vm0, %v4313_v1  ;;  %4138 = vmatprep.mubr.msk.bf16.mxu1 %vm4314_vm0, %v4313_v1  ;;  %v1451_v37 = vadd.f32 %v4550_v61, %v1450_v34  ;;  %v1083_v42 = vadd.f32 %v4550_v61, %v1082_v33 }
 0x13e   : > { %v3856_v35 = vpop.f32.mrf.mxu0  ;;  %v4040_v36 = vpop.f32.mrf.mxu1 }
 0x140   : > { %v1085_v38 = vpop.f32.mrf.mxu0  ;;  %v1453_v40 = vpop.f32.mrf.mxu1 }
 0x141   : > { %v1086_v43 = vadd.f32 %v4550_v61, %v1085_v38  ;;  %v1454_v44 = vadd.f32 %v4550_v61, %v1453_v40 }
 0x142   : > { %v3857_v45 = vpop.f32.mrf.mxu0  ;;  %v4041_v46 = vpop.f32.mrf.mxu1 }
 0x143   : > { %v3213_v47 = vpack.c.bf16 %v1086_v43, %v1083_v42  ;;  %v3443_v48 = vpack.c.bf16 %v1454_v44, %v1451_v37  ;;  %v4292_v43 = vld [vmem:[%s4370_s23 + $0x2a8] sm:$0xff]  }
 0x144   : > { %v1090_v49 = vpop.f32.mrf.mxu0  ;;  %3955 = vmatmul.mubr.bf16.gmra.mxu0 %v4283_v39  ;;  %v1458_v50 = vpop.f32.mrf.mxu1  ;;  %4139 = vmatmul.mubr.bf16.gmra.mxu1 %v4284_v41  ;;  %v4291_v41 = vld [vmem:[%s4370_s23 + $0x138] sm:$0xff]  }
 0x145   : > { %3619 = vst [vmem:[%s4563_s11 + $0x50] sm:$0xff] %v3213_v47   ;;  %3665 = vst [vmem:[%s4563_s11 + $0x1c0] sm:$0xff] %v3443_v48   ;;  %3958 = vmatprep.mubr.msk.bf16.mxu0 %vm4314_vm0, %v4313_v1  ;;  %4142 = vmatprep.mubr.msk.bf16.mxu1 %vm4314_vm0, %v4313_v1  ;;  %v1459_v53 = vadd.f32 %v4550_v61, %v1458_v50  ;;  %v1091_v58 = vadd.f32 %v4550_v61, %v1090_v49 }
 0x146   : > { %v3860_v51 = vpop.f32.mrf.mxu0  ;;  %v4044_v52 = vpop.f32.mrf.mxu1 }
 0x148   : > { %v1093_v54 = vpop.f32.mrf.mxu0  ;;  %v1461_v56 = vpop.f32.mrf.mxu1 }
 0x149   : > { %v1094_v59 = vadd.f32 %v4550_v61, %v1093_v54  ;;  %v1462_v60 = vadd.f32 %v4550_v61, %v1461_v56 }
 0x14a   : > { %v3861_v62 = vpop.f32.mrf.mxu0  ;;  %v4045_v63 = vpop.f32.mrf.mxu1 }
 0x14b   : > { %v3218_v0 = vpack.c.bf16 %v1094_v59, %v1091_v58  ;;  %v3448_v2 = vpack.c.bf16 %v1462_v60, %v1459_v53  ;;  %v4294_v59 = vld [vmem:[%s4370_s23 + $0x2b0] sm:$0xff]  }
 0x14c   : > { %v1098_v3 = vpop.f32.mrf.mxu0  ;;  %3959 = vmatmul.mubr.bf16.gmra.mxu0 %v4285_v55  ;;  %v1466_v4 = vpop.f32.mrf.mxu1  ;;  %4143 = vmatmul.mubr.bf16.gmra.mxu1 %v4286_v57  ;;  %v4293_v57 = vld [vmem:[%s4370_s23 + $0x140] sm:$0xff]  }
 0x14d   : > { %3620 = vst [vmem:[%s4563_s11 + $0x58] sm:$0xff] %v3218_v0   ;;  %3666 = vst [vmem:[%s4563_s11 + $0x1c8] sm:$0xff] %v3448_v2   ;;  %3962 = vmatprep.mubr.msk.bf16.mxu0 %vm4314_vm0, %v4313_v1  ;;  %4146 = vmatprep.mubr.msk.bf16.mxu1 %vm4314_vm0, %v4313_v1  ;;  %v1467_v7 = vadd.f32 %v4550_v61, %v1466_v4  ;;  %v1099_v12 = vadd.f32 %v4550_v61, %v1098_v3 }
 0x14e   : > { %v3864_v5 = vpop.f32.mrf.mxu0  ;;  %v4048_v6 = vpop.f32.mrf.mxu1 }
 0x150   : > { %v1101_v8 = vpop.f32.mrf.mxu0  ;;  %v1469_v10 = vpop.f32.mrf.mxu1 }
 0x151   : > { %v1102_v13 = vadd.f32 %v4550_v61, %v1101_v8  ;;  %v1470_v14 = vadd.f32 %v4550_v61, %v1469_v10 }
 0x152   : > { %v3865_v15 = vpop.f32.mrf.mxu0  ;;  %v4049_v16 = vpop.f32.mrf.mxu1 }
 0x153   : > { %v3223_v17 = vpack.c.bf16 %v1102_v13, %v1099_v12  ;;  %v3453_v18 = vpack.c.bf16 %v1470_v14, %v1467_v7  ;;  %v4296_v13 = vld [vmem:[%s4370_s23 + $0x2b8] sm:$0xff]  }
 0x154   : > { %v1106_v19 = vpop.f32.mrf.mxu0  ;;  %3963 = vmatmul.mubr.bf16.gmra.mxu0 %v4287_v9  ;;  %v1474_v20 = vpop.f32.mrf.mxu1  ;;  %4147 = vmatmul.mubr.bf16.gmra.mxu1 %v4288_v11  ;;  %v4295_v11 = vld [vmem:[%s4370_s23 + $0x148] sm:$0xff]  }
 0x155   : > { %3621 = vst [vmem:[%s4563_s11 + $0x60] sm:$0xff] %v3223_v17   ;;  %3667 = vst [vmem:[%s4563_s11 + $0x1d0] sm:$0xff] %v3453_v18   ;;  %3966 = vmatprep.mubr.msk.bf16.mxu0 %vm4314_vm0, %v4313_v1  ;;  %4150 = vmatprep.mubr.msk.bf16.mxu1 %vm4314_vm0, %v4313_v1  ;;  %v1475_v23 = vadd.f32 %v4550_v61, %v1474_v20  ;;  %v1107_v28 = vadd.f32 %v4550_v61, %v1106_v19 }
 0x156   : > { %v3868_v21 = vpop.f32.mrf.mxu0  ;;  %v4052_v22 = vpop.f32.mrf.mxu1 }
 0x158   : > { %v1109_v24 = vpop.f32.mrf.mxu0  ;;  %v1477_v26 = vpop.f32.mrf.mxu1 }
 0x159   : > { %v1110_v29 = vadd.f32 %v4550_v61, %v1109_v24  ;;  %v1478_v30 = vadd.f32 %v4550_v61, %v1477_v26 }
 0x15a   : > { %v3869_v31 = vpop.f32.mrf.mxu0  ;;  %v4053_v32 = vpop.f32.mrf.mxu1 }
 0x15b   : > { %v3228_v33 = vpack.c.bf16 %v1110_v29, %v1107_v28  ;;  %v3458_v34 = vpack.c.bf16 %v1478_v30, %v1475_v23  ;;  %v4298_v29 = vld [vmem:[%s4370_s23 + $0x2c0] sm:$0xff]  }
 0x15c   : > { %v1114_v35 = vpop.f32.mrf.mxu0  ;;  %3967 = vmatmul.mubr.bf16.gmra.mxu0 %v4289_v25  ;;  %v1482_v36 = vpop.f32.mrf.mxu1  ;;  %4151 = vmatmul.mubr.bf16.gmra.mxu1 %v4290_v27  ;;  %v4297_v27 = vld [vmem:[%s4370_s23 + $0x150] sm:$0xff]  }
 0x15d   : > { %3622 = vst [vmem:[%s4563_s11 + $0x68] sm:$0xff] %v3228_v33   ;;  %3668 = vst [vmem:[%s4563_s11 + $0x1d8] sm:$0xff] %v3458_v34   ;;  %3970 = vmatprep.mubr.msk.bf16.mxu0 %vm4314_vm0, %v4313_v1  ;;  %4154 = vmatprep.mubr.msk.bf16.mxu1 %vm4314_vm0, %v4313_v1  ;;  %v1483_v39 = vadd.f32 %v4550_v61, %v1482_v36  ;;  %v1115_v44 = vadd.f32 %v4550_v61, %v1114_v35 }
 0x15e   : > { %v3872_v37 = vpop.f32.mrf.mxu0  ;;  %v4056_v38 = vpop.f32.mrf.mxu1 }
 0x160   : > { %v1117_v40 = vpop.f32.mrf.mxu0  ;;  %v1485_v42 = vpop.f32.mrf.mxu1 }
 0x161   : > { %v1118_v45 = vadd.f32 %v4550_v61, %v1117_v40  ;;  %v1486_v46 = vadd.f32 %v4550_v61, %v1485_v42 }
 0x162   : > { %v3873_v47 = vpop.f32.mrf.mxu0  ;;  %v4057_v48 = vpop.f32.mrf.mxu1 }
 0x163   : > { %v3233_v49 = vpack.c.bf16 %v1118_v45, %v1115_v44  ;;  %v3463_v50 = vpack.c.bf16 %v1486_v46, %v1483_v39  ;;  %v4300_v45 = vld [vmem:[%s4370_s23 + $0x2c8] sm:$0xff]  }
 0x164   : > { %v1122_v51 = vpop.f32.mrf.mxu0  ;;  %3971 = vmatmul.mubr.bf16.gmra.mxu0 %v4291_v41  ;;  %v1490_v52 = vpop.f32.mrf.mxu1  ;;  %4155 = vmatmul.mubr.bf16.gmra.mxu1 %v4292_v43  ;;  %v4299_v43 = vld [vmem:[%s4370_s23 + $0x158] sm:$0xff]  }
 0x165   : > { %3623 = vst [vmem:[%s4563_s11 + $0x70] sm:$0xff] %v3233_v49   ;;  %3669 = vst [vmem:[%s4563_s11 + $0x1e0] sm:$0xff] %v3463_v50   ;;  %3974 = vmatprep.mubr.msk.bf16.mxu0 %vm4314_vm0, %v4313_v1  ;;  %4158 = vmatprep.mubr.msk.bf16.mxu1 %vm4314_vm0, %v4313_v1  ;;  %v1491_v55 = vadd.f32 %v4550_v61, %v1490_v52  ;;  %v1123_v60 = vadd.f32 %v4550_v61, %v1122_v51 }
 0x166   : > { %v3876_v53 = vpop.f32.mrf.mxu0  ;;  %v4060_v54 = vpop.f32.mrf.mxu1 }
 0x168   : > { %v1125_v56 = vpop.f32.mrf.mxu0  ;;  %v1493_v58 = vpop.f32.mrf.mxu1 }
 0x169   : > { %v1126_v62 = vadd.f32 %v4550_v61, %v1125_v56  ;;  %v1494_v63 = vadd.f32 %v4550_v61, %v1493_v58 }
 0x16a   : > { %v3877_v0 = vpop.f32.mrf.mxu0  ;;  %v4061_v2 = vpop.f32.mrf.mxu1 }
 0x16b   : > { %v3238_v3 = vpack.c.bf16 %v1126_v62, %v1123_v60  ;;  %v3468_v4 = vpack.c.bf16 %v1494_v63, %v1491_v55  ;;  %v4302_v62 = vld [vmem:[%s4370_s23 + $0x2d0] ss:$0 sps:$4 sm:$0x33]  }
 0x16c   : > { %v1130_v5 = vpop.f32.mrf.mxu0  ;;  %3975 = vmatmul.mubr.bf16.gmra.mxu0 %v4293_v57  ;;  %v1498_v6 = vpop.f32.mrf.mxu1  ;;  %4159 = vmatmul.mubr.bf16.gmra.mxu1 %v4294_v59  ;;  %v4301_v59 = vld [vmem:[%s4370_s23 + $0x160] sm:$0xff]  }
 0x16d   : > { %3624 = vst [vmem:[%s4563_s11 + $0x78] sm:$0xff] %v3238_v3   ;;  %3670 = vst [vmem:[%s4563_s11 + $0x1e8] sm:$0xff] %v3468_v4   ;;  %3978 = vmatprep.mubr.msk.bf16.mxu0 %vm4314_vm0, %v4313_v1  ;;  %4162 = vmatprep.mubr.msk.bf16.mxu1 %vm4314_vm0, %v4313_v1  ;;  %v1499_v9 = vadd.f32 %v4550_v61, %v1498_v6  ;;  %v1131_v14 = vadd.f32 %v4550_v61, %v1130_v5 }
 0x16e   : > { %v3880_v7 = vpop.f32.mrf.mxu0  ;;  %v4064_v8 = vpop.f32.mrf.mxu1 }
 0x170   : > { %v1133_v10 = vpop.f32.mrf.mxu0  ;;  %v1501_v12 = vpop.f32.mrf.mxu1 }
 0x171   : > { %v1134_v15 = vadd.f32 %v4550_v61, %v1133_v10  ;;  %v1502_v16 = vadd.f32 %v4550_v61, %v1501_v12 }
 0x172   : > { %v3881_v17 = vpop.f32.mrf.mxu0  ;;  %v4065_v18 = vpop.f32.mrf.mxu1 }
 0x173   : > { %v3243_v19 = vpack.c.bf16 %v1134_v15, %v1131_v14  ;;  %v3473_v20 = vpack.c.bf16 %v1502_v16, %v1499_v9 }
 0x174   : > { %v1138_v21 = vpop.f32.mrf.mxu0  ;;  %3979 = vmatmul.mubr.bf16.gmra.mxu0 %v4295_v11  ;;  %v1506_v22 = vpop.f32.mrf.mxu1  ;;  %4163 = vmatmul.mubr.bf16.gmra.mxu1 %v4296_v13  ;;  %v4303_v13 = vld [vmem:[%s4370_s23 + $0x168] sm:$0xff]  }
 0x175   : > { %3625 = vst [vmem:[%s4563_s11 + $0x80] sm:$0xff] %v3243_v19   ;;  %3671 = vst [vmem:[%s4563_s11 + $0x1f0] sm:$0xff] %v3473_v20   ;;  %3982 = vmatprep.mubr.msk.bf16.mxu0 %vm4314_vm0, %v4313_v1  ;;  %4166 = vmatprep.mubr.msk.bf16.mxu1 %vm4314_vm0, %v4313_v1  ;;  %v1507_v25 = vadd.f32 %v4550_v61, %v1506_v22  ;;  %v1139_v30 = vadd.f32 %v4550_v61, %v1138_v21 }
 0x176   : > { %v3884_v23 = vpop.f32.mrf.mxu0  ;;  %v4068_v24 = vpop.f32.mrf.mxu1 }
 0x178   : > { %v1141_v26 = vpop.f32.mrf.mxu0  ;;  %v1509_v28 = vpop.f32.mrf.mxu1 }
 0x179   : > { %v1142_v31 = vadd.f32 %v4550_v61, %v1141_v26  ;;  %v1510_v32 = vadd.f32 %v4550_v61, %v1509_v28 }
 0x17a   : > { %v3885_v33 = vpop.f32.mrf.mxu0  ;;  %v4069_v34 = vpop.f32.mrf.mxu1 }
 0x17b   : > { %v3248_v35 = vpack.c.bf16 %v1142_v31, %v1139_v30  ;;  %v3478_v36 = vpack.c.bf16 %v1510_v32, %v1507_v25 }
 0x17c   : > { %v1146_v37 = vpop.f32.mrf.mxu0  ;;  %3983 = vmatmul.mubr.bf16.gmra.mxu0 %v4297_v27  ;;  %v1514_v38 = vpop.f32.mrf.mxu1  ;;  %4167 = vmatmul.mubr.bf16.gmra.mxu1 %v4298_v29 }
 0x17d   : > { %3626 = vst [vmem:[%s4563_s11 + $0x88] sm:$0xff] %v3248_v35   ;;  %3672 = vst [vmem:[%s4563_s11 + $0x1f8] sm:$0xff] %v3478_v36   ;;  %3986 = vmatprep.mubr.msk.bf16.mxu0 %vm4314_vm0, %v4313_v1  ;;  %4170 = vmatprep.mubr.msk.bf16.mxu1 %vm4314_vm0, %v4313_v1  ;;  %v1515_v41 = vadd.f32 %v4550_v61, %v1514_v38  ;;  %v1147_v46 = vadd.f32 %v4550_v61, %v1146_v37 }
 0x17e   : > { %v3888_v39 = vpop.f32.mrf.mxu0  ;;  %v4072_v40 = vpop.f32.mrf.mxu1 }
 0x180   : > { %v1149_v42 = vpop.f32.mrf.mxu0  ;;  %v1517_v44 = vpop.f32.mrf.mxu1 }
 0x181   : > { %v1150_v47 = vadd.f32 %v4550_v61, %v1149_v42  ;;  %v1518_v48 = vadd.f32 %v4550_v61, %v1517_v44 }
 0x182   : > { %v3889_v49 = vpop.f32.mrf.mxu0  ;;  %v4073_v50 = vpop.f32.mrf.mxu1 }
 0x183   : > { %v3253_v51 = vpack.c.bf16 %v1150_v47, %v1147_v46  ;;  %v3483_v52 = vpack.c.bf16 %v1518_v48, %v1515_v41 }
 0x184   : > { %v1154_v53 = vpop.f32.mrf.mxu0  ;;  %3987 = vmatmul.mubr.bf16.gmra.mxu0 %v4299_v43  ;;  %v1522_v54 = vpop.f32.mrf.mxu1  ;;  %4171 = vmatmul.mubr.bf16.gmra.mxu1 %v4300_v45 }
 0x185   : > { %3627 = vst [vmem:[%s4563_s11 + $0x90] sm:$0xff] %v3253_v51   ;;  %3673 = vst [vmem:[%s4563_s11 + $0x200] sm:$0xff] %v3483_v52   ;;  %3990 = vmatprep.mubr.msk.bf16.mxu0 %vm4314_vm0, %v4313_v1  ;;  %4174 = vmatprep.mubr.msk.bf16.mxu1 %vm4314_vm0, %v4313_v1  ;;  %v1523_v57 = vadd.f32 %v4550_v61, %v1522_v54  ;;  %v1155_v63 = vadd.f32 %v4550_v61, %v1154_v53 }
 0x186   : > { %v3892_v55 = vpop.f32.mrf.mxu0  ;;  %v4076_v56 = vpop.f32.mrf.mxu1 }
 0x188   : > { %v1157_v58 = vpop.f32.mrf.mxu0  ;;  %v1525_v60 = vpop.f32.mrf.mxu1 }
 0x189   : > { %v1158_v0 = vadd.f32 %v4550_v61, %v1157_v58  ;;  %v1526_v2 = vadd.f32 %v4550_v61, %v1525_v60 }
 0x18a   : > { %v3893_v3 = vpop.f32.mrf.mxu0  ;;  %v4077_v4 = vpop.f32.mrf.mxu1 }
 0x18b   : > { %v3258_v5 = vpack.c.bf16 %v1158_v0, %v1155_v63  ;;  %v3488_v6 = vpack.c.bf16 %v1526_v2, %v1523_v57 }
 0x18c   : > { %v1162_v7 = vpop.f32.mrf.mxu0  ;;  %3991 = vmatmul.mubr.bf16.gmra.mxu0 %v4301_v59  ;;  %v1530_v8 = vpop.f32.mrf.mxu1  ;;  %4175 = vmatmul.mubr.bf16.gmra.mxu1 %v4302_v62 }
 0x18d   : > { %3628 = vst [vmem:[%s4563_s11 + $0x98] sm:$0xff] %v3258_v5   ;;  %3674 = vst [vmem:[%s4563_s11 + $0x208] sm:$0xff] %v3488_v6   ;;  %3994 = vmatprep.mubr.msk.bf16.mxu0 %vm4314_vm0, %v4313_v1  ;;  %v1531_v11 = vadd.f32 %v4550_v61, %v1530_v8  ;;  %v1163_v15 = vadd.f32 %v4550_v61, %v1162_v7  ;;  %v4826_v8 = vld [vmem:[%s4960_s2] ss:$0 sm:$0xff] }
 0x18e   : > { %v3896_v9 = vpop.f32.mrf.mxu0  ;;  %v4080_v10 = vpop.f32.mrf.mxu1 }
 0x190   : > { %v1165_v12 = vpop.f32.mrf.mxu0  ;;  %v1533_v14 = vpop.f32.mrf.mxu1 }
 0x191   : > { %v1166_v16 = vadd.f32 %v4550_v61, %v1165_v12  ;;  %v1534_v17 = vadd.f32 %v4550_v61, %v1533_v14 }
 0x192   : > { %v3897_v18 = vpop.f32.mrf.mxu0  ;;  %v4081_v19 = vpop.f32.mrf.mxu1 }
 0x193   : > { %v3263_v20 = vpack.c.bf16 %v1166_v16, %v1163_v15  ;;  %v3493_v21 = vpack.c.bf16 %v1534_v17, %v1531_v11 }
 0x194   : > { %v1170_v1 = vpop.f32.mrf.mxu0  ;;  %3995 = vmatmul.mubr.bf16.gmra.mxu0 %v4303_v13  ;;  %v1538_v22 = vpop.f32.mrf.mxu1 }
 0x195   : > { %3629 = vst [vmem:[%s4563_s11 + $0xa0] sm:$0xff] %v3263_v20   ;;  %3675 = vst [vmem:[%s4563_s11 + $0x210] sm:$0xff] %v3493_v21   ;;  %v1539_v25 = vadd.f32 %v4550_v61, %v1538_v22  ;;  %v1171_v28 = vadd.f32 %v4550_v61, %v1170_v1 }
 0x196   : > { %v3900_v23 = vpop.f32.mrf.mxu0  ;;  %v4084_v24 = vpop.f32.mrf.mxu1 }
 0x198   : > { %v1173_v26 = vpop.f32.mrf.mxu0  ;;  %v1541_v27 = vpop.f32.mrf.mxu1 }
 0x199   : > { %v1174_v29 = vadd.f32 %v4550_v61, %v1173_v26  ;;  %v1542_v30 = vadd.f32 %v4550_v61, %v1541_v27 }
 0x19a   : > { %v3901_v31 = vpop.f32.mrf.mxu0  ;;  %v4085_v32 = vpop.f32.mrf.mxu1 }
 0x19b   : > { %v3268_v33 = vpack.c.bf16 %v1174_v29, %v1171_v28  ;;  %v3498_v34 = vpack.c.bf16 %v1542_v30, %v1539_v25 }
 0x19c   : > { %v1178_v35 = vpop.f32.mrf.mxu0  ;;  %v1546_v36 = vpop.f32.mrf.mxu1 }
 0x19d   : > { %3630 = vst [vmem:[%s4563_s11 + $0xa8] sm:$0xff] %v3268_v33   ;;  %3676 = vst [vmem:[%s4563_s11 + $0x218] sm:$0xff] %v3498_v34   ;;  %v1547_v39 = vadd.f32 %v4550_v61, %v1546_v36  ;;  %v1179_v42 = vadd.f32 %v4550_v61, %v1178_v35 }
 0x19e   : > { %v3904_v37 = vpop.f32.mrf.mxu0  ;;  %v4088_v38 = vpop.f32.mrf.mxu1 }
 0x1a0   : > { %v1181_v40 = vpop.f32.mrf.mxu0  ;;  %v1549_v41 = vpop.f32.mrf.mxu1 }
 0x1a1   : > { %v1182_v43 = vadd.f32 %v4550_v61, %v1181_v40  ;;  %v1550_v44 = vadd.f32 %v4550_v61, %v1549_v41 }
 0x1a2   : > { %v3905_v45 = vpop.f32.mrf.mxu0  ;;  %v4089_v46 = vpop.f32.mrf.mxu1 }
 0x1a3   : > { %v3273_v47 = vpack.c.bf16 %v1182_v43, %v1179_v42  ;;  %v3503_v48 = vpack.c.bf16 %v1550_v44, %v1547_v39 }
 0x1a4   : > { %v1186_v49 = vpop.f32.mrf.mxu0  ;;  %v1554_v50 = vpop.f32.mrf.mxu1 }
 0x1a5   : > { %3631 = vst [vmem:[%s4563_s11 + $0xb0] sm:$0xff] %v3273_v47   ;;  %3677 = vst [vmem:[%s4563_s11 + $0x220] sm:$0xff] %v3503_v48   ;;  %v1555_v53 = vadd.f32 %v4550_v61, %v1554_v50  ;;  %v1187_v56 = vadd.f32 %v4550_v61, %v1186_v49 }
 0x1a6   : > { %v3908_v51 = vpop.f32.mrf.mxu0  ;;  %v4092_v52 = vpop.f32.mrf.mxu1 }
 0x1a8   : > { %v1189_v54 = vpop.f32.mrf.mxu0  ;;  %v1557_v55 = vpop.f32.mrf.mxu1 }
 0x1a9   : > { %v1190_v57 = vadd.f32 %v4550_v61, %v1189_v54  ;;  %v1558_v58 = vadd.f32 %v4550_v61, %v1557_v55 }
 0x1aa   : > { %v3909_v59 = vpop.f32.mrf.mxu0  ;;  %v4093_v60 = vpop.f32.mrf.mxu1 }
 0x1ab   : > { %v3278_v62 = vpack.c.bf16 %v1190_v57, %v1187_v56  ;;  %v3508_v63 = vpack.c.bf16 %v1558_v58, %v1555_v53 }
 0x1ac   : > { %v1194_v0 = vpop.f32.mrf.mxu0  ;;  %v1562_v2 = vpop.f32.mrf.mxu1 }
 0x1ad   : > { %3632 = vst [vmem:[%s4563_s11 + $0xb8] sm:$0xff] %v3278_v62   ;;  %3678 = vst [vmem:[%s4563_s11 + $0x228] sm:$0xff] %v3508_v63   ;;  %v1563_v5 = vadd.f32 %v4550_v61, %v1562_v2  ;;  %v1195_v9 = vadd.f32 %v4826_v8, %v1194_v0 }
 0x1ae   : > { %v3912_v3 = vpop.f32.mrf.mxu0  ;;  %v4096_v4 = vpop.f32.mrf.mxu1 }
 0x1b0   : > { %v1197_v6 = vpop.f32.mrf.mxu0  ;;  %v1565_v7 = vpop.f32.mrf.mxu1 }
 0x1b1   : > { %v1198_v10 = vadd.f32 %v4826_v8, %v1197_v6  ;;  %v1566_v11 = vadd.f32 %v4826_v8, %v1565_v7 }
 0x1b2   : > { %v3913_v12 = vpop.f32.mrf.mxu0  ;;  %v4097_v13 = vpop.f32.mrf.mxu1 }
 0x1b3   : > { %v3283_v14 = vpack.c.bf16 %v1198_v10, %v1195_v9  ;;  %v3513_v15 = vpack.c.bf16 %v1566_v11, %v1563_v5 }
 0x1b4   : > { %v1202_v16 = vpop.f32.mrf.mxu0  ;;  %v1570_v17 = vpop.f32.mrf.mxu1 }
 0x1b5   : > { %3633 = vst [vmem:[%s4563_s11 + $0xc0] sm:$0xff] %v3283_v14   ;;  %3679 = vst [vmem:[%s4563_s11 + $0x230] sm:$0xff] %v3513_v15   ;;  %v1571_v19 = vadd.f32 %v4826_v8, %v1570_v17  ;;  %v1203_v1 = vadd.f32 %v4826_v8, %v1202_v16 }
 0x1b6   : > { %v3916_v61 = vpop.f32.mrf.mxu0  ;;  %v4100_v18 = vpop.f32.mrf.mxu1 }
 0x1b8   : > { %v1205_v20 = vpop.f32.mrf.mxu0  ;;  %v1573_v21 = vpop.f32.mrf.mxu1 }
 0x1b9   : > { %v1206_v22 = vadd.f32 %v4826_v8, %v1205_v20  ;;  %v1574_v23 = vadd.f32 %v4826_v8, %v1573_v21 }
 0x1ba   : > { %v3917_v24 = vpop.f32.mrf.mxu0  ;;  %v4101_v25 = vpop.f32.mrf.mxu1 }
 0x1bb   : > { %v3288_v26 = vpack.c.bf16 %v1206_v22, %v1203_v1  ;;  %v3518_v27 = vpack.c.bf16 %v1574_v23, %v1571_v19 }
 0x1bc   : > { %v1210_v28 = vpop.f32.mrf.mxu0  ;;  %v1578_v29 = vpop.f32.mrf.mxu1 }
 0x1bd   : > { %3634 = vst [vmem:[%s4563_s11 + $0xc8] sm:$0xff] %v3288_v26   ;;  %3680 = vst [vmem:[%s4563_s11 + $0x238] sm:$0xff] %v3518_v27   ;;  %v1579_v32 = vadd.f32 %v4826_v8, %v1578_v29  ;;  %v1211_v35 = vadd.f32 %v4826_v8, %v1210_v28 }
 0x1be   : > { %v3920_v30 = vpop.f32.mrf.mxu0  ;;  %v4104_v31 = vpop.f32.mrf.mxu1 }
 0x1c0   : > { %v1213_v33 = vpop.f32.mrf.mxu0  ;;  %v1581_v34 = vpop.f32.mrf.mxu1 }
 0x1c1   : > { %v1214_v36 = vadd.f32 %v4826_v8, %v1213_v33  ;;  %v1582_v37 = vadd.f32 %v4826_v8, %v1581_v34 }
 0x1c2   : > { %v3921_v38 = vpop.f32.mrf.mxu0  ;;  %v4105_v39 = vpop.f32.mrf.mxu1 }
 0x1c3   : > { %v3293_v40 = vpack.c.bf16 %v1214_v36, %v1211_v35  ;;  %v3523_v41 = vpack.c.bf16 %v1582_v37, %v1579_v32 }
 0x1c4   : > { %v1218_v42 = vpop.f32.mrf.mxu0  ;;  %v1586_v43 = vpop.f32.mrf.mxu1 }
 0x1c5   : > { %3635 = vst [vmem:[%s4563_s11 + $0xd0] sm:$0xff] %v3293_v40   ;;  %3681 = vst [vmem:[%s4563_s11 + $0x240] sm:$0xff] %v3523_v41   ;;  %v1587_v46 = vadd.f32 %v4826_v8, %v1586_v43  ;;  %v1219_v49 = vadd.f32 %v4826_v8, %v1218_v42 }
 0x1c6   : > { %v3924_v44 = vpop.f32.mrf.mxu0  ;;  %v4108_v45 = vpop.f32.mrf.mxu1 }
 0x1c8   : > { %v1221_v47 = vpop.f32.mrf.mxu0  ;;  %v1589_v48 = vpop.f32.mrf.mxu1 }
 0x1c9   : > { %v1222_v50 = vadd.f32 %v4826_v8, %v1221_v47  ;;  %v1590_v51 = vadd.f32 %v4826_v8, %v1589_v48 }
 0x1ca   : > { %v3925_v52 = vpop.f32.mrf.mxu0  ;;  %v4109_v53 = vpop.f32.mrf.mxu1 }
 0x1cb   : > { %v3298_v54 = vpack.c.bf16 %v1222_v50, %v1219_v49  ;;  %v3528_v55 = vpack.c.bf16 %v1590_v51, %v1587_v46 }
 0x1cc   : > { %v1226_v56 = vpop.f32.mrf.mxu0  ;;  %v1594_v57 = vpop.f32.mrf.mxu1 }
 0x1cd   : > { %3636 = vst [vmem:[%s4563_s11 + $0xd8] sm:$0xff] %v3298_v54   ;;  %3682 = vst [vmem:[%s4563_s11 + $0x248] sm:$0xff] %v3528_v55   ;;  %v1595_v60 = vadd.f32 %v4826_v8, %v1594_v57  ;;  %v1227_v0 = vadd.f32 %v4826_v8, %v1226_v56 }
 0x1ce   : > { %v3928_v58 = vpop.f32.mrf.mxu0  ;;  %v4112_v59 = vpop.f32.mrf.mxu1 }
 0x1d0   : > { %v1229_v62 = vpop.f32.mrf.mxu0  ;;  %v1597_v63 = vpop.f32.mrf.mxu1 }
 0x1d1   : > { %v1230_v2 = vadd.f32 %v4826_v8, %v1229_v62  ;;  %v1598_v3 = vadd.f32 %v4826_v8, %v1597_v63 }
 0x1d2   : > { %v3929_v4 = vpop.f32.mrf.mxu0  ;;  %v4113_v5 = vpop.f32.mrf.mxu1 }
 0x1d3   : > { %v3303_v6 = vpack.c.bf16 %v1230_v2, %v1227_v0  ;;  %v3533_v7 = vpack.c.bf16 %v1598_v3, %v1595_v60 }
 0x1d4   : > { %v1234_v9 = vpop.f32.mrf.mxu0  ;;  %v1602_v10 = vpop.f32.mrf.mxu1 }
 0x1d5   : > { %3637 = vst [vmem:[%s4563_s11 + $0xe0] sm:$0xff] %v3303_v6   ;;  %3683 = vst [vmem:[%s4563_s11 + $0x250] sm:$0xff] %v3533_v7   ;;  %v1603_v13 = vadd.f32 %v4826_v8, %v1602_v10  ;;  %v1235_v16 = vadd.f32 %v4826_v8, %v1234_v9 }
 0x1d6   : > { %v3932_v11 = vpop.f32.mrf.mxu0  ;;  %v4116_v12 = vpop.f32.mrf.mxu1 }
 0x1d8   : > { %v1237_v14 = vpop.f32.mrf.mxu0  ;;  %v1605_v15 = vpop.f32.mrf.mxu1 }
 0x1d9   : > { %v1238_v17 = vadd.f32 %v4826_v8, %v1237_v14  ;;  %v1606_v61 = vadd.f32 %v4826_v8, %v1605_v15 }
 0x1da   : > { %v3933_v18 = vpop.f32.mrf.mxu0  ;;  %v4117_v19 = vpop.f32.mrf.mxu1 }
 0x1db   : > { %v3308_v20 = vpack.c.bf16 %v1238_v17, %v1235_v16  ;;  %v3538_v21 = vpack.c.bf16 %v1606_v61, %v1603_v13 }
 0x1dc   : > { %v1242_v1 = vpop.f32.mrf.mxu0  ;;  %v1610_v22 = vpop.f32.mrf.mxu1 }
 0x1dd   : > { %3638 = vst [vmem:[%s4563_s11 + $0xe8] sm:$0xff] %v3308_v20   ;;  %3684 = vst [vmem:[%s4563_s11 + $0x258] sm:$0xff] %v3538_v21   ;;  %v1611_v25 = vadd.f32 %v4826_v8, %v1610_v22  ;;  %v1243_v28 = vadd.f32 %v4826_v8, %v1242_v1 }
 0x1de   : > { %v3936_v23 = vpop.f32.mrf.mxu0  ;;  %v4120_v24 = vpop.f32.mrf.mxu1 }
 0x1e0   : > { %v1245_v26 = vpop.f32.mrf.mxu0  ;;  %v1613_v27 = vpop.f32.mrf.mxu1 }
 0x1e1   : > { %v1246_v29 = vadd.f32 %v4826_v8, %v1245_v26  ;;  %v1614_v30 = vadd.f32 %v4826_v8, %v1613_v27 }
 0x1e2   : > { %v3937_v31 = vpop.f32.mrf.mxu0  ;;  %v4121_v32 = vpop.f32.mrf.mxu1 }
 0x1e3   : > { %v3313_v33 = vpack.c.bf16 %v1246_v29, %v1243_v28  ;;  %v3543_v34 = vpack.c.bf16 %v1614_v30, %v1611_v25 }
 0x1e4   : > { %v1250_v35 = vpop.f32.mrf.mxu0  ;;  %v1618_v36 = vpop.f32.mrf.mxu1 }
 0x1e5   : > { %3639 = vst [vmem:[%s4563_s11 + $0xf0] sm:$0xff] %v3313_v33   ;;  %3685 = vst [vmem:[%s4563_s11 + $0x260] sm:$0xff] %v3543_v34   ;;  %v1619_v39 = vadd.f32 %v4826_v8, %v1618_v36  ;;  %v1251_v42 = vadd.f32 %v4826_v8, %v1250_v35 }
 0x1e6   : > { %v3940_v37 = vpop.f32.mrf.mxu0  ;;  %v4124_v38 = vpop.f32.mrf.mxu1 }
 0x1e8   : > { %v1253_v40 = vpop.f32.mrf.mxu0  ;;  %v1621_v41 = vpop.f32.mrf.mxu1 }
 0x1e9   : > { %v1254_v43 = vadd.f32 %v4826_v8, %v1253_v40  ;;  %v1622_v44 = vadd.f32 %v4826_v8, %v1621_v41 }
 0x1ea   : > { %v3941_v45 = vpop.f32.mrf.mxu0  ;;  %v4125_v46 = vpop.f32.mrf.mxu1 }
 0x1eb   : > { %v3318_v47 = vpack.c.bf16 %v1254_v43, %v1251_v42  ;;  %v3548_v48 = vpack.c.bf16 %v1622_v44, %v1619_v39 }
 0x1ec   : > { %v1258_v49 = vpop.f32.mrf.mxu0  ;;  %v1626_v50 = vpop.f32.mrf.mxu1 }
 0x1ed   : > { %3640 = vst [vmem:[%s4563_s11 + $0xf8] sm:$0xff] %v3318_v47   ;;  %3686 = vst [vmem:[%s4563_s11 + $0x268] sm:$0xff] %v3548_v48   ;;  %v1627_v53 = vadd.f32 %v4826_v8, %v1626_v50  ;;  %v1259_v56 = vadd.f32 %v4826_v8, %v1258_v49 }
 0x1ee   : > { %v3944_v51 = vpop.f32.mrf.mxu0  ;;  %v4128_v52 = vpop.f32.mrf.mxu1 }
 0x1f0   : > { %v1261_v54 = vpop.f32.mrf.mxu0  ;;  %v1629_v55 = vpop.f32.mrf.mxu1 }
 0x1f1   : > { %v1262_v57 = vadd.f32 %v4826_v8, %v1261_v54  ;;  %v1630_v58 = vadd.f32 %v4826_v8, %v1629_v55 }
 0x1f2   : > { %v3945_v59 = vpop.f32.mrf.mxu0  ;;  %v4129_v60 = vpop.f32.mrf.mxu1 }
 0x1f3   : > { %v3323_v62 = vpack.c.bf16 %v1262_v57, %v1259_v56  ;;  %v3553_v63 = vpack.c.bf16 %v1630_v58, %v1627_v53 }
 0x1f4   : > { %v1266_v0 = vpop.f32.mrf.mxu0  ;;  %v1634_v2 = vpop.f32.mrf.mxu1 }
 0x1f5   : > { %3641 = vst [vmem:[%s4563_s11 + $0x100] sm:$0xff] %v3323_v62   ;;  %3687 = vst [vmem:[%s4563_s11 + $0x270] sm:$0xff] %v3553_v63   ;;  %v1635_v5 = vadd.f32 %v4826_v8, %v1634_v2  ;;  %v1267_v9 = vadd.f32 %v4826_v8, %v1266_v0 }
 0x1f6   : > { %v3948_v3 = vpop.f32.mrf.mxu0  ;;  %v4132_v4 = vpop.f32.mrf.mxu1 }
 0x1f8   : > { %v1269_v6 = vpop.f32.mrf.mxu0  ;;  %v1637_v7 = vpop.f32.mrf.mxu1 }
 0x1f9   : > { %v1270_v10 = vadd.f32 %v4826_v8, %v1269_v6  ;;  %v1638_v11 = vadd.f32 %v4826_v8, %v1637_v7 }
 0x1fa   : > { %v3949_v12 = vpop.f32.mrf.mxu0  ;;  %v4133_v13 = vpop.f32.mrf.mxu1 }
 0x1fb   : > { %v3328_v14 = vpack.c.bf16 %v1270_v10, %v1267_v9  ;;  %v3558_v15 = vpack.c.bf16 %v1638_v11, %v1635_v5 }
 0x1fc   : > { %v1274_v16 = vpop.f32.mrf.mxu0  ;;  %v1642_v17 = vpop.f32.mrf.mxu1 }
 0x1fd   : > { %3642 = vst [vmem:[%s4563_s11 + $0x108] sm:$0xff] %v3328_v14   ;;  %3688 = vst [vmem:[%s4563_s11 + $0x278] sm:$0xff] %v3558_v15   ;;  %v1643_v19 = vadd.f32 %v4826_v8, %v1642_v17  ;;  %v1275_v1 = vadd.f32 %v4826_v8, %v1274_v16 }
 0x1fe   : > { %v3952_v61 = vpop.f32.mrf.mxu0  ;;  %v4136_v18 = vpop.f32.mrf.mxu1 }
 0x200   : > { %v1277_v20 = vpop.f32.mrf.mxu0  ;;  %v1645_v21 = vpop.f32.mrf.mxu1 }
 0x201   : > { %v1278_v22 = vadd.f32 %v4826_v8, %v1277_v20  ;;  %v1646_v23 = vadd.f32 %v4826_v8, %v1645_v21 }
 0x202   : > { %v3953_v24 = vpop.f32.mrf.mxu0  ;;  %v4137_v25 = vpop.f32.mrf.mxu1 }
 0x203   : > { %v3333_v26 = vpack.c.bf16 %v1278_v22, %v1275_v1  ;;  %v3563_v27 = vpack.c.bf16 %v1646_v23, %v1643_v19 }
 0x204   : > { %v1282_v28 = vpop.f32.mrf.mxu0  ;;  %v1650_v29 = vpop.f32.mrf.mxu1 }
 0x205   : > { %3643 = vst [vmem:[%s4563_s11 + $0x110] sm:$0xff] %v3333_v26   ;;  %3689 = vst [vmem:[%s4563_s11 + $0x280] sm:$0xff] %v3563_v27   ;;  %v1651_v32 = vadd.f32 %v4826_v8, %v1650_v29  ;;  %v1283_v35 = vadd.f32 %v4826_v8, %v1282_v28 }
 0x206   : > { %v3956_v30 = vpop.f32.mrf.mxu0  ;;  %v4140_v31 = vpop.f32.mrf.mxu1 }
 0x208   : > { %v1285_v33 = vpop.f32.mrf.mxu0  ;;  %v1653_v34 = vpop.f32.mrf.mxu1 }
 0x209   : > { %v1286_v36 = vadd.f32 %v4826_v8, %v1285_v33  ;;  %v1654_v37 = vadd.f32 %v4826_v8, %v1653_v34 }
 0x20a   : > { %v3957_v38 = vpop.f32.mrf.mxu0  ;;  %v4141_v39 = vpop.f32.mrf.mxu1 }
 0x20b   : > { %v3338_v40 = vpack.c.bf16 %v1286_v36, %v1283_v35  ;;  %v3568_v41 = vpack.c.bf16 %v1654_v37, %v1651_v32 }
 0x20c   : > { %v1290_v42 = vpop.f32.mrf.mxu0  ;;  %v1658_v43 = vpop.f32.mrf.mxu1 }
 0x20d   : > { %3644 = vst [vmem:[%s4563_s11 + $0x118] sm:$0xff] %v3338_v40   ;;  %3690 = vst [vmem:[%s4563_s11 + $0x288] sm:$0xff] %v3568_v41   ;;  %v1659_v46 = vadd.f32 %v4826_v8, %v1658_v43  ;;  %v1291_v49 = vadd.f32 %v4826_v8, %v1290_v42 }
 0x20e   : > { %v3960_v44 = vpop.f32.mrf.mxu0  ;;  %v4144_v45 = vpop.f32.mrf.mxu1 }
 0x210   : > { %v1293_v47 = vpop.f32.mrf.mxu0  ;;  %v1661_v48 = vpop.f32.mrf.mxu1 }
 0x211   : > { %v1294_v50 = vadd.f32 %v4826_v8, %v1293_v47  ;;  %v1662_v51 = vadd.f32 %v4826_v8, %v1661_v48 }
 0x212   : > { %v3961_v52 = vpop.f32.mrf.mxu0  ;;  %v4145_v53 = vpop.f32.mrf.mxu1 }
 0x213   : > { %v3343_v54 = vpack.c.bf16 %v1294_v50, %v1291_v49  ;;  %v3573_v55 = vpack.c.bf16 %v1662_v51, %v1659_v46 }
 0x214   : > { %v1298_v56 = vpop.f32.mrf.mxu0  ;;  %v1666_v57 = vpop.f32.mrf.mxu1 }
 0x215   : > { %3645 = vst [vmem:[%s4563_s11 + $0x120] sm:$0xff] %v3343_v54   ;;  %3691 = vst [vmem:[%s4563_s11 + $0x290] sm:$0xff] %v3573_v55   ;;  %v1667_v60 = vadd.f32 %v4826_v8, %v1666_v57  ;;  %v1299_v0 = vadd.f32 %v4826_v8, %v1298_v56 }
 0x216   : > { %v3964_v58 = vpop.f32.mrf.mxu0  ;;  %v4148_v59 = vpop.f32.mrf.mxu1 }
 0x218   : > { %v1301_v62 = vpop.f32.mrf.mxu0  ;;  %v1669_v63 = vpop.f32.mrf.mxu1 }
 0x219   : > { %v1302_v2 = vadd.f32 %v4826_v8, %v1301_v62  ;;  %v1670_v3 = vadd.f32 %v4826_v8, %v1669_v63 }
 0x21a   : > { %v3965_v4 = vpop.f32.mrf.mxu0  ;;  %v4149_v5 = vpop.f32.mrf.mxu1 }
 0x21b   : > { %v3348_v6 = vpack.c.bf16 %v1302_v2, %v1299_v0  ;;  %v3578_v7 = vpack.c.bf16 %v1670_v3, %v1667_v60 }
 0x21c   : > { %v1306_v9 = vpop.f32.mrf.mxu0  ;;  %v1674_v10 = vpop.f32.mrf.mxu1 }
 0x21d   : > { %3646 = vst [vmem:[%s4563_s11 + $0x128] sm:$0xff] %v3348_v6   ;;  %3692 = vst [vmem:[%s4563_s11 + $0x298] sm:$0xff] %v3578_v7   ;;  %v1675_v13 = vadd.f32 %v4826_v8, %v1674_v10  ;;  %v1307_v16 = vadd.f32 %v4826_v8, %v1306_v9 }
 0x21e   : > { %v3968_v11 = vpop.f32.mrf.mxu0  ;;  %v4152_v12 = vpop.f32.mrf.mxu1 }
 0x220   : > { %v1309_v14 = vpop.f32.mrf.mxu0  ;;  %v1677_v15 = vpop.f32.mrf.mxu1 }
 0x221   : > { %v1310_v17 = vadd.f32 %v4826_v8, %v1309_v14  ;;  %v1678_v61 = vadd.f32 %v4826_v8, %v1677_v15 }
 0x222   : > { %v3969_v18 = vpop.f32.mrf.mxu0  ;;  %v4153_v19 = vpop.f32.mrf.mxu1 }
 0x223   : > { %v3353_v20 = vpack.c.bf16 %v1310_v17, %v1307_v16  ;;  %v3583_v21 = vpack.c.bf16 %v1678_v61, %v1675_v13 }
 0x224   : > { %v1314_v1 = vpop.f32.mrf.mxu0  ;;  %v1682_v22 = vpop.f32.mrf.mxu1 }
 0x225   : > { %3647 = vst [vmem:[%s4563_s11 + $0x130] sm:$0xff] %v3353_v20   ;;  %3693 = vst [vmem:[%s4563_s11 + $0x2a0] sm:$0xff] %v3583_v21   ;;  %v1683_v25 = vadd.f32 %v4826_v8, %v1682_v22  ;;  %v1315_v28 = vadd.f32 %v4826_v8, %v1314_v1 }
 0x226   : > { %v3972_v23 = vpop.f32.mrf.mxu0  ;;  %v4156_v24 = vpop.f32.mrf.mxu1 }
 0x228   : > { %v1317_v26 = vpop.f32.mrf.mxu0  ;;  %v1685_v27 = vpop.f32.mrf.mxu1 }
 0x229   : > { %v1318_v29 = vadd.f32 %v4826_v8, %v1317_v26  ;;  %v1686_v30 = vadd.f32 %v4826_v8, %v1685_v27 }
 0x22a   : > { %v3973_v31 = vpop.f32.mrf.mxu0  ;;  %v4157_v32 = vpop.f32.mrf.mxu1 }
 0x22b   : > { %v3358_v33 = vpack.c.bf16 %v1318_v29, %v1315_v28  ;;  %v3588_v34 = vpack.c.bf16 %v1686_v30, %v1683_v25 }
 0x22c   : > { %v1322_v35 = vpop.f32.mrf.mxu0  ;;  %v1690_v36 = vpop.f32.mrf.mxu1 }
 0x22d   : > { %3648 = vst [vmem:[%s4563_s11 + $0x138] sm:$0xff] %v3358_v33   ;;  %3694 = vst [vmem:[%s4563_s11 + $0x2a8] sm:$0xff] %v3588_v34   ;;  %v1691_v39 = vadd.f32 %v4826_v8, %v1690_v36  ;;  %v1323_v42 = vadd.f32 %v4826_v8, %v1322_v35 }
 0x22e   : > { %v3976_v37 = vpop.f32.mrf.mxu0  ;;  %v4160_v38 = vpop.f32.mrf.mxu1 }
 0x230   : > { %v1325_v40 = vpop.f32.mrf.mxu0  ;;  %v1693_v41 = vpop.f32.mrf.mxu1 }
 0x231   : > { %v1326_v43 = vadd.f32 %v4826_v8, %v1325_v40  ;;  %v1694_v44 = vadd.f32 %v4826_v8, %v1693_v41 }
 0x232   : > { %v3977_v45 = vpop.f32.mrf.mxu0  ;;  %v4161_v46 = vpop.f32.mrf.mxu1 }
 0x233   : > { %v3363_v47 = vpack.c.bf16 %v1326_v43, %v1323_v42  ;;  %v3593_v48 = vpack.c.bf16 %v1694_v44, %v1691_v39 }
 0x234   : > { %v1330_v49 = vpop.f32.mrf.mxu0  ;;  %v1698_v50 = vpop.f32.mrf.mxu1 }
 0x235   : > { %3649 = vst [vmem:[%s4563_s11 + $0x140] sm:$0xff] %v3363_v47   ;;  %3695 = vst [vmem:[%s4563_s11 + $0x2b0] sm:$0xff] %v3593_v48   ;;  %v1699_v53 = vadd.f32 %v4826_v8, %v1698_v50  ;;  %v1331_v56 = vadd.f32 %v4826_v8, %v1330_v49 }
 0x236   : > { %v3980_v51 = vpop.f32.mrf.mxu0  ;;  %v4164_v52 = vpop.f32.mrf.mxu1 }
 0x238   : > { %v1333_v54 = vpop.f32.mrf.mxu0  ;;  %v1701_v55 = vpop.f32.mrf.mxu1 }
 0x239   : > { %v1334_v57 = vadd.f32 %v4826_v8, %v1333_v54  ;;  %v1702_v58 = vadd.f32 %v4826_v8, %v1701_v55 }
 0x23a   : > { %v3981_v59 = vpop.f32.mrf.mxu0  ;;  %v4165_v60 = vpop.f32.mrf.mxu1 }
 0x23b   : > { %v3368_v62 = vpack.c.bf16 %v1334_v57, %v1331_v56  ;;  %v3598_v63 = vpack.c.bf16 %v1702_v58, %v1699_v53 }
 0x23c   : > { %v1338_v0 = vpop.f32.mrf.mxu0  ;;  %v1706_v2 = vpop.f32.mrf.mxu1 }
 0x23d   : > { %3650 = vst [vmem:[%s4563_s11 + $0x148] sm:$0xff] %v3368_v62   ;;  %3696 = vst [vmem:[%s4563_s11 + $0x2b8] sm:$0xff] %v3598_v63   ;;  %v1707_v5 = vadd.f32 %v4826_v8, %v1706_v2  ;;  %v1339_v9 = vadd.f32 %v4826_v8, %v1338_v0 }
 0x23e   : > { %v3984_v3 = vpop.f32.mrf.mxu0  ;;  %v4168_v4 = vpop.f32.mrf.mxu1 }
 0x240   : > { %v1341_v6 = vpop.f32.mrf.mxu0  ;;  %v1709_v7 = vpop.f32.mrf.mxu1 }
 0x241   : > { %v1342_v10 = vadd.f32 %v4826_v8, %v1341_v6  ;;  %v1710_v11 = vadd.f32 %v4826_v8, %v1709_v7 }
 0x242   : > { %v3985_v12 = vpop.f32.mrf.mxu0  ;;  %v4169_v13 = vpop.f32.mrf.mxu1 }
 0x243   : > { %v3373_v14 = vpack.c.bf16 %v1342_v10, %v1339_v9  ;;  %v3603_v15 = vpack.c.bf16 %v1710_v11, %v1707_v5 }
 0x244   : > { %v1346_v16 = vpop.f32.mrf.mxu0  ;;  %v1714_v17 = vpop.f32.mrf.mxu1 }
 0x245   : > { %3651 = vst [vmem:[%s4563_s11 + $0x150] sm:$0xff] %v3373_v14   ;;  %3697 = vst [vmem:[%s4563_s11 + $0x2c0] sm:$0xff] %v3603_v15   ;;  %v1715_v19 = vadd.f32 %v4826_v8, %v1714_v17  ;;  %v1347_v1 = vadd.f32 %v4826_v8, %v1346_v16 }
 0x246   : > { %v3988_v61 = vpop.f32.mrf.mxu0  ;;  %v4172_v18 = vpop.f32.mrf.mxu1 }
 0x248   : > { %v1349_v20 = vpop.f32.mrf.mxu0  ;;  %v1717_v21 = vpop.f32.mrf.mxu1 }
 0x249   : > { %v1350_v22 = vadd.f32 %v4826_v8, %v1349_v20  ;;  %v1718_v23 = vadd.f32 %v4826_v8, %v1717_v21 }
 0x24a   : > { %v3989_v24 = vpop.f32.mrf.mxu0  ;;  %v4173_v25 = vpop.f32.mrf.mxu1 }
 0x24b   : > { %v3378_v26 = vpack.c.bf16 %v1350_v22, %v1347_v1  ;;  %v3608_v27 = vpack.c.bf16 %v1718_v23, %v1715_v19 }
 0x24c   : > { %v1354_v28 = vpop.f32.mrf.mxu0  ;;  %v1722_v29 = vpop.f32.mrf.mxu1 }
 0x24d   : > { %3652 = vst [vmem:[%s4563_s11 + $0x158] sm:$0xff] %v3378_v26   ;;  %3698 = vst [vmem:[%s4563_s11 + $0x2c8] sm:$0xff] %v3608_v27   ;;  %v1723_v30 = vadd.f32 %v4826_v8, %v1722_v29  ;;  %v1355_v36 = vadd.f32 %v4826_v8, %v1354_v28 }
 0x24e   : > { %v3992_v31 = vpop.f32.mrf.mxu0  ;;  %v4176_v32 = vpop.f32.mrf.mxu1 }
 0x24f   : > { %v3159_v33 = vpack.c.bf16 %v1723_v30, %v1723_v30 }
 0x250   : > { %v1357_v34 = vpop.f32.mrf.mxu0  ;;  %v1725_v35 = vpop.f32.mrf.mxu1 }
 0x251   : > { %v1358_v37 = vadd.f32 %v4826_v8, %v1357_v34  ;;  %2633 = vst [vmem:[%s4563_s11 + $0x2d0] sm:$0x3] %v3159_v33 }
 0x252   : > { %v3993_v38 = vpop.f32.mrf.mxu0  ;;  %v4177_v39 = vpop.f32.mrf.mxu1 }
 0x253   : > { %v3383_v40 = vpack.c.bf16 %v1358_v37, %v1355_v36 }
 0x254   : > { %v1362_v41 = vpop.f32.mrf.mxu0 }
 0x255   : > { %3653 = vst [vmem:[%s4563_s11 + $0x160] sm:$0xff] %v3383_v40   ;;  %v1363_v44 = vadd.f32 %v4826_v8, %v1362_v41 }
 0x256   : > { %v3996_v42 = vpop.f32.mrf.mxu0 }
 0x258   : > { %v1365_v43 = vpop.f32.mrf.mxu0 }
 0x259   : > { %v1366_v45 = vadd.f32 %v4826_v8, %v1365_v43 }
 0x25a   : > { %v3997_v46 = vpop.f32.mrf.mxu0 }
 0x25b   : > { %v3388_v47 = vpack.c.bf16 %v1366_v45, %v1363_v44 }
 0x25d   : > { %3654 = vst [vmem:[%s4563_s11 + $0x168] sm:$0xff] %v3388_v47  }
 0x25e PF: > { %s13_s12 = sadd.s32 1, %s4311_s12  }
 0x25f   : > { %p10_p4 = scmp.ge.s32.totalorder %s13_s12, 4  }
 0x261   :  { %12 = sbr.rel (!%p10_p4) target bundleno = 1 (0x1), region = 62 }

// kernel: decoder_forward.9
= control target key start
LH: loop header
LB: loop body
LE: loop exit
PB: predicated region body
PF: predicated region fallthrough
CT: control target
= control target key end

     0   :  { %s2240_s12 = smov 0   ;;  %s2726_s0 = inlined_call_operand.vmem [shape: bf16[2,1024,256], index: 0, kind: input, shape index: {}]   ;;  %s2727_s1 = inlined_call_operand.vmem [shape: bf16[256,128], index: 1, kind: input, shape index: {}]   ;;  %s2728_s2 = inlined_call_operand.vmem [shape: f32[1,128], index: 2, kind: input, shape index: {}]   ;;  %s2729_s3 = inlined_call_operand.vmem [shape: f32[2,1024,128], index: 3, kind: output, shape index: {}]  }
   0x1 LB: > { %s1803_s13 = sadd.s32 4294967295, %s2217_s12   ;;  %p1807_p0 = scmp.ge.s32.totalorder %s2217_s12, 1  ;;  %s2217_s12 = sphi %s2240_s12, %s13_s12  }
   0x2   : > { %p137_p1 = scmp.lt.s32.totalorder %s2217_s12, 3 }
   0x4   : > { %p138_p2 = pnand %p1807_p0, %p137_p1 }
   0x5   : > { %p161_p3 = scmp.lt.s32.totalorder (!%p138_p2), %s1803_s13, 1 }
   0x6   : > { %141 = sbr.rel (%p138_p2) target bundleno = 524 (0x20c), region = 32 }
   0xb   : > { %v2002_v0 = vld [vmem:[%s2727_s1 + $0x38] sm:$0xff]   ;;  %v2219_v1 = vmov 0   ;;  %v2003_v2 = vld [vmem:[%s2727_s1 + $0x30] sm:$0xff]   ;;  %v2004_v3 = vld [vmem:[%s2727_s1 + $0x28] sm:$0xff]   ;;  %s2731_s13 = smov (!%p161_p3, %s1803_s13), 1 }
   0xc   : > { %1075 = vmatprep.subr.bf16.mxu0 %v2219_v1  ;;  %1961 = vmatprep.subr.bf16.mxu1 %v2219_v1  ;;  %v2005_v4 = vld [vmem:[%s2727_s1 + $0x20] sm:$0xff]   ;;  %s1959_s22 = sshll.u32 %s2731_s13, 10  ;;  %v2006_v5 = vld [vmem:[%s2727_s1 + $0x18] sm:$0xff]   ;;  %v2007_v7 = vld [vmem:[%s2727_s1 + $0x10] sm:$0xff]  }
   0xd   : > { %1076 = vmatpush1.bf16.msra.mxu0 %v2002_v0  ;;  %1977 = vmatpush1.bf16.msra.mxu1 %v2002_v0  ;;  %s2279_s27 = scalar_lea.vmem %s2726_s0, %s1959_s22  ;;  %v2008_v9 = vld [vmem:[%s2727_s1 + $0x8] sm:$0xff]   ;;  %v2009_v10 = vld [vmem:[%s2727_s1] sm:$0xff]   ;;  %v2010_v11 = vld [vmem:[%s2727_s1 + $0x78] sm:$0xff]   ;;  %s2450_s4 = scalar_lea.vmem %s2729_s3, %s1959_s22 }
   0xe   : > { %1077 = vmatprep.subr.bf16.mxu0 %v2219_v1  ;;  %1962 = vmatprep.subr.bf16.mxu1 %v2219_v1  ;;  %v2020_v6 = vld [vmem:[%s2279_s27 + $0x4] ss:$8 sps:$4 sm:$0xff]   ;;  %v2011_v12 = vld [vmem:[%s2727_s1 + $0x70] sm:$0xff]   ;;  %v2014_v15 = vld [vmem:[%s2727_s1 + $0x58] sm:$0xff]  }
   0xf   : > { %v2023_v8 = vld [vmem:[%s2279_s27 + $0x204] ss:$8 sps:$4 sm:$0xff]   ;;  %1107 = vmatprep.mubr.bf16.mxu0 %v2020_v6  ;;  %v2015_v16 = vld [vmem:[%s2727_s1 + $0x50] sm:$0xff]   ;;  %v2018_v19 = vld [vmem:[%s2279_s27] ss:$8 sps:$4 sm:$0xff]  }
  0x10   : > { %1363 = vmatprep.mubr.bf16.mxu1 %v2023_v8  ;;  %v2012_v13 = vld [vmem:[%s2727_s1 + $0x68] sm:$0xff]   ;;  %v2013_v14 = vld [vmem:[%s2727_s1 + $0x60] sm:$0xff]   ;;  %v2024_v21 = vld [vmem:[%s2279_s27 + $0x14] ss:$8 sps:$4 sm:$0xff]  }
  0x11   : > { %1078 = vmatpush1.bf16.msra.mxu0 %v2003_v2  ;;  %1978 = vmatpush1.bf16.msra.mxu1 %v2003_v2  ;;  %v2016_v17 = vld [vmem:[%s2727_s1 + $0x48] sm:$0xff]   ;;  %v2017_v18 = vld [vmem:[%s2727_s1 + $0x40] sm:$0xff]   ;;  %v2026_v22 = vld [vmem:[%s2279_s27 + $0x214] ss:$8 sps:$4 sm:$0xff]  }
  0x12   : > { %1079 = vmatprep.subr.bf16.mxu0 %v2219_v1  ;;  %1963 = vmatprep.subr.bf16.mxu1 %v2219_v1  ;;  %v2021_v20 = vld [vmem:[%s2279_s27 + $0x200] ss:$8 sps:$4 sm:$0xff]   ;;  %v2028_v23 = vld [vmem:[%s2279_s27 + $0x10] ss:$8 sps:$4 sm:$0xff]   ;;  %v2030_v25 = vld [vmem:[%s2279_s27 + $0x24] ss:$8 sps:$4 sm:$0xff]  }
  0x13   : > { %v2029_v24 = vld [vmem:[%s2279_s27 + $0x210] ss:$8 sps:$4 sm:$0xff]   ;;  %v2032_v26 = vld [vmem:[%s2279_s27 + $0x224] ss:$8 sps:$4 sm:$0xff]   ;;  %v2034_v27 = vld [vmem:[%s2279_s27 + $0x20] ss:$8 sps:$4 sm:$0xff]  }
  0x14   : > { %v2035_v28 = vld [vmem:[%s2279_s27 + $0x220] ss:$8 sps:$4 sm:$0xff]   ;;  %v2036_v29 = vld [vmem:[%s2279_s27 + $0x34] ss:$8 sps:$4 sm:$0xff]   ;;  %v2040_v31 = vld [vmem:[%s2279_s27 + $0x30] ss:$8 sps:$4 sm:$0xff]  }
  0x15   : > { %1080 = vmatpush1.bf16.msra.mxu0 %v2004_v3  ;;  %1979 = vmatpush1.bf16.msra.mxu1 %v2004_v3  ;;  %v2038_v30 = vld [vmem:[%s2279_s27 + $0x234] ss:$8 sps:$4 sm:$0xff]   ;;  %v2041_v32 = vld [vmem:[%s2279_s27 + $0x230] ss:$8 sps:$4 sm:$0xff]   ;;  %v2042_v33 = vld [vmem:[%s2279_s27 + $0x44] ss:$8 sps:$4 sm:$0xff]  }
  0x16   : > { %1081 = vmatprep.subr.bf16.mxu0 %v2219_v1  ;;  %1964 = vmatprep.subr.bf16.mxu1 %v2219_v1  ;;  %v2044_v34 = vld [vmem:[%s2279_s27 + $0x244] ss:$8 sps:$4 sm:$0xff]   ;;  %v2046_v35 = vld [vmem:[%s2279_s27 + $0x40] ss:$8 sps:$4 sm:$0xff]   ;;  %v2048_v37 = vld [vmem:[%s2279_s27 + $0x54] ss:$8 sps:$4 sm:$0xff]  }
  0x17   : > { %v2047_v36 = vld [vmem:[%s2279_s27 + $0x240] ss:$8 sps:$4 sm:$0xff]   ;;  %v2050_v38 = vld [vmem:[%s2279_s27 + $0x254] ss:$8 sps:$4 sm:$0xff]   ;;  %v2052_v39 = vld [vmem:[%s2279_s27 + $0x50] ss:$8 sps:$4 sm:$0xff]  }
  0x18   : > { %v2053_v40 = vld [vmem:[%s2279_s27 + $0x250] ss:$8 sps:$4 sm:$0xff]   ;;  %v2054_v41 = vld [vmem:[%s2279_s27 + $0x64] ss:$8 sps:$4 sm:$0xff]   ;;  %v2058_v43 = vld [vmem:[%s2279_s27 + $0x60] ss:$8 sps:$4 sm:$0xff]  }
  0x19   : > { %1082 = vmatpush1.bf16.msra.mxu0 %v2005_v4  ;;  %1980 = vmatpush1.bf16.msra.mxu1 %v2005_v4  ;;  %v2056_v42 = vld [vmem:[%s2279_s27 + $0x264] ss:$8 sps:$4 sm:$0xff]   ;;  %v2059_v44 = vld [vmem:[%s2279_s27 + $0x260] ss:$8 sps:$4 sm:$0xff]   ;;  %v2060_v45 = vld [vmem:[%s2279_s27 + $0x74] ss:$8 sps:$4 sm:$0xff]  }
  0x1a   : > { %1083 = vmatprep.subr.bf16.mxu0 %v2219_v1  ;;  %1965 = vmatprep.subr.bf16.mxu1 %v2219_v1  ;;  %v2062_v46 = vld [vmem:[%s2279_s27 + $0x274] ss:$8 sps:$4 sm:$0xff]   ;;  %v2064_v47 = vld [vmem:[%s2279_s27 + $0x70] ss:$8 sps:$4 sm:$0xff]   ;;  %v2066_v49 = vld [vmem:[%s2279_s27 + $0x84] ss:$8 sps:$4 sm:$0xff]  }
  0x1b   : > { %v2065_v48 = vld [vmem:[%s2279_s27 + $0x270] ss:$8 sps:$4 sm:$0xff]   ;;  %v2068_v50 = vld [vmem:[%s2279_s27 + $0x284] ss:$8 sps:$4 sm:$0xff]   ;;  %v2070_v51 = vld [vmem:[%s2279_s27 + $0x80] ss:$8 sps:$4 sm:$0xff]  }
  0x1c   : > { %v2071_v52 = vld [vmem:[%s2279_s27 + $0x280] ss:$8 sps:$4 sm:$0xff]   ;;  %v2072_v53 = vld [vmem:[%s2279_s27 + $0x94] ss:$8 sps:$4 sm:$0xff]   ;;  %v2076_v55 = vld [vmem:[%s2279_s27 + $0x90] ss:$8 sps:$4 sm:$0xff]  }
  0x1d   : > { %1084 = vmatpush1.bf16.msra.mxu0 %v2006_v5  ;;  %1981 = vmatpush1.bf16.msra.mxu1 %v2006_v5  ;;  %v2074_v54 = vld [vmem:[%s2279_s27 + $0x294] ss:$8 sps:$4 sm:$0xff]   ;;  %v2077_v56 = vld [vmem:[%s2279_s27 + $0x290] ss:$8 sps:$4 sm:$0xff]   ;;  %v2078_v57 = vld [vmem:[%s2279_s27 + $0xa4] ss:$8 sps:$4 sm:$0xff]  }
  0x1e   : > { %1085 = vmatprep.subr.bf16.mxu0 %v2219_v1  ;;  %1966 = vmatprep.subr.bf16.mxu1 %v2219_v1  ;;  %v2080_v58 = vld [vmem:[%s2279_s27 + $0x2a4] ss:$8 sps:$4 sm:$0xff]   ;;  %v2082_v59 = vld [vmem:[%s2279_s27 + $0xa0] ss:$8 sps:$4 sm:$0xff]   ;;  %v2084_v61 = vld [vmem:[%s2279_s27 + $0xb4] ss:$8 sps:$4 sm:$0xff]  }
  0x1f   : > { %v2083_v60 = vld [vmem:[%s2279_s27 + $0x2a0] ss:$8 sps:$4 sm:$0xff]   ;;  %v2086_v62 = vld [vmem:[%s2279_s27 + $0x2b4] ss:$8 sps:$4 sm:$0xff]   ;;  %v2088_v63 = vld [vmem:[%s2279_s27 + $0xb0] ss:$8 sps:$4 sm:$0xff]  }
  0x20   : > { %v2089_v0 = vld [vmem:[%s2279_s27 + $0x2b0] ss:$8 sps:$4 sm:$0xff]   ;;  %v2092_v2 = vld [vmem:[%s2279_s27 + $0x2c4] ss:$8 sps:$4 sm:$0xff]   ;;  %v2094_v3 = vld [vmem:[%s2279_s27 + $0xc0] ss:$8 sps:$4 sm:$0xff]  }
  0x21   : > { %1086 = vmatpush1.bf16.msra.mxu0 %v2007_v7  ;;  %1982 = vmatpush1.bf16.msra.mxu1 %v2007_v7  ;;  %v2095_v4 = vld [vmem:[%s2279_s27 + $0x2c0] ss:$8 sps:$4 sm:$0xff]   ;;  %v2096_v5 = vld [vmem:[%s2279_s27 + $0xd4] ss:$8 sps:$4 sm:$0xff]   ;;  %v2100_v7 = vld [vmem:[%s2279_s27 + $0xd0] ss:$8 sps:$4 sm:$0xff]  }
  0x22   : > { %1087 = vmatprep.subr.bf16.mxu0 %v2219_v1  ;;  %1967 = vmatprep.subr.bf16.mxu1 %v2219_v1  ;;  %v2098_v6 = vld [vmem:[%s2279_s27 + $0x2d4] ss:$8 sps:$4 sm:$0xff]   ;;  %v2101_v8 = vld [vmem:[%s2279_s27 + $0x2d0] ss:$8 sps:$4 sm:$0xff]  }
  0x25   : > { %1088 = vmatpush1.bf16.msra.mxu0 %v2008_v9  ;;  %1983 = vmatpush1.bf16.msra.mxu1 %v2008_v9  ;;  %v2102_v9 = vld [vmem:[%s2279_s27 + $0xe4] ss:$8 sps:$4 sm:$0xff]  }
  0x26   : > { %1089 = vmatprep.subr.bf16.mxu0 %v2219_v1  ;;  %1968 = vmatprep.subr.bf16.mxu1 %v2219_v1 }
  0x29   : > { %1090 = vmatpush1.bf16.msra.mxu0 %v2009_v10  ;;  %1984 = vmatpush1.bf16.msra.mxu1 %v2009_v10  ;;  %v2104_v10 = vld [vmem:[%s2279_s27 + $0x2e4] ss:$8 sps:$4 sm:$0xff]  }
  0x2a   : > { %1091 = vmatprep.subr.bf16.mxu0 %v2219_v1  ;;  %1969 = vmatprep.subr.bf16.mxu1 %v2219_v1 }
  0x2d   : > { %1092 = vmatpush2.bf16.msra.mxu0 %v2010_v11  ;;  %1985 = vmatpush2.bf16.msra.mxu1 %v2010_v11  ;;  %v2106_v11 = vld [vmem:[%s2279_s27 + $0xe0] ss:$8 sps:$4 sm:$0xff]  }
  0x2e   : > { %1093 = vmatprep.subr.bf16.mxu0 %v2219_v1  ;;  %1970 = vmatprep.subr.bf16.mxu1 %v2219_v1 }
  0x31   : > { %1094 = vmatpush2.bf16.msra.mxu0 %v2011_v12  ;;  %1986 = vmatpush2.bf16.msra.mxu1 %v2011_v12  ;;  %v2107_v12 = vld [vmem:[%s2279_s27 + $0x2e0] ss:$8 sps:$4 sm:$0xff]  }
  0x32   : > { %1095 = vmatprep.subr.bf16.mxu0 %v2219_v1  ;;  %1971 = vmatprep.subr.bf16.mxu1 %v2219_v1 }
  0x35   : > { %1096 = vmatpush2.bf16.msra.mxu0 %v2012_v13  ;;  %1987 = vmatpush2.bf16.msra.mxu1 %v2012_v13  ;;  %v2108_v13 = vld [vmem:[%s2279_s27 + $0xf4] ss:$8 sps:$4 sm:$0xff]  }
  0x36   : > { %1097 = vmatprep.subr.bf16.mxu0 %v2219_v1  ;;  %1972 = vmatprep.subr.bf16.mxu1 %v2219_v1 }
  0x39   : > { %1098 = vmatpush2.bf16.msra.mxu0 %v2013_v14  ;;  %1988 = vmatpush2.bf16.msra.mxu1 %v2013_v14  ;;  %v2110_v14 = vld [vmem:[%s2279_s27 + $0x2f4] ss:$8 sps:$4 sm:$0xff]  }
  0x3a   : > { %1099 = vmatprep.subr.bf16.mxu0 %v2219_v1  ;;  %1973 = vmatprep.subr.bf16.mxu1 %v2219_v1 }
  0x3d   : > { %1100 = vmatpush2.bf16.msra.mxu0 %v2014_v15  ;;  %1989 = vmatpush2.bf16.msra.mxu1 %v2014_v15  ;;  %v2112_v15 = vld [vmem:[%s2279_s27 + $0xf0] ss:$8 sps:$4 sm:$0xff]  }
  0x3e   : > { %1101 = vmatprep.subr.bf16.mxu0 %v2219_v1  ;;  %1974 = vmatprep.subr.bf16.mxu1 %v2219_v1 }
  0x41   : > { %1102 = vmatpush2.bf16.msra.mxu0 %v2015_v16  ;;  %1990 = vmatpush2.bf16.msra.mxu1 %v2015_v16  ;;  %v2113_v16 = vld [vmem:[%s2279_s27 + $0x2f0] ss:$8 sps:$4 sm:$0xff]  }
  0x42   : > { %1103 = vmatprep.subr.bf16.mxu0 %v2219_v1  ;;  %1975 = vmatprep.subr.bf16.mxu1 %v2219_v1 }
  0x45   : > { %1104 = vmatpush2.bf16.msra.mxu0 %v2016_v17  ;;  %1991 = vmatpush2.bf16.msra.mxu1 %v2016_v17  ;;  %v2114_v17 = vld [vmem:[%s2279_s27 + $0x104] ss:$8 sps:$4 sm:$0xff]  }
  0x46   : > { %1105 = vmatprep.subr.bf16.mxu0 %v2219_v1  ;;  %1976 = vmatprep.subr.bf16.mxu1 %v2219_v1  ;;  %v2090_v1 = vld [vmem:[%s2279_s27 + $0xc4] ss:$8 sps:$4 sm:$0xff]  }
  0x49   : > { %1106 = vmatpush2.bf16.msra.mxu0 %v2017_v18  ;;  %1992 = vmatpush2.bf16.msra.mxu1 %v2017_v18  ;;  %v2116_v18 = vld [vmem:[%s2279_s27 + $0x304] ss:$8 sps:$4 sm:$0xff]  }
  0x4c   : > { %1108 = vmatmul.mubr.bf16.vlgmr.msra.gmra.mxu0 %v2018_v19  ;;  %1364 = vmatmul.mubr.bf16.vlgmr.msra.gmra.mxu1 %v2021_v20  ;;  %v2118_v19 = vld [vmem:[%s2279_s27 + $0x100] ss:$8 sps:$4 sm:$0xff]  }
  0x4d   : > { %1115 = vmatprep.mubr.bf16.mxu0 %v2024_v21  ;;  %1371 = vmatprep.mubr.bf16.mxu1 %v2026_v22  ;;  %v2119_v20 = vld [vmem:[%s2279_s27 + $0x300] ss:$8 sps:$4 sm:$0xff]   ;;  %v2120_v21 = vld [vmem:[%s2279_s27 + $0x114] ss:$8 sps:$4 sm:$0xff]  }
  0x4e   : > { %v2122_v22 = vld [vmem:[%s2279_s27 + $0x314] ss:$8 sps:$4 sm:$0xff]  }
  0x54   : > { %1116 = vmatmul.mubr.bf16.gmra.mxu0 %v2028_v23  ;;  %1372 = vmatmul.mubr.bf16.gmra.mxu1 %v2029_v24  ;;  %v2124_v23 = vld [vmem:[%s2279_s27 + $0x110] ss:$8 sps:$4 sm:$0xff]  }
  0x55   : > { %1123 = vmatprep.mubr.bf16.mxu0 %v2030_v25  ;;  %1379 = vmatprep.mubr.bf16.mxu1 %v2032_v26  ;;  %v2125_v24 = vld [vmem:[%s2279_s27 + $0x310] ss:$8 sps:$4 sm:$0xff]   ;;  %v2126_v25 = vld [vmem:[%s2279_s27 + $0x124] ss:$8 sps:$4 sm:$0xff]  }
  0x56   : > { %v2128_v26 = vld [vmem:[%s2279_s27 + $0x324] ss:$8 sps:$4 sm:$0xff]  }
  0x5c   : > { %1124 = vmatmul.mubr.bf16.gmra.mxu0 %v2034_v27  ;;  %1380 = vmatmul.mubr.bf16.gmra.mxu1 %v2035_v28  ;;  %v2130_v27 = vld [vmem:[%s2279_s27 + $0x120] ss:$8 sps:$4 sm:$0xff]  }
  0x5d   : > { %1131 = vmatprep.mubr.bf16.mxu0 %v2036_v29  ;;  %1387 = vmatprep.mubr.bf16.mxu1 %v2038_v30  ;;  %v2131_v28 = vld [vmem:[%s2279_s27 + $0x320] ss:$8 sps:$4 sm:$0xff]   ;;  %v2132_v29 = vld [vmem:[%s2279_s27 + $0x134] ss:$8 sps:$4 sm:$0xff]  }
  0x5e   : > { %v2134_v30 = vld [vmem:[%s2279_s27 + $0x334] ss:$8 sps:$4 sm:$0xff]  }
  0x64   : > { %1132 = vmatmul.mubr.bf16.gmra.mxu0 %v2040_v31  ;;  %1388 = vmatmul.mubr.bf16.gmra.mxu1 %v2041_v32  ;;  %v2136_v31 = vld [vmem:[%s2279_s27 + $0x130] ss:$8 sps:$4 sm:$0xff]  }
  0x65   : > { %1139 = vmatprep.mubr.bf16.mxu0 %v2042_v33  ;;  %1395 = vmatprep.mubr.bf16.mxu1 %v2044_v34  ;;  %v2137_v32 = vld [vmem:[%s2279_s27 + $0x330] ss:$8 sps:$4 sm:$0xff]   ;;  %v2138_v33 = vld [vmem:[%s2279_s27 + $0x144] ss:$8 sps:$4 sm:$0xff]  }
  0x66   : > { %v2140_v34 = vld [vmem:[%s2279_s27 + $0x344] ss:$8 sps:$4 sm:$0xff]  }
  0x6c   : > { %1140 = vmatmul.mubr.bf16.gmra.mxu0 %v2046_v35  ;;  %1396 = vmatmul.mubr.bf16.gmra.mxu1 %v2047_v36  ;;  %v2142_v35 = vld [vmem:[%s2279_s27 + $0x140] ss:$8 sps:$4 sm:$0xff]  }
  0x6d   : > { %1147 = vmatprep.mubr.bf16.mxu0 %v2048_v37  ;;  %1403 = vmatprep.mubr.bf16.mxu1 %v2050_v38  ;;  %v2143_v36 = vld [vmem:[%s2279_s27 + $0x340] ss:$8 sps:$4 sm:$0xff]   ;;  %v2144_v37 = vld [vmem:[%s2279_s27 + $0x154] ss:$8 sps:$4 sm:$0xff]  }
  0x6e   : > { %v2146_v38 = vld [vmem:[%s2279_s27 + $0x354] ss:$8 sps:$4 sm:$0xff]  }
  0x74   : > { %1148 = vmatmul.mubr.bf16.gmra.mxu0 %v2052_v39  ;;  %1404 = vmatmul.mubr.bf16.gmra.mxu1 %v2053_v40  ;;  %v2148_v39 = vld [vmem:[%s2279_s27 + $0x150] ss:$8 sps:$4 sm:$0xff]  }
  0x75   : > { %1155 = vmatprep.mubr.bf16.mxu0 %v2054_v41  ;;  %1411 = vmatprep.mubr.bf16.mxu1 %v2056_v42  ;;  %v2149_v40 = vld [vmem:[%s2279_s27 + $0x350] ss:$8 sps:$4 sm:$0xff]   ;;  %v2150_v41 = vld [vmem:[%s2279_s27 + $0x164] ss:$8 sps:$4 sm:$0xff]  }
  0x76   : > { %v2152_v42 = vld [vmem:[%s2279_s27 + $0x364] ss:$8 sps:$4 sm:$0xff]  }
  0x7c   : > { %1156 = vmatmul.mubr.bf16.gmra.mxu0 %v2058_v43  ;;  %1412 = vmatmul.mubr.bf16.gmra.mxu1 %v2059_v44  ;;  %v2154_v43 = vld [vmem:[%s2279_s27 + $0x160] ss:$8 sps:$4 sm:$0xff]  }
  0x7d   : > { %1163 = vmatprep.mubr.bf16.mxu0 %v2060_v45  ;;  %1419 = vmatprep.mubr.bf16.mxu1 %v2062_v46  ;;  %v2155_v44 = vld [vmem:[%s2279_s27 + $0x360] ss:$8 sps:$4 sm:$0xff]   ;;  %v2156_v45 = vld [vmem:[%s2279_s27 + $0x174] ss:$8 sps:$4 sm:$0xff]  }
  0x7e   : > { %v2158_v46 = vld [vmem:[%s2279_s27 + $0x374] ss:$8 sps:$4 sm:$0xff]  }
  0x84   : > { %1164 = vmatmul.mubr.bf16.gmra.mxu0 %v2064_v47  ;;  %1420 = vmatmul.mubr.bf16.gmra.mxu1 %v2065_v48  ;;  %v2160_v47 = vld [vmem:[%s2279_s27 + $0x170] ss:$8 sps:$4 sm:$0xff]  }
  0x85   : > { %1171 = vmatprep.mubr.bf16.mxu0 %v2066_v49  ;;  %1427 = vmatprep.mubr.bf16.mxu1 %v2068_v50  ;;  %v2161_v48 = vld [vmem:[%s2279_s27 + $0x370] ss:$8 sps:$4 sm:$0xff]   ;;  %v2162_v49 = vld [vmem:[%s2279_s27 + $0x184] ss:$8 sps:$4 sm:$0xff]  }
  0x86   : > { %v2164_v50 = vld [vmem:[%s2279_s27 + $0x384] ss:$8 sps:$4 sm:$0xff]  }
  0x8c   : > { %1172 = vmatmul.mubr.bf16.gmra.mxu0 %v2070_v51  ;;  %1428 = vmatmul.mubr.bf16.gmra.mxu1 %v2071_v52  ;;  %v2166_v51 = vld [vmem:[%s2279_s27 + $0x180] ss:$8 sps:$4 sm:$0xff]  }
  0x8d   : > { %1179 = vmatprep.mubr.bf16.mxu0 %v2072_v53  ;;  %1435 = vmatprep.mubr.bf16.mxu1 %v2074_v54  ;;  %v2167_v52 = vld [vmem:[%s2279_s27 + $0x380] ss:$8 sps:$4 sm:$0xff]   ;;  %v2168_v53 = vld [vmem:[%s2279_s27 + $0x194] ss:$8 sps:$4 sm:$0xff]  }
  0x8e   : > { %v2170_v54 = vld [vmem:[%s2279_s27 + $0x394] ss:$8 sps:$4 sm:$0xff]  }
  0x94   : > { %1180 = vmatmul.mubr.bf16.gmra.mxu0 %v2076_v55  ;;  %1436 = vmatmul.mubr.bf16.gmra.mxu1 %v2077_v56  ;;  %v2443_v55 = vld [vmem:[%s2728_s2] ss:$0 sm:$0xff] }
  0x95   : > { %1187 = vmatprep.mubr.bf16.mxu0 %v2078_v57  ;;  %1443 = vmatprep.mubr.bf16.mxu1 %v2080_v58 }
  0x9c   : > { %1188 = vmatmul.mubr.bf16.gmra.mxu0 %v2082_v59  ;;  %1444 = vmatmul.mubr.bf16.gmra.mxu1 %v2083_v60 }
  0x9d   : > { %1195 = vmatprep.mubr.bf16.mxu0 %v2084_v61  ;;  %1451 = vmatprep.mubr.bf16.mxu1 %v2086_v62 }
  0xa4   : > { %1196 = vmatmul.mubr.bf16.gmra.mxu0 %v2088_v63  ;;  %1452 = vmatmul.mubr.bf16.gmra.mxu1 %v2089_v0  ;;  %v2172_v0 = vld [vmem:[%s2279_s27 + $0x190] ss:$8 sps:$4 sm:$0xff]  }
  0xa5   : > { %1203 = vmatprep.mubr.bf16.mxu0 %v2090_v1  ;;  %1459 = vmatprep.mubr.bf16.mxu1 %v2092_v2  ;;  %v2173_v1 = vld [vmem:[%s2279_s27 + $0x390] ss:$8 sps:$4 sm:$0xff]  }
  0xac   : > { %1204 = vmatmul.mubr.bf16.gmra.mxu0 %v2094_v3  ;;  %1460 = vmatmul.mubr.bf16.gmra.mxu1 %v2095_v4  ;;  %v2174_v4 = vld [vmem:[%s2279_s27 + $0x1a4] ss:$8 sps:$4 sm:$0xff]  }
  0xad   : > { %1211 = vmatprep.mubr.bf16.mxu0 %v2096_v5  ;;  %1467 = vmatprep.mubr.bf16.mxu1 %v2098_v6  ;;  %v2176_v5 = vld [vmem:[%s2279_s27 + $0x3a4] ss:$8 sps:$4 sm:$0xff]  }
  0xb4   : > { %1212 = vmatmul.mubr.bf16.gmra.mxu0 %v2100_v7  ;;  %1468 = vmatmul.mubr.bf16.gmra.mxu1 %v2101_v8 }
  0xb5   : > { %1219 = vmatprep.mubr.bf16.mxu0 %v2102_v9  ;;  %1475 = vmatprep.mubr.bf16.mxu1 %v2104_v10 }
  0xbc   : > { %1220 = vmatmul.mubr.bf16.gmra.mxu0 %v2106_v11  ;;  %1476 = vmatmul.mubr.bf16.gmra.mxu1 %v2107_v12 }
  0xbd   : > { %1227 = vmatprep.mubr.bf16.mxu0 %v2108_v13  ;;  %1483 = vmatprep.mubr.bf16.mxu1 %v2110_v14 }
  0xc4   : > { %1228 = vmatmul.mubr.bf16.gmra.mxu0 %v2112_v15  ;;  %1484 = vmatmul.mubr.bf16.gmra.mxu1 %v2113_v16  ;;  %v2178_v16 = vld [vmem:[%s2279_s27 + $0x1a0] ss:$8 sps:$4 sm:$0xff]  }
  0xc5   : > { %1235 = vmatprep.mubr.bf16.mxu0 %v2114_v17  ;;  %1491 = vmatprep.mubr.bf16.mxu1 %v2116_v18  ;;  %v2179_v17 = vld [vmem:[%s2279_s27 + $0x3a0] ss:$8 sps:$4 sm:$0xff]  }
  0xcc   : > { %1236 = vmatmul.mubr.bf16.gmra.mxu0 %v2118_v19  ;;  %1492 = vmatmul.mubr.bf16.gmra.mxu1 %v2119_v20  ;;  %v2180_v20 = vld [vmem:[%s2279_s27 + $0x1b4] ss:$8 sps:$4 sm:$0xff]  }
  0xcd   : > { %1243 = vmatprep.mubr.bf16.mxu0 %v2120_v21  ;;  %1499 = vmatprep.mubr.bf16.mxu1 %v2122_v22  ;;  %v2182_v21 = vld [vmem:[%s2279_s27 + $0x3b4] ss:$8 sps:$4 sm:$0xff]  }
  0xd4   : > { %1244 = vmatmul.mubr.bf16.gmra.mxu0 %v2124_v23  ;;  %1500 = vmatmul.mubr.bf16.gmra.mxu1 %v2125_v24 }
  0xd5   : > { %1251 = vmatprep.mubr.bf16.mxu0 %v2126_v25  ;;  %1507 = vmatprep.mubr.bf16.mxu1 %v2128_v26 }
  0xdc   : > { %1252 = vmatmul.mubr.bf16.gmra.mxu0 %v2130_v27  ;;  %1508 = vmatmul.mubr.bf16.gmra.mxu1 %v2131_v28 }
  0xdd   : > { %1259 = vmatprep.mubr.bf16.mxu0 %v2132_v29  ;;  %1515 = vmatprep.mubr.bf16.mxu1 %v2134_v30 }
  0xe4   : > { %1260 = vmatmul.mubr.bf16.gmra.mxu0 %v2136_v31  ;;  %1516 = vmatmul.mubr.bf16.gmra.mxu1 %v2137_v32  ;;  %v2184_v32 = vld [vmem:[%s2279_s27 + $0x1b0] ss:$8 sps:$4 sm:$0xff]  }
  0xe5   : > { %1267 = vmatprep.mubr.bf16.mxu0 %v2138_v33  ;;  %1523 = vmatprep.mubr.bf16.mxu1 %v2140_v34  ;;  %v2185_v33 = vld [vmem:[%s2279_s27 + $0x3b0] ss:$8 sps:$4 sm:$0xff]  }
  0xec   : > { %1268 = vmatmul.mubr.bf16.gmra.mxu0 %v2142_v35  ;;  %1524 = vmatmul.mubr.bf16.gmra.mxu1 %v2143_v36  ;;  %v2188_v36 = vld [vmem:[%s2279_s27 + $0x1c4] ss:$8 sps:$4 sm:$0xff]  }
  0xed   : > { %1275 = vmatprep.mubr.bf16.mxu0 %v2144_v37  ;;  %1531 = vmatprep.mubr.bf16.mxu1 %v2146_v38  ;;  %v2191_v37 = vld [vmem:[%s2279_s27 + $0x3c4] ss:$8 sps:$4 sm:$0xff]  }
  0xf4   : > { %1276 = vmatmul.mubr.bf16.gmra.mxu0 %v2148_v39  ;;  %1532 = vmatmul.mubr.bf16.gmra.mxu1 %v2149_v40 }
  0xf5   : > { %1283 = vmatprep.mubr.bf16.mxu0 %v2150_v41  ;;  %1539 = vmatprep.mubr.bf16.mxu1 %v2152_v42 }
  0xfc   : > { %1284 = vmatmul.mubr.bf16.gmra.mxu0 %v2154_v43  ;;  %1540 = vmatmul.mubr.bf16.gmra.mxu1 %v2155_v44 }
  0xfd   : > { %1291 = vmatprep.mubr.bf16.mxu0 %v2156_v45  ;;  %1547 = vmatprep.mubr.bf16.mxu1 %v2158_v46 }
 0x104   : > { %1292 = vmatmul.mubr.bf16.gmra.mxu0 %v2160_v47  ;;  %1548 = vmatmul.mubr.bf16.gmra.mxu1 %v2161_v48  ;;  %v2186_v48 = vld [vmem:[%s2279_s27 + $0x1c0] ss:$8 sps:$4 sm:$0xff]  }
 0x105   : > { %1299 = vmatprep.mubr.bf16.mxu0 %v2162_v49  ;;  %1555 = vmatprep.mubr.bf16.mxu1 %v2164_v50  ;;  %v2189_v49 = vld [vmem:[%s2279_s27 + $0x3c0] ss:$8 sps:$4 sm:$0xff]  }
 0x10c   : > { %v1109_v56 = vpop.f32.mrf.mxu0  ;;  %1300 = vmatmul.mubr.bf16.gmra.mxu0 %v2166_v51  ;;  %v1365_v57 = vpop.f32.mrf.mxu1  ;;  %1556 = vmatmul.mubr.bf16.gmra.mxu1 %v2167_v52  ;;  %v2194_v52 = vld [vmem:[%s2279_s27 + $0x1d4] ss:$8 sps:$4 sm:$0xff]  }
 0x10d   : > { %v1110_v58 = vadd.f32 %v2443_v55, %v1109_v56  ;;  %v1366_v59 = vadd.f32 %v2443_v55, %v1365_v57  ;;  %1307 = vmatprep.mubr.bf16.mxu0 %v2168_v53  ;;  %1563 = vmatprep.mubr.bf16.mxu1 %v2170_v54  ;;  %v2197_v53 = vld [vmem:[%s2279_s27 + $0x3d4] ss:$8 sps:$4 sm:$0xff]  }
 0x10e   : > { %v1111_v60 = vpop.f32.mrf.mxu0  ;;  %v1367_v61 = vpop.f32.mrf.mxu1 }
 0x10f   : > { %1620 = vst [vmem:[%s2450_s4] sm:$0xff] %v1110_v58  ;;  %1684 = vst [vmem:[%s2450_s4 + $0x200] sm:$0xff] %v1366_v59 }
 0x110   : > { %v1112_v62 = vpop.f32.mrf.mxu0  ;;  %v1368_v63 = vpop.f32.mrf.mxu1 }
 0x111   : > { %v1113_v2 = vadd.f32 %v2443_v55, %v1112_v62  ;;  %v1369_v3 = vadd.f32 %v2443_v55, %v1368_v63 }
 0x112   : > { %v1114_v6 = vpop.f32.mrf.mxu0  ;;  %v1370_v7 = vpop.f32.mrf.mxu1 }
 0x113   : > { %1621 = vst [vmem:[%s2450_s4 + $0x8] sm:$0xff] %v1113_v2  ;;  %1685 = vst [vmem:[%s2450_s4 + $0x208] sm:$0xff] %v1369_v3  ;;  %v2195_v2 = vld [vmem:[%s2279_s27 + $0x3d0] ss:$8 sps:$4 sm:$0xff]   ;;  %v2203_v6 = vld [vmem:[%s2279_s27 + $0x3e4] ss:$8 sps:$4 sm:$0xff]  }
 0x114   : > { %v1117_v8 = vpop.f32.mrf.mxu0  ;;  %1308 = vmatmul.mubr.bf16.gmra.mxu0 %v2172_v0  ;;  %v1373_v9 = vpop.f32.mrf.mxu1  ;;  %1564 = vmatmul.mubr.bf16.gmra.mxu1 %v2173_v1  ;;  %v2192_v1 = vld [vmem:[%s2279_s27 + $0x1d0] ss:$8 sps:$4 sm:$0xff]  }
 0x115   : > { %v1118_v10 = vadd.f32 %v2443_v55, %v1117_v8  ;;  %v1374_v11 = vadd.f32 %v2443_v55, %v1373_v9  ;;  %1315 = vmatprep.mubr.bf16.mxu0 %v2174_v4  ;;  %1571 = vmatprep.mubr.bf16.mxu1 %v2176_v5  ;;  %v2200_v5 = vld [vmem:[%s2279_s27 + $0x1e4] ss:$8 sps:$4 sm:$0xff]  }
 0x116   : > { %v1119_v12 = vpop.f32.mrf.mxu0  ;;  %v1375_v13 = vpop.f32.mrf.mxu1 }
 0x117   : > { %1622 = vst [vmem:[%s2450_s4 + $0x10] sm:$0xff] %v1118_v10  ;;  %1686 = vst [vmem:[%s2450_s4 + $0x210] sm:$0xff] %v1374_v11 }
 0x118   : > { %v1120_v14 = vpop.f32.mrf.mxu0  ;;  %v1376_v15 = vpop.f32.mrf.mxu1 }
 0x119   : > { %v1121_v18 = vadd.f32 %v2443_v55, %v1120_v14  ;;  %v1377_v19 = vadd.f32 %v2443_v55, %v1376_v15 }
 0x11a   : > { %v1122_v22 = vpop.f32.mrf.mxu0  ;;  %v1378_v23 = vpop.f32.mrf.mxu1 }
 0x11b   : > { %1623 = vst [vmem:[%s2450_s4 + $0x18] sm:$0xff] %v1121_v18  ;;  %1687 = vst [vmem:[%s2450_s4 + $0x218] sm:$0xff] %v1377_v19  ;;  %v2201_v18 = vld [vmem:[%s2279_s27 + $0x3e0] ss:$8 sps:$4 sm:$0xff]   ;;  %v2209_v22 = vld [vmem:[%s2279_s27 + $0x3f4] ss:$8 sps:$4 sm:$0xff]  }
 0x11c   : > { %v1125_v24 = vpop.f32.mrf.mxu0  ;;  %1316 = vmatmul.mubr.bf16.gmra.mxu0 %v2178_v16  ;;  %v1381_v25 = vpop.f32.mrf.mxu1  ;;  %1572 = vmatmul.mubr.bf16.gmra.mxu1 %v2179_v17  ;;  %v2198_v17 = vld [vmem:[%s2279_s27 + $0x1e0] ss:$8 sps:$4 sm:$0xff]  }
 0x11d   : > { %v1126_v26 = vadd.f32 %v2443_v55, %v1125_v24  ;;  %v1382_v27 = vadd.f32 %v2443_v55, %v1381_v25  ;;  %1323 = vmatprep.mubr.bf16.mxu0 %v2180_v20  ;;  %1579 = vmatprep.mubr.bf16.mxu1 %v2182_v21  ;;  %v2206_v21 = vld [vmem:[%s2279_s27 + $0x1f4] ss:$8 sps:$4 sm:$0xff]  }
 0x11e   : > { %v1127_v28 = vpop.f32.mrf.mxu0  ;;  %v1383_v29 = vpop.f32.mrf.mxu1 }
 0x11f   : > { %1624 = vst [vmem:[%s2450_s4 + $0x20] sm:$0xff] %v1126_v26  ;;  %1688 = vst [vmem:[%s2450_s4 + $0x220] sm:$0xff] %v1382_v27 }
 0x120   : > { %v1128_v30 = vpop.f32.mrf.mxu0  ;;  %v1384_v31 = vpop.f32.mrf.mxu1 }
 0x121   : > { %v1129_v34 = vadd.f32 %v2443_v55, %v1128_v30  ;;  %v1385_v35 = vadd.f32 %v2443_v55, %v1384_v31 }
 0x122   : > { %v1130_v38 = vpop.f32.mrf.mxu0  ;;  %v1386_v39 = vpop.f32.mrf.mxu1 }
 0x123   : > { %1625 = vst [vmem:[%s2450_s4 + $0x28] sm:$0xff] %v1129_v34  ;;  %1689 = vst [vmem:[%s2450_s4 + $0x228] sm:$0xff] %v1385_v35  ;;  %v2207_v34 = vld [vmem:[%s2279_s27 + $0x3f0] ss:$8 sps:$4 sm:$0xff]  }
 0x124   : > { %v1133_v40 = vpop.f32.mrf.mxu0  ;;  %1324 = vmatmul.mubr.bf16.gmra.mxu0 %v2184_v32  ;;  %v1389_v41 = vpop.f32.mrf.mxu1  ;;  %1580 = vmatmul.mubr.bf16.gmra.mxu1 %v2185_v33  ;;  %v2204_v33 = vld [vmem:[%s2279_s27 + $0x1f0] ss:$8 sps:$4 sm:$0xff]  }
 0x125   : > { %v1134_v42 = vadd.f32 %v2443_v55, %v1133_v40  ;;  %v1390_v43 = vadd.f32 %v2443_v55, %v1389_v41  ;;  %1331 = vmatprep.mubr.bf16.mxu0 %v2188_v36  ;;  %1587 = vmatprep.mubr.bf16.mxu1 %v2191_v37 }
 0x126   : > { %v1135_v44 = vpop.f32.mrf.mxu0  ;;  %v1391_v45 = vpop.f32.mrf.mxu1 }
 0x127   : > { %1626 = vst [vmem:[%s2450_s4 + $0x30] sm:$0xff] %v1134_v42  ;;  %1690 = vst [vmem:[%s2450_s4 + $0x230] sm:$0xff] %v1390_v43 }
 0x128   : > { %v1136_v46 = vpop.f32.mrf.mxu0  ;;  %v1392_v47 = vpop.f32.mrf.mxu1 }
 0x129   : > { %v1137_v50 = vadd.f32 %v2443_v55, %v1136_v46  ;;  %v1393_v51 = vadd.f32 %v2443_v55, %v1392_v47 }
 0x12a   : > { %v1138_v54 = vpop.f32.mrf.mxu0  ;;  %v1394_v56 = vpop.f32.mrf.mxu1 }
 0x12b   : > { %1627 = vst [vmem:[%s2450_s4 + $0x38] sm:$0xff] %v1137_v50  ;;  %1691 = vst [vmem:[%s2450_s4 + $0x238] sm:$0xff] %v1393_v51 }
 0x12c   : > { %v1141_v57 = vpop.f32.mrf.mxu0  ;;  %1332 = vmatmul.mubr.bf16.gmra.mxu0 %v2186_v48  ;;  %v1397_v58 = vpop.f32.mrf.mxu1  ;;  %1588 = vmatmul.mubr.bf16.gmra.mxu1 %v2189_v49 }
 0x12d   : > { %v1142_v59 = vadd.f32 %v2443_v55, %v1141_v57  ;;  %v1398_v60 = vadd.f32 %v2443_v55, %v1397_v58  ;;  %1339 = vmatprep.mubr.bf16.mxu0 %v2194_v52  ;;  %1595 = vmatprep.mubr.bf16.mxu1 %v2197_v53 }
 0x12e   : > { %v1143_v61 = vpop.f32.mrf.mxu0  ;;  %v1399_v62 = vpop.f32.mrf.mxu1 }
 0x12f   : > { %1628 = vst [vmem:[%s2450_s4 + $0x40] sm:$0xff] %v1142_v59  ;;  %1692 = vst [vmem:[%s2450_s4 + $0x240] sm:$0xff] %v1398_v60 }
 0x130   : > { %v1144_v63 = vpop.f32.mrf.mxu0  ;;  %v1400_v0 = vpop.f32.mrf.mxu1 }
 0x131   : > { %v1145_v3 = vadd.f32 %v2443_v55, %v1144_v63  ;;  %v1401_v4 = vadd.f32 %v2443_v55, %v1400_v0 }
 0x132   : > { %v1146_v7 = vpop.f32.mrf.mxu0  ;;  %v1402_v8 = vpop.f32.mrf.mxu1 }
 0x133   : > { %1629 = vst [vmem:[%s2450_s4 + $0x48] sm:$0xff] %v1145_v3  ;;  %1693 = vst [vmem:[%s2450_s4 + $0x248] sm:$0xff] %v1401_v4 }
 0x134   : > { %v1149_v9 = vpop.f32.mrf.mxu0  ;;  %1340 = vmatmul.mubr.bf16.gmra.mxu0 %v2192_v1  ;;  %v1405_v10 = vpop.f32.mrf.mxu1  ;;  %1596 = vmatmul.mubr.bf16.gmra.mxu1 %v2195_v2 }
 0x135   : > { %v1150_v11 = vadd.f32 %v2443_v55, %v1149_v9  ;;  %v1406_v12 = vadd.f32 %v2443_v55, %v1405_v10  ;;  %1347 = vmatprep.mubr.bf16.mxu0 %v2200_v5  ;;  %1603 = vmatprep.mubr.bf16.mxu1 %v2203_v6 }
 0x136   : > { %v1151_v13 = vpop.f32.mrf.mxu0  ;;  %v1407_v14 = vpop.f32.mrf.mxu1 }
 0x137   : > { %1630 = vst [vmem:[%s2450_s4 + $0x50] sm:$0xff] %v1150_v11  ;;  %1694 = vst [vmem:[%s2450_s4 + $0x250] sm:$0xff] %v1406_v12 }
 0x138   : > { %v1152_v15 = vpop.f32.mrf.mxu0  ;;  %v1408_v16 = vpop.f32.mrf.mxu1 }
 0x139   : > { %v1153_v19 = vadd.f32 %v2443_v55, %v1152_v15  ;;  %v1409_v20 = vadd.f32 %v2443_v55, %v1408_v16 }
 0x13a   : > { %v1154_v23 = vpop.f32.mrf.mxu0  ;;  %v1410_v24 = vpop.f32.mrf.mxu1 }
 0x13b   : > { %1631 = vst [vmem:[%s2450_s4 + $0x58] sm:$0xff] %v1153_v19  ;;  %1695 = vst [vmem:[%s2450_s4 + $0x258] sm:$0xff] %v1409_v20 }
 0x13c   : > { %v1157_v25 = vpop.f32.mrf.mxu0  ;;  %1348 = vmatmul.mubr.bf16.gmra.mxu0 %v2198_v17  ;;  %v1413_v26 = vpop.f32.mrf.mxu1  ;;  %1604 = vmatmul.mubr.bf16.gmra.mxu1 %v2201_v18 }
 0x13d   : > { %v1158_v27 = vadd.f32 %v2443_v55, %v1157_v25  ;;  %v1414_v28 = vadd.f32 %v2443_v55, %v1413_v26  ;;  %1355 = vmatprep.mubr.bf16.mxu0 %v2206_v21  ;;  %1611 = vmatprep.mubr.bf16.mxu1 %v2209_v22 }
 0x13e   : > { %v1159_v29 = vpop.f32.mrf.mxu0  ;;  %v1415_v30 = vpop.f32.mrf.mxu1 }
 0x13f   : > { %1632 = vst [vmem:[%s2450_s4 + $0x60] sm:$0xff] %v1158_v27  ;;  %1696 = vst [vmem:[%s2450_s4 + $0x260] sm:$0xff] %v1414_v28 }
 0x140   : > { %v1160_v31 = vpop.f32.mrf.mxu0  ;;  %v1416_v32 = vpop.f32.mrf.mxu1 }
 0x141   : > { %v1161_v35 = vadd.f32 %v2443_v55, %v1160_v31  ;;  %v1417_v36 = vadd.f32 %v2443_v55, %v1416_v32 }
 0x142   : > { %v1162_v37 = vpop.f32.mrf.mxu0  ;;  %v1418_v38 = vpop.f32.mrf.mxu1 }
 0x143   : > { %1633 = vst [vmem:[%s2450_s4 + $0x68] sm:$0xff] %v1161_v35  ;;  %1697 = vst [vmem:[%s2450_s4 + $0x268] sm:$0xff] %v1417_v36 }
 0x144   : > { %v1165_v39 = vpop.f32.mrf.mxu0  ;;  %1356 = vmatmul.mubr.bf16.gmra.mxu0 %v2204_v33  ;;  %v1421_v40 = vpop.f32.mrf.mxu1  ;;  %1612 = vmatmul.mubr.bf16.gmra.mxu1 %v2207_v34 }
 0x145   : > { %v1166_v41 = vadd.f32 %v2443_v55, %v1165_v39  ;;  %v1422_v42 = vadd.f32 %v2443_v55, %v1421_v40 }
 0x146   : > { %v1167_v43 = vpop.f32.mrf.mxu0  ;;  %v1423_v44 = vpop.f32.mrf.mxu1 }
 0x147   : > { %1634 = vst [vmem:[%s2450_s4 + $0x70] sm:$0xff] %v1166_v41  ;;  %1698 = vst [vmem:[%s2450_s4 + $0x270] sm:$0xff] %v1422_v42 }
 0x148   : > { %v1168_v45 = vpop.f32.mrf.mxu0  ;;  %v1424_v46 = vpop.f32.mrf.mxu1 }
 0x149   : > { %v1169_v47 = vadd.f32 %v2443_v55, %v1168_v45  ;;  %v1425_v48 = vadd.f32 %v2443_v55, %v1424_v46 }
 0x14a   : > { %v1170_v49 = vpop.f32.mrf.mxu0  ;;  %v1426_v50 = vpop.f32.mrf.mxu1 }
 0x14b   : > { %1635 = vst [vmem:[%s2450_s4 + $0x78] sm:$0xff] %v1169_v47  ;;  %1699 = vst [vmem:[%s2450_s4 + $0x278] sm:$0xff] %v1425_v48 }
 0x14c   : > { %v1173_v51 = vpop.f32.mrf.mxu0  ;;  %v1429_v52 = vpop.f32.mrf.mxu1 }
 0x14d   : > { %v1174_v53 = vadd.f32 %v2443_v55, %v1173_v51  ;;  %v1430_v54 = vadd.f32 %v2443_v55, %v1429_v52 }
 0x14e   : > { %v1175_v56 = vpop.f32.mrf.mxu0  ;;  %v1431_v57 = vpop.f32.mrf.mxu1 }
 0x14f   : > { %1636 = vst [vmem:[%s2450_s4 + $0x80] sm:$0xff] %v1174_v53  ;;  %1700 = vst [vmem:[%s2450_s4 + $0x280] sm:$0xff] %v1430_v54 }
 0x150   : > { %v1176_v58 = vpop.f32.mrf.mxu0  ;;  %v1432_v59 = vpop.f32.mrf.mxu1 }
 0x151   : > { %v1177_v60 = vadd.f32 %v2443_v55, %v1176_v58  ;;  %v1433_v61 = vadd.f32 %v2443_v55, %v1432_v59 }
 0x152   : > { %v1178_v62 = vpop.f32.mrf.mxu0  ;;  %v1434_v63 = vpop.f32.mrf.mxu1 }
 0x153   : > { %1637 = vst [vmem:[%s2450_s4 + $0x88] sm:$0xff] %v1177_v60  ;;  %1701 = vst [vmem:[%s2450_s4 + $0x288] sm:$0xff] %v1433_v61 }
 0x154   : > { %v1181_v0 = vpop.f32.mrf.mxu0  ;;  %v1437_v1 = vpop.f32.mrf.mxu1 }
 0x155   : > { %v1182_v2 = vadd.f32 %v2443_v55, %v1181_v0  ;;  %v1438_v3 = vadd.f32 %v2443_v55, %v1437_v1 }
 0x156   : > { %v1183_v4 = vpop.f32.mrf.mxu0  ;;  %v1439_v5 = vpop.f32.mrf.mxu1 }
 0x157   : > { %1638 = vst [vmem:[%s2450_s4 + $0x90] sm:$0xff] %v1182_v2  ;;  %1702 = vst [vmem:[%s2450_s4 + $0x290] sm:$0xff] %v1438_v3 }
 0x158   : > { %v1184_v6 = vpop.f32.mrf.mxu0  ;;  %v1440_v7 = vpop.f32.mrf.mxu1 }
 0x159   : > { %v1185_v8 = vadd.f32 %v2443_v55, %v1184_v6  ;;  %v1441_v9 = vadd.f32 %v2443_v55, %v1440_v7 }
 0x15a   : > { %v1186_v10 = vpop.f32.mrf.mxu0  ;;  %v1442_v11 = vpop.f32.mrf.mxu1 }
 0x15b   : > { %1639 = vst [vmem:[%s2450_s4 + $0x98] sm:$0xff] %v1185_v8  ;;  %1703 = vst [vmem:[%s2450_s4 + $0x298] sm:$0xff] %v1441_v9 }
 0x15c   : > { %v1189_v12 = vpop.f32.mrf.mxu0  ;;  %v1445_v13 = vpop.f32.mrf.mxu1 }
 0x15d   : > { %v1190_v14 = vadd.f32 %v2443_v55, %v1189_v12  ;;  %v1446_v15 = vadd.f32 %v2443_v55, %v1445_v13 }
 0x15e   : > { %v1191_v16 = vpop.f32.mrf.mxu0  ;;  %v1447_v17 = vpop.f32.mrf.mxu1 }
 0x15f   : > { %1640 = vst [vmem:[%s2450_s4 + $0xa0] sm:$0xff] %v1190_v14  ;;  %1704 = vst [vmem:[%s2450_s4 + $0x2a0] sm:$0xff] %v1446_v15 }
 0x160   : > { %v1192_v18 = vpop.f32.mrf.mxu0  ;;  %v1448_v19 = vpop.f32.mrf.mxu1 }
 0x161   : > { %v1193_v20 = vadd.f32 %v2443_v55, %v1192_v18  ;;  %v1449_v21 = vadd.f32 %v2443_v55, %v1448_v19 }
 0x162   : > { %v1194_v22 = vpop.f32.mrf.mxu0  ;;  %v1450_v23 = vpop.f32.mrf.mxu1 }
 0x163   : > { %1641 = vst [vmem:[%s2450_s4 + $0xa8] sm:$0xff] %v1193_v20  ;;  %1705 = vst [vmem:[%s2450_s4 + $0x2a8] sm:$0xff] %v1449_v21 }
 0x164   : > { %v1197_v24 = vpop.f32.mrf.mxu0  ;;  %v1453_v25 = vpop.f32.mrf.mxu1 }
 0x165   : > { %v1198_v26 = vadd.f32 %v2443_v55, %v1197_v24  ;;  %v1454_v27 = vadd.f32 %v2443_v55, %v1453_v25 }
 0x166   : > { %v1199_v28 = vpop.f32.mrf.mxu0  ;;  %v1455_v29 = vpop.f32.mrf.mxu1 }
 0x167   : > { %1642 = vst [vmem:[%s2450_s4 + $0xb0] sm:$0xff] %v1198_v26  ;;  %1706 = vst [vmem:[%s2450_s4 + $0x2b0] sm:$0xff] %v1454_v27 }
 0x168   : > { %v1200_v30 = vpop.f32.mrf.mxu0  ;;  %v1456_v31 = vpop.f32.mrf.mxu1 }
 0x169   : > { %v1201_v32 = vadd.f32 %v2443_v55, %v1200_v30  ;;  %v1457_v33 = vadd.f32 %v2443_v55, %v1456_v31 }
 0x16a   : > { %v1202_v34 = vpop.f32.mrf.mxu0  ;;  %v1458_v35 = vpop.f32.mrf.mxu1 }
 0x16b   : > { %1643 = vst [vmem:[%s2450_s4 + $0xb8] sm:$0xff] %v1201_v32  ;;  %1707 = vst [vmem:[%s2450_s4 + $0x2b8] sm:$0xff] %v1457_v33 }
 0x16c   : > { %v1205_v36 = vpop.f32.mrf.mxu0  ;;  %v1461_v37 = vpop.f32.mrf.mxu1 }
 0x16d   : > { %v1206_v38 = vadd.f32 %v2443_v55, %v1205_v36  ;;  %v1462_v39 = vadd.f32 %v2443_v55, %v1461_v37 }
 0x16e   : > { %v1207_v40 = vpop.f32.mrf.mxu0  ;;  %v1463_v41 = vpop.f32.mrf.mxu1 }
 0x16f   : > { %1644 = vst [vmem:[%s2450_s4 + $0xc0] sm:$0xff] %v1206_v38  ;;  %1708 = vst [vmem:[%s2450_s4 + $0x2c0] sm:$0xff] %v1462_v39 }
 0x170   : > { %v1208_v42 = vpop.f32.mrf.mxu0  ;;  %v1464_v43 = vpop.f32.mrf.mxu1 }
 0x171   : > { %v1209_v44 = vadd.f32 %v2443_v55, %v1208_v42  ;;  %v1465_v45 = vadd.f32 %v2443_v55, %v1464_v43 }
 0x172   : > { %v1210_v46 = vpop.f32.mrf.mxu0  ;;  %v1466_v47 = vpop.f32.mrf.mxu1 }
 0x173   : > { %1645 = vst [vmem:[%s2450_s4 + $0xc8] sm:$0xff] %v1209_v44  ;;  %1709 = vst [vmem:[%s2450_s4 + $0x2c8] sm:$0xff] %v1465_v45 }
 0x174   : > { %v1213_v48 = vpop.f32.mrf.mxu0  ;;  %v1469_v49 = vpop.f32.mrf.mxu1 }
 0x175   : > { %v1214_v50 = vadd.f32 %v2443_v55, %v1213_v48  ;;  %v1470_v51 = vadd.f32 %v2443_v55, %v1469_v49 }
 0x176   : > { %v1215_v52 = vpop.f32.mrf.mxu0  ;;  %v1471_v53 = vpop.f32.mrf.mxu1 }
 0x177   : > { %1646 = vst [vmem:[%s2450_s4 + $0xd0] sm:$0xff] %v1214_v50  ;;  %1710 = vst [vmem:[%s2450_s4 + $0x2d0] sm:$0xff] %v1470_v51 }
 0x178   : > { %v1216_v54 = vpop.f32.mrf.mxu0  ;;  %v1472_v56 = vpop.f32.mrf.mxu1 }
 0x179   : > { %v1217_v57 = vadd.f32 %v2443_v55, %v1216_v54  ;;  %v1473_v58 = vadd.f32 %v2443_v55, %v1472_v56 }
 0x17a   : > { %v1218_v59 = vpop.f32.mrf.mxu0  ;;  %v1474_v60 = vpop.f32.mrf.mxu1 }
 0x17b   : > { %1647 = vst [vmem:[%s2450_s4 + $0xd8] sm:$0xff] %v1217_v57  ;;  %1711 = vst [vmem:[%s2450_s4 + $0x2d8] sm:$0xff] %v1473_v58 }
 0x17c   : > { %v1221_v61 = vpop.f32.mrf.mxu0  ;;  %v1477_v62 = vpop.f32.mrf.mxu1 }
 0x17d   : > { %v1222_v63 = vadd.f32 %v2443_v55, %v1221_v61  ;;  %v1478_v0 = vadd.f32 %v2443_v55, %v1477_v62 }
 0x17e   : > { %v1223_v1 = vpop.f32.mrf.mxu0  ;;  %v1479_v2 = vpop.f32.mrf.mxu1 }
 0x17f   : > { %1648 = vst [vmem:[%s2450_s4 + $0xe0] sm:$0xff] %v1222_v63  ;;  %1712 = vst [vmem:[%s2450_s4 + $0x2e0] sm:$0xff] %v1478_v0 }
 0x180   : > { %v1224_v3 = vpop.f32.mrf.mxu0  ;;  %v1480_v4 = vpop.f32.mrf.mxu1 }
 0x181   : > { %v1225_v5 = vadd.f32 %v2443_v55, %v1224_v3  ;;  %v1481_v6 = vadd.f32 %v2443_v55, %v1480_v4 }
 0x182   : > { %v1226_v7 = vpop.f32.mrf.mxu0  ;;  %v1482_v8 = vpop.f32.mrf.mxu1 }
 0x183   : > { %1649 = vst [vmem:[%s2450_s4 + $0xe8] sm:$0xff] %v1225_v5  ;;  %1713 = vst [vmem:[%s2450_s4 + $0x2e8] sm:$0xff] %v1481_v6 }
 0x184   : > { %v1229_v9 = vpop.f32.mrf.mxu0  ;;  %v1485_v10 = vpop.f32.mrf.mxu1 }
 0x185   : > { %v1230_v11 = vadd.f32 %v2443_v55, %v1229_v9  ;;  %v1486_v12 = vadd.f32 %v2443_v55, %v1485_v10 }
 0x186   : > { %v1231_v13 = vpop.f32.mrf.mxu0  ;;  %v1487_v14 = vpop.f32.mrf.mxu1 }
 0x187   : > { %1650 = vst [vmem:[%s2450_s4 + $0xf0] sm:$0xff] %v1230_v11  ;;  %1714 = vst [vmem:[%s2450_s4 + $0x2f0] sm:$0xff] %v1486_v12 }
 0x188   : > { %v1232_v15 = vpop.f32.mrf.mxu0  ;;  %v1488_v16 = vpop.f32.mrf.mxu1 }
 0x189   : > { %v1233_v17 = vadd.f32 %v2443_v55, %v1232_v15  ;;  %v1489_v18 = vadd.f32 %v2443_v55, %v1488_v16 }
 0x18a   : > { %v1234_v19 = vpop.f32.mrf.mxu0  ;;  %v1490_v20 = vpop.f32.mrf.mxu1 }
 0x18b   : > { %1651 = vst [vmem:[%s2450_s4 + $0xf8] sm:$0xff] %v1233_v17  ;;  %1715 = vst [vmem:[%s2450_s4 + $0x2f8] sm:$0xff] %v1489_v18 }
 0x18c   : > { %v1237_v21 = vpop.f32.mrf.mxu0  ;;  %v1493_v22 = vpop.f32.mrf.mxu1 }
 0x18d   : > { %v1238_v23 = vadd.f32 %v2443_v55, %v1237_v21  ;;  %v1494_v24 = vadd.f32 %v2443_v55, %v1493_v22 }
 0x18e   : > { %v1239_v25 = vpop.f32.mrf.mxu0  ;;  %v1495_v26 = vpop.f32.mrf.mxu1 }
 0x18f   : > { %1652 = vst [vmem:[%s2450_s4 + $0x100] sm:$0xff] %v1238_v23  ;;  %1716 = vst [vmem:[%s2450_s4 + $0x300] sm:$0xff] %v1494_v24 }
 0x190   : > { %v1240_v27 = vpop.f32.mrf.mxu0  ;;  %v1496_v28 = vpop.f32.mrf.mxu1 }
 0x191   : > { %v1241_v29 = vadd.f32 %v2443_v55, %v1240_v27  ;;  %v1497_v30 = vadd.f32 %v2443_v55, %v1496_v28 }
 0x192   : > { %v1242_v31 = vpop.f32.mrf.mxu0  ;;  %v1498_v32 = vpop.f32.mrf.mxu1 }
 0x193   : > { %1653 = vst [vmem:[%s2450_s4 + $0x108] sm:$0xff] %v1241_v29  ;;  %1717 = vst [vmem:[%s2450_s4 + $0x308] sm:$0xff] %v1497_v30 }
 0x194   : > { %v1245_v33 = vpop.f32.mrf.mxu0  ;;  %v1501_v34 = vpop.f32.mrf.mxu1 }
 0x195   : > { %v1246_v35 = vadd.f32 %v2443_v55, %v1245_v33  ;;  %v1502_v36 = vadd.f32 %v2443_v55, %v1501_v34 }
 0x196   : > { %v1247_v37 = vpop.f32.mrf.mxu0  ;;  %v1503_v38 = vpop.f32.mrf.mxu1 }
 0x197   : > { %1654 = vst [vmem:[%s2450_s4 + $0x110] sm:$0xff] %v1246_v35  ;;  %1718 = vst [vmem:[%s2450_s4 + $0x310] sm:$0xff] %v1502_v36 }
 0x198   : > { %v1248_v39 = vpop.f32.mrf.mxu0  ;;  %v1504_v40 = vpop.f32.mrf.mxu1 }
 0x199   : > { %v1249_v41 = vadd.f32 %v2443_v55, %v1248_v39  ;;  %v1505_v42 = vadd.f32 %v2443_v55, %v1504_v40 }
 0x19a   : > { %v1250_v43 = vpop.f32.mrf.mxu0  ;;  %v1506_v44 = vpop.f32.mrf.mxu1 }
 0x19b   : > { %1655 = vst [vmem:[%s2450_s4 + $0x118] sm:$0xff] %v1249_v41  ;;  %1719 = vst [vmem:[%s2450_s4 + $0x318] sm:$0xff] %v1505_v42 }
 0x19c   : > { %v1253_v45 = vpop.f32.mrf.mxu0  ;;  %v1509_v46 = vpop.f32.mrf.mxu1 }
 0x19d   : > { %v1254_v47 = vadd.f32 %v2443_v55, %v1253_v45  ;;  %v1510_v48 = vadd.f32 %v2443_v55, %v1509_v46 }
 0x19e   : > { %v1255_v49 = vpop.f32.mrf.mxu0  ;;  %v1511_v50 = vpop.f32.mrf.mxu1 }
 0x19f   : > { %1656 = vst [vmem:[%s2450_s4 + $0x120] sm:$0xff] %v1254_v47  ;;  %1720 = vst [vmem:[%s2450_s4 + $0x320] sm:$0xff] %v1510_v48 }
 0x1a0   : > { %v1256_v51 = vpop.f32.mrf.mxu0  ;;  %v1512_v52 = vpop.f32.mrf.mxu1 }
 0x1a1   : > { %v1257_v53 = vadd.f32 %v2443_v55, %v1256_v51  ;;  %v1513_v54 = vadd.f32 %v2443_v55, %v1512_v52 }
 0x1a2   : > { %v1258_v56 = vpop.f32.mrf.mxu0  ;;  %v1514_v57 = vpop.f32.mrf.mxu1 }
 0x1a3   : > { %1657 = vst [vmem:[%s2450_s4 + $0x128] sm:$0xff] %v1257_v53  ;;  %1721 = vst [vmem:[%s2450_s4 + $0x328] sm:$0xff] %v1513_v54 }
 0x1a4   : > { %v1261_v58 = vpop.f32.mrf.mxu0  ;;  %v1517_v59 = vpop.f32.mrf.mxu1 }
 0x1a5   : > { %v1262_v60 = vadd.f32 %v2443_v55, %v1261_v58  ;;  %v1518_v61 = vadd.f32 %v2443_v55, %v1517_v59 }
 0x1a6   : > { %v1263_v62 = vpop.f32.mrf.mxu0  ;;  %v1519_v63 = vpop.f32.mrf.mxu1 }
 0x1a7   : > { %1658 = vst [vmem:[%s2450_s4 + $0x130] sm:$0xff] %v1262_v60  ;;  %1722 = vst [vmem:[%s2450_s4 + $0x330] sm:$0xff] %v1518_v61 }
 0x1a8   : > { %v1264_v0 = vpop.f32.mrf.mxu0  ;;  %v1520_v1 = vpop.f32.mrf.mxu1 }
 0x1a9   : > { %v1265_v2 = vadd.f32 %v2443_v55, %v1264_v0  ;;  %v1521_v3 = vadd.f32 %v2443_v55, %v1520_v1 }
 0x1aa   : > { %v1266_v4 = vpop.f32.mrf.mxu0  ;;  %v1522_v5 = vpop.f32.mrf.mxu1 }
 0x1ab   : > { %1659 = vst [vmem:[%s2450_s4 + $0x138] sm:$0xff] %v1265_v2  ;;  %1723 = vst [vmem:[%s2450_s4 + $0x338] sm:$0xff] %v1521_v3 }
 0x1ac   : > { %v1269_v6 = vpop.f32.mrf.mxu0  ;;  %v1525_v7 = vpop.f32.mrf.mxu1 }
 0x1ad   : > { %v1270_v8 = vadd.f32 %v2443_v55, %v1269_v6  ;;  %v1526_v9 = vadd.f32 %v2443_v55, %v1525_v7 }
 0x1ae   : > { %v1271_v10 = vpop.f32.mrf.mxu0  ;;  %v1527_v11 = vpop.f32.mrf.mxu1 }
 0x1af   : > { %1660 = vst [vmem:[%s2450_s4 + $0x140] sm:$0xff] %v1270_v8  ;;  %1724 = vst [vmem:[%s2450_s4 + $0x340] sm:$0xff] %v1526_v9 }
 0x1b0   : > { %v1272_v12 = vpop.f32.mrf.mxu0  ;;  %v1528_v13 = vpop.f32.mrf.mxu1 }
 0x1b1   : > { %v1273_v14 = vadd.f32 %v2443_v55, %v1272_v12  ;;  %v1529_v15 = vadd.f32 %v2443_v55, %v1528_v13 }
 0x1b2   : > { %v1274_v16 = vpop.f32.mrf.mxu0  ;;  %v1530_v17 = vpop.f32.mrf.mxu1 }
 0x1b3   : > { %1661 = vst [vmem:[%s2450_s4 + $0x148] sm:$0xff] %v1273_v14  ;;  %1725 = vst [vmem:[%s2450_s4 + $0x348] sm:$0xff] %v1529_v15 }
 0x1b4   : > { %v1277_v18 = vpop.f32.mrf.mxu0  ;;  %v1533_v19 = vpop.f32.mrf.mxu1 }
 0x1b5   : > { %v1278_v20 = vadd.f32 %v2443_v55, %v1277_v18  ;;  %v1534_v21 = vadd.f32 %v2443_v55, %v1533_v19 }
 0x1b6   : > { %v1279_v22 = vpop.f32.mrf.mxu0  ;;  %v1535_v23 = vpop.f32.mrf.mxu1 }
 0x1b7   : > { %1662 = vst [vmem:[%s2450_s4 + $0x150] sm:$0xff] %v1278_v20  ;;  %1726 = vst [vmem:[%s2450_s4 + $0x350] sm:$0xff] %v1534_v21 }
 0x1b8   : > { %v1280_v24 = vpop.f32.mrf.mxu0  ;;  %v1536_v25 = vpop.f32.mrf.mxu1 }
 0x1b9   : > { %v1281_v26 = vadd.f32 %v2443_v55, %v1280_v24  ;;  %v1537_v27 = vadd.f32 %v2443_v55, %v1536_v25 }
 0x1ba   : > { %v1282_v28 = vpop.f32.mrf.mxu0  ;;  %v1538_v29 = vpop.f32.mrf.mxu1 }
 0x1bb   : > { %1663 = vst [vmem:[%s2450_s4 + $0x158] sm:$0xff] %v1281_v26  ;;  %1727 = vst [vmem:[%s2450_s4 + $0x358] sm:$0xff] %v1537_v27 }
 0x1bc   : > { %v1285_v30 = vpop.f32.mrf.mxu0  ;;  %v1541_v31 = vpop.f32.mrf.mxu1 }
 0x1bd   : > { %v1286_v32 = vadd.f32 %v2443_v55, %v1285_v30  ;;  %v1542_v33 = vadd.f32 %v2443_v55, %v1541_v31 }
 0x1be   : > { %v1287_v34 = vpop.f32.mrf.mxu0  ;;  %v1543_v35 = vpop.f32.mrf.mxu1 }
 0x1bf   : > { %1664 = vst [vmem:[%s2450_s4 + $0x160] sm:$0xff] %v1286_v32  ;;  %1728 = vst [vmem:[%s2450_s4 + $0x360] sm:$0xff] %v1542_v33 }
 0x1c0   : > { %v1288_v36 = vpop.f32.mrf.mxu0  ;;  %v1544_v37 = vpop.f32.mrf.mxu1 }
 0x1c1   : > { %v1289_v38 = vadd.f32 %v2443_v55, %v1288_v36  ;;  %v1545_v39 = vadd.f32 %v2443_v55, %v1544_v37 }
 0x1c2   : > { %v1290_v40 = vpop.f32.mrf.mxu0  ;;  %v1546_v41 = vpop.f32.mrf.mxu1 }
 0x1c3   : > { %1665 = vst [vmem:[%s2450_s4 + $0x168] sm:$0xff] %v1289_v38  ;;  %1729 = vst [vmem:[%s2450_s4 + $0x368] sm:$0xff] %v1545_v39 }
 0x1c4   : > { %v1293_v42 = vpop.f32.mrf.mxu0  ;;  %v1549_v43 = vpop.f32.mrf.mxu1 }
 0x1c5   : > { %v1294_v44 = vadd.f32 %v2443_v55, %v1293_v42  ;;  %v1550_v45 = vadd.f32 %v2443_v55, %v1549_v43 }
 0x1c6   : > { %v1295_v46 = vpop.f32.mrf.mxu0  ;;  %v1551_v47 = vpop.f32.mrf.mxu1 }
 0x1c7   : > { %1666 = vst [vmem:[%s2450_s4 + $0x170] sm:$0xff] %v1294_v44  ;;  %1730 = vst [vmem:[%s2450_s4 + $0x370] sm:$0xff] %v1550_v45  ;;  %v2210_v47 = vld [vmem:[%s2728_s2] ss:$0 sm:$0xff] }
 0x1c8   : > { %v1296_v48 = vpop.f32.mrf.mxu0  ;;  %v1552_v49 = vpop.f32.mrf.mxu1 }
 0x1c9   : > { %v1297_v50 = vadd.f32 %v2443_v55, %v1296_v48  ;;  %v1553_v51 = vadd.f32 %v2443_v55, %v1552_v49 }
 0x1ca   : > { %v1298_v52 = vpop.f32.mrf.mxu0  ;;  %v1554_v53 = vpop.f32.mrf.mxu1 }
 0x1cb   : > { %1667 = vst [vmem:[%s2450_s4 + $0x178] sm:$0xff] %v1297_v50  ;;  %1731 = vst [vmem:[%s2450_s4 + $0x378] sm:$0xff] %v1553_v51 }
 0x1cc   : > { %v1301_v54 = vpop.f32.mrf.mxu0  ;;  %v1557_v56 = vpop.f32.mrf.mxu1 }
 0x1cd   : > { %v1302_v57 = vadd.f32 %v2443_v55, %v1301_v54  ;;  %v1558_v58 = vadd.f32 %v2443_v55, %v1557_v56 }
 0x1ce   : > { %v1303_v59 = vpop.f32.mrf.mxu0  ;;  %v1559_v60 = vpop.f32.mrf.mxu1 }
 0x1cf   : > { %1668 = vst [vmem:[%s2450_s4 + $0x180] sm:$0xff] %v1302_v57  ;;  %1732 = vst [vmem:[%s2450_s4 + $0x380] sm:$0xff] %v1558_v58 }
 0x1d0   : > { %v1304_v61 = vpop.f32.mrf.mxu0  ;;  %v1560_v62 = vpop.f32.mrf.mxu1 }
 0x1d1   : > { %v1305_v63 = vadd.f32 %v2443_v55, %v1304_v61  ;;  %v1561_v0 = vadd.f32 %v2443_v55, %v1560_v62 }
 0x1d2   : > { %v1306_v1 = vpop.f32.mrf.mxu0  ;;  %v1562_v2 = vpop.f32.mrf.mxu1 }
 0x1d3   : > { %1669 = vst [vmem:[%s2450_s4 + $0x188] sm:$0xff] %v1305_v63  ;;  %1733 = vst [vmem:[%s2450_s4 + $0x388] sm:$0xff] %v1561_v0 }
 0x1d4   : > { %v1309_v3 = vpop.f32.mrf.mxu0  ;;  %v1565_v4 = vpop.f32.mrf.mxu1 }
 0x1d5   : > { %v1310_v5 = vadd.f32 %v2443_v55, %v1309_v3  ;;  %v1566_v6 = vadd.f32 %v2443_v55, %v1565_v4 }
 0x1d6   : > { %v1311_v7 = vpop.f32.mrf.mxu0  ;;  %v1567_v8 = vpop.f32.mrf.mxu1 }
 0x1d7   : > { %1670 = vst [vmem:[%s2450_s4 + $0x190] sm:$0xff] %v1310_v5  ;;  %1734 = vst [vmem:[%s2450_s4 + $0x390] sm:$0xff] %v1566_v6 }
 0x1d8   : > { %v1312_v9 = vpop.f32.mrf.mxu0  ;;  %v1568_v10 = vpop.f32.mrf.mxu1 }
 0x1d9   : > { %v1313_v11 = vadd.f32 %v2443_v55, %v1312_v9  ;;  %v1569_v12 = vadd.f32 %v2443_v55, %v1568_v10 }
 0x1da   : > { %v1314_v13 = vpop.f32.mrf.mxu0  ;;  %v1570_v14 = vpop.f32.mrf.mxu1 }
 0x1db   : > { %1671 = vst [vmem:[%s2450_s4 + $0x198] sm:$0xff] %v1313_v11  ;;  %1735 = vst [vmem:[%s2450_s4 + $0x398] sm:$0xff] %v1569_v12 }
 0x1dc   : > { %v1317_v15 = vpop.f32.mrf.mxu0  ;;  %v1573_v16 = vpop.f32.mrf.mxu1 }
 0x1dd   : > { %v1318_v17 = vadd.f32 %v2443_v55, %v1317_v15  ;;  %v1574_v18 = vadd.f32 %v2443_v55, %v1573_v16 }
 0x1de   : > { %v1319_v19 = vpop.f32.mrf.mxu0  ;;  %v1575_v20 = vpop.f32.mrf.mxu1 }
 0x1df   : > { %1672 = vst [vmem:[%s2450_s4 + $0x1a0] sm:$0xff] %v1318_v17  ;;  %1736 = vst [vmem:[%s2450_s4 + $0x3a0] sm:$0xff] %v1574_v18 }
 0x1e0   : > { %v1320_v21 = vpop.f32.mrf.mxu0  ;;  %v1576_v22 = vpop.f32.mrf.mxu1 }
 0x1e1   : > { %v1321_v23 = vadd.f32 %v2443_v55, %v1320_v21  ;;  %v1577_v24 = vadd.f32 %v2443_v55, %v1576_v22 }
 0x1e2   : > { %v1322_v25 = vpop.f32.mrf.mxu0  ;;  %v1578_v26 = vpop.f32.mrf.mxu1 }
 0x1e3   : > { %1673 = vst [vmem:[%s2450_s4 + $0x1a8] sm:$0xff] %v1321_v23  ;;  %1737 = vst [vmem:[%s2450_s4 + $0x3a8] sm:$0xff] %v1577_v24 }
 0x1e4   : > { %v1325_v27 = vpop.f32.mrf.mxu0  ;;  %v1581_v28 = vpop.f32.mrf.mxu1 }
 0x1e5   : > { %v1326_v29 = vadd.f32 %v2443_v55, %v1325_v27  ;;  %v1582_v30 = vadd.f32 %v2443_v55, %v1581_v28 }
 0x1e6   : > { %v1327_v31 = vpop.f32.mrf.mxu0  ;;  %v1583_v32 = vpop.f32.mrf.mxu1 }
 0x1e7   : > { %1674 = vst [vmem:[%s2450_s4 + $0x1b0] sm:$0xff] %v1326_v29  ;;  %1738 = vst [vmem:[%s2450_s4 + $0x3b0] sm:$0xff] %v1582_v30 }
 0x1e8   : > { %v1328_v33 = vpop.f32.mrf.mxu0  ;;  %v1584_v34 = vpop.f32.mrf.mxu1 }
 0x1e9   : > { %v1329_v35 = vadd.f32 %v2443_v55, %v1328_v33  ;;  %v1585_v36 = vadd.f32 %v2443_v55, %v1584_v34 }
 0x1ea   : > { %v1330_v37 = vpop.f32.mrf.mxu0  ;;  %v1586_v38 = vpop.f32.mrf.mxu1 }
 0x1eb   : > { %1675 = vst [vmem:[%s2450_s4 + $0x1b8] sm:$0xff] %v1329_v35  ;;  %1739 = vst [vmem:[%s2450_s4 + $0x3b8] sm:$0xff] %v1585_v36 }
 0x1ec   : > { %v1333_v39 = vpop.f32.mrf.mxu0  ;;  %v1589_v40 = vpop.f32.mrf.mxu1 }
 0x1ed   : > { %v1334_v41 = vadd.f32 %v2443_v55, %v1333_v39  ;;  %v1590_v42 = vadd.f32 %v2443_v55, %v1589_v40 }
 0x1ee   : > { %v1335_v43 = vpop.f32.mrf.mxu0  ;;  %v1591_v44 = vpop.f32.mrf.mxu1 }
 0x1ef   : > { %1676 = vst [vmem:[%s2450_s4 + $0x1c0] sm:$0xff] %v1334_v41  ;;  %1740 = vst [vmem:[%s2450_s4 + $0x3c0] sm:$0xff] %v1590_v42 }
 0x1f0   : > { %v1336_v45 = vpop.f32.mrf.mxu0  ;;  %v1592_v46 = vpop.f32.mrf.mxu1 }
 0x1f1   : > { %v1337_v48 = vadd.f32 %v2210_v47, %v1336_v45  ;;  %v1593_v49 = vadd.f32 %v2210_v47, %v1592_v46 }
 0x1f2   : > { %v1338_v50 = vpop.f32.mrf.mxu0  ;;  %v1594_v51 = vpop.f32.mrf.mxu1 }
 0x1f3   : > { %1677 = vst [vmem:[%s2450_s4 + $0x1c8] sm:$0xff] %v1337_v48  ;;  %1741 = vst [vmem:[%s2450_s4 + $0x3c8] sm:$0xff] %v1593_v49 }
 0x1f4   : > { %v1341_v55 = vpop.f32.mrf.mxu0  ;;  %v1597_v52 = vpop.f32.mrf.mxu1 }
 0x1f5   : > { %v1342_v53 = vadd.f32 %v2210_v47, %v1341_v55  ;;  %v1598_v54 = vadd.f32 %v2210_v47, %v1597_v52 }
 0x1f6   : > { %v1343_v56 = vpop.f32.mrf.mxu0  ;;  %v1599_v57 = vpop.f32.mrf.mxu1 }
 0x1f7   : > { %1678 = vst [vmem:[%s2450_s4 + $0x1d0] sm:$0xff] %v1342_v53  ;;  %1742 = vst [vmem:[%s2450_s4 + $0x3d0] sm:$0xff] %v1598_v54 }
 0x1f8   : > { %v1344_v58 = vpop.f32.mrf.mxu0  ;;  %v1600_v59 = vpop.f32.mrf.mxu1 }
 0x1f9   : > { %v1345_v60 = vadd.f32 %v2210_v47, %v1344_v58  ;;  %v1601_v61 = vadd.f32 %v2210_v47, %v1600_v59 }
 0x1fa   : > { %v1346_v62 = vpop.f32.mrf.mxu0  ;;  %v1602_v63 = vpop.f32.mrf.mxu1 }
 0x1fb   : > { %1679 = vst [vmem:[%s2450_s4 + $0x1d8] sm:$0xff] %v1345_v60  ;;  %1743 = vst [vmem:[%s2450_s4 + $0x3d8] sm:$0xff] %v1601_v61 }
 0x1fc   : > { %v1349_v0 = vpop.f32.mrf.mxu0  ;;  %v1605_v1 = vpop.f32.mrf.mxu1 }
 0x1fd   : > { %v1350_v2 = vadd.f32 %v2210_v47, %v1349_v0  ;;  %v1606_v3 = vadd.f32 %v2210_v47, %v1605_v1 }
 0x1fe   : > { %v1351_v4 = vpop.f32.mrf.mxu0  ;;  %v1607_v5 = vpop.f32.mrf.mxu1 }
 0x1ff   : > { %1680 = vst [vmem:[%s2450_s4 + $0x1e0] sm:$0xff] %v1350_v2  ;;  %1744 = vst [vmem:[%s2450_s4 + $0x3e0] sm:$0xff] %v1606_v3 }
 0x200   : > { %v1352_v6 = vpop.f32.mrf.mxu0  ;;  %v1608_v7 = vpop.f32.mrf.mxu1 }
 0x201   : > { %v1353_v8 = vadd.f32 %v2210_v47, %v1352_v6  ;;  %v1609_v9 = vadd.f32 %v2210_v47, %v1608_v7 }
 0x202   : > { %v1354_v10 = vpop.f32.mrf.mxu0  ;;  %v1610_v11 = vpop.f32.mrf.mxu1 }
 0x203   : > { %1681 = vst [vmem:[%s2450_s4 + $0x1e8] sm:$0xff] %v1353_v8  ;;  %1745 = vst [vmem:[%s2450_s4 + $0x3e8] sm:$0xff] %v1609_v9 }
 0x204   : > { %v1357_v12 = vpop.f32.mrf.mxu0  ;;  %v1613_v13 = vpop.f32.mrf.mxu1 }
 0x205   : > { %v1358_v14 = vadd.f32 %v2210_v47, %v1357_v12  ;;  %v1614_v15 = vadd.f32 %v2210_v47, %v1613_v13 }
 0x206   : > { %v1359_v16 = vpop.f32.mrf.mxu0  ;;  %v1615_v17 = vpop.f32.mrf.mxu1 }
 0x207   : > { %1682 = vst [vmem:[%s2450_s4 + $0x1f0] sm:$0xff] %v1358_v14  ;;  %1746 = vst [vmem:[%s2450_s4 + $0x3f0] sm:$0xff] %v1614_v15 }
 0x208   : > { %v1360_v18 = vpop.f32.mrf.mxu0  ;;  %v1616_v19 = vpop.f32.mrf.mxu1 }
 0x209   : > { %v1361_v20 = vadd.f32 %v2210_v47, %v1360_v18  ;;  %v1617_v21 = vadd.f32 %v2210_v47, %v1616_v19 }
 0x20a   : > { %v1362_v22 = vpop.f32.mrf.mxu0  ;;  %v1618_v23 = vpop.f32.mrf.mxu1 }
 0x20b   : > { %1683 = vst [vmem:[%s2450_s4 + $0x1f8] sm:$0xff] %v1361_v20  ;;  %1747 = vst [vmem:[%s2450_s4 + $0x3f8] sm:$0xff] %v1617_v21 }
 0x20c PF: > { %s13_s12 = sadd.s32 1, %s2217_s12  }
 0x20d   : > { %p10_p4 = scmp.ge.s32.totalorder %s13_s12, 4  }
 0x20f   :  { %12 = sbr.rel (!%p10_p4) target bundleno = 1 (0x1), region = 62 }

</bundles_post_ra>
